<compile_context>
chip_gen: v7x
topology: tpu7x:2x2x1
jax: 0.10.0
libtpu: 0.0.40
codegen_flags: <defaults>
</compile_context>

<pallas_src>
import functools

import jax
import jax.numpy as jnp
from jax import lax
from jax.experimental import pallas as pl
from jax.experimental.pallas import tpu as pltpu

MAX_POS_EMB = 512            # lucidrains conformer Attention default
ROW_TILE = 1024              # row tile for row-parallel kernels
Q_TILE = 512                 # flash attention q tile
KV_TILE = 512                # flash attention kv tile


def _vmem_limit_bytes():
    cap = 128 * 1024 * 1024
    try:
        info = pltpu.get_tpu_info()
        cap = int(getattr(info, "vmem_capacity_bytes", cap))
    except Exception:
        pass
    # v6e/v5e (128 MiB) -> 64 MiB; v7x (64 MiB) -> 32 MiB.
    return int(min(64 * 1024 * 1024, max(cap // 2, 16 * 1024 * 1024)))


VMEM_LIMIT = _vmem_limit_bytes()


def _row_tile(n, cap=ROW_TILE):
    return n if n <= cap else cap


# Whole-array block, single grid point (used only where global stats force it).
def _fs(shape):
    nd = len(shape)
    return pl.BlockSpec(shape, lambda *_: (0,) * nd)


# ----------------------------------------------------------------------------
# Kernel 1: row-tiled Linear (+ bias), bf16 operands, fp32 accumulation.
# Used for LL (1024 -> emb).
# ----------------------------------------------------------------------------
def _linear_kernel(x_ref, w_ref, b_ref, o_ref):
    o_ref[...] = (jnp.dot(x_ref[...].astype(jnp.bfloat16), w_ref[...],
                          preferred_element_type=jnp.float32) + b_ref[...])


def linear(x, w_bf16, b_row):
    m, k = x.shape
    n = w_bf16.shape[1]
    rt = _row_tile(m)
    return pl.pallas_call(
        _linear_kernel,
        out_shape=jax.ShapeDtypeStruct((m, n), jnp.float32),
        grid=(pl.cdiv(m, rt),),
        in_specs=[pl.BlockSpec((rt, k), lambda i: (i, 0)),
                  pl.BlockSpec((k, n), lambda i: (0, 0)),
                  pl.BlockSpec((1, n), lambda i: (0, 0))],
        out_specs=pl.BlockSpec((rt, n), lambda i: (i, 0)),
        compiler_params=pltpu.CompilerParams(
            dimension_semantics=("parallel",), vmem_limit_bytes=VMEM_LIMIT),
    )(x, w_bf16, b_row)


# ----------------------------------------------------------------------------
# Kernel 2: first_bn (BatchNorm2d(1), train-mode stats over the whole (T, E)
# tensor, learnable gamma/beta) fused with SELU. Global stats => single block.
# ----------------------------------------------------------------------------
def _bn2d_selu_kernel(x_ref, g_ref, b_ref, o_ref):
    x = x_ref[...]
    mu = jnp.mean(x, axis=(0, 1), keepdims=True)
    var = jnp.mean((x - mu) ** 2, axis=(0, 1), keepdims=True)
    y = (x - mu) * lax.rsqrt(var + 1e-5) * g_ref[...] + b_ref[...]
    alpha = 1.6732632423543772
    scale = 1.0507009873554805
    o_ref[...] = scale * jnp.where(y > 0, y, alpha * (jnp.exp(y) - 1.0))


def first_bn_selu(x, g, b):
    n, d = x.shape
    return pl.pallas_call(
        _bn2d_selu_kernel,
        out_shape=jax.ShapeDtypeStruct((n, d), jnp.float32),
        in_specs=[_fs((n, d)), _fs((1, 1)), _fs((1, 1))],
        out_specs=_fs((n, d)),
        compiler_params=pltpu.CompilerParams(vmem_limit_bytes=VMEM_LIMIT),
    )(x, g, b)


# ----------------------------------------------------------------------------
# Kernel 3: fused FeedForward module
#   out = x + 0.5 * (SiLU(LN(x) @ W1 + b1) @ W2 + b2)   [+ optional post-LN]
# Row-tiled over the sequence, weights resident (already bf16).
# ----------------------------------------------------------------------------
def _ff_kernel(x_ref, g_ref, b_ref, w1_ref, b1_ref, w2_ref, b2_ref, *rest):
    o_ref = rest[-1]
    x = x_ref[...]
    mu = jnp.mean(x, axis=-1, keepdims=True)
    var = jnp.mean((x - mu) ** 2, axis=-1, keepdims=True)
    h = (x - mu) * lax.rsqrt(var + 1e-5) * g_ref[...] + b_ref[...]
    h = jnp.dot(h.astype(jnp.bfloat16), w1_ref[...],
                preferred_element_type=jnp.float32) + b1_ref[...]
    h = h * jax.nn.sigmoid(h)                               # SiLU / Swish
    y = jnp.dot(h.astype(jnp.bfloat16), w2_ref[...],
                preferred_element_type=jnp.float32) + b2_ref[...]
    y = x + 0.5 * y                                         # Scale(0.5) + residual
    if len(rest) == 3:                                      # fused block post-LN
        pg_ref, pb_ref = rest[0], rest[1]
        mu2 = jnp.mean(y, axis=-1, keepdims=True)
        var2 = jnp.mean((y - mu2) ** 2, axis=-1, keepdims=True)
        y = (y - mu2) * lax.rsqrt(var2 + 1e-5) * pg_ref[...] + pb_ref[...]
    o_ref[...] = y


def ff_block(x, p, post_ln=None):
    n, emb = x.shape
    d_ff = p["w1"].shape[1]
    rt = _row_tile(n)
    row_spec = pl.BlockSpec((rt, emb), lambda i: (i, 0))
    vec = lambda d: pl.BlockSpec((1, d), lambda i: (0, 0))
    inputs = [x, p["ln_g"], p["ln_b"], p["w1"], p["b1"], p["w2"], p["b2"]]
    in_specs = [row_spec, vec(emb), vec(emb),
                pl.BlockSpec((emb, d_ff), lambda i: (0, 0)), vec(d_ff),
                pl.BlockSpec((d_ff, emb), lambda i: (0, 0)), vec(emb)]
    if post_ln is not None:
        inputs += [post_ln[0], post_ln[1]]
        in_specs += [vec(emb), vec(emb)]
    return pl.pallas_call(
        _ff_kernel,
        out_shape=jax.ShapeDtypeStruct((n, emb), jnp.float32),
        grid=(pl.cdiv(n, rt),),
        in_specs=in_specs,
        out_specs=row_spec,
        compiler_params=pltpu.CompilerParams(
            dimension_semantics=("parallel",), vmem_limit_bytes=VMEM_LIMIT),
    )(*inputs)


# ----------------------------------------------------------------------------
# Kernel 4: fused LayerNorm + QKV projection (single matmul, no bias),
# outputs q/k/v as lane-dense (n, heads*dim_head) bf16.
# ----------------------------------------------------------------------------
def _ln_qkv_kernel(inner, x_ref, g_ref, b_ref, w_ref, q_ref, k_ref, v_ref):
    x = x_ref[...]
    mu = jnp.mean(x, axis=-1, keepdims=True)
    var = jnp.mean((x - mu) ** 2, axis=-1, keepdims=True)
    h = (x - mu) * lax.rsqrt(var + 1e-5) * g_ref[...] + b_ref[...]
    qkv = jnp.dot(h.astype(jnp.bfloat16), w_ref[...],
                  preferred_element_type=jnp.float32)
    q_ref[...] = qkv[:, :inner].astype(jnp.bfloat16)
    k_ref[...] = qkv[:, inner:2 * inner].astype(jnp.bfloat16)
    v_ref[...] = qkv[:, 2 * inner:].astype(jnp.bfloat16)


def ln_qkv(x, ln_g, ln_b, wqkv_bf16, inner):
    n, emb = x.shape
    rt = _row_tile(n)
    row_in = pl.BlockSpec((rt, emb), lambda i: (i, 0))
    row_out = pl.BlockSpec((rt, inner), lambda i: (i, 0))
    vec = lambda d: pl.BlockSpec((1, d), lambda i: (0, 0))
    return pl.pallas_call(
        functools.partial(_ln_qkv_kernel, inner),
        out_shape=tuple(jax.ShapeDtypeStruct((n, inner), jnp.bfloat16)
                        for _ in range(3)),
        grid=(pl.cdiv(n, rt),),
        in_specs=[row_in, vec(emb), vec(emb),
                  pl.BlockSpec((emb, 3 * inner), lambda i: (0, 0))],
        out_specs=(row_out, row_out, row_out),
        compiler_params=pltpu.CompilerParams(
            dimension_semantics=("parallel",), vmem_limit_bytes=VMEM_LIMIT),
    )(x, ln_g, ln_b, wqkv_bf16)


# ----------------------------------------------------------------------------
# Relative-position bias (Shaw / lucidrains):
#   bias[h, i, j] = q[i, h] . rel_table[clamp(i - j)]
# computed via the Transformer-XL pad+reshape relative-shift trick (no gather
# over an (n, n) index tensor) and carried in bf16.
# ----------------------------------------------------------------------------
def _rel_pos_bias(q, rel_pos_emb_bf16, heads, dim_head, n):
    # Reversed clamped window: column r of s2 corresponds to distance (n-1-r).
    idx = jnp.clip((n - 1) - jnp.arange(2 * n - 1),
                   -MAX_POS_EMB, MAX_POS_EMB) + MAX_POS_EMB
    rel_rev = jnp.take(rel_pos_emb_bf16, idx, axis=0)            # (2n-1, d)
    qh = q.reshape(n, heads, dim_head)
    s2 = jnp.einsum("nhd,rd->hnr", qh, rel_rev,
                    preferred_element_type=jnp.float32).astype(jnp.bfloat16)
    # Relative shift:  bias[h,i,j] = s2[h, i, j + (n-1-i)]
    s2 = jnp.pad(s2, ((0, 0), (0, 0), (0, 1)))                   # (h, n, 2n)
    s2 = s2.reshape(heads, 2 * n * n)[:, : n * (2 * n - 1)]
    return s2.reshape(heads, n, 2 * n - 1)[:, :, n - 1:]         # (h, n, n) bf16


# ----------------------------------------------------------------------------
# Kernel 5: flash-style attention core with relative-position bias tiles.
# Grid (q_tiles, kv_tiles); online softmax with LANE-DENSE scratch:
#   ml_sc : (2, tq, 128) fp32 -- row max (idx 0) / row sum (idx 1), replicated
#           across each head's 32 lanes.
#   acc_sc: (tq, 128) fp32    -- concatenated per-head accumulators.
# The output projection (single full-K matmul against Wo) and the residual add
# are fused into the epilogue at the last kv step.
# ----------------------------------------------------------------------------
def _flash_attn_kernel(heads, dim_head, scale, n_total,
                       q_ref, k_ref, v_ref, bias_ref, xres_ref, wo_ref, bo_ref,
                       o_ref, ml_sc, acc_sc):
    kv_i = pl.program_id(1)
    tq = q_ref.shape[0]
    tk = k_ref.shape[0]
    inner = heads * dim_head

    @pl.when(kv_i == 0)
    def _():
        ml_sc[0] = jnp.full((tq, inner), -jnp.inf, jnp.float32)
        ml_sc[1] = jnp.zeros((tq, inner), jnp.float32)
        acc_sc[...] = jnp.zeros((tq, inner), jnp.float32)

    q = q_ref[...]                     # (tq, heads*dim_head) bf16
    k = k_ref[...]                     # (tk, heads*dim_head) bf16
    v = v_ref[...]

    if n_total % tk != 0:              # mask padded key columns of the edge block
        col = lax.broadcasted_iota(jnp.int32, (1, tk), 1) + kv_i * tk
        kmask = col < n_total
        row = lax.broadcasted_iota(jnp.int32, (tk, 1), 0) + kv_i * tk
        v = jnp.where(row < n_total, v, jnp.zeros_like(v))
    else:
        kmask = None

    m_prev_full = ml_sc[0]             # (tq, inner) lane-replicated per head
    l_prev_full = ml_sc[1]

    m_parts, l_parts, a_parts, pv_parts = [], [], [], []
    for h in range(heads):             # static unroll -> back-to-back MXU ops
        sl = slice(h * dim_head, (h + 1) * dim_head)
        s = lax.dot_general(q[:, sl], k[:, sl],
                            (((1,), (1,)), ((), ())),
                            preferred_element_type=jnp.float32)   # (tq, tk)
        s = (s + bias_ref[h].astype(jnp.float32)) * scale
        if kmask is not None:
            s = jnp.where(kmask, s, -1e30)
        m_prev = m_prev_full[:, h * dim_head:h * dim_head + 1]    # (tq, 1)
        l_prev = l_prev_full[:, h * dim_head:h * dim_head + 1]
        m_new = jnp.maximum(m_prev, jnp.max(s, axis=-1, keepdims=True))
        alpha = jnp.exp(m_prev - m_new)
        p = jnp.exp(s - m_new)
        l_new = alpha * l_prev + jnp.sum(p, axis=-1, keepdims=True)
        pv = jnp.dot(p.astype(jnp.bfloat16), v[:, sl],
                     preferred_element_type=jnp.float32)          # (tq, d_h)
        m_parts.append(jnp.broadcast_to(m_new, (tq, dim_head)))
        l_parts.append(jnp.broadcast_to(l_new, (tq, dim_head)))
        a_parts.append(jnp.broadcast_to(alpha, (tq, dim_head)))
        pv_parts.append(pv)

    # Single lane-dense update of every scratch buffer per kv step.
    ml_sc[0] = jnp.concatenate(m_parts, axis=-1)
    ml_sc[1] = jnp.concatenate(l_parts, axis=-1)
    acc_sc[...] = (jnp.concatenate(a_parts, axis=-1) * acc_sc[...]
                   + jnp.concatenate(pv_parts, axis=-1))

    @pl.when(kv_i == pl.num_programs(1) - 1)
    def _():
        # out = x + (acc / l) @ Wo + bo  -- one full-K (tq,128)@(128,emb) matmul.
        attn = (acc_sc[...] * pl.reciprocal(ml_sc[1], approx=True)
                ).astype(jnp.bfloat16)
        proj = jnp.dot(attn, wo_ref[...], preferred_element_type=jnp.float32)
        o_ref[...] = xres_ref[...] + proj + bo_ref[...]


def attn_core(q, k, v, bias, x_res, wo_bf16, bo_row, heads, dim_head):
    n, inner = q.shape
    emb = x_res.shape[1]
    tq = n if n <= Q_TILE else Q_TILE
    tk = n if n <= KV_TILE else KV_TILE
    scale = dim_head ** -0.5
    kernel = functools.partial(_flash_attn_kernel, heads, dim_head, scale, n)
    return pl.pallas_call(
        kernel,
        out_shape=jax.ShapeDtypeStruct((n, emb), jnp.float32),
        grid=(pl.cdiv(n, tq), pl.cdiv(n, tk)),
        in_specs=[
            pl.BlockSpec((tq, inner), lambda qi, ki: (qi, 0)),
            pl.BlockSpec((tk, inner), lambda qi, ki: (0, ki)),
            pl.BlockSpec((tk, inner), lambda qi, ki: (0, ki)),
            pl.BlockSpec((heads, tq, tk), lambda qi, ki: (0, qi, ki)),
            pl.BlockSpec((tq, emb), lambda qi, ki: (qi, 0)),
            pl.BlockSpec((inner, emb), lambda qi, ki: (0, 0)),
            pl.BlockSpec((1, emb), lambda qi, ki: (0, 0)),
        ],
        out_specs=pl.BlockSpec((tq, emb), lambda qi, ki: (qi, 0)),
        scratch_shapes=[pltpu.VMEM((2, tq, inner), jnp.float32),
                        pltpu.VMEM((tq, inner), jnp.float32)],
        compiler_params=pltpu.CompilerParams(
            dimension_semantics=("parallel", "arbitrary"),
            vmem_limit_bytes=VMEM_LIMIT),
    )(q, k, v, bias, x_res, wo_bf16, bo_row)


def attention_block(x, p, heads, dim_head):
    n, emb = x.shape
    inner = heads * dim_head
    q, k, v = ln_qkv(x, p["ln_g"], p["ln_b"], p["wqkv"], inner)
    bias = _rel_pos_bias(q, p["rel_pos_emb"], heads, dim_head, n)
    return attn_core(q, k, v, bias, x, p["wo"], p["bo"], heads, dim_head)


# ----------------------------------------------------------------------------
# Kernel 6: fused Conformer conv module (+ residual).
#   LN -> 1x1 conv + GLU -> depthwise conv (zero "same" padding via bf16 VMEM
#   scratch) -> BatchNorm1d (train stats over time) -> Swish -> 1x1 conv -> +x
# Train-mode BN over time forces whole-sequence residency (single grid point).
# ----------------------------------------------------------------------------
def _conv_module_kernel(ksize, pad_l,
                        x_ref, g_ref, b_ref, w1_ref, b1_ref,
                        dw_w_ref, dw_b_ref, bng_ref, bnb_ref, w2_ref, b2_ref,
                        o_ref, pad_sc):
    n = x_ref.shape[0]
    inner = dw_b_ref.shape[1]
    x = x_ref[...]
    mu = jnp.mean(x, axis=-1, keepdims=True)
    var = jnp.mean((x - mu) ** 2, axis=-1, keepdims=True)
    h = (x - mu) * lax.rsqrt(var + 1e-5) * g_ref[...] + b_ref[...]
    u = jnp.dot(h.astype(jnp.bfloat16), w1_ref[...],
                preferred_element_type=jnp.float32) + b1_ref[...]        # (n, 2*inner)
    u = u[:, :inner] * jax.nn.sigmoid(u[:, inner:])                      # GLU
    # depthwise "same" conv through a zero-padded bf16 VMEM scratch
    pad_sc[...] = jnp.zeros(pad_sc.shape, jnp.bfloat16)
    pad_sc[pl.ds(pad_l, n), :] = u.astype(jnp.bfloat16)
    acc = jnp.zeros((n, inner), jnp.float32) + dw_b_ref[...]
    for t in range(ksize):                                               # static taps
        acc = acc + pad_sc[pl.ds(t, n), :] * dw_w_ref[pl.ds(t, 1), :]
    # BatchNorm1d train-mode stats over time (B == 1), then Swish.
    mu_c = jnp.mean(acc, axis=0, keepdims=True)
    var_c = jnp.mean((acc - mu_c) ** 2, axis=0, keepdims=True)
    y = (acc - mu_c) * lax.rsqrt(var_c + 1e-5) * bng_ref[...] + bnb_ref[...]
    y = y * jax.nn.sigmoid(y)
    out = jnp.dot(y.astype(jnp.bfloat16), w2_ref[...],
                  preferred_element_type=jnp.float32) + b2_ref[...]
    o_ref[...] = x + out


def conv_block(x, p, ksize):
    n, emb = x.shape
    inner2 = p["pw1_w"].shape[1]
    inner = inner2 // 2
    pad_l = ksize // 2
    pad_r = ksize // 2 - (ksize + 1) % 2          # lucidrains calc_same_padding
    n_pad = n + pad_l + pad_r                     # == n + ksize - 1
    return pl.pallas_call(
        functools.partial(_conv_module_kernel, ksize, pad_l),
        out_shape=jax.ShapeDtypeStruct((n, emb), jnp.float32),
        in_specs=[_fs((n, emb)), _fs((1, emb)), _fs((1, emb)),
                  _fs((emb, inner2)), _fs((1, inner2)),
                  _fs((ksize, inner)), _fs((1, inner)),
                  _fs((1, inner)), _fs((1, inner)),
                  _fs((inner, emb)), _fs((1, emb))],
        out_specs=_fs((n, emb)),
        scratch_shapes=[pltpu.VMEM((n_pad, inner), jnp.bfloat16)],
        compiler_params=pltpu.CompilerParams(vmem_limit_bytes=VMEM_LIMIT),
    )(x, p["ln_g"], p["ln_b"], p["pw1_w"], p["pw1_b"],
      p["dw_w"], p["dw_b"], p["bn_g"], p["bn_b"], p["pw2_w"], p["pw2_b"])


# ----------------------------------------------------------------------------
# Conformer block / model glue (lucidrains ConformerBlock, dropouts = 0).
# ----------------------------------------------------------------------------
def conformer_block(x, p, heads, dim_head, ksize):
    x = ff_block(x, p["ff1"])                                  # x + 0.5*FF
    x = attention_block(x, p["attn"], heads, dim_head)         # x + MHSA
    x = conv_block(x, p["conv"], ksize)                        # x + Conv
    x = ff_block(x, p["ff2"],                                  # x + 0.5*FF, post-LN
                 post_ln=(p["post_ln_g"], p["post_ln_b"]))
    return x


def model2_forward_single(feat, params, heads, dim_head, ksize):
    # feat: (T, 1024) = SSL feature of one utterance (see TODO(synk) at top)
    f = linear(feat, params["LL_w"], params["LL_b"])           # LL: Linear(1024, emb)
    f = first_bn_selu(f, params["first_bn_g"], params["first_bn_b"])
    x = jnp.concatenate([params["class_token"], f], axis=0)    # prepend class token
    for bp in params["blocks"]:
        x = conformer_block(x, bp, heads, dim_head, ksize)
        # TODO(synk): GPBlock (applied after every 2nd encoder) has no source.
    emb_vec = x[0:1, :]                                        # (1, emb)
    # fc5: (1, emb) @ (emb, 2) is too small for a Pallas call -> plain XLA.
    out = emb_vec @ params["fc5_w"] + params["fc5_b"]
    return out[0]                                              # (2,)


# ----------------------------------------------------------------------------
# One-time parameter prep: bf16 weight casts, QKV concat, bias row-vectors.
# ----------------------------------------------------------------------------
def prepare_params(p):
    r = lambda v: v.reshape(1, -1)
    bf = lambda v: v.astype(jnp.bfloat16)

    def ff(fp):
        return dict(ln_g=r(fp["ln_g"]), ln_b=r(fp["ln_b"]),
                    w1=bf(fp["w1"]), b1=r(fp["b1"]),
                    w2=bf(fp["w2"]), b2=r(fp["b2"]))

    blocks = []
    for bp in p["blocks"]:
        ap, cp = bp["attn"], bp["conv"]
        blocks.append(dict(
            ff1=ff(bp["ff1"]),
            attn=dict(ln_g=r(ap["ln_g"]), ln_b=r(ap["ln_b"]),
                      wqkv=bf(jnp.concatenate([ap["wq"], ap["wkv"]], axis=1)),
                      wo=bf(ap["wo"]), bo=r(ap["bo"]),
                      rel_pos_emb=bf(ap["rel_pos_emb"])),
            conv=dict(ln_g=r(cp["ln_g"]), ln_b=r(cp["ln_b"]),
                      pw1_w=bf(cp["pw1_w"]), pw1_b=r(cp["pw1_b"]),
                      dw_w=cp["dw_w"], dw_b=r(cp["dw_b"]),
                      bn_g=r(cp["bn_g"]), bn_b=r(cp["bn_b"]),
                      pw2_w=bf(cp["pw2_w"]), pw2_b=r(cp["pw2_b"])),
            ff2=ff(bp["ff2"]),
            post_ln_g=r(bp["post_ln_g"]), post_ln_b=r(bp["post_ln_b"]),
        ))
    return dict(LL_w=bf(p["LL_w"]), LL_b=r(p["LL_b"]),
                first_bn_g=p["first_bn_g"].reshape(1, 1),
                first_bn_b=p["first_bn_b"].reshape(1, 1),
                class_token=p["class_token"],
                fc5_w=p["fc5_w"], fc5_b=p["fc5_b"],
                blocks=blocks)


# ----------------------------------------------------------------------------
# Deterministic parameter init (shapes follow the PyTorch module __init__).
# ----------------------------------------------------------------------------
def init_params(key, emb, heads, ff_mult, exp_fac, ksize, n_enc, ssl_dim=1024):
    dim_head = emb // heads
    inner_attn = dim_head * heads
    inner_conv = emb * exp_fac
    keys = iter(jax.random.split(key, 256))

    def w(shape, s=0.05):
        return (s * jax.random.normal(next(keys), shape)).astype(jnp.float32)

    zeros = lambda s: jnp.zeros(s, jnp.float32)
    ones = lambda s: jnp.ones(s, jnp.float32)

    def ff_params():
        return dict(ln_g=ones((emb,)), ln_b=zeros((emb,)),
                    w1=w((emb, emb * ff_mult)), b1=zeros((emb * ff_mult,)),
                    w2=w((emb * ff_mult, emb)), b2=zeros((emb,)))

    blocks = []
    for _ in range(n_enc):
        blocks.append(dict(
            ff1=ff_params(),
            attn=dict(ln_g=ones((emb,)), ln_b=zeros((emb,)),
                      wq=w((emb, inner_attn)), wkv=w((emb, 2 * inner_attn)),
                      wo=w((inner_attn, emb)), bo=zeros((emb,)),
                      rel_pos_emb=w((2 * MAX_POS_EMB + 1, dim_head))),
            conv=dict(ln_g=ones((emb,)), ln_b=zeros((emb,)),
                      pw1_w=w((emb, 2 * inner_conv)), pw1_b=zeros((2 * inner_conv,)),
                      dw_w=w((ksize, inner_conv)), dw_b=zeros((inner_conv,)),
                      bn_g=ones((inner_conv,)), bn_b=zeros((inner_conv,)),
                      pw2_w=w((inner_conv, emb)), pw2_b=zeros((emb,))),
            ff2=ff_params(),
            post_ln_g=ones((emb,)), post_ln_b=zeros((emb,)),
        ))
    return dict(LL_w=w((ssl_dim, emb)), LL_b=zeros((emb,)),
                first_bn_g=ones((1,)), first_bn_b=zeros((1,)),
                class_token=w((1, emb), 1.0),
                fc5_w=w((emb, 2)), fc5_b=zeros((2,)),
                blocks=blocks)


# ----------------------------------------------------------------------------
if __name__ == "__main__":
    EMB, HEADS, FF_MULT, EXP_FAC, KSIZE, N_ENC = 128, 4, 4, 2, 16, 2
    DIM_HEAD = EMB // HEADS
    T, SSL_DIM, N_UTT = 8, 1024, 2

    key = jax.random.PRNGKey(0)
    kp, kx = jax.random.split(key)
    params = init_params(kp, EMB, HEADS, FF_MULT, EXP_FAC, KSIZE, N_ENC, SSL_DIM)
    params = prepare_params(params)     # bf16 casts / QKV concat done ONCE

    fwd = jax.jit(functools.partial(model2_forward_single,
                                    heads=HEADS, dim_head=DIM_HEAD, ksize=KSIZE))

    # Model2 loops over variable-length utterances; emulate with 2 utterances
    # whose SSL features are (T, 1024).
    feats = [jax.random.normal(jax.random.fold_in(kx, i), (T, SSL_DIM), jnp.float32)
             for i in range(N_UTT)]
    output = jnp.stack([fwd(f, params) for f in feats], axis=0)  # (N_UTT, 2)
    jax.block_until_ready(output)
    assert output.shape == (N_UTT, 2) and output.dtype == jnp.float32
    print("KERNEL_OK")
</pallas_src>

<mosaic_0001>
module attributes {stable_mosaic.version = 11 : i64} {
  func.func @_linear_kernel(%arg0: i32, %arg1: memref<8x1024xf32, #tpu.memory_space<vmem>>, %arg2: memref<1024x128xbf16, #tpu.memory_space<vmem>>, %arg3: memref<1x128xf32, #tpu.memory_space<vmem>>, %arg4: memref<8x128xf32, #tpu.memory_space<vmem>>) attributes {dimension_semantics = [#tpu.dimension_semantics<parallel>], iteration_bounds = array<i64: 1>, scalar_prefetch = 0 : i64, scratch_operands = 0 : i64, tpu.core_type = #tpu.core_type<tc>, window_params = [{transform_indices = @transform_0, window_bounds = array<i64: 8, 1024>}, {pipeline_mode = #tpu.pipeline_mode<synchronous>, transform_indices = @transform_1, window_bounds = array<i64: 1024, 128>}, {pipeline_mode = #tpu.pipeline_mode<synchronous>, transform_indices = @transform_2, window_bounds = array<i64: 1, 128>}, {transform_indices = @transform_3, window_bounds = array<i64: 8, 128>}]} {
    %c0 = arith.constant 0 : index
    %c0_0 = arith.constant 0 : index
    %0 = vector.load %arg1[%c0, %c0_0] : memref<8x1024xf32, #tpu.memory_space<vmem>>, vector<8x1024xf32>
    %1 = arith.truncf %0 : vector<8x1024xf32> to vector<8x1024xbf16>
    %c0_1 = arith.constant 0 : index
    %c0_2 = arith.constant 0 : index
    %2 = vector.load %arg2[%c0_1, %c0_2] : memref<1024x128xbf16, #tpu.memory_space<vmem>>, vector<1024x128xbf16>
    %cst = arith.constant dense<0.000000e+00> : vector<8x128xf32>
    %3 = tpu.matmul %1, %2, %cst {dimension_numbers = #tpu.dot_dimension_numbers<[1], [0], [0], [1], [0, 0, 1, 1], [], []>} : vector<8x1024xbf16>, vector<1024x128xbf16>, vector<8x128xf32> -> vector<8x128xf32>
    %c0_3 = arith.constant 0 : index
    %c0_4 = arith.constant 0 : index
    %4 = vector.load %arg3[%c0_3, %c0_4] : memref<1x128xf32, #tpu.memory_space<vmem>>, vector<1x128xf32>
    %5 = vector.broadcast %4 : vector<1x128xf32> to vector<8x128xf32>
    %6 = arith.addf %3, %5 : vector<8x128xf32>
    %c0_5 = arith.constant 0 : index
    %c0_6 = arith.constant 0 : index
    %7 = vector.load %arg4[%c0_5, %c0_6] : memref<8x128xf32, #tpu.memory_space<vmem>>, vector<8x128xf32>
    tpu.vector_store %arg4[%c0_5, %c0_6], %6 {strides = array<i32>} : memref<8x128xf32, #tpu.memory_space<vmem>>, vector<8x128xf32>,
    return
  }
  func.func @transform_0(%arg0: i32) -> (i32, i32) {
    %c0_i32 = arith.constant 0 : i32
    %c0_i32_0 = arith.constant 0 : i32
    return %arg0, %c0_i32 : i32, i32
  }
  func.func @transform_1(%arg0: i32) -> (i32, i32) {
    %c0_i32 = arith.constant 0 : i32
    %c0_i32_0 = arith.constant 0 : i32
    %c0_i32_1 = arith.constant 0 : i32
    return %c0_i32, %c0_i32_0 : i32, i32
  }
  func.func @transform_2(%arg0: i32) -> (i32, i32) {
    %c0_i32 = arith.constant 0 : i32
    %c0_i32_0 = arith.constant 0 : i32
    %c0_i32_1 = arith.constant 0 : i32
    return %c0_i32, %c0_i32_0 : i32, i32
  }
  func.func @transform_3(%arg0: i32) -> (i32, i32) {
    %c0_i32 = arith.constant 0 : i32
    %c0_i32_0 = arith.constant 0 : i32
    return %arg0, %c0_i32 : i32, i32
  }
}

module attributes {stable_mosaic.version = 11 : i64} {
  func.func @_bn2d_selu_kernel(%arg0: memref<8x128xf32, #tpu.memory_space<vmem>>, %arg1: memref<1x1xf32, #tpu.memory_space<vmem>>, %arg2: memref<1x1xf32, #tpu.memory_space<vmem>>, %arg3: memref<8x128xf32, #tpu.memory_space<vmem>>) attributes {dimension_semantics = [], scalar_prefetch = 0 : i64, scratch_operands = 0 : i64, tpu.core_type = #tpu.core_type<tc>} {
    %c0 = arith.constant 0 : index
    %c0_0 = arith.constant 0 : index
    %0 = vector.load %arg0[%c0, %c0_0] : memref<8x128xf32, #tpu.memory_space<vmem>>, vector<8x128xf32>
    %1 = vector.shape_cast %0 : vector<8x128xf32> to vector<1x8x128xf32>
    %cst = arith.constant dense<0.000000e+00> : vector<1xf32>
    %2 = vector.multi_reduction <add>, %1, %cst [1, 2] : vector<1x8x128xf32> to vector<1xf32>
    %3 = vector.shape_cast %2 : vector<1xf32> to vector<1x1x1xf32>
    %4 = vector.extract %3[0, 0, 0] : f32 from vector<1x1x1xf32>
    %5 = vector.broadcast %4 : f32 to vector<1x1xf32>
    %cst_1 = arith.constant 1.024000e+03 : f32
    %6 = vector.broadcast %cst_1 : f32 to vector<1x1xf32>
    %7 = arith.divf %5, %6 : vector<1x1xf32>
    %8 = vector.broadcast %7 : vector<1x1xf32> to vector<8x128xf32>
    %9 = arith.subf %0, %8 : vector<8x128xf32>
    %10 = arith.mulf %9, %9 : vector<8x128xf32>
    %11 = vector.shape_cast %10 : vector<8x128xf32> to vector<1x8x128xf32>
    %cst_2 = arith.constant dense<0.000000e+00> : vector<1xf32>
    %12 = vector.multi_reduction <add>, %11, %cst_2 [1, 2] : vector<1x8x128xf32> to vector<1xf32>
    %13 = vector.shape_cast %12 : vector<1xf32> to vector<1x1x1xf32>
    %14 = vector.extract %13[0, 0, 0] : f32 from vector<1x1x1xf32>
    %15 = vector.broadcast %14 : f32 to vector<1x1xf32>
    %cst_3 = arith.constant 1.024000e+03 : f32
    %16 = vector.broadcast %cst_3 : f32 to vector<1x1xf32>
    %17 = arith.divf %15, %16 : vector<1x1xf32>
    %18 = vector.broadcast %7 : vector<1x1xf32> to vector<8x128xf32>
    %19 = arith.subf %0, %18 : vector<8x128xf32>
    %cst_4 = arith.constant 9.99999974E-6 : f32
    %20 = vector.broadcast %cst_4 : f32 to vector<1x1xf32>
    %21 = arith.addf %17, %20 : vector<1x1xf32>
    %22 = math.rsqrt %21 : vector<1x1xf32>
    %23 = vector.broadcast %22 : vector<1x1xf32> to vector<8x128xf32>
    %24 = arith.mulf %19, %23 : vector<8x128xf32>
    %c0_5 = arith.constant 0 : index
    %c0_6 = arith.constant 0 : index
    %25 = vector.load %arg1[%c0_5, %c0_6] : memref<1x1xf32, #tpu.memory_space<vmem>>, vector<1x1xf32>
    %26 = vector.broadcast %25 : vector<1x1xf32> to vector<8x128xf32>
    %27 = arith.mulf %24, %26 : vector<8x128xf32>
    %c0_7 = arith.constant 0 : index
    %c0_8 = arith.constant 0 : index
    %28 = vector.load %arg2[%c0_7, %c0_8] : memref<1x1xf32, #tpu.memory_space<vmem>>, vector<1x1xf32>
    %29 = vector.broadcast %28 : vector<1x1xf32> to vector<8x128xf32>
    %30 = arith.addf %27, %29 : vector<8x128xf32>
    %cst_9 = arith.constant 0.000000e+00 : f32
    %31 = vector.broadcast %cst_9 : f32 to vector<8x128xf32>
    %32 = arith.cmpf ogt, %30, %31 : vector<8x128xf32>
    %33 = math.exp %30 : vector<8x128xf32>
    %cst_10 = arith.constant 1.000000e+00 : f32
    %34 = vector.broadcast %cst_10 : f32 to vector<8x128xf32>
    %35 = arith.subf %33, %34 : vector<8x128xf32>
    %cst_11 = arith.constant 1.67326319 : f32
    %36 = vector.broadcast %cst_11 : f32 to vector<8x128xf32>
    %37 = arith.mulf %36, %35 : vector<8x128xf32>
    %38 = arith.select %32, %30, %37 : vector<8x128xi1>, vector<8x128xf32>
    %cst_12 = arith.constant 1.05070102 : f32
    %39 = vector.broadcast %cst_12 : f32 to vector<8x128xf32>
    %40 = arith.mulf %39, %38 : vector<8x128xf32>
    %c0_13 = arith.constant 0 : index
    %c0_14 = arith.constant 0 : index
    %41 = vector.load %arg3[%c0_13, %c0_14] : memref<8x128xf32, #tpu.memory_space<vmem>>, vector<8x128xf32>
    tpu.vector_store %arg3[%c0_13, %c0_14], %40 {strides = array<i32>} : memref<8x128xf32, #tpu.memory_space<vmem>>, vector<8x128xf32>,
    return
  }
}

module attributes {stable_mosaic.version = 11 : i64} {
  func.func @_ff_kernel(%arg0: i32, %arg1: memref<9x128xf32, #tpu.memory_space<vmem>>, %arg2: memref<1x128xf32, #tpu.memory_space<vmem>>, %arg3: memref<1x128xf32, #tpu.memory_space<vmem>>, %arg4: memref<128x512xbf16, #tpu.memory_space<vmem>>, %arg5: memref<1x512xf32, #tpu.memory_space<vmem>>, %arg6: memref<512x128xbf16, #tpu.memory_space<vmem>>, %arg7: memref<1x128xf32, #tpu.memory_space<vmem>>, %arg8: memref<9x128xf32, #tpu.memory_space<vmem>>) attributes {dimension_semantics = [#tpu.dimension_semantics<parallel>], iteration_bounds = array<i64: 1>, scalar_prefetch = 0 : i64, scratch_operands = 0 : i64, tpu.core_type = #tpu.core_type<tc>, window_params = [{transform_indices = @transform_0, window_bounds = array<i64: 9, 128>}, {pipeline_mode = #tpu.pipeline_mode<synchronous>, transform_indices = @transform_1, window_bounds = array<i64: 1, 128>}, {pipeline_mode = #tpu.pipeline_mode<synchronous>, transform_indices = @transform_2, window_bounds = array<i64: 1, 128>}, {pipeline_mode = #tpu.pipeline_mode<synchronous>, transform_indices = @transform_3, window_bounds = array<i64: 128, 512>}, {pipeline_mode = #tpu.pipeline_mode<synchronous>, transform_indices = @transform_4, window_bounds = array<i64: 1, 512>}, {pipeline_mode = #tpu.pipeline_mode<synchronous>, transform_indices = @transform_5, window_bounds = array<i64: 512, 128>}, {pipeline_mode = #tpu.pipeline_mode<synchronous>, transform_indices = @transform_6, window_bounds = array<i64: 1, 128>}, {transform_indices = @transform_7, window_bounds = array<i64: 9, 128>}]} {
    %c0 = arith.constant 0 : index
    %c0_0 = arith.constant 0 : index
    %0 = vector.load %arg1[%c0, %c0_0] : memref<9x128xf32, #tpu.memory_space<vmem>>, vector<9x128xf32>
    %cst = arith.constant dense<0.000000e+00> : vector<9xf32>
    %1 = vector.multi_reduction <add>, %0, %cst [1] : vector<9x128xf32> to vector<9xf32>
    %2 = vector.shape_cast %1 : vector<9xf32> to vector<9x1xf32>
    %cst_1 = arith.constant 1.280000e+02 : f32
    %3 = vector.broadcast %cst_1 : f32 to vector<9x1xf32>
    %4 = arith.divf %2, %3 : vector<9x1xf32>
    %5 = vector.broadcast %4 : vector<9x1xf32> to vector<9x128xf32>
    %6 = arith.subf %0, %5 : vector<9x128xf32>
    %7 = arith.mulf %6, %6 : vector<9x128xf32>
    %cst_2 = arith.constant dense<0.000000e+00> : vector<9xf32>
    %8 = vector.multi_reduction <add>, %7, %cst_2 [1] : vector<9x128xf32> to vector<9xf32>
    %9 = vector.shape_cast %8 : vector<9xf32> to vector<9x1xf32>
    %cst_3 = arith.constant 1.280000e+02 : f32
    %10 = vector.broadcast %cst_3 : f32 to vector<9x1xf32>
    %11 = arith.divf %9, %10 : vector<9x1xf32>
    %12 = vector.broadcast %4 : vector<9x1xf32> to vector<9x128xf32>
    %13 = arith.subf %0, %12 : vector<9x128xf32>
    %cst_4 = arith.constant 9.99999974E-6 : f32
    %14 = vector.broadcast %cst_4 : f32 to vector<9x1xf32>
    %15 = arith.addf %11, %14 : vector<9x1xf32>
    %16 = math.rsqrt %15 : vector<9x1xf32>
    %17 = vector.broadcast %16 : vector<9x1xf32> to vector<9x128xf32>
    %18 = arith.mulf %13, %17 : vector<9x128xf32>
    %c0_5 = arith.constant 0 : index
    %c0_6 = arith.constant 0 : index
    %19 = vector.load %arg2[%c0_5, %c0_6] : memref<1x128xf32, #tpu.memory_space<vmem>>, vector<1x128xf32>
    %20 = vector.broadcast %19 : vector<1x128xf32> to vector<9x128xf32>
    %21 = arith.mulf %18, %20 : vector<9x128xf32>
    %c0_7 = arith.constant 0 : index
    %c0_8 = arith.constant 0 : index
    %22 = vector.load %arg3[%c0_7, %c0_8] : memref<1x128xf32, #tpu.memory_space<vmem>>, vector<1x128xf32>
    %23 = vector.broadcast %22 : vector<1x128xf32> to vector<9x128xf32>
    %24 = arith.addf %21, %23 : vector<9x128xf32>
    %25 = arith.truncf %24 : vector<9x128xf32> to vector<9x128xbf16>
    %c0_9 = arith.constant 0 : index
    %c0_10 = arith.constant 0 : index
    %26 = vector.load %arg4[%c0_9, %c0_10] : memref<128x512xbf16, #tpu.memory_space<vmem>>, vector<128x512xbf16>
    %cst_11 = arith.constant dense<0.000000e+00> : vector<9x512xf32>
    %27 = tpu.matmul %25, %26, %cst_11 {dimension_numbers = #tpu.dot_dimension_numbers<[1], [0], [0], [1], [0, 0, 1, 1], [], []>} : vector<9x128xbf16>, vector<128x512xbf16>, vector<9x512xf32> -> vector<9x512xf32>
    %c0_12 = arith.constant 0 : index
    %c0_13 = arith.constant 0 : index
    %28 = vector.load %arg5[%c0_12, %c0_13] : memref<1x512xf32, #tpu.memory_space<vmem>>, vector<1x512xf32>
    %29 = vector.broadcast %28 : vector<1x512xf32> to vector<9x512xf32>
    %30 = arith.addf %27, %29 : vector<9x512xf32>
    %31 = arith.negf %30 : vector<9x512xf32>
    %32 = math.exp %31 : vector<9x512xf32>
    %cst_14 = arith.constant 1.000000e+00 : f32
    %33 = vector.broadcast %cst_14 : f32 to vector<9x512xf32>
    %34 = arith.addf %33, %32 : vector<9x512xf32>
    %35 = arith.divf %33, %34 : vector<9x512xf32>
    %36 = arith.mulf %30, %35 : vector<9x512xf32>
    %37 = arith.truncf %36 : vector<9x512xf32> to vector<9x512xbf16>
    %c0_15 = arith.constant 0 : index
    %c0_16 = arith.constant 0 : index
    %38 = vector.load %arg6[%c0_15, %c0_16] : memref<512x128xbf16, #tpu.memory_space<vmem>>, vector<512x128xbf16>
    %cst_17 = arith.constant dense<0.000000e+00> : vector<9x128xf32>
    %39 = tpu.matmul %37, %38, %cst_17 {dimension_numbers = #tpu.dot_dimension_numbers<[1], [0], [0], [1], [0, 0, 1, 1], [], []>} : vector<9x512xbf16>, vector<512x128xbf16>, vector<9x128xf32> -> vector<9x128xf32>
    %c0_18 = arith.constant 0 : index
    %c0_19 = arith.constant 0 : index
    %40 = vector.load %arg7[%c0_18, %c0_19] : memref<1x128xf32, #tpu.memory_space<vmem>>, vector<1x128xf32>
    %41 = vector.broadcast %40 : vector<1x128xf32> to vector<9x128xf32>
    %42 = arith.addf %39, %41 : vector<9x128xf32>
    %cst_20 = arith.constant 5.000000e-01 : f32
    %43 = vector.broadcast %cst_20 : f32 to vector<9x128xf32>
    %44 = arith.mulf %43, %42 : vector<9x128xf32>
    %45 = arith.addf %0, %44 : vector<9x128xf32>
    %c0_21 = arith.constant 0 : index
    %c0_22 = arith.constant 0 : index
    %46 = vector.load %arg8[%c0_21, %c0_22] : memref<9x128xf32, #tpu.memory_space<vmem>>, vector<9x128xf32>
    tpu.vector_store %arg8[%c0_21, %c0_22], %45 {strides = array<i32>} : memref<9x128xf32, #tpu.memory_space<vmem>>, vector<9x128xf32>,
    return
  }
  func.func @transform_0(%arg0: i32) -> (i32, i32) {
    %c0_i32 = arith.constant 0 : i32
    %c0_i32_0 = arith.constant 0 : i32
    return %arg0, %c0_i32 : i32, i32
  }
  func.func @transform_1(%arg0: i32) -> (i32, i32) {
    %c0_i32 = arith.constant 0 : i32
    %c0_i32_0 = arith.constant 0 : i32
    %c0_i32_1 = arith.constant 0 : i32
    return %c0_i32, %c0_i32_0 : i32, i32
  }
  func.func @transform_2(%arg0: i32) -> (i32, i32) {
    %c0_i32 = arith.constant 0 : i32
    %c0_i32_0 = arith.constant 0 : i32
    %c0_i32_1 = arith.constant 0 : i32
    return %c0_i32, %c0_i32_0 : i32, i32
  }
  func.func @transform_3(%arg0: i32) -> (i32, i32) {
    %c0_i32 = arith.constant 0 : i32
    %c0_i32_0 = arith.constant 0 : i32
    %c0_i32_1 = arith.constant 0 : i32
    return %c0_i32, %c0_i32_0 : i32, i32
  }
  func.func @transform_4(%arg0: i32) -> (i32, i32) {
    %c0_i32 = arith.constant 0 : i32
    %c0_i32_0 = arith.constant 0 : i32
    %c0_i32_1 = arith.constant 0 : i32
    return %c0_i32, %c0_i32_0 : i32, i32
  }
  func.func @transform_5(%arg0: i32) -> (i32, i32) {
    %c0_i32 = arith.constant 0 : i32
    %c0_i32_0 = arith.constant 0 : i32
    %c0_i32_1 = arith.constant 0 : i32
    return %c0_i32, %c0_i32_0 : i32, i32
  }
  func.func @transform_6(%arg0: i32) -> (i32, i32) {
    %c0_i32 = arith.constant 0 : i32
    %c0_i32_0 = arith.constant 0 : i32
    %c0_i32_1 = arith.constant 0 : i32
    return %c0_i32, %c0_i32_0 : i32, i32
  }
  func.func @transform_7(%arg0: i32) -> (i32, i32) {
    %c0_i32 = arith.constant 0 : i32
    %c0_i32_0 = arith.constant 0 : i32
    return %arg0, %c0_i32 : i32, i32
  }
}

module attributes {stable_mosaic.version = 11 : i64} {
  func.func @_ln_qkv_kernel(%arg0: i32, %arg1: memref<9x128xf32, #tpu.memory_space<vmem>>, %arg2: memref<1x128xf32, #tpu.memory_space<vmem>>, %arg3: memref<1x128xf32, #tpu.memory_space<vmem>>, %arg4: memref<128x384xbf16, #tpu.memory_space<vmem>>, %arg5: memref<9x128xbf16, #tpu.memory_space<vmem>>, %arg6: memref<9x128xbf16, #tpu.memory_space<vmem>>, %arg7: memref<9x128xbf16, #tpu.memory_space<vmem>>) attributes {dimension_semantics = [#tpu.dimension_semantics<parallel>], iteration_bounds = array<i64: 1>, scalar_prefetch = 0 : i64, scratch_operands = 0 : i64, tpu.core_type = #tpu.core_type<tc>, window_params = [{transform_indices = @transform_0, window_bounds = array<i64: 9, 128>}, {pipeline_mode = #tpu.pipeline_mode<synchronous>, transform_indices = @transform_1, window_bounds = array<i64: 1, 128>}, {pipeline_mode = #tpu.pipeline_mode<synchronous>, transform_indices = @transform_2, window_bounds = array<i64: 1, 128>}, {pipeline_mode = #tpu.pipeline_mode<synchronous>, transform_indices = @transform_3, window_bounds = array<i64: 128, 384>}, {transform_indices = @transform_4, window_bounds = array<i64: 9, 128>}, {transform_indices = @transform_5, window_bounds = array<i64: 9, 128>}, {transform_indices = @transform_6, window_bounds = array<i64: 9, 128>}]} {
    %c0 = arith.constant 0 : index
    %c0_0 = arith.constant 0 : index
    %0 = vector.load %arg1[%c0, %c0_0] : memref<9x128xf32, #tpu.memory_space<vmem>>, vector<9x128xf32>
    %cst = arith.constant dense<0.000000e+00> : vector<9xf32>
    %1 = vector.multi_reduction <add>, %0, %cst [1] : vector<9x128xf32> to vector<9xf32>
    %2 = vector.shape_cast %1 : vector<9xf32> to vector<9x1xf32>
    %cst_1 = arith.constant 1.280000e+02 : f32
    %3 = vector.broadcast %cst_1 : f32 to vector<9x1xf32>
    %4 = arith.divf %2, %3 : vector<9x1xf32>
    %5 = vector.broadcast %4 : vector<9x1xf32> to vector<9x128xf32>
    %6 = arith.subf %0, %5 : vector<9x128xf32>
    %7 = arith.mulf %6, %6 : vector<9x128xf32>
    %cst_2 = arith.constant dense<0.000000e+00> : vector<9xf32>
    %8 = vector.multi_reduction <add>, %7, %cst_2 [1] : vector<9x128xf32> to vector<9xf32>
    %9 = vector.shape_cast %8 : vector<9xf32> to vector<9x1xf32>
    %cst_3 = arith.constant 1.280000e+02 : f32
    %10 = vector.broadcast %cst_3 : f32 to vector<9x1xf32>
    %11 = arith.divf %9, %10 : vector<9x1xf32>
    %12 = vector.broadcast %4 : vector<9x1xf32> to vector<9x128xf32>
    %13 = arith.subf %0, %12 : vector<9x128xf32>
    %cst_4 = arith.constant 9.99999974E-6 : f32
    %14 = vector.broadcast %cst_4 : f32 to vector<9x1xf32>
    %15 = arith.addf %11, %14 : vector<9x1xf32>
    %16 = math.rsqrt %15 : vector<9x1xf32>
    %17 = vector.broadcast %16 : vector<9x1xf32> to vector<9x128xf32>
    %18 = arith.mulf %13, %17 : vector<9x128xf32>
    %c0_5 = arith.constant 0 : index
    %c0_6 = arith.constant 0 : index
    %19 = vector.load %arg2[%c0_5, %c0_6] : memref<1x128xf32, #tpu.memory_space<vmem>>, vector<1x128xf32>
    %20 = vector.broadcast %19 : vector<1x128xf32> to vector<9x128xf32>
    %21 = arith.mulf %18, %20 : vector<9x128xf32>
    %c0_7 = arith.constant 0 : index
    %c0_8 = arith.constant 0 : index
    %22 = vector.load %arg3[%c0_7, %c0_8] : memref<1x128xf32, #tpu.memory_space<vmem>>, vector<1x128xf32>
    %23 = vector.broadcast %22 : vector<1x128xf32> to vector<9x128xf32>
    %24 = arith.addf %21, %23 : vector<9x128xf32>
    %25 = arith.truncf %24 : vector<9x128xf32> to vector<9x128xbf16>
    %c0_9 = arith.constant 0 : index
    %c0_10 = arith.constant 0 : index
    %26 = vector.load %arg4[%c0_9, %c0_10] : memref<128x384xbf16, #tpu.memory_space<vmem>>, vector<128x384xbf16>
    %cst_11 = arith.constant dense<0.000000e+00> : vector<9x384xf32>
    %27 = tpu.matmul %25, %26, %cst_11 {dimension_numbers = #tpu.dot_dimension_numbers<[1], [0], [0], [1], [0, 0, 1, 1], [], []>} : vector<9x128xbf16>, vector<128x384xbf16>, vector<9x384xf32> -> vector<9x384xf32>
    %28 = vector.extract_strided_slice %27 {offsets = [0, 0], sizes = [9, 128], strides = [1, 1]} : vector<9x384xf32> to vector<9x128xf32>
    %29 = arith.truncf %28 : vector<9x128xf32> to vector<9x128xbf16>
    %c0_12 = arith.constant 0 : index
    %c0_13 = arith.constant 0 : index
    %30 = vector.load %arg5[%c0_12, %c0_13] : memref<9x128xbf16, #tpu.memory_space<vmem>>, vector<9x128xbf16>
    tpu.vector_store %arg5[%c0_12, %c0_13], %29 {strides = array<i32>} : memref<9x128xbf16, #tpu.memory_space<vmem>>, vector<9x128xbf16>,
    %31 = vector.extract_strided_slice %27 {offsets = [0, 128], sizes = [9, 128], strides = [1, 1]} : vector<9x384xf32> to vector<9x128xf32>
    %32 = arith.truncf %31 : vector<9x128xf32> to vector<9x128xbf16>
    %c0_14 = arith.constant 0 : index
    %c0_15 = arith.constant 0 : index
    %33 = vector.load %arg6[%c0_14, %c0_15] : memref<9x128xbf16, #tpu.memory_space<vmem>>, vector<9x128xbf16>
    tpu.vector_store %arg6[%c0_14, %c0_15], %32 {strides = array<i32>} : memref<9x128xbf16, #tpu.memory_space<vmem>>, vector<9x128xbf16>,
    %34 = vector.extract_strided_slice %27 {offsets = [0, 256], sizes = [9, 128], strides = [1, 1]} : vector<9x384xf32> to vector<9x128xf32>
    %35 = arith.truncf %34 : vector<9x128xf32> to vector<9x128xbf16>
    %c0_16 = arith.constant 0 : index
    %c0_17 = arith.constant 0 : index
    %36 = vector.load %arg7[%c0_16, %c0_17] : memref<9x128xbf16, #tpu.memory_space<vmem>>, vector<9x128xbf16>
    tpu.vector_store %arg7[%c0_16, %c0_17], %35 {strides = array<i32>} : memref<9x128xbf16, #tpu.memory_space<vmem>>, vector<9x128xbf16>,
    return
  }
  func.func @transform_0(%arg0: i32) -> (i32, i32) {
    %c0_i32 = arith.constant 0 : i32
    %c0_i32_0 = arith.constant 0 : i32
    return %arg0, %c0_i32 : i32, i32
  }
  func.func @transform_1(%arg0: i32) -> (i32, i32) {
    %c0_i32 = arith.constant 0 : i32
    %c0_i32_0 = arith.constant 0 : i32
    %c0_i32_1 = arith.constant 0 : i32
    return %c0_i32, %c0_i32_0 : i32, i32
  }
  func.func @transform_2(%arg0: i32) -> (i32, i32) {
    %c0_i32 = arith.constant 0 : i32
    %c0_i32_0 = arith.constant 0 : i32
    %c0_i32_1 = arith.constant 0 : i32
    return %c0_i32, %c0_i32_0 : i32, i32
  }
  func.func @transform_3(%arg0: i32) -> (i32, i32) {
    %c0_i32 = arith.constant 0 : i32
    %c0_i32_0 = arith.constant 0 : i32
    %c0_i32_1 = arith.constant 0 : i32
    return %c0_i32, %c0_i32_0 : i32, i32
  }
  func.func @transform_4(%arg0: i32) -> (i32, i32) {
    %c0_i32 = arith.constant 0 : i32
    %c0_i32_0 = arith.constant 0 : i32
    return %arg0, %c0_i32 : i32, i32
  }
  func.func @transform_5(%arg0: i32) -> (i32, i32) {
    %c0_i32 = arith.constant 0 : i32
    %c0_i32_0 = arith.constant 0 : i32
    return %arg0, %c0_i32 : i32, i32
  }
  func.func @transform_6(%arg0: i32) -> (i32, i32) {
    %c0_i32 = arith.constant 0 : i32
    %c0_i32_0 = arith.constant 0 : i32
    return %arg0, %c0_i32 : i32, i32
  }
}

module attributes {stable_mosaic.version = 11 : i64} {
  func.func @_flash_attn_kernel(%arg0: i32, %arg1: i32, %arg2: memref<9x128xbf16, #tpu.memory_space<vmem>>, %arg3: memref<9x128xbf16, #tpu.memory_space<vmem>>, %arg4: memref<9x128xbf16, #tpu.memory_space<vmem>>, %arg5: memref<4x9x9xbf16, #tpu.memory_space<vmem>>, %arg6: memref<9x128xf32, #tpu.memory_space<vmem>>, %arg7: memref<128x128xbf16, #tpu.memory_space<vmem>>, %arg8: memref<1x128xf32, #tpu.memory_space<vmem>>, %arg9: memref<9x128xf32, #tpu.memory_space<vmem>>, %arg10: memref<2x9x128xf32, #tpu.memory_space<vmem>>, %arg11: memref<9x128xf32, #tpu.memory_space<vmem>>) attributes {dimension_semantics = [#tpu.dimension_semantics<parallel>, #tpu.dimension_semantics<arbitrary>], iteration_bounds = array<i64: 1, 1>, scalar_prefetch = 0 : i64, scratch_operands = 2 : i64, tpu.core_type = #tpu.core_type<tc>, window_params = [{transform_indices = @transform_0, window_bounds = array<i64: 9, 128>}, {transform_indices = @transform_1, window_bounds = array<i64: 9, 128>}, {transform_indices = @transform_2, window_bounds = array<i64: 9, 128>}, {transform_indices = @transform_3, window_bounds = array<i64: 4, 9, 9>}, {transform_indices = @transform_4, window_bounds = array<i64: 9, 128>}, {pipeline_mode = #tpu.pipeline_mode<synchronous>, transform_indices = @transform_5, window_bounds = array<i64: 128, 128>}, {pipeline_mode = #tpu.pipeline_mode<synchronous>, transform_indices = @transform_6, window_bounds = array<i64: 1, 128>}, {transform_indices = @transform_7, window_bounds = array<i64: 9, 128>}]} {
    %c0_i32 = arith.constant 0 : i32
    %0 = arith.cmpi eq, %arg1, %c0_i32 : i32
    %1 = arith.extui %0 : i1 to i32
    %c0_i32_0 = arith.constant 0 : i32
    %2 = arith.cmpi ne, %1, %c0_i32_0 : i32
    scf.if %2 {
      %cst_52 = arith.constant 0xFF800000 : f32
      %155 = vector.broadcast %cst_52 : f32 to vector<9x128xf32>
      %c0_53 = arith.constant 0 : index
      %c0_54 = arith.constant 0 : index
      %c0_55 = arith.constant 0 : index
      %156 = vector.load %arg10[%c0_53, %c0_54, %c0_55] : memref<2x9x128xf32, #tpu.memory_space<vmem>>, vector<1x9x128xf32>
      %157 = vector.shape_cast %156 : vector<1x9x128xf32> to vector<9x128xf32>
      %158 = vector.shape_cast %155 : vector<9x128xf32> to vector<1x9x128xf32>
      tpu.vector_store %arg10[%c0_53, %c0_54, %c0_55], %158 {strides = array<i32>} : memref<2x9x128xf32, #tpu.memory_space<vmem>>, vector<1x9x128xf32>,
      %cst_56 = arith.constant 0.000000e+00 : f32
      %159 = vector.broadcast %cst_56 : f32 to vector<9x128xf32>
      %c1_57 = arith.constant 1 : index
      %c0_58 = arith.constant 0 : index
      %c0_59 = arith.constant 0 : index
      %160 = vector.load %arg10[%c1_57, %c0_58, %c0_59] : memref<2x9x128xf32, #tpu.memory_space<vmem>>, vector<1x9x128xf32>
      %161 = vector.shape_cast %160 : vector<1x9x128xf32> to vector<9x128xf32>
      %162 = vector.shape_cast %159 : vector<9x128xf32> to vector<1x9x128xf32>
      tpu.vector_store %arg10[%c1_57, %c0_58, %c0_59], %162 {strides = array<i32>} : memref<2x9x128xf32, #tpu.memory_space<vmem>>, vector<1x9x128xf32>,
      %cst_60 = arith.constant 0.000000e+00 : f32
      %163 = vector.broadcast %cst_60 : f32 to vector<9x128xf32>
      %c0_61 = arith.constant 0 : index
      %c0_62 = arith.constant 0 : index
      %164 = vector.load %arg11[%c0_61, %c0_62] : memref<9x128xf32, #tpu.memory_space<vmem>>, vector<9x128xf32>
      tpu.vector_store %arg11[%c0_61, %c0_62], %163 {strides = array<i32>} : memref<9x128xf32, #tpu.memory_space<vmem>>, vector<9x128xf32>,
    } else {
    }
    %c0 = arith.constant 0 : index
    %c0_1 = arith.constant 0 : index
    %3 = vector.load %arg2[%c0, %c0_1] : memref<9x128xbf16, #tpu.memory_space<vmem>>, vector<9x128xbf16>
    %c0_2 = arith.constant 0 : index
    %c0_3 = arith.constant 0 : index
    %4 = vector.load %arg3[%c0_2, %c0_3] : memref<9x128xbf16, #tpu.memory_space<vmem>>, vector<9x128xbf16>
    %c0_4 = arith.constant 0 : index
    %c0_5 = arith.constant 0 : index
    %5 = vector.load %arg4[%c0_4, %c0_5] : memref<9x128xbf16, #tpu.memory_space<vmem>>, vector<9x128xbf16>
    %c0_6 = arith.constant 0 : index
    %c0_7 = arith.constant 0 : index
    %c0_8 = arith.constant 0 : index
    %6 = vector.load %arg10[%c0_6, %c0_7, %c0_8] : memref<2x9x128xf32, #tpu.memory_space<vmem>>, vector<1x9x128xf32>
    %7 = vector.shape_cast %6 : vector<1x9x128xf32> to vector<9x128xf32>
    %c1 = arith.constant 1 : index
    %c0_9 = arith.constant 0 : index
    %c0_10 = arith.constant 0 : index
    %8 = vector.load %arg10[%c1, %c0_9, %c0_10] : memref<2x9x128xf32, #tpu.memory_space<vmem>>, vector<1x9x128xf32>
    %9 = vector.shape_cast %8 : vector<1x9x128xf32> to vector<9x128xf32>
    %10 = vector.extract_strided_slice %3 {offsets = [0, 0], sizes = [9, 32], strides = [1, 1]} : vector<9x128xbf16> to vector<9x32xbf16>
    %11 = vector.extract_strided_slice %4 {offsets = [0, 0], sizes = [9, 32], strides = [1, 1]} : vector<9x128xbf16> to vector<9x32xbf16>
    %cst = arith.constant dense<0.000000e+00> : vector<9x9xf32>
    %12 = tpu.matmul %10, %11, %cst {dimension_numbers = #tpu.dot_dimension_numbers<[1], [1], [0], [0], [0, 0, 1, 0], [], []>} : vector<9x32xbf16>, vector<9x32xbf16>, vector<9x9xf32> -> vector<9x9xf32>
    %c0_11 = arith.constant 0 : index
    %c0_12 = arith.constant 0 : index
    %c0_13 = arith.constant 0 : index
    %13 = vector.load %arg5[%c0_11, %c0_12, %c0_13] : memref<4x9x9xbf16, #tpu.memory_space<vmem>>, vector<1x9x9xbf16>
    %14 = vector.shape_cast %13 : vector<1x9x9xbf16> to vector<9x9xbf16>
    %15 = arith.extf %14 : vector<9x9xbf16> to vector<9x9xf32>
    %16 = arith.addf %12, %15 : vector<9x9xf32>
    %cst_14 = arith.constant 0.176776692 : f32
    %17 = vector.broadcast %cst_14 : f32 to vector<9x9xf32>
    %18 = arith.mulf %16, %17 : vector<9x9xf32>
    %19 = vector.extract_strided_slice %7 {offsets = [0, 0], sizes = [9, 1], strides = [1, 1]} : vector<9x128xf32> to vector<9x1xf32>
    %20 = vector.extract_strided_slice %9 {offsets = [0, 0], sizes = [9, 1], strides = [1, 1]} : vector<9x128xf32> to vector<9x1xf32>
    %cst_15 = arith.constant dense<0xFF800000> : vector<9xf32>
    %21 = vector.multi_reduction <maximumf>, %18, %cst_15 [1] : vector<9x9xf32> to vector<9xf32>
    %22 = vector.shape_cast %21 : vector<9xf32> to vector<9x1xf32>
    %23 = arith.maximumf %19, %22 : vector<9x1xf32>
    %24 = arith.subf %19, %23 : vector<9x1xf32>
    %25 = math.exp %24 : vector<9x1xf32>
    %26 = vector.broadcast %23 : vector<9x1xf32> to vector<9x9xf32>
    %27 = arith.subf %18, %26 : vector<9x9xf32>
    %28 = math.exp %27 : vector<9x9xf32>
    %29 = arith.mulf %25, %20 : vector<9x1xf32>
    %cst_16 = arith.constant dense<0.000000e+00> : vector<9xf32>
    %30 = vector.multi_reduction <add>, %28, %cst_16 [1] : vector<9x9xf32> to vector<9xf32>
    %31 = vector.shape_cast %30 : vector<9xf32> to vector<9x1xf32>
    %32 = arith.addf %29, %31 : vector<9x1xf32>
    %33 = arith.truncf %28 : vector<9x9xf32> to vector<9x9xbf16>
    %34 = vector.extract_strided_slice %5 {offsets = [0, 0], sizes = [9, 32], strides = [1, 1]} : vector<9x128xbf16> to vector<9x32xbf16>
    %cst_17 = arith.constant dense<0.000000e+00> : vector<9x32xf32>
    %35 = tpu.matmul %33, %34, %cst_17 {dimension_numbers = #tpu.dot_dimension_numbers<[1], [0], [0], [1], [0, 0, 1, 1], [], []>} : vector<9x9xbf16>, vector<9x32xbf16>, vector<9x32xf32> -> vector<9x32xf32>
    %36 = vector.shape_cast %23 : vector<9x1xf32> to vector<9x1xf32>
    %37 = vector.broadcast %36 : vector<9x1xf32> to vector<9x32xf32>
    %38 = vector.shape_cast %32 : vector<9x1xf32> to vector<9x1xf32>
    %39 = vector.broadcast %38 : vector<9x1xf32> to vector<9x32xf32>
    %40 = vector.shape_cast %25 : vector<9x1xf32> to vector<9x1xf32>
    %41 = vector.broadcast %40 : vector<9x1xf32> to vector<9x32xf32>
    %42 = vector.extract_strided_slice %3 {offsets = [0, 32], sizes = [9, 32], strides = [1, 1]} : vector<9x128xbf16> to vector<9x32xbf16>
    %43 = vector.extract_strided_slice %4 {offsets = [0, 32], sizes = [9, 32], strides = [1, 1]} : vector<9x128xbf16> to vector<9x32xbf16>
    %cst_18 = arith.constant dense<0.000000e+00> : vector<9x9xf32>
    %44 = tpu.matmul %42, %43, %cst_18 {dimension_numbers = #tpu.dot_dimension_numbers<[1], [1], [0], [0], [0, 0, 1, 0], [], []>} : vector<9x32xbf16>, vector<9x32xbf16>, vector<9x9xf32> -> vector<9x9xf32>
    %c1_19 = arith.constant 1 : index
    %c0_20 = arith.constant 0 : index
    %c0_21 = arith.constant 0 : index
    %45 = vector.load %arg5[%c1_19, %c0_20, %c0_21] : memref<4x9x9xbf16, #tpu.memory_space<vmem>>, vector<1x9x9xbf16>
    %46 = vector.shape_cast %45 : vector<1x9x9xbf16> to vector<9x9xbf16>
    %47 = arith.extf %46 : vector<9x9xbf16> to vector<9x9xf32>
    %48 = arith.addf %44, %47 : vector<9x9xf32>
    %cst_22 = arith.constant 0.176776692 : f32
    %49 = vector.broadcast %cst_22 : f32 to vector<9x9xf32>
    %50 = arith.mulf %48, %49 : vector<9x9xf32>
    %51 = vector.extract_strided_slice %7 {offsets = [0, 32], sizes = [9, 1], strides = [1, 1]} : vector<9x128xf32> to vector<9x1xf32>
    %52 = vector.extract_strided_slice %9 {offsets = [0, 32], sizes = [9, 1], strides = [1, 1]} : vector<9x128xf32> to vector<9x1xf32>
    %cst_23 = arith.constant dense<0xFF800000> : vector<9xf32>
    %53 = vector.multi_reduction <maximumf>, %50, %cst_23 [1] : vector<9x9xf32> to vector<9xf32>
    %54 = vector.shape_cast %53 : vector<9xf32> to vector<9x1xf32>
    %55 = arith.maximumf %51, %54 : vector<9x1xf32>
    %56 = arith.subf %51, %55 : vector<9x1xf32>
    %57 = math.exp %56 : vector<9x1xf32>
    %58 = vector.broadcast %55 : vector<9x1xf32> to vector<9x9xf32>
    %59 = arith.subf %50, %58 : vector<9x9xf32>
    %60 = math.exp %59 : vector<9x9xf32>
    %61 = arith.mulf %57, %52 : vector<9x1xf32>
    %cst_24 = arith.constant dense<0.000000e+00> : vector<9xf32>
    %62 = vector.multi_reduction <add>, %60, %cst_24 [1] : vector<9x9xf32> to vector<9xf32>
    %63 = vector.shape_cast %62 : vector<9xf32> to vector<9x1xf32>
    %64 = arith.addf %61, %63 : vector<9x1xf32>
    %65 = arith.truncf %60 : vector<9x9xf32> to vector<9x9xbf16>
    %66 = vector.extract_strided_slice %5 {offsets = [0, 32], sizes = [9, 32], strides = [1, 1]} : vector<9x128xbf16> to vector<9x32xbf16>
    %cst_25 = arith.constant dense<0.000000e+00> : vector<9x32xf32>
    %67 = tpu.matmul %65, %66, %cst_25 {dimension_numbers = #tpu.dot_dimension_numbers<[1], [0], [0], [1], [0, 0, 1, 1], [], []>} : vector<9x9xbf16>, vector<9x32xbf16>, vector<9x32xf32> -> vector<9x32xf32>
    %68 = vector.shape_cast %55 : vector<9x1xf32> to vector<9x1xf32>
    %69 = vector.broadcast %68 : vector<9x1xf32> to vector<9x32xf32>
    %70 = vector.shape_cast %64 : vector<9x1xf32> to vector<9x1xf32>
    %71 = vector.broadcast %70 : vector<9x1xf32> to vector<9x32xf32>
    %72 = vector.shape_cast %57 : vector<9x1xf32> to vector<9x1xf32>
    %73 = vector.broadcast %72 : vector<9x1xf32> to vector<9x32xf32>
    %74 = vector.extract_strided_slice %3 {offsets = [0, 64], sizes = [9, 32], strides = [1, 1]} : vector<9x128xbf16> to vector<9x32xbf16>
    %75 = vector.extract_strided_slice %4 {offsets = [0, 64], sizes = [9, 32], strides = [1, 1]} : vector<9x128xbf16> to vector<9x32xbf16>
    %cst_26 = arith.constant dense<0.000000e+00> : vector<9x9xf32>
    %76 = tpu.matmul %74, %75, %cst_26 {dimension_numbers = #tpu.dot_dimension_numbers<[1], [1], [0], [0], [0, 0, 1, 0], [], []>} : vector<9x32xbf16>, vector<9x32xbf16>, vector<9x9xf32> -> vector<9x9xf32>
    %c2 = arith.constant 2 : index
    %c0_27 = arith.constant 0 : index
    %c0_28 = arith.constant 0 : index
    %77 = vector.load %arg5[%c2, %c0_27, %c0_28] : memref<4x9x9xbf16, #tpu.memory_space<vmem>>, vector<1x9x9xbf16>
    %78 = vector.shape_cast %77 : vector<1x9x9xbf16> to vector<9x9xbf16>
    %79 = arith.extf %78 : vector<9x9xbf16> to vector<9x9xf32>
    %80 = arith.addf %76, %79 : vector<9x9xf32>
    %cst_29 = arith.constant 0.176776692 : f32
    %81 = vector.broadcast %cst_29 : f32 to vector<9x9xf32>
    %82 = arith.mulf %80, %81 : vector<9x9xf32>
    %83 = vector.extract_strided_slice %7 {offsets = [0, 64], sizes = [9, 1], strides = [1, 1]} : vector<9x128xf32> to vector<9x1xf32>
    %84 = vector.extract_strided_slice %9 {offsets = [0, 64], sizes = [9, 1], strides = [1, 1]} : vector<9x128xf32> to vector<9x1xf32>
    %cst_30 = arith.constant dense<0xFF800000> : vector<9xf32>
    %85 = vector.multi_reduction <maximumf>, %82, %cst_30 [1] : vector<9x9xf32> to vector<9xf32>
    %86 = vector.shape_cast %85 : vector<9xf32> to vector<9x1xf32>
    %87 = arith.maximumf %83, %86 : vector<9x1xf32>
    %88 = arith.subf %83, %87 : vector<9x1xf32>
    %89 = math.exp %88 : vector<9x1xf32>
    %90 = vector.broadcast %87 : vector<9x1xf32> to vector<9x9xf32>
    %91 = arith.subf %82, %90 : vector<9x9xf32>
    %92 = math.exp %91 : vector<9x9xf32>
    %93 = arith.mulf %89, %84 : vector<9x1xf32>
    %cst_31 = arith.constant dense<0.000000e+00> : vector<9xf32>
    %94 = vector.multi_reduction <add>, %92, %cst_31 [1] : vector<9x9xf32> to vector<9xf32>
    %95 = vector.shape_cast %94 : vector<9xf32> to vector<9x1xf32>
    %96 = arith.addf %93, %95 : vector<9x1xf32>
    %97 = arith.truncf %92 : vector<9x9xf32> to vector<9x9xbf16>
    %98 = vector.extract_strided_slice %5 {offsets = [0, 64], sizes = [9, 32], strides = [1, 1]} : vector<9x128xbf16> to vector<9x32xbf16>
    %cst_32 = arith.constant dense<0.000000e+00> : vector<9x32xf32>
    %99 = tpu.matmul %97, %98, %cst_32 {dimension_numbers = #tpu.dot_dimension_numbers<[1], [0], [0], [1], [0, 0, 1, 1], [], []>} : vector<9x9xbf16>, vector<9x32xbf16>, vector<9x32xf32> -> vector<9x32xf32>
    %100 = vector.shape_cast %87 : vector<9x1xf32> to vector<9x1xf32>
    %101 = vector.broadcast %100 : vector<9x1xf32> to vector<9x32xf32>
    %102 = vector.shape_cast %96 : vector<9x1xf32> to vector<9x1xf32>
    %103 = vector.broadcast %102 : vector<9x1xf32> to vector<9x32xf32>
    %104 = vector.shape_cast %89 : vector<9x1xf32> to vector<9x1xf32>
    %105 = vector.broadcast %104 : vector<9x1xf32> to vector<9x32xf32>
    %106 = vector.extract_strided_slice %3 {offsets = [0, 96], sizes = [9, 32], strides = [1, 1]} : vector<9x128xbf16> to vector<9x32xbf16>
    %107 = vector.extract_strided_slice %4 {offsets = [0, 96], sizes = [9, 32], strides = [1, 1]} : vector<9x128xbf16> to vector<9x32xbf16>
    %cst_33 = arith.constant dense<0.000000e+00> : vector<9x9xf32>
    %108 = tpu.matmul %106, %107, %cst_33 {dimension_numbers = #tpu.dot_dimension_numbers<[1], [1], [0], [0], [0, 0, 1, 0], [], []>} : vector<9x32xbf16>, vector<9x32xbf16>, vector<9x9xf32> -> vector<9x9xf32>
    %c3 = arith.constant 3 : index
    %c0_34 = arith.constant 0 : index
    %c0_35 = arith.constant 0 : index
    %109 = vector.load %arg5[%c3, %c0_34, %c0_35] : memref<4x9x9xbf16, #tpu.memory_space<vmem>>, vector<1x9x9xbf16>
    %110 = vector.shape_cast %109 : vector<1x9x9xbf16> to vector<9x9xbf16>
    %111 = arith.extf %110 : vector<9x9xbf16> to vector<9x9xf32>
    %112 = arith.addf %108, %111 : vector<9x9xf32>
    %cst_36 = arith.constant 0.176776692 : f32
    %113 = vector.broadcast %cst_36 : f32 to vector<9x9xf32>
    %114 = arith.mulf %112, %113 : vector<9x9xf32>
    %115 = vector.extract_strided_slice %7 {offsets = [0, 96], sizes = [9, 1], strides = [1, 1]} : vector<9x128xf32> to vector<9x1xf32>
    %116 = vector.extract_strided_slice %9 {offsets = [0, 96], sizes = [9, 1], strides = [1, 1]} : vector<9x128xf32> to vector<9x1xf32>
    %cst_37 = arith.constant dense<0xFF800000> : vector<9xf32>
    %117 = vector.multi_reduction <maximumf>, %114, %cst_37 [1] : vector<9x9xf32> to vector<9xf32>
    %118 = vector.shape_cast %117 : vector<9xf32> to vector<9x1xf32>
    %119 = arith.maximumf %115, %118 : vector<9x1xf32>
    %120 = arith.subf %115, %119 : vector<9x1xf32>
    %121 = math.exp %120 : vector<9x1xf32>
    %122 = vector.broadcast %119 : vector<9x1xf32> to vector<9x9xf32>
    %123 = arith.subf %114, %122 : vector<9x9xf32>
    %124 = math.exp %123 : vector<9x9xf32>
    %125 = arith.mulf %121, %116 : vector<9x1xf32>
    %cst_38 = arith.constant dense<0.000000e+00> : vector<9xf32>
    %126 = vector.multi_reduction <add>, %124, %cst_38 [1] : vector<9x9xf32> to vector<9xf32>
    %127 = vector.shape_cast %126 : vector<9xf32> to vector<9x1xf32>
    %128 = arith.addf %125, %127 : vector<9x1xf32>
    %129 = arith.truncf %124 : vector<9x9xf32> to vector<9x9xbf16>
    %130 = vector.extract_strided_slice %5 {offsets = [0, 96], sizes = [9, 32], strides = [1, 1]} : vector<9x128xbf16> to vector<9x32xbf16>
    %cst_39 = arith.constant dense<0.000000e+00> : vector<9x32xf32>
    %131 = tpu.matmul %129, %130, %cst_39 {dimension_numbers = #tpu.dot_dimension_numbers<[1], [0], [0], [1], [0, 0, 1, 1], [], []>} : vector<9x9xbf16>, vector<9x32xbf16>, vector<9x32xf32> -> vector<9x32xf32>
    %132 = vector.shape_cast %119 : vector<9x1xf32> to vector<9x1xf32>
    %133 = vector.broadcast %132 : vector<9x1xf32> to vector<9x32xf32>
    %134 = vector.shape_cast %128 : vector<9x1xf32> to vector<9x1xf32>
    %135 = vector.broadcast %134 : vector<9x1xf32> to vector<9x32xf32>
    %136 = vector.shape_cast %121 : vector<9x1xf32> to vector<9x1xf32>
    %137 = vector.broadcast %136 : vector<9x1xf32> to vector<9x32xf32>
    %138 = tpu.concatenate %37, %69, %101, %133 in 1 : vector<9x32xf32>, vector<9x32xf32>, vector<9x32xf32>, vector<9x32xf32> -> vector<9x128xf32>
    %c0_40 = arith.constant 0 : index
    %c0_41 = arith.constant 0 : index
    %c0_42 = arith.constant 0 : index
    %139 = vector.load %arg10[%c0_40, %c0_41, %c0_42] : memref<2x9x128xf32, #tpu.memory_space<vmem>>, vector<1x9x128xf32>
    %140 = vector.shape_cast %139 : vector<1x9x128xf32> to vector<9x128xf32>
    %141 = vector.shape_cast %138 : vector<9x128xf32> to vector<1x9x128xf32>
    tpu.vector_store %arg10[%c0_40, %c0_41, %c0_42], %141 {strides = array<i32>} : memref<2x9x128xf32, #tpu.memory_space<vmem>>, vector<1x9x128xf32>,
    %142 = tpu.concatenate %39, %71, %103, %135 in 1 : vector<9x32xf32>, vector<9x32xf32>, vector<9x32xf32>, vector<9x32xf32> -> vector<9x128xf32>
    %c1_43 = arith.constant 1 : index
    %c0_44 = arith.constant 0 : index
    %c0_45 = arith.constant 0 : index
    %143 = vector.load %arg10[%c1_43, %c0_44, %c0_45] : memref<2x9x128xf32, #tpu.memory_space<vmem>>, vector<1x9x128xf32>
    %144 = vector.shape_cast %143 : vector<1x9x128xf32> to vector<9x128xf32>
    %145 = vector.shape_cast %142 : vector<9x128xf32> to vector<1x9x128xf32>
    tpu.vector_store %arg10[%c1_43, %c0_44, %c0_45], %145 {strides = array<i32>} : memref<2x9x128xf32, #tpu.memory_space<vmem>>, vector<1x9x128xf32>,
    %146 = tpu.concatenate %41, %73, %105, %137 in 1 : vector<9x32xf32>, vector<9x32xf32>, vector<9x32xf32>, vector<9x32xf32> -> vector<9x128xf32>
    %c0_46 = arith.constant 0 : index
    %c0_47 = arith.constant 0 : index
    %147 = vector.load %arg11[%c0_46, %c0_47] : memref<9x128xf32, #tpu.memory_space<vmem>>, vector<9x128xf32>
    %148 = arith.mulf %146, %147 : vector<9x128xf32>
    %149 = tpu.concatenate %35, %67, %99, %131 in 1 : vector<9x32xf32>, vector<9x32xf32>, vector<9x32xf32>, vector<9x32xf32> -> vector<9x128xf32>
    %150 = arith.addf %148, %149 : vector<9x128xf32>
    %c0_48 = arith.constant 0 : index
    %c0_49 = arith.constant 0 : index
    %151 = vector.load %arg11[%c0_48, %c0_49] : memref<9x128xf32, #tpu.memory_space<vmem>>, vector<9x128xf32>
    tpu.vector_store %arg11[%c0_48, %c0_49], %150 {strides = array<i32>} : memref<9x128xf32, #tpu.memory_space<vmem>>, vector<9x128xf32>,
    %c0_i32_50 = arith.constant 0 : i32
    %152 = arith.cmpi eq, %arg1, %c0_i32_50 : i32
    %153 = arith.extui %152 : i1 to i32
    %c0_i32_51 = arith.constant 0 : i32
    %154 = arith.cmpi ne, %153, %c0_i32_51 : i32
    scf.if %154 {
      %c0_52 = arith.constant 0 : index
      %c0_53 = arith.constant 0 : index
      %155 = vector.load %arg11[%c0_52, %c0_53] : memref<9x128xf32, #tpu.memory_space<vmem>>, vector<9x128xf32>
      %c1_54 = arith.constant 1 : index
      %c0_55 = arith.constant 0 : index
      %c0_56 = arith.constant 0 : index
      %156 = vector.load %arg10[%c1_54, %c0_55, %c0_56] : memref<2x9x128xf32, #tpu.memory_space<vmem>>, vector<1x9x128xf32>
      %157 = vector.shape_cast %156 : vector<1x9x128xf32> to vector<9x128xf32>
      %158 = tpu.reciprocal %157 {approx = true} : vector<9x128xf32> -> vector<9x128xf32>
      %159 = arith.mulf %155, %158 : vector<9x128xf32>
      %160 = arith.truncf %159 : vector<9x128xf32> to vector<9x128xbf16>
      %c0_57 = arith.constant 0 : index
      %c0_58 = arith.constant 0 : index
      %161 = vector.load %arg7[%c0_57, %c0_58] : memref<128x128xbf16, #tpu.memory_space<vmem>>, vector<128x128xbf16>
      %cst_59 = arith.constant dense<0.000000e+00> : vector<9x128xf32>
      %162 = tpu.matmul %160, %161, %cst_59 {dimension_numbers = #tpu.dot_dimension_numbers<[1], [0], [0], [1], [0, 0, 1, 1], [], []>} : vector<9x128xbf16>, vector<128x128xbf16>, vector<9x128xf32> -> vector<9x128xf32>
      %c0_60 = arith.constant 0 : index
      %c0_61 = arith.constant 0 : index
      %163 = vector.load %arg6[%c0_60, %c0_61] : memref<9x128xf32, #tpu.memory_space<vmem>>, vector<9x128xf32>
      %164 = arith.addf %163, %162 : vector<9x128xf32>
      %c0_62 = arith.constant 0 : index
      %c0_63 = arith.constant 0 : index
      %165 = vector.load %arg8[%c0_62, %c0_63] : memref<1x128xf32, #tpu.memory_space<vmem>>, vector<1x128xf32>
      %166 = vector.broadcast %165 : vector<1x128xf32> to vector<9x128xf32>
      %167 = arith.addf %164, %166 : vector<9x128xf32>
      %c0_64 = arith.constant 0 : index
      %c0_65 = arith.constant 0 : index
      %168 = vector.load %arg9[%c0_64, %c0_65] : memref<9x128xf32, #tpu.memory_space<vmem>>, vector<9x128xf32>
      tpu.vector_store %arg9[%c0_64, %c0_65], %167 {strides = array<i32>} : memref<9x128xf32, #tpu.memory_space<vmem>>, vector<9x128xf32>,
    } else {
    }
    return
  }
  func.func @transform_0(%arg0: i32, %arg1: i32) -> (i32, i32) {
    %c0_i32 = arith.constant 0 : i32
    %c0_i32_0 = arith.constant 0 : i32
    return %arg0, %c0_i32 : i32, i32
  }
  func.func @transform_1(%arg0: i32, %arg1: i32) -> (i32, i32) {
    %c0_i32 = arith.constant 0 : i32
    %c0_i32_0 = arith.constant 0 : i32
    return %c0_i32, %arg1 : i32, i32
  }
  func.func @transform_2(%arg0: i32, %arg1: i32) -> (i32, i32) {
    %c0_i32 = arith.constant 0 : i32
    %c0_i32_0 = arith.constant 0 : i32
    return %c0_i32, %arg1 : i32, i32
  }
  func.func @transform_3(%arg0: i32, %arg1: i32) -> (i32, i32, i32) {
    %c0_i32 = arith.constant 0 : i32
    %c0_i32_0 = arith.constant 0 : i32
    return %c0_i32, %arg0, %arg1 : i32, i32, i32
  }
  func.func @transform_4(%arg0: i32, %arg1: i32) -> (i32, i32) {
    %c0_i32 = arith.constant 0 : i32
    %c0_i32_0 = arith.constant 0 : i32
    return %arg0, %c0_i32 : i32, i32
  }
  func.func @transform_5(%arg0: i32, %arg1: i32) -> (i32, i32) {
    %c0_i32 = arith.constant 0 : i32
    %c0_i32_0 = arith.constant 0 : i32
    %c0_i32_1 = arith.constant 0 : i32
    return %c0_i32, %c0_i32_0 : i32, i32
  }
  func.func @transform_6(%arg0: i32, %arg1: i32) -> (i32, i32) {
    %c0_i32 = arith.constant 0 : i32
    %c0_i32_0 = arith.constant 0 : i32
    %c0_i32_1 = arith.constant 0 : i32
    return %c0_i32, %c0_i32_0 : i32, i32
  }
  func.func @transform_7(%arg0: i32, %arg1: i32) -> (i32, i32) {
    %c0_i32 = arith.constant 0 : i32
    %c0_i32_0 = arith.constant 0 : i32
    return %arg0, %c0_i32 : i32, i32
  }
}

module attributes {stable_mosaic.version = 11 : i64} {
  func.func @_conv_module_kernel(%arg0: memref<9x128xf32, #tpu.memory_space<vmem>>, %arg1: memref<1x128xf32, #tpu.memory_space<vmem>>, %arg2: memref<1x128xf32, #tpu.memory_space<vmem>>, %arg3: memref<128x512xbf16, #tpu.memory_space<vmem>>, %arg4: memref<1x512xf32, #tpu.memory_space<vmem>>, %arg5: memref<16x256xf32, #tpu.memory_space<vmem>>, %arg6: memref<1x256xf32, #tpu.memory_space<vmem>>, %arg7: memref<1x256xf32, #tpu.memory_space<vmem>>, %arg8: memref<1x256xf32, #tpu.memory_space<vmem>>, %arg9: memref<256x128xbf16, #tpu.memory_space<vmem>>, %arg10: memref<1x128xf32, #tpu.memory_space<vmem>>, %arg11: memref<9x128xf32, #tpu.memory_space<vmem>>, %arg12: memref<24x256xbf16, #tpu.memory_space<vmem>>) attributes {dimension_semantics = [], scalar_prefetch = 0 : i64, scratch_operands = 1 : i64, tpu.core_type = #tpu.core_type<tc>} {
    %c0 = arith.constant 0 : index
    %c0_0 = arith.constant 0 : index
    %0 = vector.load %arg0[%c0, %c0_0] : memref<9x128xf32, #tpu.memory_space<vmem>>, vector<9x128xf32>
    %cst = arith.constant dense<0.000000e+00> : vector<9xf32>
    %1 = vector.multi_reduction <add>, %0, %cst [1] : vector<9x128xf32> to vector<9xf32>
    %2 = vector.shape_cast %1 : vector<9xf32> to vector<9x1xf32>
    %cst_1 = arith.constant 1.280000e+02 : f32
    %3 = vector.broadcast %cst_1 : f32 to vector<9x1xf32>
    %4 = arith.divf %2, %3 : vector<9x1xf32>
    %5 = vector.broadcast %4 : vector<9x1xf32> to vector<9x128xf32>
    %6 = arith.subf %0, %5 : vector<9x128xf32>
    %7 = arith.mulf %6, %6 : vector<9x128xf32>
    %cst_2 = arith.constant dense<0.000000e+00> : vector<9xf32>
    %8 = vector.multi_reduction <add>, %7, %cst_2 [1] : vector<9x128xf32> to vector<9xf32>
    %9 = vector.shape_cast %8 : vector<9xf32> to vector<9x1xf32>
    %cst_3 = arith.constant 1.280000e+02 : f32
    %10 = vector.broadcast %cst_3 : f32 to vector<9x1xf32>
    %11 = arith.divf %9, %10 : vector<9x1xf32>
    %12 = vector.broadcast %4 : vector<9x1xf32> to vector<9x128xf32>
    %13 = arith.subf %0, %12 : vector<9x128xf32>
    %cst_4 = arith.constant 9.99999974E-6 : f32
    %14 = vector.broadcast %cst_4 : f32 to vector<9x1xf32>
    %15 = arith.addf %11, %14 : vector<9x1xf32>
    %16 = math.rsqrt %15 : vector<9x1xf32>
    %17 = vector.broadcast %16 : vector<9x1xf32> to vector<9x128xf32>
    %18 = arith.mulf %13, %17 : vector<9x128xf32>
    %c0_5 = arith.constant 0 : index
    %c0_6 = arith.constant 0 : index
    %19 = vector.load %arg1[%c0_5, %c0_6] : memref<1x128xf32, #tpu.memory_space<vmem>>, vector<1x128xf32>
    %20 = vector.broadcast %19 : vector<1x128xf32> to vector<9x128xf32>
    %21 = arith.mulf %18, %20 : vector<9x128xf32>
    %c0_7 = arith.constant 0 : index
    %c0_8 = arith.constant 0 : index
    %22 = vector.load %arg2[%c0_7, %c0_8] : memref<1x128xf32, #tpu.memory_space<vmem>>, vector<1x128xf32>
    %23 = vector.broadcast %22 : vector<1x128xf32> to vector<9x128xf32>
    %24 = arith.addf %21, %23 : vector<9x128xf32>
    %25 = arith.truncf %24 : vector<9x128xf32> to vector<9x128xbf16>
    %c0_9 = arith.constant 0 : index
    %c0_10 = arith.constant 0 : index
    %26 = vector.load %arg3[%c0_9, %c0_10] : memref<128x512xbf16, #tpu.memory_space<vmem>>, vector<128x512xbf16>
    %cst_11 = arith.constant dense<0.000000e+00> : vector<9x512xf32>
    %27 = tpu.matmul %25, %26, %cst_11 {dimension_numbers = #tpu.dot_dimension_numbers<[1], [0], [0], [1], [0, 0, 1, 1], [], []>} : vector<9x128xbf16>, vector<128x512xbf16>, vector<9x512xf32> -> vector<9x512xf32>
    %c0_12 = arith.constant 0 : index
    %c0_13 = arith.constant 0 : index
    %28 = vector.load %arg4[%c0_12, %c0_13] : memref<1x512xf32, #tpu.memory_space<vmem>>, vector<1x512xf32>
    %29 = vector.broadcast %28 : vector<1x512xf32> to vector<9x512xf32>
    %30 = arith.addf %27, %29 : vector<9x512xf32>
    %31 = vector.extract_strided_slice %30 {offsets = [0, 0], sizes = [9, 256], strides = [1, 1]} : vector<9x512xf32> to vector<9x256xf32>
    %32 = vector.extract_strided_slice %30 {offsets = [0, 256], sizes = [9, 256], strides = [1, 1]} : vector<9x512xf32> to vector<9x256xf32>
    %33 = arith.negf %32 : vector<9x256xf32>
    %34 = math.exp %33 : vector<9x256xf32>
    %cst_14 = arith.constant 1.000000e+00 : f32
    %35 = vector.broadcast %cst_14 : f32 to vector<9x256xf32>
    %36 = arith.addf %35, %34 : vector<9x256xf32>
    %37 = arith.divf %35, %36 : vector<9x256xf32>
    %38 = arith.mulf %31, %37 : vector<9x256xf32>
    %cst_15 = arith.constant 0.000000e+00 : bf16
    %39 = vector.broadcast %cst_15 : bf16 to vector<24x256xbf16>
    %c0_16 = arith.constant 0 : index
    %c0_17 = arith.constant 0 : index
    %40 = vector.load %arg12[%c0_16, %c0_17] : memref<24x256xbf16, #tpu.memory_space<vmem>>, vector<24x256xbf16>
    tpu.vector_store %arg12[%c0_16, %c0_17], %39 {strides = array<i32>} : memref<24x256xbf16, #tpu.memory_space<vmem>>, vector<24x256xbf16>,
    %41 = arith.truncf %38 : vector<9x256xf32> to vector<9x256xbf16>
    %c8 = arith.constant 8 : index
    %c0_18 = arith.constant 0 : index
    %42 = vector.load %arg12[%c8, %c0_18] : memref<24x256xbf16, #tpu.memory_space<vmem>>, vector<9x256xbf16>
    tpu.vector_store %arg12[%c8, %c0_18], %41 {strides = array<i32>} : memref<24x256xbf16, #tpu.memory_space<vmem>>, vector<9x256xbf16>,
    %cst_19 = arith.constant 0.000000e+00 : f32
    %43 = vector.broadcast %cst_19 : f32 to vector<9x256xf32>
    %c0_20 = arith.constant 0 : index
    %c0_21 = arith.constant 0 : index
    %44 = vector.load %arg6[%c0_20, %c0_21] : memref<1x256xf32, #tpu.memory_space<vmem>>, vector<1x256xf32>
    %45 = vector.broadcast %44 : vector<1x256xf32> to vector<9x256xf32>
    %46 = arith.addf %43, %45 : vector<9x256xf32>
    %c0_22 = arith.constant 0 : index
    %c0_23 = arith.constant 0 : index
    %47 = vector.load %arg12[%c0_22, %c0_23] : memref<24x256xbf16, #tpu.memory_space<vmem>>, vector<9x256xbf16>
    %c0_24 = arith.constant 0 : index
    %c0_25 = arith.constant 0 : index
    %48 = vector.load %arg5[%c0_24, %c0_25] : memref<16x256xf32, #tpu.memory_space<vmem>>, vector<1x256xf32>
    %49 = arith.extf %47 : vector<9x256xbf16> to vector<9x256xf32>
    %50 = vector.broadcast %48 : vector<1x256xf32> to vector<9x256xf32>
    %51 = arith.mulf %49, %50 : vector<9x256xf32>
    %52 = arith.addf %46, %51 : vector<9x256xf32>
    %c1 = arith.constant 1 : index
    %c0_26 = arith.constant 0 : index
    %53 = vector.load %arg12[%c1, %c0_26] : memref<24x256xbf16, #tpu.memory_space<vmem>>, vector<9x256xbf16>
    %c1_27 = arith.constant 1 : index
    %c0_28 = arith.constant 0 : index
    %54 = vector.load %arg5[%c1_27, %c0_28] : memref<16x256xf32, #tpu.memory_space<vmem>>, vector<1x256xf32>
    %55 = arith.extf %53 : vector<9x256xbf16> to vector<9x256xf32>
    %56 = vector.broadcast %54 : vector<1x256xf32> to vector<9x256xf32>
    %57 = arith.mulf %55, %56 : vector<9x256xf32>
    %58 = arith.addf %52, %57 : vector<9x256xf32>
    %c2 = arith.constant 2 : index
    %c0_29 = arith.constant 0 : index
    %59 = vector.load %arg12[%c2, %c0_29] : memref<24x256xbf16, #tpu.memory_space<vmem>>, vector<9x256xbf16>
    %c2_30 = arith.constant 2 : index
    %c0_31 = arith.constant 0 : index
    %60 = vector.load %arg5[%c2_30, %c0_31] : memref<16x256xf32, #tpu.memory_space<vmem>>, vector<1x256xf32>
    %61 = arith.extf %59 : vector<9x256xbf16> to vector<9x256xf32>
    %62 = vector.broadcast %60 : vector<1x256xf32> to vector<9x256xf32>
    %63 = arith.mulf %61, %62 : vector<9x256xf32>
    %64 = arith.addf %58, %63 : vector<9x256xf32>
    %c3 = arith.constant 3 : index
    %c0_32 = arith.constant 0 : index
    %65 = vector.load %arg12[%c3, %c0_32] : memref<24x256xbf16, #tpu.memory_space<vmem>>, vector<9x256xbf16>
    %c3_33 = arith.constant 3 : index
    %c0_34 = arith.constant 0 : index
    %66 = vector.load %arg5[%c3_33, %c0_34] : memref<16x256xf32, #tpu.memory_space<vmem>>, vector<1x256xf32>
    %67 = arith.extf %65 : vector<9x256xbf16> to vector<9x256xf32>
    %68 = vector.broadcast %66 : vector<1x256xf32> to vector<9x256xf32>
    %69 = arith.mulf %67, %68 : vector<9x256xf32>
    %70 = arith.addf %64, %69 : vector<9x256xf32>
    %c4 = arith.constant 4 : index
    %c0_35 = arith.constant 0 : index
    %71 = vector.load %arg12[%c4, %c0_35] : memref<24x256xbf16, #tpu.memory_space<vmem>>, vector<9x256xbf16>
    %c4_36 = arith.constant 4 : index
    %c0_37 = arith.constant 0 : index
    %72 = vector.load %arg5[%c4_36, %c0_37] : memref<16x256xf32, #tpu.memory_space<vmem>>, vector<1x256xf32>
    %73 = arith.extf %71 : vector<9x256xbf16> to vector<9x256xf32>
    %74 = vector.broadcast %72 : vector<1x256xf32> to vector<9x256xf32>
    %75 = arith.mulf %73, %74 : vector<9x256xf32>
    %76 = arith.addf %70, %75 : vector<9x256xf32>
    %c5 = arith.constant 5 : index
    %c0_38 = arith.constant 0 : index
    %77 = vector.load %arg12[%c5, %c0_38] : memref<24x256xbf16, #tpu.memory_space<vmem>>, vector<9x256xbf16>
    %c5_39 = arith.constant 5 : index
    %c0_40 = arith.constant 0 : index
    %78 = vector.load %arg5[%c5_39, %c0_40] : memref<16x256xf32, #tpu.memory_space<vmem>>, vector<1x256xf32>
    %79 = arith.extf %77 : vector<9x256xbf16> to vector<9x256xf32>
    %80 = vector.broadcast %78 : vector<1x256xf32> to vector<9x256xf32>
    %81 = arith.mulf %79, %80 : vector<9x256xf32>
    %82 = arith.addf %76, %81 : vector<9x256xf32>
    %c6 = arith.constant 6 : index
    %c0_41 = arith.constant 0 : index
    %83 = vector.load %arg12[%c6, %c0_41] : memref<24x256xbf16, #tpu.memory_space<vmem>>, vector<9x256xbf16>
    %c6_42 = arith.constant 6 : index
    %c0_43 = arith.constant 0 : index
    %84 = vector.load %arg5[%c6_42, %c0_43] : memref<16x256xf32, #tpu.memory_space<vmem>>, vector<1x256xf32>
    %85 = arith.extf %83 : vector<9x256xbf16> to vector<9x256xf32>
    %86 = vector.broadcast %84 : vector<1x256xf32> to vector<9x256xf32>
    %87 = arith.mulf %85, %86 : vector<9x256xf32>
    %88 = arith.addf %82, %87 : vector<9x256xf32>
    %c7 = arith.constant 7 : index
    %c0_44 = arith.constant 0 : index
    %89 = vector.load %arg12[%c7, %c0_44] : memref<24x256xbf16, #tpu.memory_space<vmem>>, vector<9x256xbf16>
    %c7_45 = arith.constant 7 : index
    %c0_46 = arith.constant 0 : index
    %90 = vector.load %arg5[%c7_45, %c0_46] : memref<16x256xf32, #tpu.memory_space<vmem>>, vector<1x256xf32>
    %91 = arith.extf %89 : vector<9x256xbf16> to vector<9x256xf32>
    %92 = vector.broadcast %90 : vector<1x256xf32> to vector<9x256xf32>
    %93 = arith.mulf %91, %92 : vector<9x256xf32>
    %94 = arith.addf %88, %93 : vector<9x256xf32>
    %c8_47 = arith.constant 8 : index
    %c0_48 = arith.constant 0 : index
    %95 = vector.load %arg12[%c8_47, %c0_48] : memref<24x256xbf16, #tpu.memory_space<vmem>>, vector<9x256xbf16>
    %c8_49 = arith.constant 8 : index
    %c0_50 = arith.constant 0 : index
    %96 = vector.load %arg5[%c8_49, %c0_50] : memref<16x256xf32, #tpu.memory_space<vmem>>, vector<1x256xf32>
    %97 = arith.extf %95 : vector<9x256xbf16> to vector<9x256xf32>
    %98 = vector.broadcast %96 : vector<1x256xf32> to vector<9x256xf32>
    %99 = arith.mulf %97, %98 : vector<9x256xf32>
    %100 = arith.addf %94, %99 : vector<9x256xf32>
    %c9 = arith.constant 9 : index
    %c0_51 = arith.constant 0 : index
    %101 = vector.load %arg12[%c9, %c0_51] : memref<24x256xbf16, #tpu.memory_space<vmem>>, vector<9x256xbf16>
    %c9_52 = arith.constant 9 : index
    %c0_53 = arith.constant 0 : index
    %102 = vector.load %arg5[%c9_52, %c0_53] : memref<16x256xf32, #tpu.memory_space<vmem>>, vector<1x256xf32>
    %103 = arith.extf %101 : vector<9x256xbf16> to vector<9x256xf32>
    %104 = vector.broadcast %102 : vector<1x256xf32> to vector<9x256xf32>
    %105 = arith.mulf %103, %104 : vector<9x256xf32>
    %106 = arith.addf %100, %105 : vector<9x256xf32>
    %c10 = arith.constant 10 : index
    %c0_54 = arith.constant 0 : index
    %107 = vector.load %arg12[%c10, %c0_54] : memref<24x256xbf16, #tpu.memory_space<vmem>>, vector<9x256xbf16>
    %c10_55 = arith.constant 10 : index
    %c0_56 = arith.constant 0 : index
    %108 = vector.load %arg5[%c10_55, %c0_56] : memref<16x256xf32, #tpu.memory_space<vmem>>, vector<1x256xf32>
    %109 = arith.extf %107 : vector<9x256xbf16> to vector<9x256xf32>
    %110 = vector.broadcast %108 : vector<1x256xf32> to vector<9x256xf32>
    %111 = arith.mulf %109, %110 : vector<9x256xf32>
    %112 = arith.addf %106, %111 : vector<9x256xf32>
    %c11 = arith.constant 11 : index
    %c0_57 = arith.constant 0 : index
    %113 = vector.load %arg12[%c11, %c0_57] : memref<24x256xbf16, #tpu.memory_space<vmem>>, vector<9x256xbf16>
    %c11_58 = arith.constant 11 : index
    %c0_59 = arith.constant 0 : index
    %114 = vector.load %arg5[%c11_58, %c0_59] : memref<16x256xf32, #tpu.memory_space<vmem>>, vector<1x256xf32>
    %115 = arith.extf %113 : vector<9x256xbf16> to vector<9x256xf32>
    %116 = vector.broadcast %114 : vector<1x256xf32> to vector<9x256xf32>
    %117 = arith.mulf %115, %116 : vector<9x256xf32>
    %118 = arith.addf %112, %117 : vector<9x256xf32>
    %c12 = arith.constant 12 : index
    %c0_60 = arith.constant 0 : index
    %119 = vector.load %arg12[%c12, %c0_60] : memref<24x256xbf16, #tpu.memory_space<vmem>>, vector<9x256xbf16>
    %c12_61 = arith.constant 12 : index
    %c0_62 = arith.constant 0 : index
    %120 = vector.load %arg5[%c12_61, %c0_62] : memref<16x256xf32, #tpu.memory_space<vmem>>, vector<1x256xf32>
    %121 = arith.extf %119 : vector<9x256xbf16> to vector<9x256xf32>
    %122 = vector.broadcast %120 : vector<1x256xf32> to vector<9x256xf32>
    %123 = arith.mulf %121, %122 : vector<9x256xf32>
    %124 = arith.addf %118, %123 : vector<9x256xf32>
    %c13 = arith.constant 13 : index
    %c0_63 = arith.constant 0 : index
    %125 = vector.load %arg12[%c13, %c0_63] : memref<24x256xbf16, #tpu.memory_space<vmem>>, vector<9x256xbf16>
    %c13_64 = arith.constant 13 : index
    %c0_65 = arith.constant 0 : index
    %126 = vector.load %arg5[%c13_64, %c0_65] : memref<16x256xf32, #tpu.memory_space<vmem>>, vector<1x256xf32>
    %127 = arith.extf %125 : vector<9x256xbf16> to vector<9x256xf32>
    %128 = vector.broadcast %126 : vector<1x256xf32> to vector<9x256xf32>
    %129 = arith.mulf %127, %128 : vector<9x256xf32>
    %130 = arith.addf %124, %129 : vector<9x256xf32>
    %c14 = arith.constant 14 : index
    %c0_66 = arith.constant 0 : index
    %131 = vector.load %arg12[%c14, %c0_66] : memref<24x256xbf16, #tpu.memory_space<vmem>>, vector<9x256xbf16>
    %c14_67 = arith.constant 14 : index
    %c0_68 = arith.constant 0 : index
    %132 = vector.load %arg5[%c14_67, %c0_68] : memref<16x256xf32, #tpu.memory_space<vmem>>, vector<1x256xf32>
    %133 = arith.extf %131 : vector<9x256xbf16> to vector<9x256xf32>
    %134 = vector.broadcast %132 : vector<1x256xf32> to vector<9x256xf32>
    %135 = arith.mulf %133, %134 : vector<9x256xf32>
    %136 = arith.addf %130, %135 : vector<9x256xf32>
    %c15 = arith.constant 15 : index
    %c0_69 = arith.constant 0 : index
    %137 = vector.load %arg12[%c15, %c0_69] : memref<24x256xbf16, #tpu.memory_space<vmem>>, vector<9x256xbf16>
    %c15_70 = arith.constant 15 : index
    %c0_71 = arith.constant 0 : index
    %138 = vector.load %arg5[%c15_70, %c0_71] : memref<16x256xf32, #tpu.memory_space<vmem>>, vector<1x256xf32>
    %139 = arith.extf %137 : vector<9x256xbf16> to vector<9x256xf32>
    %140 = vector.broadcast %138 : vector<1x256xf32> to vector<9x256xf32>
    %141 = arith.mulf %139, %140 : vector<9x256xf32>
    %142 = arith.addf %136, %141 : vector<9x256xf32>
    %cst_72 = arith.constant dense<0.000000e+00> : vector<256xf32>
    %143 = vector.multi_reduction <add>, %142, %cst_72 [0] : vector<9x256xf32> to vector<256xf32>
    %144 = vector.shape_cast %143 : vector<256xf32> to vector<1x256xf32>
    %cst_73 = arith.constant 9.000000e+00 : f32
    %145 = vector.broadcast %cst_73 : f32 to vector<1x256xf32>
    %146 = arith.divf %144, %145 : vector<1x256xf32>
    %147 = vector.broadcast %146 : vector<1x256xf32> to vector<9x256xf32>
    %148 = arith.subf %142, %147 : vector<9x256xf32>
    %149 = arith.mulf %148, %148 : vector<9x256xf32>
    %cst_74 = arith.constant dense<0.000000e+00> : vector<256xf32>
    %150 = vector.multi_reduction <add>, %149, %cst_74 [0] : vector<9x256xf32> to vector<256xf32>
    %151 = vector.shape_cast %150 : vector<256xf32> to vector<1x256xf32>
    %cst_75 = arith.constant 9.000000e+00 : f32
    %152 = vector.broadcast %cst_75 : f32 to vector<1x256xf32>
    %153 = arith.divf %151, %152 : vector<1x256xf32>
    %154 = vector.broadcast %146 : vector<1x256xf32> to vector<9x256xf32>
    %155 = arith.subf %142, %154 : vector<9x256xf32>
    %cst_76 = arith.constant 9.99999974E-6 : f32
    %156 = vector.broadcast %cst_76 : f32 to vector<1x256xf32>
    %157 = arith.addf %153, %156 : vector<1x256xf32>
    %158 = math.rsqrt %157 : vector<1x256xf32>
    %159 = vector.broadcast %158 : vector<1x256xf32> to vector<9x256xf32>
    %160 = arith.mulf %155, %159 : vector<9x256xf32>
    %c0_77 = arith.constant 0 : index
    %c0_78 = arith.constant 0 : index
    %161 = vector.load %arg7[%c0_77, %c0_78] : memref<1x256xf32, #tpu.memory_space<vmem>>, vector<1x256xf32>
    %162 = vector.broadcast %161 : vector<1x256xf32> to vector<9x256xf32>
    %163 = arith.mulf %160, %162 : vector<9x256xf32>
    %c0_79 = arith.constant 0 : index
    %c0_80 = arith.constant 0 : index
    %164 = vector.load %arg8[%c0_79, %c0_80] : memref<1x256xf32, #tpu.memory_space<vmem>>, vector<1x256xf32>
    %165 = vector.broadcast %164 : vector<1x256xf32> to vector<9x256xf32>
    %166 = arith.addf %163, %165 : vector<9x256xf32>
    %167 = arith.negf %166 : vector<9x256xf32>
    %168 = math.exp %167 : vector<9x256xf32>
    %cst_81 = arith.constant 1.000000e+00 : f32
    %169 = vector.broadcast %cst_81 : f32 to vector<9x256xf32>
    %170 = arith.addf %169, %168 : vector<9x256xf32>
    %171 = arith.divf %169, %170 : vector<9x256xf32>
    %172 = arith.mulf %166, %171 : vector<9x256xf32>
    %173 = arith.truncf %172 : vector<9x256xf32> to vector<9x256xbf16>
    %c0_82 = arith.constant 0 : index
    %c0_83 = arith.constant 0 : index
    %174 = vector.load %arg9[%c0_82, %c0_83] : memref<256x128xbf16, #tpu.memory_space<vmem>>, vector<256x128xbf16>
    %cst_84 = arith.constant dense<0.000000e+00> : vector<9x128xf32>
    %175 = tpu.matmul %173, %174, %cst_84 {dimension_numbers = #tpu.dot_dimension_numbers<[1], [0], [0], [1], [0, 0, 1, 1], [], []>} : vector<9x256xbf16>, vector<256x128xbf16>, vector<9x128xf32> -> vector<9x128xf32>
    %c0_85 = arith.constant 0 : index
    %c0_86 = arith.constant 0 : index
    %176 = vector.load %arg10[%c0_85, %c0_86] : memref<1x128xf32, #tpu.memory_space<vmem>>, vector<1x128xf32>
    %177 = vector.broadcast %176 : vector<1x128xf32> to vector<9x128xf32>
    %178 = arith.addf %175, %177 : vector<9x128xf32>
    %179 = arith.addf %0, %178 : vector<9x128xf32>
    %c0_87 = arith.constant 0 : index
    %c0_88 = arith.constant 0 : index
    %180 = vector.load %arg11[%c0_87, %c0_88] : memref<9x128xf32, #tpu.memory_space<vmem>>, vector<9x128xf32>
    tpu.vector_store %arg11[%c0_87, %c0_88], %179 {strides = array<i32>} : memref<9x128xf32, #tpu.memory_space<vmem>>, vector<9x128xf32>,
    return
  }
}

module attributes {stable_mosaic.version = 11 : i64} {
  func.func @_ff_kernel(%arg0: i32, %arg1: memref<9x128xf32, #tpu.memory_space<vmem>>, %arg2: memref<1x128xf32, #tpu.memory_space<vmem>>, %arg3: memref<1x128xf32, #tpu.memory_space<vmem>>, %arg4: memref<128x512xbf16, #tpu.memory_space<vmem>>, %arg5: memref<1x512xf32, #tpu.memory_space<vmem>>, %arg6: memref<512x128xbf16, #tpu.memory_space<vmem>>, %arg7: memref<1x128xf32, #tpu.memory_space<vmem>>, %arg8: memref<1x128xf32, #tpu.memory_space<vmem>>, %arg9: memref<1x128xf32, #tpu.memory_space<vmem>>, %arg10: memref<9x128xf32, #tpu.memory_space<vmem>>) attributes {dimension_semantics = [#tpu.dimension_semantics<parallel>], iteration_bounds = array<i64: 1>, scalar_prefetch = 0 : i64, scratch_operands = 0 : i64, tpu.core_type = #tpu.core_type<tc>, window_params = [{transform_indices = @transform_0, window_bounds = array<i64: 9, 128>}, {pipeline_mode = #tpu.pipeline_mode<synchronous>, transform_indices = @transform_1, window_bounds = array<i64: 1, 128>}, {pipeline_mode = #tpu.pipeline_mode<synchronous>, transform_indices = @transform_2, window_bounds = array<i64: 1, 128>}, {pipeline_mode = #tpu.pipeline_mode<synchronous>, transform_indices = @transform_3, window_bounds = array<i64: 128, 512>}, {pipeline_mode = #tpu.pipeline_mode<synchronous>, transform_indices = @transform_4, window_bounds = array<i64: 1, 512>}, {pipeline_mode = #tpu.pipeline_mode<synchronous>, transform_indices = @transform_5, window_bounds = array<i64: 512, 128>}, {pipeline_mode = #tpu.pipeline_mode<synchronous>, transform_indices = @transform_6, window_bounds = array<i64: 1, 128>}, {pipeline_mode = #tpu.pipeline_mode<synchronous>, transform_indices = @transform_7, window_bounds = array<i64: 1, 128>}, {pipeline_mode = #tpu.pipeline_mode<synchronous>, transform_indices = @transform_8, window_bounds = array<i64: 1, 128>}, {transform_indices = @transform_9, window_bounds = array<i64: 9, 128>}]} {
    %c0 = arith.constant 0 : index
    %c0_0 = arith.constant 0 : index
    %0 = vector.load %arg1[%c0, %c0_0] : memref<9x128xf32, #tpu.memory_space<vmem>>, vector<9x128xf32>
    %cst = arith.constant dense<0.000000e+00> : vector<9xf32>
    %1 = vector.multi_reduction <add>, %0, %cst [1] : vector<9x128xf32> to vector<9xf32>
    %2 = vector.shape_cast %1 : vector<9xf32> to vector<9x1xf32>
    %cst_1 = arith.constant 1.280000e+02 : f32
    %3 = vector.broadcast %cst_1 : f32 to vector<9x1xf32>
    %4 = arith.divf %2, %3 : vector<9x1xf32>
    %5 = vector.broadcast %4 : vector<9x1xf32> to vector<9x128xf32>
    %6 = arith.subf %0, %5 : vector<9x128xf32>
    %7 = arith.mulf %6, %6 : vector<9x128xf32>
    %cst_2 = arith.constant dense<0.000000e+00> : vector<9xf32>
    %8 = vector.multi_reduction <add>, %7, %cst_2 [1] : vector<9x128xf32> to vector<9xf32>
    %9 = vector.shape_cast %8 : vector<9xf32> to vector<9x1xf32>
    %cst_3 = arith.constant 1.280000e+02 : f32
    %10 = vector.broadcast %cst_3 : f32 to vector<9x1xf32>
    %11 = arith.divf %9, %10 : vector<9x1xf32>
    %12 = vector.broadcast %4 : vector<9x1xf32> to vector<9x128xf32>
    %13 = arith.subf %0, %12 : vector<9x128xf32>
    %cst_4 = arith.constant 9.99999974E-6 : f32
    %14 = vector.broadcast %cst_4 : f32 to vector<9x1xf32>
    %15 = arith.addf %11, %14 : vector<9x1xf32>
    %16 = math.rsqrt %15 : vector<9x1xf32>
    %17 = vector.broadcast %16 : vector<9x1xf32> to vector<9x128xf32>
    %18 = arith.mulf %13, %17 : vector<9x128xf32>
    %c0_5 = arith.constant 0 : index
    %c0_6 = arith.constant 0 : index
    %19 = vector.load %arg2[%c0_5, %c0_6] : memref<1x128xf32, #tpu.memory_space<vmem>>, vector<1x128xf32>
    %20 = vector.broadcast %19 : vector<1x128xf32> to vector<9x128xf32>
    %21 = arith.mulf %18, %20 : vector<9x128xf32>
    %c0_7 = arith.constant 0 : index
    %c0_8 = arith.constant 0 : index
    %22 = vector.load %arg3[%c0_7, %c0_8] : memref<1x128xf32, #tpu.memory_space<vmem>>, vector<1x128xf32>
    %23 = vector.broadcast %22 : vector<1x128xf32> to vector<9x128xf32>
    %24 = arith.addf %21, %23 : vector<9x128xf32>
    %25 = arith.truncf %24 : vector<9x128xf32> to vector<9x128xbf16>
    %c0_9 = arith.constant 0 : index
    %c0_10 = arith.constant 0 : index
    %26 = vector.load %arg4[%c0_9, %c0_10] : memref<128x512xbf16, #tpu.memory_space<vmem>>, vector<128x512xbf16>
    %cst_11 = arith.constant dense<0.000000e+00> : vector<9x512xf32>
    %27 = tpu.matmul %25, %26, %cst_11 {dimension_numbers = #tpu.dot_dimension_numbers<[1], [0], [0], [1], [0, 0, 1, 1], [], []>} : vector<9x128xbf16>, vector<128x512xbf16>, vector<9x512xf32> -> vector<9x512xf32>
    %c0_12 = arith.constant 0 : index
    %c0_13 = arith.constant 0 : index
    %28 = vector.load %arg5[%c0_12, %c0_13] : memref<1x512xf32, #tpu.memory_space<vmem>>, vector<1x512xf32>
    %29 = vector.broadcast %28 : vector<1x512xf32> to vector<9x512xf32>
    %30 = arith.addf %27, %29 : vector<9x512xf32>
    %31 = arith.negf %30 : vector<9x512xf32>
    %32 = math.exp %31 : vector<9x512xf32>
    %cst_14 = arith.constant 1.000000e+00 : f32
    %33 = vector.broadcast %cst_14 : f32 to vector<9x512xf32>
    %34 = arith.addf %33, %32 : vector<9x512xf32>
    %35 = arith.divf %33, %34 : vector<9x512xf32>
    %36 = arith.mulf %30, %35 : vector<9x512xf32>
    %37 = arith.truncf %36 : vector<9x512xf32> to vector<9x512xbf16>
    %c0_15 = arith.constant 0 : index
    %c0_16 = arith.constant 0 : index
    %38 = vector.load %arg6[%c0_15, %c0_16] : memref<512x128xbf16, #tpu.memory_space<vmem>>, vector<512x128xbf16>
    %cst_17 = arith.constant dense<0.000000e+00> : vector<9x128xf32>
    %39 = tpu.matmul %37, %38, %cst_17 {dimension_numbers = #tpu.dot_dimension_numbers<[1], [0], [0], [1], [0, 0, 1, 1], [], []>} : vector<9x512xbf16>, vector<512x128xbf16>, vector<9x128xf32> -> vector<9x128xf32>
    %c0_18 = arith.constant 0 : index
    %c0_19 = arith.constant 0 : index
    %40 = vector.load %arg7[%c0_18, %c0_19] : memref<1x128xf32, #tpu.memory_space<vmem>>, vector<1x128xf32>
    %41 = vector.broadcast %40 : vector<1x128xf32> to vector<9x128xf32>
    %42 = arith.addf %39, %41 : vector<9x128xf32>
    %cst_20 = arith.constant 5.000000e-01 : f32
    %43 = vector.broadcast %cst_20 : f32 to vector<9x128xf32>
    %44 = arith.mulf %43, %42 : vector<9x128xf32>
    %45 = arith.addf %0, %44 : vector<9x128xf32>
    %cst_21 = arith.constant dense<0.000000e+00> : vector<9xf32>
    %46 = vector.multi_reduction <add>, %45, %cst_21 [1] : vector<9x128xf32> to vector<9xf32>
    %47 = vector.shape_cast %46 : vector<9xf32> to vector<9x1xf32>
    %cst_22 = arith.constant 1.280000e+02 : f32
    %48 = vector.broadcast %cst_22 : f32 to vector<9x1xf32>
    %49 = arith.divf %47, %48 : vector<9x1xf32>
    %50 = vector.broadcast %49 : vector<9x1xf32> to vector<9x128xf32>
    %51 = arith.subf %45, %50 : vector<9x128xf32>
    %52 = arith.mulf %51, %51 : vector<9x128xf32>
    %cst_23 = arith.constant dense<0.000000e+00> : vector<9xf32>
    %53 = vector.multi_reduction <add>, %52, %cst_23 [1] : vector<9x128xf32> to vector<9xf32>
    %54 = vector.shape_cast %53 : vector<9xf32> to vector<9x1xf32>
    %cst_24 = arith.constant 1.280000e+02 : f32
    %55 = vector.broadcast %cst_24 : f32 to vector<9x1xf32>
    %56 = arith.divf %54, %55 : vector<9x1xf32>
    %57 = vector.broadcast %49 : vector<9x1xf32> to vector<9x128xf32>
    %58 = arith.subf %45, %57 : vector<9x128xf32>
    %cst_25 = arith.constant 9.99999974E-6 : f32
    %59 = vector.broadcast %cst_25 : f32 to vector<9x1xf32>
    %60 = arith.addf %56, %59 : vector<9x1xf32>
    %61 = math.rsqrt %60 : vector<9x1xf32>
    %62 = vector.broadcast %61 : vector<9x1xf32> to vector<9x128xf32>
    %63 = arith.mulf %58, %62 : vector<9x128xf32>
    %c0_26 = arith.constant 0 : index
    %c0_27 = arith.constant 0 : index
    %64 = vector.load %arg8[%c0_26, %c0_27] : memref<1x128xf32, #tpu.memory_space<vmem>>, vector<1x128xf32>
    %65 = vector.broadcast %64 : vector<1x128xf32> to vector<9x128xf32>
    %66 = arith.mulf %63, %65 : vector<9x128xf32>
    %c0_28 = arith.constant 0 : index
    %c0_29 = arith.constant 0 : index
    %67 = vector.load %arg9[%c0_28, %c0_29] : memref<1x128xf32, #tpu.memory_space<vmem>>, vector<1x128xf32>
    %68 = vector.broadcast %67 : vector<1x128xf32> to vector<9x128xf32>
    %69 = arith.addf %66, %68 : vector<9x128xf32>
    %c0_30 = arith.constant 0 : index
    %c0_31 = arith.constant 0 : index
    %70 = vector.load %arg10[%c0_30, %c0_31] : memref<9x128xf32, #tpu.memory_space<vmem>>, vector<9x128xf32>
    tpu.vector_store %arg10[%c0_30, %c0_31], %69 {strides = array<i32>} : memref<9x128xf32, #tpu.memory_space<vmem>>, vector<9x128xf32>,
    return
  }
  func.func @transform_0(%arg0: i32) -> (i32, i32) {
    %c0_i32 = arith.constant 0 : i32
    %c0_i32_0 = arith.constant 0 : i32
    return %arg0, %c0_i32 : i32, i32
  }
  func.func @transform_1(%arg0: i32) -> (i32, i32) {
    %c0_i32 = arith.constant 0 : i32
    %c0_i32_0 = arith.constant 0 : i32
    %c0_i32_1 = arith.constant 0 : i32
    return %c0_i32, %c0_i32_0 : i32, i32
  }
  func.func @transform_2(%arg0: i32) -> (i32, i32) {
    %c0_i32 = arith.constant 0 : i32
    %c0_i32_0 = arith.constant 0 : i32
    %c0_i32_1 = arith.constant 0 : i32
    return %c0_i32, %c0_i32_0 : i32, i32
  }
  func.func @transform_3(%arg0: i32) -> (i32, i32) {
    %c0_i32 = arith.constant 0 : i32
    %c0_i32_0 = arith.constant 0 : i32
    %c0_i32_1 = arith.constant 0 : i32
    return %c0_i32, %c0_i32_0 : i32, i32
  }
  func.func @transform_4(%arg0: i32) -> (i32, i32) {
    %c0_i32 = arith.constant 0 : i32
    %c0_i32_0 = arith.constant 0 : i32
    %c0_i32_1 = arith.constant 0 : i32
    return %c0_i32, %c0_i32_0 : i32, i32
  }
  func.func @transform_5(%arg0: i32) -> (i32, i32) {
    %c0_i32 = arith.constant 0 : i32
    %c0_i32_0 = arith.constant 0 : i32
    %c0_i32_1 = arith.constant 0 : i32
    return %c0_i32, %c0_i32_0 : i32, i32
  }
  func.func @transform_6(%arg0: i32) -> (i32, i32) {
    %c0_i32 = arith.constant 0 : i32
    %c0_i32_0 = arith.constant 0 : i32
    %c0_i32_1 = arith.constant 0 : i32
    return %c0_i32, %c0_i32_0 : i32, i32
  }
  func.func @transform_7(%arg0: i32) -> (i32, i32) {
    %c0_i32 = arith.constant 0 : i32
    %c0_i32_0 = arith.constant 0 : i32
    %c0_i32_1 = arith.constant 0 : i32
    return %c0_i32, %c0_i32_0 : i32, i32
  }
  func.func @transform_8(%arg0: i32) -> (i32, i32) {
    %c0_i32 = arith.constant 0 : i32
    %c0_i32_0 = arith.constant 0 : i32
    %c0_i32_1 = arith.constant 0 : i32
    return %c0_i32, %c0_i32_0 : i32, i32
  }
  func.func @transform_9(%arg0: i32) -> (i32, i32) {
    %c0_i32 = arith.constant 0 : i32
    %c0_i32_0 = arith.constant 0 : i32
    return %arg0, %c0_i32 : i32, i32
  }
}

</mosaic_0001>

<bundles_post_ra>
// kernel: model2_forward_single.13
= control target key start
LH: loop header
LB: loop body
LE: loop exit
PB: predicated region body
PF: predicated region fallthrough
CT: control target
= control target key end

     0   :  { %s222_s0 = inlined_call_operand.hbm [shape: f32[8,128], index: 0, kind: input, shape index: {}]   ;;  %s223_s1 = inlined_call_operand.<no memory space> [shape: f32[1,1], index: 1, kind: input, shape index: {}]   ;;  %s224_s3 = inlined_call_operand.hbm [shape: f32[8,128], index: 3, kind: output, shape index: {}]   ;;  %s225_s2 = inlined_call_operand.<no memory space> [shape: f32[1,1], index: 2, kind: input, shape index: {}]  }
   0x1   :  { %v8_v0 = vstv %s223_s1  ;;  %v10_v1 = vstv %s225_s2 }
   0x2   :  { %9 = vst [vmem:[#allocation2] sm:$0x1] %v8_v0  ;;  %11 = vst [vmem:[#allocation3] sm:$0x1] %v10_v1 }
   0x3   :  { %12 = vsyncpa [#allocation5], 0 }
   0x4   :  { %13 = vsyncpa [#allocation6], 0  ;;  %s169_s16 = smov [#allocation4]   ;;  %s121_s20 = scalar_lea.hbm %s222_s0, 128 }
   0x5   :  { %s20_s17 = sshll.u32 %s169_s16, 4  ;;  %p122_p0 = scmp.ne.s32.totalorder %s222_s0, %s121_s20  ;;  %s21_s17 = int_to_ptr.vmem [resolvable:$true] %s20_s17 }
   0x6   :  { %p125_p1 = scmp.lt.u32.totalorder %s121_s20, %s222_s0 }
   0x8   :  { %p127_p2 = pnand %p125_p1, %p122_p0 }
   0xa   :  { %130 = shalt.err (!%p127_p2)
}
   0xb   :  { %s131_s2 = scalar_lea.vmem %s21_s17, 128  ;;  %p136_p4 = scmp.lt.s32.totalorder %s21_s17, %s21_s17 }
   0xc   :  { %p132_p3 = scmp.ne.s32.totalorder %s21_s17, %s131_s2  ;;  %p137_p5 = scmp.lt.s32.totalorder %s131_s2, %s131_s2 }
   0xe   :  { %p138_p6 = por %p137_p5, %p136_p4 }
  0x10   :  { %p139_p7 = pnand %p138_p6, %p132_p3 }
  0x12   :  { %142 = shalt.err (!%p139_p7)
}
  0x13   :  { %23 = dma.hbm_to_vmem [thread:$0]  %s222_s0, 128, %s21_s17, [#allocation5]  }
  0x14   :  { %165 = dma.done.wait [#allocation5], 128  }
  0x15   :  { %166 = vsyncadd [#allocation5], 4294967168  ;;  %v31_v2 = vld [vmem:[#allocation4] sm:$0xff]  ;;  %v105_v3 = vld [vmem:[#allocation2] ss:$0 sm:$0xff]  ;;  %v170_v4 = vmov 0  }
  0x16   :  { %32 = vadd.xlane.f32.xlu0 %v31_v2  ;;  %115 = vset.pattern.permute.xlu1 %v170_v4  ;;  %v106_v5 = vld [vmem:[#allocation3] ss:$0 sm:$0xff]  ;;  %s171_s27 = smov [#allocation7]  }
  0x17   :  { %116 = vset.pattern.permute.xlu0 %v170_v4  ;;  %67 = vperm.xlu1 %115, %v105_v3   ;;  %s96_s28 = sshll.u32 %s171_s27, 4  ;;  %s97_s28 = int_to_ptr.vmem [resolvable:$true] %s96_s28 }
  0x18   :  { %s143_s29 = scalar_lea.vmem %s97_s28, 128  ;;  %p148_p9 = scmp.lt.s32.totalorder %s97_s28, %s97_s28 }
  0x19   :  { %p144_p8 = scmp.ne.s32.totalorder %s97_s28, %s143_s29  ;;  %p149_p10 = scmp.lt.s32.totalorder %s143_s29, %s143_s29 }
  0x1b   :  { %78 = vperm.xlu1 %115, %v106_v5   ;;  %p150_p11 = por %p149_p10, %p148_p9 }
  0x1d   :  { %p151_p12 = pnand %p150_p11, %p144_p8 }
  0x96   :  { %v68_v27 = vpop.permute.xlu1 %67 }
  0x9a   :  { %v79_v31 = vpop.permute.xlu1 %78 }
  0xa3   :  { %v33_v6 = vpop.xlane.xlu0 %32 }
  0xa4   :  { %v34_v7 = vrot.slane %v33_v6, 4 }
  0xa6   :  { %v35_v8 = vadd.f32 %v34_v7, %v33_v6 }
  0xa8   :  { %v36_v9 = vrot.slane %v35_v8, 2 }
  0xaa   :  { %v37_v10 = vadd.f32 %v36_v9, %v35_v8 }
  0xac   :  { %v38_v11 = vrot.slane %v37_v10, 1 }
  0xae   :  { %v39_v12 = vadd.f32 %v38_v11, %v37_v10 }
  0xb0   :  { %108 = vpush %v39_v12 }
  0xe1   :  { %s109_s0 = spop %108 }
  0xe2   :  { %v41_v13 = vstv %s109_s0 }
  0xe3   :  { %v43_v14 = vmul.f32 0.0009765625, %v41_v13 }
  0xe5   :  { %v44_v15 = vsub.f32 %v31_v2, %v43_v14 }
  0xe7   :  { %v45_v16 = vmul.f32 %v44_v15, %v44_v15 }
  0xe9   :  { %46 = vadd.xlane.f32.xlu0 %v45_v16 }
 0x176   :  { %v47_v17 = vpop.xlane.xlu0 %46 }
 0x177   :  { %v48_v18 = vrot.slane %v47_v17, 4 }
 0x179   :  { %v49_v19 = vadd.f32 %v48_v18, %v47_v17 }
 0x17b   :  { %v50_v20 = vrot.slane %v49_v19, 2 }
 0x17d   :  { %v51_v21 = vadd.f32 %v50_v20, %v49_v19 }
 0x17f   :  { %v52_v22 = vrot.slane %v51_v21, 1 }
 0x181   :  { %v53_v23 = vadd.f32 %v52_v22, %v51_v21 }
 0x183   :  { %110 = vpush %v53_v23 }
 0x1b4   :  { %s111_s26 = spop %110 }
 0x1b5   :  { %v55_v24 = vstv %s111_s26 }
 0x1b6   :  { %v56_v25 = vmul.f32 0.0009765625, %v55_v24 }
 0x1b8   :  { %v57_v26 = vadd.f32 1e-05, %v56_v25 }
 0x1ba   :  { %117 = vrsqrt.f32 %v57_v26 }
 0x1c4   :  { %v118_v28 = vpop.eup %117 }
 0x1c5   :  { %v59_v29 = vmul.f32 %v118_v28, %v44_v15 }
 0x1c7   :  { %v70_v30 = vmul.f32 %v68_v27, %v59_v29 }
 0x1c9   :  { %v81_v32 = vadd.f32 %v79_v31, %v70_v30 }
 0x1cb   :  { %v83_v33 = vmul.f32 1.442695, %v81_v32  ;;  %vm82_vm0 = vcmp.gt.f32.partialorder %v81_v32, 0.0 }
 0x1cd   :  { %119 = vpow2.f32 %v83_v33 }
 0x1d7   :  { %v120_v34 = vpop.eup %119 }
 0x1d8   :  { %v107_v35 = vadd.f32 -1.0, %v120_v34 }
 0x1da   :  { %v86_v36 = vmul.f32 1.6732632, %v107_v35 }
 0x1dc   :  { %v87_v37 = vsel %vm82_vm0, %v81_v32, %v86_v36 }
 0x1dd   :  { %v88_v38 = vmul.f32 1.050701, %v87_v37 }
 0x1df   :  { %89 = vst [vmem:[#allocation7] sm:$0xff] %v88_v38 }
 0x1e0   :  { %154 = shalt.err (!%p151_p12)
}
 0x1e1   :  { %s155_s5 = scalar_lea.hbm %s224_s3, 128 }
 0x1e2   :  { %p156_p13 = scmp.ne.s32.totalorder %s224_s3, %s155_s5  ;;  %p159_p0 = scmp.lt.u32.totalorder %s155_s5, %s224_s3 }
 0x1e4   :  { %p161_p1 = pnand %p159_p0, %p156_p13 }
 0x1e6   :  { %164 = shalt.err (!%p161_p1)
}
 0x1e7   :  { %99 = dma.vmem_to_hbm [thread:$0]  %s97_s28, 128, %s224_s3, [#allocation6]  }
 0x1e8   :  { %167 = dma.done.wait [#allocation6], 128  }
 0x1e9   :  { %168 = vsyncadd [#allocation6], 4294967168 }
 0x1ea   :  { %103 = vsyncpa [#allocation5], 1 }
 0x1eb   :  { %104 = vsyncpa [#allocation6], 1 }

// kernel: model2_forward_single.12
= control target key start
LH: loop header
LB: loop body
LE: loop exit
PB: predicated region body
PF: predicated region fallthrough
CT: control target
= control target key end

     0   :  { %8 = vsyncpa [#allocation3], 0  ;;  %s1156_s0 = inlined_call_operand.hbm [shape: f32[8,1024], index: 0, kind: input, shape index: {}]   ;;  %s1157_s1 = inlined_call_operand.hbm [shape: bf16[1024,128], index: 1, kind: input, shape index: {}]   ;;  %s1158_s2 = inlined_call_operand.hbm [shape: f32[1,128], index: 2, kind: input, shape index: {}]   ;;  %s1159_s3 = inlined_call_operand.hbm [shape: f32[8,128], index: 3, kind: output, shape index: {}]  }
   0x1   :  { %9 = vsyncpa [#allocation6], 0 }
   0x2   :  { %10 = vsyncpa [#allocation4], 0  ;;  %s1082_s12 = smov [#allocation5]   ;;  %s988_s16 = scalar_lea.hbm %s1157_s1, 8192 }
   0x3   :  { %s26_s13 = sshll.u32 %s1082_s12, 4  ;;  %p989_p0 = scmp.ne.s32.totalorder %s1157_s1, %s988_s16  ;;  %s27_s13 = int_to_ptr.vmem [resolvable:$true] %s26_s13 }
   0x4   :  { %p992_p1 = scmp.lt.u32.totalorder %s988_s16, %s1157_s1 }
   0x6   :  { %p994_p2 = pnand %p992_p1, %p989_p0 }
   0x8   :  { %997 = shalt.err (!%p994_p2)
}
   0x9   :  { %s998_s21 = scalar_lea.vmem %s27_s13, 8192  ;;  %p1003_p4 = scmp.lt.s32.totalorder %s27_s13, %s27_s13 }
   0xa   :  { %p999_p3 = scmp.ne.s32.totalorder %s27_s13, %s998_s21  ;;  %p1004_p5 = scmp.lt.s32.totalorder %s998_s21, %s998_s21 }
   0xc   :  { %p1005_p6 = por %p1004_p5, %p1003_p4 }
   0xe   :  { %p1006_p7 = pnand %p1005_p6, %p999_p3 }
  0x10   :  { %1009 = shalt.err (!%p1006_p7)
}
  0x11   :  { %s1083_s22 = smov 64   ;;  %s1084_s23 = smov 4  }
  0x12   :  { %32 = dma.hbm_to_vmem [thread:$0]  %s1157_s1, 8192, %s27_s13, [#allocation6], %s1083_s22, %s1083_s22, %s1084_s23  }
  0x13   :  { %s1085_s26 = smov [#allocation2]   ;;  %s1086_s28 = smov [#allocation7]  }
  0x14   :  { %s17_s27 = sshll.u32 %s1085_s26, 4  ;;  %s39_s29 = sshll.u32 %s1086_s28, 4  ;;  %s18_s27 = int_to_ptr.vmem [resolvable:$true] %s17_s27  ;;  %s40_s29 = int_to_ptr.vmem [resolvable:$true] %s39_s29 }
  0x15   :  { %s1010_s5 = scalar_lea.hbm %s1156_s0, 1024 }
  0x16   :  { %p1011_p8 = scmp.ne.s32.totalorder %s1156_s0, %s1010_s5  ;;  %p1014_p9 = scmp.lt.u32.totalorder %s1010_s5, %s1156_s0 }
  0x18   :  { %p1016_p10 = pnand %p1014_p9, %p1011_p8 }
  0x1a   :  { %1019 = shalt.err (!%p1016_p10)
}
  0x1b   :  { %s1020_s1 = scalar_lea.vmem %s18_s27, 1024  ;;  %p1025_p12 = scmp.lt.s32.totalorder %s18_s27, %s18_s27 }
  0x1c   :  { %p1021_p11 = scmp.ne.s32.totalorder %s18_s27, %s1020_s1  ;;  %p1026_p13 = scmp.lt.s32.totalorder %s1020_s1, %s1020_s1 }
  0x1e   :  { %p1027_p0 = por %p1026_p13, %p1025_p12 }
  0x20   :  { %p1028_p1 = pnand %p1027_p0, %p1021_p11 }
  0x22   :  { %1031 = shalt.err (!%p1028_p1)
}
  0x23   :  { %20 = dma.hbm_to_vmem [thread:$0]  %s1156_s0, 1024, %s18_s27, [#allocation3]  }
  0x24   :  { %s1032_s14 = scalar_lea.hbm %s1158_s2, 16 }
  0x25   :  { %p1033_p2 = scmp.ne.s32.totalorder %s1158_s2, %s1032_s14  ;;  %p1036_p3 = scmp.lt.u32.totalorder %s1032_s14, %s1158_s2 }
  0x27   :  { %p1038_p4 = pnand %p1036_p3, %p1033_p2 }
  0x29   :  { %1041 = shalt.err (!%p1038_p4)
}
  0x2a   :  { %s1042_s19 = scalar_lea.vmem %s40_s29, 16  ;;  %s1046_s20 = scalar_lea.vmem %s40_s29, 32 }
  0x2b   :  { %p1043_p5 = scmp.ne.s32.totalorder %s40_s29, %s1042_s19  ;;  %p1047_p6 = scmp.lt.s32.totalorder %s40_s29, %s40_s29 }
  0x2c   :  { %p1048_p7 = scmp.lt.s32.totalorder %s1046_s20, %s1042_s19 }
  0x2e   :  { %p1049_p8 = por %p1048_p7, %p1047_p6 }
  0x30   :  { %p1050_p9 = pnand %p1049_p8, %p1043_p5 }
  0x32   :  { %1053 = shalt.err (!%p1050_p9)
}
  0x33   :  { %42 = dma.hbm_to_vmem [thread:$0]  %s1158_s2, 16, %s40_s29, [#allocation6]  }
  0x34   :  { %1076 = dma.done.wait [#allocation3], 1024  }
  0x35   :  { %1077 = vsyncadd [#allocation3], 4294966272 }
  0x36   :  { %1078 = dma.done.wait [#allocation6], 8208  }
  0x37   :  { %1079 = vsyncadd [#allocation6], 4294959088  ;;  %v924_v0 = vld [vmem:[#allocation5 + $0x40] sm:$0xff]   ;;  %v928_v4 = vld [vmem:[#allocation5 + $0x48] sm:$0xff]   ;;  %s1087_s2 = smov [#allocation8]  }
  0x38   :  { %v925_v1 = vld [vmem:[#allocation5 + $0xc0] sm:$0xff]   ;;  %830 = vmatprep.subr.bf16.mxu0 %v924_v0  ;;  %v929_v5 = vld [vmem:[#allocation5 + $0xc8] sm:$0xff]   ;;  %v932_v8 = vld [vmem:[#allocation5 + $0x50] sm:$0xff]   ;;  %s755_s22 = sshll.u32 %s1087_s2, 4  ;;  %s756_s22 = int_to_ptr.vmem [resolvable:$true] %s755_s22 }
  0x39   :  { %v926_v2 = vld [vmem:[#allocation5] sm:$0xff]   ;;  %852 = vmatprep.subr.bf16.mxu1 %v925_v1  ;;  %v930_v6 = vld [vmem:[#allocation5 + $0x8] sm:$0xff]   ;;  %v933_v9 = vld [vmem:[#allocation5 + $0xd0] sm:$0xff]   ;;  %s1054_s23 = scalar_lea.vmem %s756_s22, 128  ;;  %p1059_p11 = scmp.lt.s32.totalorder %s756_s22, %s756_s22 }
  0x3a   :  { %v927_v3 = vld [vmem:[#allocation5 + $0x80] sm:$0xff]   ;;  %831 = vmatpush3.bf16.msra.mxu0 %v926_v2  ;;  %v931_v7 = vld [vmem:[#allocation5 + $0x88] sm:$0xff]   ;;  %v934_v10 = vld [vmem:[#allocation5 + $0x10] sm:$0xff]   ;;  %p1055_p10 = scmp.ne.s32.totalorder %s756_s22, %s1054_s23  ;;  %p1060_p12 = scmp.lt.s32.totalorder %s1054_s23, %s1054_s23 }
  0x3b   :  { %853 = vmatpush3.bf16.msra.mxu1 %v927_v3  ;;  %832 = vmatprep.subr.bf16.mxu0 %v928_v4  ;;  %v935_v11 = vld [vmem:[#allocation5 + $0x90] sm:$0xff]   ;;  %v936_v12 = vld [vmem:[#allocation5 + $0x58] sm:$0xff]   ;;  %v940_v16 = vld [vmem:[#allocation5 + $0x60] sm:$0xff]  }
  0x3c   :  { %854 = vmatprep.subr.bf16.mxu1 %v929_v5  ;;  %v937_v13 = vld [vmem:[#allocation5 + $0xd8] sm:$0xff]   ;;  %v941_v17 = vld [vmem:[#allocation5 + $0xe0] sm:$0xff]   ;;  %v944_v20 = vld [vmem:[#allocation5 + $0x68] sm:$0xff]   ;;  %p1061_p13 = por %p1060_p12, %p1059_p11 }
  0x3d   :  { %v938_v14 = vld [vmem:[#allocation5 + $0x18] sm:$0xff]   ;;  %v942_v18 = vld [vmem:[#allocation5 + $0x20] sm:$0xff]   ;;  %v945_v21 = vld [vmem:[#allocation5 + $0xe8] sm:$0xff]  }
  0x3e   :  { %833 = vmatpush3.bf16.msra.mxu0 %v930_v6  ;;  %v939_v15 = vld [vmem:[#allocation5 + $0x98] sm:$0xff]   ;;  %v943_v19 = vld [vmem:[#allocation5 + $0xa0] sm:$0xff]   ;;  %v946_v22 = vld [vmem:[#allocation5 + $0x28] sm:$0xff]   ;;  %p1062_p0 = pnand %p1061_p13, %p1055_p10 }
  0x3f   :  { %855 = vmatpush3.bf16.msra.mxu1 %v931_v7  ;;  %834 = vmatprep.subr.bf16.mxu0 %v932_v8  ;;  %v947_v23 = vld [vmem:[#allocation5 + $0xa8] sm:$0xff]   ;;  %v948_v24 = vld [vmem:[#allocation5 + $0x70] sm:$0xff]   ;;  %v952_v28 = vld [vmem:[#allocation5 + $0x78] sm:$0xff]  }
  0x40   :  { %856 = vmatprep.subr.bf16.mxu1 %v933_v9  ;;  %v949_v25 = vld [vmem:[#allocation5 + $0xf0] sm:$0xff]   ;;  %v953_v29 = vld [vmem:[#allocation5 + $0xf8] sm:$0xff]   ;;  %v54_v32 = vld [vmem:[#allocation2 + $0x8] sm:$0xff] }
  0x41   :  { %v950_v26 = vld [vmem:[#allocation5 + $0x30] sm:$0xff]   ;;  %v954_v30 = vld [vmem:[#allocation5 + $0x38] sm:$0xff]   ;;  %v53_v34 = vld [vmem:[#allocation2] sm:$0xff]  ;;  %v62_v35 = vpack.c.bf16 %v54_v32, %v54_v32 }
  0x42   :  { %835 = vmatpush3.bf16.msra.mxu0 %v934_v10  ;;  %v951_v27 = vld [vmem:[#allocation5 + $0xb0] sm:$0xff]   ;;  %v955_v31 = vld [vmem:[#allocation5 + $0xb8] sm:$0xff]   ;;  %v61_v37 = vpack.c.bf16 %v53_v34, %v53_v34  ;;  %v956_v40 = vld [vmem:[#allocation5 + $0x140] sm:$0xff]  }
  0x43   :  { %857 = vmatpush3.bf16.msra.mxu1 %v935_v11  ;;  %836 = vmatprep.subr.bf16.mxu0 %v936_v12  ;;  %v56_v33 = vld [vmem:[#allocation2 + $0x18] sm:$0xff]  ;;  %v55_v38 = vld [vmem:[#allocation2 + $0x10] sm:$0xff]  ;;  %v957_v41 = vld [vmem:[#allocation5 + $0x1c0] sm:$0xff]  }
  0x44   :  { %858 = vmatprep.subr.bf16.mxu1 %v937_v13  ;;  %v64_v36 = vpack.c.bf16 %v56_v33, %v56_v33  ;;  %v63_v39 = vpack.c.bf16 %v55_v38, %v55_v38  ;;  %620 = vmatprep.mubr.bf16.mxu0 %v62_v35  ;;  %v958_v42 = vld [vmem:[#allocation5 + $0x100] sm:$0xff]   ;;  %v960_v44 = vld [vmem:[#allocation5 + $0x148] sm:$0xff]   ;;  %v964_v48 = vld [vmem:[#allocation5 + $0x150] sm:$0xff]  }
  0x45   :  { %v959_v43 = vld [vmem:[#allocation5 + $0x180] sm:$0xff]   ;;  %v961_v45 = vld [vmem:[#allocation5 + $0x1c8] sm:$0xff]   ;;  %v965_v49 = vld [vmem:[#allocation5 + $0x1d0] sm:$0xff]  }
  0x46   :  { %837 = vmatpush3.bf16.msra.mxu0 %v938_v14  ;;  %660 = vmatprep.mubr.bf16.mxu1 %v64_v36  ;;  %v962_v46 = vld [vmem:[#allocation5 + $0x108] sm:$0xff]   ;;  %v966_v50 = vld [vmem:[#allocation5 + $0x110] sm:$0xff]   ;;  %v968_v52 = vld [vmem:[#allocation5 + $0x158] sm:$0xff]  }
  0x47   :  { %859 = vmatpush3.bf16.msra.mxu1 %v939_v15  ;;  %838 = vmatprep.subr.bf16.mxu0 %v940_v16  ;;  %v963_v47 = vld [vmem:[#allocation5 + $0x188] sm:$0xff]   ;;  %v967_v51 = vld [vmem:[#allocation5 + $0x190] sm:$0xff]   ;;  %v969_v53 = vld [vmem:[#allocation5 + $0x1d8] sm:$0xff]  }
  0x48   :  { %860 = vmatprep.subr.bf16.mxu1 %v941_v17  ;;  %v970_v54 = vld [vmem:[#allocation5 + $0x118] sm:$0xff]   ;;  %v972_v56 = vld [vmem:[#allocation5 + $0x160] sm:$0xff]   ;;  %v976_v60 = vld [vmem:[#allocation5 + $0x168] sm:$0xff]  }
  0x49   :  { %v971_v55 = vld [vmem:[#allocation5 + $0x198] sm:$0xff]   ;;  %v973_v57 = vld [vmem:[#allocation5 + $0x1e0] sm:$0xff]   ;;  %v977_v61 = vld [vmem:[#allocation5 + $0x1e8] sm:$0xff]  }
  0x4a   :  { %839 = vmatpush3.bf16.msra.mxu0 %v942_v18  ;;  %v974_v58 = vld [vmem:[#allocation5 + $0x120] sm:$0xff]   ;;  %v978_v62 = vld [vmem:[#allocation5 + $0x128] sm:$0xff]   ;;  %v980_v0 = vld [vmem:[#allocation5 + $0x170] sm:$0xff]  }
  0x4b   :  { %861 = vmatpush3.bf16.msra.mxu1 %v943_v19  ;;  %840 = vmatprep.subr.bf16.mxu0 %v944_v20  ;;  %v975_v59 = vld [vmem:[#allocation5 + $0x1a0] sm:$0xff]   ;;  %v979_v63 = vld [vmem:[#allocation5 + $0x1a8] sm:$0xff]   ;;  %v981_v1 = vld [vmem:[#allocation5 + $0x1f0] sm:$0xff]  }
  0x4c   :  { %862 = vmatprep.subr.bf16.mxu1 %v945_v21  ;;  %v982_v2 = vld [vmem:[#allocation5 + $0x130] sm:$0xff]   ;;  %v984_v4 = vld [vmem:[#allocation5 + $0x178] sm:$0xff]   ;;  %v58_v8 = vld [vmem:[#allocation2 + $0x28] sm:$0xff] }
  0x4d   :  { %v983_v3 = vld [vmem:[#allocation5 + $0x1b0] sm:$0xff]   ;;  %v985_v5 = vld [vmem:[#allocation5 + $0x1f8] sm:$0xff]   ;;  %v66_v10 = vpack.c.bf16 %v58_v8, %v58_v8  ;;  %v57_v12 = vld [vmem:[#allocation2 + $0x20] sm:$0xff] }
  0x4e   :  { %841 = vmatpush3.bf16.msra.mxu0 %v946_v22  ;;  %v986_v6 = vld [vmem:[#allocation5 + $0x138] sm:$0xff]   ;;  %v59_v13 = vld [vmem:[#allocation2 + $0x30] sm:$0xff]  ;;  %v65_v14 = vpack.c.bf16 %v57_v12, %v57_v12  ;;  %v765_v18 = vld [vmem:[#allocation7] ss:$0 sm:$0xff] }
  0x4f   :  { %863 = vmatpush3.bf16.msra.mxu1 %v947_v23  ;;  %842 = vmatprep.subr.bf16.mxu0 %v948_v24  ;;  %v987_v7 = vld [vmem:[#allocation5 + $0x1b8] sm:$0xff]   ;;  %v67_v15 = vpack.c.bf16 %v59_v13, %v59_v13 }
  0x50   :  { %864 = vmatprep.subr.bf16.mxu1 %v949_v25  ;;  %v60_v9 = vld [vmem:[#allocation2 + $0x38] sm:$0xff] }
  0x51   :  { %v68_v11 = vpack.c.bf16 %v60_v9, %v60_v9 }
  0x52   :  { %843 = vmatpush3.bf16.msra.mxu0 %v950_v26 }
  0x53   :  { %865 = vmatpush3.bf16.msra.mxu1 %v951_v27  ;;  %844 = vmatprep.subr.bf16.mxu0 %v952_v28 }
  0x54   :  { %866 = vmatprep.subr.bf16.mxu1 %v953_v29 }
  0x56   :  { %845 = vmatpush3.bf16.msra.mxu0 %v954_v30 }
  0x57   :  { %867 = vmatpush3.bf16.msra.mxu1 %v955_v31  ;;  %874 = vmatprep.subr.bf16.mxu0 %v956_v40 }
  0x58   :  { %896 = vmatprep.subr.bf16.mxu1 %v957_v41 }
  0x59   :  { %621 = vmatmul.mubr.bf16.vlgmr.msra.gmra.mrb[0].mxu0 %v61_v37 }
  0x5a   :  { %661 = vmatmul.mubr.bf16.vlgmr.msra.gmra.mrb[0].mxu1 %v63_v39  ;;  %875 = vmatpush3.bf16.msra.mxu0 %v958_v42 }
  0x5b   :  { %897 = vmatpush3.bf16.msra.mxu1 %v959_v43  ;;  %876 = vmatprep.subr.bf16.mxu0 %v960_v44 }
  0x5c   :  { %898 = vmatprep.subr.bf16.mxu1 %v961_v45  ;;  %700 = vmatprep.mubr.bf16.mxu0 %v66_v10 }
  0x5d   :  { %740 = vmatprep.mubr.bf16.mxu1 %v68_v11 }
  0x5e   :  { %877 = vmatpush3.bf16.msra.mxu0 %v962_v46 }
  0x5f   :  { %899 = vmatpush3.bf16.msra.mxu1 %v963_v47  ;;  %878 = vmatprep.subr.bf16.mxu0 %v964_v48 }
  0x60   :  { %900 = vmatprep.subr.bf16.mxu1 %v965_v49 }
  0x62   :  { %879 = vmatpush3.bf16.msra.mxu0 %v966_v50 }
  0x63   :  { %901 = vmatpush3.bf16.msra.mxu1 %v967_v51  ;;  %880 = vmatprep.subr.bf16.mxu0 %v968_v52 }
  0x64   :  { %902 = vmatprep.subr.bf16.mxu1 %v969_v53 }
  0x66   :  { %881 = vmatpush3.bf16.msra.mxu0 %v970_v54 }
  0x67   :  { %903 = vmatpush3.bf16.msra.mxu1 %v971_v55  ;;  %882 = vmatprep.subr.bf16.mxu0 %v972_v56 }
  0x68   :  { %904 = vmatprep.subr.bf16.mxu1 %v973_v57 }
  0x6a   :  { %883 = vmatpush3.bf16.msra.mxu0 %v974_v58 }
  0x6b   :  { %905 = vmatpush3.bf16.msra.mxu1 %v975_v59  ;;  %884 = vmatprep.subr.bf16.mxu0 %v976_v60 }
  0x6c   :  { %906 = vmatprep.subr.bf16.mxu1 %v977_v61 }
  0x6e   :  { %885 = vmatpush3.bf16.msra.mxu0 %v978_v62 }
  0x6f   :  { %907 = vmatpush3.bf16.msra.mxu1 %v979_v63  ;;  %886 = vmatprep.subr.bf16.mxu0 %v980_v0 }
  0x70   :  { %908 = vmatprep.subr.bf16.mxu1 %v981_v1 }
  0x72   :  { %887 = vmatpush3.bf16.msra.mxu0 %v982_v2 }
  0x73   :  { %909 = vmatpush3.bf16.msra.mxu1 %v983_v3  ;;  %888 = vmatprep.subr.bf16.mxu0 %v984_v4 }
  0x74   :  { %910 = vmatprep.subr.bf16.mxu1 %v985_v5 }
  0x76   :  { %889 = vmatpush3.bf16.msra.mxu0 %v986_v6 }
  0x77   :  { %911 = vmatpush3.bf16.msra.mxu1 %v987_v7 }
  0x79   :  { %701 = vmatmul.mubr.bf16.vlgmr.msra.gmra.mrb[4].mxu0 %v65_v14 }
  0x7a   :  { %741 = vmatmul.mubr.bf16.vlgmr.msra.gmra.mrb[4].mxu1 %v67_v15 }
 0x12c   :  { %v846_v16 = vpop.f32.mrb[0].mxu0 }
 0x12d   :  { %v868_v17 = vpop.f32.mrb[0].mxu1  ;;  %v847_v19 = vpop.f32.mrb[1].mxu0 }
 0x12e   :  { %v869_v20 = vpop.f32.mrb[1].mxu1  ;;  %v848_v21 = vadd.f32 %v847_v19, %v846_v16  ;;  %v849_v23 = vpop.f32.mrb[2].mxu0 }
 0x12f   :  { %v870_v22 = vadd.f32 %v869_v20, %v868_v17  ;;  %v871_v24 = vpop.f32.mrb[2].mxu1  ;;  %v850_v25 = vpop.f32.mrb[3].mxu0 }
 0x130   :  { %v872_v26 = vpop.f32.mrb[3].mxu1  ;;  %v623_v27 = vadd.f32 %v848_v21, %v765_v18 }
 0x132   :  { %v663_v28 = vadd.f32 %v870_v22, %v623_v27 }
 0x14c   :  { %v890_v29 = vpop.f32.mrb[4].mxu0 }
 0x14d   :  { %v912_v30 = vpop.f32.mrb[4].mxu1  ;;  %v891_v31 = vpop.f32.mrb[5].mxu0 }
 0x14e   :  { %v892_v32 = vadd.f32 %v891_v31, %v890_v29  ;;  %v913_v33 = vpop.f32.mrb[5].mxu1  ;;  %v893_v34 = vpop.f32.mrb[6].mxu0 }
 0x14f   :  { %v914_v35 = vadd.f32 %v913_v33, %v912_v30  ;;  %v915_v36 = vpop.f32.mrb[6].mxu1  ;;  %v894_v37 = vpop.f32.mrb[7].mxu0 }
 0x150   :  { %v703_v38 = vadd.f32 %v892_v32, %v663_v28  ;;  %v916_v39 = vpop.f32.mrb[7].mxu1 }
 0x152   :  { %v743_v40 = vadd.f32 %v914_v35, %v703_v38 }
 0x154   :  { %748 = vst [vmem:[#allocation8] sm:$0xff] %v743_v40 }
 0x155   :  { %1065 = shalt.err (!%p1062_p0)
}
 0x156   :  { %s1066_s26 = scalar_lea.hbm %s1159_s3, 128 }
 0x157   :  { %p1067_p1 = scmp.ne.s32.totalorder %s1159_s3, %s1066_s26  ;;  %p1070_p2 = scmp.lt.u32.totalorder %s1066_s26, %s1159_s3 }
 0x159   :  { %p1072_p3 = pnand %p1070_p2, %p1067_p1 }
 0x15b   :  { %1075 = shalt.err (!%p1072_p3)
}
 0x15c   :  { %758 = dma.vmem_to_hbm [thread:$0]  %s756_s22, 128, %s1159_s3, [#allocation4]  }
 0x15d   :  { %1080 = dma.done.wait [#allocation4], 128  }
 0x15e   :  { %1081 = vsyncadd [#allocation4], 4294967168 }
 0x15f   :  { %762 = vsyncpa [#allocation3], 1 }
 0x160   :  { %763 = vsyncpa [#allocation6], 1 }
 0x161   :  { %764 = vsyncpa [#allocation4], 1 }

// kernel: model2_forward_single.15
= control target key start
LH: loop header
LB: loop body
LE: loop exit
PB: predicated region body
PF: predicated region fallthrough
CT: control target
= control target key end

     0   :  { %12 = vsyncpa [#allocation3], 0  ;;  %s941_s0 = inlined_call_operand.hbm [shape: f32[9,128], index: 0, kind: input, shape index: {}]   ;;  %s942_s1 = inlined_call_operand.hbm [shape: f32[1,128], index: 1, kind: input, shape index: {}]   ;;  %s943_s2 = inlined_call_operand.hbm [shape: f32[1,128], index: 2, kind: input, shape index: {}]   ;;  %s944_s3 = inlined_call_operand.hbm [shape: bf16[128,384], index: 3, kind: input, shape index: {}]   ;;  %s945_s4 = inlined_call_operand.hbm [shape: bf16[9,128], index: 4, kind: output, shape index: {0}]   ;;  %s946_s5 = inlined_call_operand.hbm [shape: bf16[9,128], index: 5, kind: output, shape index: {1}]   ;;  %s947_s6 = inlined_call_operand.hbm [shape: bf16[9,128], index: 6, kind: output, shape index: {2}]  }
   0x1   :  { %13 = vsyncpa [#allocation6], 0 }
   0x2   :  { %14 = vsyncpa [#allocation9], 0 }
   0x3   :  { %15 = vsyncpa [#allocation4], 0 }
   0x4   :  { %16 = vsyncpa [#allocation12], 0  ;;  %s737_s21 = smov [#allocation5]   ;;  %s738_s23 = smov [#allocation2]  }
   0x5   :  { %s35_s22 = sshll.u32 %s737_s21, 4  ;;  %s22_s24 = sshll.u32 %s738_s23, 4  ;;  %s36_s22 = int_to_ptr.vmem [resolvable:$true] %s35_s22  ;;  %s788_s24 = int_to_ptr.vmem [resolvable:$true] %s22_s24 }
   0x6   :  { %s573_s27 = scalar_lea.hbm %s942_s1, 16 }
   0x7   :  { %p574_p0 = scmp.ne.s32.totalorder %s942_s1, %s573_s27  ;;  %p577_p1 = scmp.lt.u32.totalorder %s573_s27, %s942_s1 }
   0x9   :  { %p579_p2 = pnand %p577_p1, %p574_p0 }
   0xb   :  { %582 = shalt.err (!%p579_p2)
}
   0xc   :  { %s583_s8 = scalar_lea.vmem %s36_s22, 16  ;;  %s587_s9 = scalar_lea.vmem %s36_s22, 32 }
   0xd   :  { %p584_p3 = scmp.ne.s32.totalorder %s36_s22, %s583_s8  ;;  %p588_p4 = scmp.lt.s32.totalorder %s36_s22, %s36_s22 }
   0xe   :  { %p589_p5 = scmp.lt.s32.totalorder %s587_s9, %s583_s8 }
  0x10   :  { %p590_p6 = por %p589_p5, %p588_p4 }
  0x12   :  { %p591_p7 = pnand %p590_p6, %p584_p3 }
  0x14   :  { %594 = shalt.err (!%p591_p7)
}
  0x15   :  { %38 = dma.hbm_to_vmem [thread:$0]  %s942_s1, 16, %s36_s22, [#allocation6]  }
  0x16   :  { %s595_s14 = scalar_lea.hbm %s941_s0, 256 }
  0x17   :  { %p596_p8 = scmp.ne.s32.totalorder %s941_s0, %s595_s14  ;;  %p599_p9 = scmp.lt.u32.totalorder %s595_s14, %s941_s0 }
  0x19   :  { %p601_p10 = pnand %p599_p9, %p596_p8 }
  0x1b   :  { %604 = shalt.err (!%p601_p10)
}
  0x1c   :  { %s605_s19 = scalar_lea.vmem %s788_s24, 256  ;;  %p610_p12 = scmp.lt.s32.totalorder %s788_s24, %s788_s24 }
  0x1d   :  { %p606_p11 = scmp.ne.s32.totalorder %s788_s24, %s605_s19  ;;  %p611_p13 = scmp.lt.s32.totalorder %s605_s19, %s605_s19 }
  0x1f   :  { %p612_p0 = por %p611_p13, %p610_p12 }
  0x21   :  { %p613_p1 = pnand %p612_p0, %p606_p11 }
  0x23   :  { %616 = shalt.err (!%p613_p1)
}
  0x24   :  { %s739_s1 = smov 128   ;;  %s740_s20 = smov 8  }
  0x25   :  { %28 = dma.hbm_to_vmem [thread:$0]  %s941_s0, 256, %s788_s24, [#allocation3], %s739_s1, %s739_s1, %s740_s20  }
  0x26   :  { %s741_s23 = smov [#allocation7]   ;;  %s742_s26 = smov [#allocation8]  }
  0x27   :  { %s45_s25 = sshll.u32 %s741_s23, 4  ;;  %s54_s27 = sshll.u32 %s742_s26, 4  ;;  %s46_s25 = int_to_ptr.vmem [resolvable:$true] %s45_s25  ;;  %s819_s27 = int_to_ptr.vmem [resolvable:$true] %s54_s27 }
  0x28   :  { %s617_s30 = scalar_lea.hbm %s943_s2, 16 }
  0x29   :  { %p618_p2 = scmp.ne.s32.totalorder %s943_s2, %s617_s30  ;;  %p621_p3 = scmp.lt.u32.totalorder %s617_s30, %s943_s2 }
  0x2b   :  { %p623_p4 = pnand %p621_p3, %p618_p2 }
  0x2d   :  { %626 = shalt.err (!%p623_p4)
}
  0x2e   :  { %s627_s0 = scalar_lea.vmem %s46_s25, 16  ;;  %s631_s24 = scalar_lea.vmem %s46_s25, 32 }
  0x2f   :  { %p628_p5 = scmp.ne.s32.totalorder %s46_s25, %s627_s0  ;;  %p632_p6 = scmp.lt.s32.totalorder %s46_s25, %s46_s25 }
  0x30   :  { %p633_p7 = scmp.lt.s32.totalorder %s631_s24, %s627_s0 }
  0x32   :  { %p634_p8 = por %p633_p7, %p632_p6 }
  0x34   :  { %p635_p9 = pnand %p634_p8, %p628_p5 }
  0x36   :  { %638 = shalt.err (!%p635_p9)
}
  0x37   :  { %48 = dma.hbm_to_vmem [thread:$0]  %s943_s2, 16, %s46_s25, [#allocation6]  }
  0x38   :  { %s639_s15 = scalar_lea.hbm %s944_s3, 3072 }
  0x39   :  { %p640_p10 = scmp.ne.s32.totalorder %s944_s3, %s639_s15  ;;  %p643_p11 = scmp.lt.u32.totalorder %s639_s15, %s944_s3 }
  0x3b   :  { %p645_p12 = pnand %p643_p11, %p640_p10 }
  0x3d   :  { %648 = shalt.err (!%p645_p12)
}
  0x3e   :  { %s649_s1 = scalar_lea.vmem %s819_s27, 3072  ;;  %p654_p0 = scmp.lt.s32.totalorder %s819_s27, %s819_s27 }
  0x3f   :  { %p650_p13 = scmp.ne.s32.totalorder %s819_s27, %s649_s1  ;;  %p655_p1 = scmp.lt.s32.totalorder %s649_s1, %s649_s1 }
  0x41   :  { %p656_p2 = por %p655_p1, %p654_p0 }
  0x43   :  { %p657_p3 = pnand %p656_p2, %p650_p13 }
  0x45   :  { %660 = shalt.err (!%p657_p3)
}
  0x46   :  { %s743_s2 = smov 192   ;;  %s744_s20 = smov 12  }
  0x47   :  { %60 = dma.hbm_to_vmem [thread:$0]  %s944_s3, 3072, %s819_s27, [#allocation9], %s743_s2, %s743_s2, %s744_s20  }
  0x48   :  { %727 = dma.done.wait [#allocation3], 256  }
  0x49   :  { %728 = vsyncadd [#allocation3], 4294967040 }
  0x4a   :  { %729 = dma.done.wait [#allocation6], 32  }
  0x4b   :  { %730 = vsyncadd [#allocation6], 4294967264 }
  0x4c   :  { %731 = dma.done.wait [#allocation9], 3072  }
  0x4d   :  { %732 = vsyncadd [#allocation9], 4294964224  ;;  %vm78_vm0 = vcmask 1040384   ;;  %v75_v0 = vld [vmem:[#allocation2 + $0x8] sm:$0x1]  ;;  %v74_v2 = vld [vmem:[#allocation2] sm:$0xff] }
  0x4e   :  { %v79_v1 = vsel %vm78_vm0, %v75_v0, 0.0  ;;  %v537_v3 = vld [vmem:[#allocation8 + $0x4] ss:$12 sps:$4 sm:$0xff]   ;;  %v539_v4 = vld [vmem:[#allocation8] ss:$12 sps:$4 sm:$0xff]   ;;  %v745_v5 = vmov 0.0  }
  0x4f   :  { %80 = vadd.xlane.f32.xlu0 %v79_v1  ;;  %501 = vmatprep.subr.bf16.mxu1 %v745_v5  ;;  %v540_v6 = vld [vmem:[#allocation8 + $0x8] ss:$12 sps:$4 sm:$0xff]   ;;  %v543_v17 = vld [vmem:[#allocation8 + $0x18] ss:$12 sps:$4 sm:$0xff]   ;;  %v544_v18 = vld [vmem:[#allocation8 + $0x20] ss:$12 sps:$4 sm:$0xff]  }
  0x50   :  { %v541_v7 = vld [vmem:[#allocation8 + $0x1c] ss:$12 sps:$4 sm:$0xff]   ;;  %281 = vmatprep.subr.bf16.mxu0 %v537_v3  ;;  %502 = vmatpush3.bf16.msra.mxu1 %v540_v6  ;;  %v545_v19 = vld [vmem:[#allocation8 + $0x34] ss:$12 sps:$4 sm:$0xff]   ;;  %v548_v21 = vld [vmem:[#allocation8 + $0x38] ss:$12 sps:$4 sm:$0xff]  }
  0x51   :  { %282 = vmatpush1.bf16.msra.mxu0 %v539_v4  ;;  %503 = vmatprep.subr.bf16.mxu1 %v745_v5  ;;  %v547_v20 = vld [vmem:[#allocation8 + $0x30] ss:$12 sps:$4 sm:$0xff]   ;;  %v549_v22 = vld [vmem:[#allocation8 + $0x4c] ss:$12 sps:$4 sm:$0xff]   ;;  %v551_v23 = vld [vmem:[#allocation8 + $0x48] ss:$12 sps:$4 sm:$0xff]  }
  0x52   :  { %283 = vmatprep.subr.bf16.mxu0 %v541_v7  ;;  %v552_v24 = vld [vmem:[#allocation8 + $0x50] ss:$12 sps:$4 sm:$0xff]   ;;  %v555_v26 = vld [vmem:[#allocation8 + $0x60] ss:$12 sps:$4 sm:$0xff]   ;;  %v556_v27 = vld [vmem:[#allocation8 + $0x68] ss:$12 sps:$4 sm:$0xff]  }
  0x53   :  { %76 = vadd.xlane.f32.xlu0 %v74_v2  ;;  %v553_v25 = vld [vmem:[#allocation8 + $0x64] ss:$12 sps:$4 sm:$0xff]   ;;  %v557_v28 = vld [vmem:[#allocation8 + $0x7c] ss:$12 sps:$4 sm:$0xff]   ;;  %v560_v30 = vld [vmem:[#allocation8 + $0x80] ss:$12 sps:$4 sm:$0xff]  }
  0x54   :  { %504 = vmatpush3.bf16.msra.mxu1 %v544_v18  ;;  %v559_v29 = vld [vmem:[#allocation8 + $0x78] ss:$12 sps:$4 sm:$0xff]   ;;  %v561_v31 = vld [vmem:[#allocation8 + $0x94] ss:$12 sps:$4 sm:$0xff]   ;;  %v746_v32 = vmov 0   ;;  %vm747_vm1 = vmmov 0  }
  0x55   :  { %284 = vmatpush1.bf16.msra.mxu0 %v543_v17  ;;  %505 = vmatprep.subr.bf16.mxu1 %v745_v5  ;;  %v563_v33 = vld [vmem:[#allocation8 + $0x90] ss:$12 sps:$4 sm:$0xff]   ;;  %v564_v34 = vld [vmem:[#allocation8 + $0x98] ss:$12 sps:$4 sm:$0xff]   ;;  %v567_v36 = vld [vmem:[#allocation8 + $0xa8] ss:$12 sps:$4 sm:$0xff]  }
  0x56   :  { %285 = vmatprep.subr.bf16.mxu0 %v545_v19  ;;  %313 = vmatprep.mubr.bf16.mxu0 %v746_v32  ;;  %v565_v35 = vld [vmem:[#allocation8 + $0xac] ss:$12 sps:$4 sm:$0xff]   ;;  %v568_v37 = vld [vmem:[#allocation8 + $0xb0] ss:$12 sps:$4 sm:$0xff]   ;;  %vm375_vm2 = vsmask.f32 256 }
  0x57   :  { %517 = vmatprep.mubr.msk.bf16.mxu1 %vm747_vm1, %v745_v5  ;;  %v454_v46 = vld [vmem:[#allocation5] ss:$0 sm:$0xff]  ;;  %v455_v50 = vld [vmem:[#allocation7] ss:$0 sm:$0xff]  ;;  %v377_v61 = vld [vmem:[#allocation10 + $0x4] sm:$0x1] }
  0x58   :  { %506 = vmatpush3.bf16.msra.mxu1 %v548_v21  ;;  %s748_s3 = smov [#allocation10]   ;;  %vm872_vm3 = vmand %vm78_vm0, %vm375_vm2  ;;  %s749_s25 = smov [#allocation11]   ;;  %v389_v6 = vld [vmem:[#allocation11 + $0x4] sm:$0x1] }
  0x59   :  { %286 = vmatpush1.bf16.msra.mxu0 %v547_v20  ;;  %507 = vmatprep.subr.bf16.mxu1 %v745_v5  ;;  %s409_s23 = sshll.u32 %s748_s3, 4  ;;  %s421_s26 = sshll.u32 %s749_s25, 4  ;;  %s410_s23 = int_to_ptr.vmem [resolvable:$true] %s409_s23  ;;  %s880_s26 = int_to_ptr.vmem [resolvable:$true] %s421_s26 }
  0x5a   :  { %287 = vmatprep.subr.bf16.mxu0 %v549_v22  ;;  %s750_s27 = smov [#allocation13]   ;;  %s661_s29 = scalar_lea.vmem %s410_s23, 128 }
  0x5b   :  { %s433_s28 = sshll.u32 %s750_s27, 4  ;;  %p662_p4 = scmp.ne.s32.totalorder %s410_s23, %s661_s29  ;;  %s884_s28 = int_to_ptr.vmem [resolvable:$true] %s433_s28 }
  0x5c   :  { %508 = vmatpush3.bf16.msra.mxu1 %v552_v24  ;;  %p666_p5 = scmp.lt.s32.totalorder %s410_s23, %s410_s23  ;;  %p667_p6 = scmp.lt.s32.totalorder %s661_s29, %s661_s29 }
  0x5d   :  { %288 = vmatpush1.bf16.msra.mxu0 %v551_v23  ;;  %509 = vmatprep.subr.bf16.mxu1 %v745_v5 }
  0x5e   :  { %289 = vmatprep.subr.bf16.mxu0 %v553_v25  ;;  %p668_p7 = por %p667_p6, %p666_p5 }
  0x60   :  { %510 = vmatpush3.bf16.msra.mxu1 %v556_v27  ;;  %p669_p8 = pnand %p668_p7, %p662_p4 }
  0x61   :  { %290 = vmatpush1.bf16.msra.mxu0 %v555_v26  ;;  %511 = vmatprep.subr.bf16.mxu1 %v745_v5 }
  0x62   :  { %291 = vmatprep.subr.bf16.mxu0 %v557_v28 }
  0x64   :  { %512 = vmatpush3.bf16.msra.mxu1 %v560_v30 }
  0x65   :  { %292 = vmatpush1.bf16.msra.mxu0 %v559_v29  ;;  %513 = vmatprep.subr.bf16.mxu1 %v745_v5 }
  0x66   :  { %293 = vmatprep.subr.bf16.mxu0 %v561_v31 }
  0x68   :  { %514 = vmatpush3.bf16.msra.mxu1 %v564_v34 }
  0x69   :  { %294 = vmatpush1.bf16.msra.mxu0 %v563_v33  ;;  %515 = vmatprep.subr.bf16.mxu1 %v745_v5 }
  0x6a   :  { %295 = vmatprep.subr.bf16.mxu0 %v565_v35 }
  0x6c   :  { %516 = vmatpush3.bf16.msra.mxu1 %v568_v37 }
  0x6d   :  { %296 = vmatpush1.bf16.msra.mxu0 %v567_v36 }
  0xdc   :  { %v81_v8 = vpop.xlane.xlu0 %80 }
  0xdd   :  { %v84_v9 = vmul.f32 0.0078125, %v81_v8 }
  0xdf   :  { %v853_v12 = vsub.f32 %v75_v0, %v84_v9 }
  0xe0   :  { %v77_v10 = vpop.xlane.xlu0 %76 }
  0xe1   :  { %v83_v11 = vmul.f32 0.0078125, %v77_v10  ;;  %v88_v15 = vmul.f32 %v853_v12, %v853_v12 }
  0xe3   :  { %v855_v13 = vsub.f32 %v74_v2, %v83_v11  ;;  %v91_v16 = vsel %vm78_vm0, %v88_v15, 0.0  ;;  %v401_v2 = vld [vmem:[#allocation13 + $0x4] sm:$0x1] }
  0xe5   :  { %v87_v14 = vmul.f32 %v855_v13, %v855_v13 }
  0xe7   :  { %89 = vadd.xlane.f32.xlu1 %v87_v14 }
  0xeb   :  { %92 = vadd.xlane.f32.xlu1 %v91_v16 }
 0x174   :  { %v90_v38 = vpop.xlane.xlu1 %89 }
 0x175   :  { %v94_v39 = vmul.f32 0.0078125, %v90_v38 }
 0x177   :  { %v96_v40 = vadd.f32 1e-05, %v94_v39 }
 0x178   :  { %v93_v41 = vpop.xlane.xlu1 %92 }
 0x179   :  { %569 = vrsqrt.f32 %v96_v40  ;;  %v95_v42 = vmul.f32 0.0078125, %v93_v41 }
 0x17b   :  { %v97_v43 = vadd.f32 1e-05, %v95_v42 }
 0x17d   :  { %571 = vrsqrt.f32 %v97_v43 }
 0x183   :  { %v570_v44 = vpop.eup %569 }
 0x184   :  { %v100_v45 = vmul.f32 %v570_v44, %v855_v13 }
 0x186   :  { %v109_v49 = vmul.f32 %v454_v46, %v100_v45 }
 0x187   :  { %v572_v47 = vpop.eup %571 }
 0x188   :  { %v101_v48 = vmul.f32 %v572_v47, %v853_v12  ;;  %v118_v52 = vadd.f32 %v455_v50, %v109_v49 }
 0x18a   :  { %v110_v51 = vmul.f32 %v454_v46, %v101_v48 }
 0x18c   :  { %v119_v53 = vadd.f32 %v455_v50, %v110_v51 }
 0x18e   :  { %v120_v54 = vpack.c.bf16 %v119_v53, %v118_v52 }
 0x190   :  { %314 = vmatmul.mubr.bf16.vlgmr.msra.gmra.mrb[0].mxu0 %v120_v54  ;;  %518 = vmatmul.mubr.bf16.vlgmr.msra.gmra.mrb[0].mxu1 %v120_v54 }
 0x263   :  { %v315_v55 = vpop.f32.mrb[0].mxu0  ;;  %v358_v56 = vpop.f32.mrb[0].mxu1 }
 0x264   :  { %v486_v57 = vpack.c.bf16 %v315_v55, %v315_v55  ;;  %v490_v58 = vpack.c.bf16 %v358_v56, %v358_v56  ;;  %v317_v59 = vpop.f32.mrb[1].mxu0  ;;  %v519_v60 = vpop.f32.mrb[1].mxu1 }
 0x265   :  { %v488_v63 = vpack.c.bf16 %v317_v59, %v317_v59  ;;  %v319_v0 = vpop.f32.mrb[2].mxu0  ;;  %v361_v1 = vpop.f32.mrb[2].mxu1 }
 0x266   :  { %373 = vst [vmem:[#allocation10] sm:$0xf] %v486_v57  ;;  %400 = vst [vmem:[#allocation13] sm:$0xf] %v490_v58  ;;  %v487_v3 = vpack.c.bf16 %v319_v0, %v319_v0  ;;  %v491_v4 = vpack.c.bf16 %v361_v1, %v361_v1  ;;  %v321_v5 = vpop.f32.mrb[3].mxu0  ;;  %v520_v7 = vpop.f32.mrb[3].mxu1 }
 0x267   :  { %388 = vst [vmem:[#allocation11] sm:$0xf] %v488_v63  ;;  %v489_v8 = vpack.c.bf16 %v321_v5, %v321_v5 }
 0x268   :  { %v378_v9 = vsel %vm872_vm3, %v487_v3, %v377_v61  ;;  %v402_v10 = vsel %vm872_vm3, %v491_v4, %v401_v2 }
 0x269   :  { %379 = vst [vmem:[#allocation10 + $0x4] sm:$0x1] %v378_v9  ;;  %403 = vst [vmem:[#allocation13 + $0x4] sm:$0x1] %v402_v10  ;;  %v390_v11 = vsel %vm872_vm3, %v489_v8, %v389_v6 }
 0x26a   :  { %391 = vst [vmem:[#allocation11 + $0x4] sm:$0x1] %v390_v11 }
 0x26b   :  { %672 = shalt.err (!%p669_p8)
}
 0x26c   :  { %s673_s8 = scalar_lea.hbm %s945_s4, 128 }
 0x26d   :  { %p674_p9 = scmp.ne.s32.totalorder %s945_s4, %s673_s8  ;;  %p677_p10 = scmp.lt.u32.totalorder %s673_s8, %s945_s4 }
 0x26f   :  { %p679_p11 = pnand %p677_p10, %p674_p9 }
 0x271   :  { %682 = shalt.err (!%p679_p11)
}
 0x272   :  { %s751_s11 = smov 64   ;;  %s752_s12 = smov 4  }
 0x273   :  { %415 = dma.vmem_to_hbm [thread:$0]  %s410_s23, 128, %s945_s4, [#allocation4], %s751_s11, %s751_s11, %s752_s12  }
 0x274   :  { %s683_s15 = scalar_lea.vmem %s880_s26, 128  ;;  %p688_p13 = scmp.lt.s32.totalorder %s880_s26, %s880_s26 }
 0x275   :  { %p684_p12 = scmp.ne.s32.totalorder %s880_s26, %s683_s15  ;;  %p689_p0 = scmp.lt.s32.totalorder %s683_s15, %s683_s15 }
 0x277   :  { %p690_p1 = por %p689_p0, %p688_p13 }
 0x279   :  { %p691_p2 = pnand %p690_p1, %p684_p12 }
 0x27b   :  { %694 = shalt.err (!%p691_p2)
}
 0x27c   :  { %s695_s18 = scalar_lea.hbm %s946_s5, 128 }
 0x27d   :  { %p696_p3 = scmp.ne.s32.totalorder %s946_s5, %s695_s18  ;;  %p699_p4 = scmp.lt.u32.totalorder %s695_s18, %s946_s5 }
 0x27f   :  { %p701_p5 = pnand %p699_p4, %p696_p3 }
 0x281   :  { %704 = shalt.err (!%p701_p5)
}
 0x282   :  { %427 = dma.vmem_to_hbm [thread:$0]  %s880_s26, 128, %s946_s5, [#allocation12], %s751_s11, %s751_s11, %s752_s12  }
 0x283   :  { %s705_s22 = scalar_lea.vmem %s884_s28, 128  ;;  %p710_p7 = scmp.lt.s32.totalorder %s884_s28, %s884_s28 }
 0x284   :  { %p706_p6 = scmp.ne.s32.totalorder %s884_s28, %s705_s22  ;;  %p711_p8 = scmp.lt.s32.totalorder %s705_s22, %s705_s22 }
 0x286   :  { %p712_p9 = por %p711_p8, %p710_p7 }
 0x288   :  { %p713_p10 = pnand %p712_p9, %p706_p6 }
 0x28a   :  { %716 = shalt.err (!%p713_p10)
}
 0x28b   :  { %s717_s25 = scalar_lea.hbm %s947_s6, 128 }
 0x28c   :  { %p718_p11 = scmp.ne.s32.totalorder %s947_s6, %s717_s25  ;;  %p721_p12 = scmp.lt.u32.totalorder %s717_s25, %s947_s6 }
 0x28e   :  { %p723_p13 = pnand %p721_p12, %p718_p11 }
 0x290   :  { %726 = shalt.err (!%p723_p13)
}
 0x291   :  { %439 = dma.vmem_to_hbm [thread:$0]  %s884_s28, 128, %s947_s6, [#allocation12], %s751_s11, %s751_s11, %s752_s12  }
 0x292   :  { %733 = dma.done.wait [#allocation4], 128  }
 0x293   :  { %734 = vsyncadd [#allocation4], 4294967168 }
 0x294   :  { %735 = dma.done.wait [#allocation12], 256  }
 0x295   :  { %736 = vsyncadd [#allocation12], 4294967040 }
 0x296   :  { %449 = vsyncpa [#allocation3], 1 }
 0x297   :  { %450 = vsyncpa [#allocation6], 1 }
 0x298   :  { %451 = vsyncpa [#allocation9], 1 }
 0x299   :  { %452 = vsyncpa [#allocation4], 1 }
 0x29a   :  { %453 = vsyncpa [#allocation12], 1 }

// kernel: model2_forward_single.14
= control target key start
LH: loop header
LB: loop body
LE: loop exit
PB: predicated region body
PF: predicated region fallthrough
CT: control target
= control target key end

     0   :  { %12 = vsyncpa [#allocation3], 0  ;;  %s1519_s0 = inlined_call_operand.hbm [shape: f32[9,128], index: 0, kind: input, shape index: {}]   ;;  %s1520_s1 = inlined_call_operand.hbm [shape: f32[1,128], index: 1, kind: input, shape index: {}]   ;;  %s1521_s2 = inlined_call_operand.hbm [shape: f32[1,128], index: 2, kind: input, shape index: {}]   ;;  %s1522_s3 = inlined_call_operand.hbm [shape: bf16[128,512], index: 3, kind: input, shape index: {}]   ;;  %s1523_s4 = inlined_call_operand.hbm [shape: f32[1,512], index: 4, kind: input, shape index: {}]   ;;  %s1524_s5 = inlined_call_operand.hbm [shape: bf16[512,128], index: 5, kind: input, shape index: {}]   ;;  %s1525_s6 = inlined_call_operand.hbm [shape: f32[1,128], index: 6, kind: input, shape index: {}]   ;;  %s1526_s7 = inlined_call_operand.hbm [shape: f32[9,128], index: 7, kind: output, shape index: {}]  }
   0x1   :  { %13 = vsyncpa [#allocation6], 0 }
   0x2   :  { %14 = vsyncpa [#allocation9], 0 }
   0x3   :  { %15 = vsyncpa [#allocation12], 0 }
   0x4   :  { %16 = vsyncpa [#allocation4], 0  ;;  %s1329_s24 = smov [#allocation5]   ;;  %s1330_s26 = smov [#allocation8]  }
   0x5   :  { %s35_s25 = sshll.u32 %s1329_s24, 4  ;;  %s54_s27 = sshll.u32 %s1330_s26, 4  ;;  %s36_s25 = int_to_ptr.vmem [resolvable:$true] %s35_s25  ;;  %s1384_s27 = int_to_ptr.vmem [resolvable:$true] %s54_s27 }
   0x6   :  { %s1143_s30 = scalar_lea.hbm %s1520_s1, 16 }
   0x7   :  { %p1144_p0 = scmp.ne.s32.totalorder %s1520_s1, %s1143_s30  ;;  %p1147_p1 = scmp.lt.u32.totalorder %s1143_s30, %s1520_s1 }
   0x9   :  { %p1149_p2 = pnand %p1147_p1, %p1144_p0 }
   0xb   :  { %1152 = shalt.err (!%p1149_p2)
}
   0xc   :  { %s1153_s12 = scalar_lea.vmem %s36_s25, 16  ;;  %s1157_s13 = scalar_lea.vmem %s36_s25, 32 }
   0xd   :  { %p1154_p3 = scmp.ne.s32.totalorder %s36_s25, %s1153_s12  ;;  %p1158_p4 = scmp.lt.s32.totalorder %s36_s25, %s36_s25 }
   0xe   :  { %p1159_p5 = scmp.lt.s32.totalorder %s1157_s13, %s1153_s12 }
  0x10   :  { %p1160_p6 = por %p1159_p5, %p1158_p4 }
  0x12   :  { %p1161_p7 = pnand %p1160_p6, %p1154_p3 }
  0x14   :  { %1164 = shalt.err (!%p1161_p7)
}
  0x15   :  { %38 = dma.hbm_to_vmem [thread:$0]  %s1520_s1, 16, %s36_s25, [#allocation6]  }
  0x16   :  { %s1165_s18 = scalar_lea.hbm %s1522_s3, 4096 }
  0x17   :  { %p1166_p8 = scmp.ne.s32.totalorder %s1522_s3, %s1165_s18  ;;  %p1169_p9 = scmp.lt.u32.totalorder %s1165_s18, %s1522_s3 }
  0x19   :  { %p1171_p10 = pnand %p1169_p9, %p1166_p8 }
  0x1b   :  { %1174 = shalt.err (!%p1171_p10)
}
  0x1c   :  { %s1175_s23 = scalar_lea.vmem %s1384_s27, 4096  ;;  %p1180_p12 = scmp.lt.s32.totalorder %s1384_s27, %s1384_s27 }
  0x1d   :  { %p1176_p11 = scmp.ne.s32.totalorder %s1384_s27, %s1175_s23  ;;  %p1181_p13 = scmp.lt.s32.totalorder %s1175_s23, %s1175_s23 }
  0x1f   :  { %p1182_p0 = por %p1181_p13, %p1180_p12 }
  0x21   :  { %p1183_p1 = pnand %p1182_p0, %p1176_p11 }
  0x23   :  { %1186 = shalt.err (!%p1183_p1)
}
  0x24   :  { %s1331_s1 = smov 256   ;;  %s1332_s24 = smov 16  }
  0x25   :  { %60 = dma.hbm_to_vmem [thread:$0]  %s1522_s3, 4096, %s1384_s27, [#allocation9], %s1331_s1, %s1331_s1, %s1332_s24  }
  0x26   :  { %s1333_s28 = smov [#allocation11]   ;;  %s1187_s9 = scalar_lea.hbm %s1524_s5, 4096 }
  0x27   :  { %s76_s29 = sshll.u32 %s1333_s28, 4  ;;  %p1188_p2 = scmp.ne.s32.totalorder %s1524_s5, %s1187_s9  ;;  %s77_s29 = int_to_ptr.vmem [resolvable:$true] %s76_s29 }
  0x28   :  { %p1191_p3 = scmp.lt.u32.totalorder %s1187_s9, %s1524_s5 }
  0x2a   :  { %p1193_p4 = pnand %p1191_p3, %p1188_p2 }
  0x2c   :  { %1196 = shalt.err (!%p1193_p4)
}
  0x2d   :  { %s1197_s14 = scalar_lea.vmem %s77_s29, 4096  ;;  %p1202_p6 = scmp.lt.s32.totalorder %s77_s29, %s77_s29 }
  0x2e   :  { %p1198_p5 = scmp.ne.s32.totalorder %s77_s29, %s1197_s14  ;;  %p1203_p7 = scmp.lt.s32.totalorder %s1197_s14, %s1197_s14 }
  0x30   :  { %p1204_p8 = por %p1203_p7, %p1202_p6 }
  0x32   :  { %p1205_p9 = pnand %p1204_p8, %p1198_p5 }
  0x34   :  { %1208 = shalt.err (!%p1205_p9)
}
  0x35   :  { %s1334_s3 = smov 64   ;;  %s1335_s27 = smov 4  }
  0x36   :  { %82 = dma.hbm_to_vmem [thread:$0]  %s1524_s5, 4096, %s77_s29, [#allocation12], %s1334_s3, %s1334_s3, %s1335_s27  }
  0x37   :  { %s1336_s17 = smov [#allocation2]   ;;  %s1209_s21 = scalar_lea.hbm %s1519_s0, 256 }
  0x38   :  { %s22_s18 = sshll.u32 %s1336_s17, 4  ;;  %p1210_p10 = scmp.ne.s32.totalorder %s1519_s0, %s1209_s21  ;;  %s23_s18 = int_to_ptr.vmem [resolvable:$true] %s22_s18 }
  0x39   :  { %p1213_p11 = scmp.lt.u32.totalorder %s1209_s21, %s1519_s0 }
  0x3b   :  { %p1215_p12 = pnand %p1213_p11, %p1210_p10 }
  0x3d   :  { %1218 = shalt.err (!%p1215_p12)
}
  0x3e   :  { %s1219_s25 = scalar_lea.vmem %s23_s18, 256  ;;  %p1224_p0 = scmp.lt.s32.totalorder %s23_s18, %s23_s18 }
  0x3f   :  { %p1220_p13 = scmp.ne.s32.totalorder %s23_s18, %s1219_s25  ;;  %p1225_p1 = scmp.lt.s32.totalorder %s1219_s25, %s1219_s25 }
  0x41   :  { %p1226_p2 = por %p1225_p1, %p1224_p0 }
  0x43   :  { %p1227_p3 = pnand %p1226_p2, %p1220_p13 }
  0x45   :  { %1230 = shalt.err (!%p1227_p3)
}
  0x46   :  { %s1337_s5 = smov 128   ;;  %s1338_s26 = smov 8  }
  0x47   :  { %28 = dma.hbm_to_vmem [thread:$0]  %s1519_s0, 256, %s23_s18, [#allocation3], %s1337_s5, %s1337_s5, %s1338_s26  }
  0x48   :  { %s1339_s30 = smov [#allocation7]   ;;  %s1340_s9 = smov [#allocation10]  }
  0x49   :  { %s45_s8 = sshll.u32 %s1339_s30, 4  ;;  %s67_s10 = sshll.u32 %s1340_s9, 4  ;;  %s46_s8 = int_to_ptr.vmem [resolvable:$true] %s45_s8  ;;  %s68_s10 = int_to_ptr.vmem [resolvable:$true] %s67_s10 }
  0x4a   :  { %s1231_s13 = scalar_lea.hbm %s1521_s2, 16 }
  0x4b   :  { %p1232_p4 = scmp.ne.s32.totalorder %s1521_s2, %s1231_s13  ;;  %p1235_p5 = scmp.lt.u32.totalorder %s1231_s13, %s1521_s2 }
  0x4d   :  { %p1237_p6 = pnand %p1235_p5, %p1232_p4 }
  0x4f   :  { %1240 = shalt.err (!%p1237_p6)
}
  0x50   :  { %s1241_s0 = scalar_lea.vmem %s46_s8, 16  ;;  %s1245_s16 = scalar_lea.vmem %s46_s8, 32 }
  0x51   :  { %p1242_p7 = scmp.ne.s32.totalorder %s46_s8, %s1241_s0  ;;  %p1246_p8 = scmp.lt.s32.totalorder %s46_s8, %s46_s8 }
  0x52   :  { %p1247_p9 = scmp.lt.s32.totalorder %s1245_s16, %s1241_s0 }
  0x54   :  { %p1248_p10 = por %p1247_p9, %p1246_p8 }
  0x56   :  { %p1249_p11 = pnand %p1248_p10, %p1242_p7 }
  0x58   :  { %1252 = shalt.err (!%p1249_p11)
}
  0x59   :  { %48 = dma.hbm_to_vmem [thread:$0]  %s1521_s2, 16, %s46_s8, [#allocation6]  }
  0x5a   :  { %s1253_s21 = scalar_lea.hbm %s1523_s4, 64 }
  0x5b   :  { %p1254_p12 = scmp.ne.s32.totalorder %s1523_s4, %s1253_s21  ;;  %p1257_p13 = scmp.lt.u32.totalorder %s1253_s21, %s1523_s4 }
  0x5d   :  { %p1259_p0 = pnand %p1257_p13, %p1254_p12 }
  0x5f   :  { %1262 = shalt.err (!%p1259_p0)
}
  0x60   :  { %s1263_s25 = scalar_lea.vmem %s68_s10, 64  ;;  %p1268_p2 = scmp.lt.s32.totalorder %s68_s10, %s68_s10 }
  0x61   :  { %p1264_p1 = scmp.ne.s32.totalorder %s68_s10, %s1263_s25  ;;  %p1269_p3 = scmp.lt.s32.totalorder %s1263_s25, %s1263_s25 }
  0x63   :  { %p1270_p4 = por %p1269_p3, %p1268_p2 }
  0x65   :  { %p1271_p5 = pnand %p1270_p4, %p1264_p1 }
  0x67   :  { %1274 = shalt.err (!%p1271_p5)
}
  0x68   :  { %70 = dma.hbm_to_vmem [thread:$0]  %s1523_s4, 64, %s68_s10, [#allocation9]  }
  0x69   :  { %s1341_s29 = smov [#allocation13]   ;;  %s1275_s11 = scalar_lea.hbm %s1525_s6, 16 }
  0x6a   :  { %s89_s30 = sshll.u32 %s1341_s29, 4  ;;  %p1276_p6 = scmp.ne.s32.totalorder %s1525_s6, %s1275_s11  ;;  %s90_s30 = int_to_ptr.vmem [resolvable:$true] %s89_s30 }
  0x6b   :  { %p1279_p7 = scmp.lt.u32.totalorder %s1275_s11, %s1525_s6 }
  0x6d   :  { %p1281_p8 = pnand %p1279_p7, %p1276_p6 }
  0x6f   :  { %1284 = shalt.err (!%p1281_p8)
}
  0x70   :  { %s1285_s27 = scalar_lea.vmem %s90_s30, 16  ;;  %s1289_s4 = scalar_lea.vmem %s90_s30, 32 }
  0x71   :  { %p1286_p9 = scmp.ne.s32.totalorder %s90_s30, %s1285_s27  ;;  %p1290_p10 = scmp.lt.s32.totalorder %s90_s30, %s90_s30 }
  0x72   :  { %p1291_p11 = scmp.lt.s32.totalorder %s1289_s4, %s1285_s27 }
  0x74   :  { %p1292_p12 = por %p1291_p11, %p1290_p10 }
  0x76   :  { %p1293_p13 = pnand %p1292_p12, %p1286_p9 }
  0x78   :  { %1296 = shalt.err (!%p1293_p13)
}
  0x79   :  { %92 = dma.hbm_to_vmem [thread:$0]  %s1525_s6, 16, %s90_s30, [#allocation12]  }
  0x7a   :  { %1319 = dma.done.wait [#allocation3], 256  }
  0x7b   :  { %1320 = vsyncadd [#allocation3], 4294967040 }
  0x7c   :  { %1321 = dma.done.wait [#allocation6], 32  }
  0x7d   :  { %1322 = vsyncadd [#allocation6], 4294967264 }
  0x7e   :  { %1323 = dma.done.wait [#allocation9], 4160  }
  0x7f   :  { %1324 = vsyncadd [#allocation9], 4294963136 }
  0x80   :  { %1325 = dma.done.wait [#allocation12], 4112  }
  0x81   :  { %1326 = vsyncadd [#allocation12], 4294963184  ;;  %vm119_vm0 = vcmask 1040384   ;;  %v1478_v0 = vld [vmem:[#allocation2 + $0x8] sm:$0x1]  ;;  %v1482_v2 = vld [vmem:[#allocation2] sm:$0xff] }
  0x82   :  { %v120_v1 = vsel %vm119_vm0, %v1478_v0, 0.0  ;;  %v1027_v3 = vld [vmem:[#allocation8 + $0x4] ss:$16 sps:$4 sm:$0xff]   ;;  %v1029_v4 = vld [vmem:[#allocation8 + $0xc] ss:$16 sps:$4 sm:$0xff]   ;;  %v1342_v38 = vmov 0  }
  0x83   :  { %121 = vadd.xlane.f32.xlu0 %v120_v1  ;;  %v1031_v5 = vld [vmem:[#allocation8] ss:$16 sps:$4 sm:$0xff]   ;;  %v1032_v6 = vld [vmem:[#allocation8 + $0x8] ss:$16 sps:$4 sm:$0xff]   ;;  %v1033_v7 = vld [vmem:[#allocation8 + $0x24] ss:$16 sps:$4 sm:$0xff]   ;;  %376 = vmatprep.subr.bf16.mxu0 %v1027_v3 }
  0x84   :  { %v1035_v8 = vld [vmem:[#allocation8 + $0x2c] ss:$16 sps:$4 sm:$0xff]   ;;  %419 = vmatprep.subr.bf16.mxu1 %v1029_v4  ;;  %377 = vmatpush1.bf16.msra.mxu0 %v1031_v5  ;;  %v1037_v18 = vld [vmem:[#allocation8 + $0x20] ss:$16 sps:$4 sm:$0xff]   ;;  %v1038_v19 = vld [vmem:[#allocation8 + $0x28] ss:$16 sps:$4 sm:$0xff]  }
  0x85   :  { %420 = vmatpush1.bf16.msra.mxu1 %v1032_v6  ;;  %378 = vmatprep.subr.bf16.mxu0 %v1033_v7  ;;  %v1039_v20 = vld [vmem:[#allocation8 + $0x44] ss:$16 sps:$4 sm:$0xff]   ;;  %v1041_v21 = vld [vmem:[#allocation8 + $0x4c] ss:$16 sps:$4 sm:$0xff]   ;;  %v1043_v22 = vld [vmem:[#allocation8 + $0x40] ss:$16 sps:$4 sm:$0xff]  }
  0x86   :  { %421 = vmatprep.subr.bf16.mxu1 %v1035_v8  ;;  %v1044_v23 = vld [vmem:[#allocation8 + $0x48] ss:$16 sps:$4 sm:$0xff]   ;;  %v1045_v24 = vld [vmem:[#allocation8 + $0x64] ss:$16 sps:$4 sm:$0xff]   ;;  %v1047_v25 = vld [vmem:[#allocation8 + $0x6c] ss:$16 sps:$4 sm:$0xff]   ;;  %408 = vmatprep.mubr.bf16.mxu0 %v1342_v38 }
  0x87   :  { %117 = vadd.xlane.f32.xlu0 %v1482_v2  ;;  %v1049_v26 = vld [vmem:[#allocation8 + $0x60] ss:$16 sps:$4 sm:$0xff]   ;;  %v1050_v27 = vld [vmem:[#allocation8 + $0x68] ss:$16 sps:$4 sm:$0xff]   ;;  %v1051_v28 = vld [vmem:[#allocation8 + $0x84] ss:$16 sps:$4 sm:$0xff]   ;;  %451 = vmatprep.mubr.bf16.mxu1 %v1342_v38 }
  0x88   :  { %379 = vmatpush1.bf16.msra.mxu0 %v1037_v18  ;;  %v1053_v29 = vld [vmem:[#allocation8 + $0x8c] ss:$16 sps:$4 sm:$0xff]   ;;  %v1055_v30 = vld [vmem:[#allocation8 + $0x80] ss:$16 sps:$4 sm:$0xff]   ;;  %v1056_v31 = vld [vmem:[#allocation8 + $0x88] ss:$16 sps:$4 sm:$0xff]  }
  0x89   :  { %422 = vmatpush1.bf16.msra.mxu1 %v1038_v19  ;;  %380 = vmatprep.subr.bf16.mxu0 %v1039_v20  ;;  %v1057_v32 = vld [vmem:[#allocation8 + $0xa4] ss:$16 sps:$4 sm:$0xff]   ;;  %v1059_v33 = vld [vmem:[#allocation8 + $0xac] ss:$16 sps:$4 sm:$0xff]   ;;  %v1061_v34 = vld [vmem:[#allocation8 + $0xa0] ss:$16 sps:$4 sm:$0xff]  }
  0x8a   :  { %423 = vmatprep.subr.bf16.mxu1 %v1041_v21  ;;  %v1062_v35 = vld [vmem:[#allocation8 + $0xa8] ss:$16 sps:$4 sm:$0xff]   ;;  %v1063_v36 = vld [vmem:[#allocation8 + $0xc4] ss:$16 sps:$4 sm:$0xff]   ;;  %v1065_v37 = vld [vmem:[#allocation8 + $0xcc] ss:$16 sps:$4 sm:$0xff]  }
  0x8b   :  { %v1067_v39 = vld [vmem:[#allocation8 + $0xc0] ss:$16 sps:$4 sm:$0xff]   ;;  %v1068_v40 = vld [vmem:[#allocation8 + $0xc8] ss:$16 sps:$4 sm:$0xff]   ;;  %v1069_v41 = vld [vmem:[#allocation8 + $0xe4] ss:$16 sps:$4 sm:$0xff]  }
  0x8c   :  { %381 = vmatpush1.bf16.msra.mxu0 %v1043_v22  ;;  %v1071_v42 = vld [vmem:[#allocation8 + $0xec] ss:$16 sps:$4 sm:$0xff]   ;;  %v1073_v43 = vld [vmem:[#allocation8 + $0xe0] ss:$16 sps:$4 sm:$0xff]   ;;  %v1074_v44 = vld [vmem:[#allocation8 + $0xe8] ss:$16 sps:$4 sm:$0xff]  }
  0x8d   :  { %424 = vmatpush1.bf16.msra.mxu1 %v1044_v23  ;;  %382 = vmatprep.subr.bf16.mxu0 %v1045_v24  ;;  %v893_v53 = vld [vmem:[#allocation5] ss:$0 sm:$0xff]  ;;  %v894_v57 = vld [vmem:[#allocation7] ss:$0 sm:$0xff]  ;;  %v1075_v62 = vld [vmem:[#allocation11 + $0x40] sm:$0xff]   ;;  %s1343_s6 = smov [#allocation14]  }
  0x8e   :  { %425 = vmatprep.subr.bf16.mxu1 %v1047_v25  ;;  %v1076_v63 = vld [vmem:[#allocation11 + $0xc0] sm:$0xff]   ;;  %v1079_v4 = vld [vmem:[#allocation11 + $0x48] sm:$0xff]   ;;  %v1083_v8 = vld [vmem:[#allocation11 + $0x50] sm:$0xff]   ;;  %s878_s0 = sshll.u32 %s1343_s6, 4  ;;  %s879_s0 = int_to_ptr.vmem [resolvable:$true] %s878_s0 }
  0x8f   :  { %v1077_v1 = vld [vmem:[#allocation11] sm:$0xff]   ;;  %v1080_v5 = vld [vmem:[#allocation11 + $0xc8] sm:$0xff]   ;;  %v1099_v24 = vld [vmem:[#allocation11 + $0x70] sm:$0xff]   ;;  %s1297_s16 = scalar_lea.vmem %s879_s0, 256  ;;  %p1302_p1 = scmp.lt.s32.totalorder %s879_s0, %s879_s0 }
  0x90   :  { %383 = vmatpush1.bf16.msra.mxu0 %v1049_v26  ;;  %v1078_v3 = vld [vmem:[#allocation11 + $0x80] sm:$0xff]   ;;  %v1081_v6 = vld [vmem:[#allocation11 + $0x8] sm:$0xff]   ;;  %v1100_v25 = vld [vmem:[#allocation11 + $0xf0] sm:$0xff]   ;;  %p1298_p0 = scmp.ne.s32.totalorder %s879_s0, %s1297_s16  ;;  %p1303_p2 = scmp.lt.s32.totalorder %s1297_s16, %s1297_s16 }
  0x91   :  { %426 = vmatpush1.bf16.msra.mxu1 %v1050_v27  ;;  %384 = vmatprep.subr.bf16.mxu0 %v1051_v28  ;;  %v1082_v7 = vld [vmem:[#allocation11 + $0x88] sm:$0xff]   ;;  %v1093_v18 = vld [vmem:[#allocation11 + $0x20] sm:$0xff]   ;;  %v1101_v26 = vld [vmem:[#allocation11 + $0x30] sm:$0xff]  }
  0x92   :  { %427 = vmatprep.subr.bf16.mxu1 %v1053_v29  ;;  %v1094_v19 = vld [vmem:[#allocation11 + $0xa0] sm:$0xff]   ;;  %v1095_v20 = vld [vmem:[#allocation11 + $0x68] sm:$0xff]   ;;  %v1102_v27 = vld [vmem:[#allocation11 + $0xb0] sm:$0xff]   ;;  %p1304_p3 = por %p1303_p2, %p1302_p1 }
  0x93   :  { %v1096_v21 = vld [vmem:[#allocation11 + $0xe8] sm:$0xff]   ;;  %v1103_v28 = vld [vmem:[#allocation11 + $0x78] sm:$0xff]  }
  0x94   :  { %385 = vmatpush1.bf16.msra.mxu0 %v1055_v30  ;;  %v1097_v22 = vld [vmem:[#allocation11 + $0x28] sm:$0xff]   ;;  %v1104_v29 = vld [vmem:[#allocation11 + $0xf8] sm:$0xff]   ;;  %p1305_p4 = pnand %p1304_p3, %p1298_p0 }
  0x95   :  { %428 = vmatpush1.bf16.msra.mxu1 %v1056_v31  ;;  %386 = vmatprep.subr.bf16.mxu0 %v1057_v32  ;;  %v1098_v23 = vld [vmem:[#allocation11 + $0xa8] sm:$0xff]   ;;  %v1105_v30 = vld [vmem:[#allocation11 + $0x38] sm:$0xff]   ;;  %v196_v32 = vlaneseq }
  0x96   :  { %429 = vmatprep.subr.bf16.mxu1 %v1059_v33  ;;  %v1106_v31 = vld [vmem:[#allocation11 + $0xb8] sm:$0xff]  }
  0x97   :  { %v197_v33 = vshrl.u32 %v196_v32, 7 }
  0x98   :  { %387 = vmatpush1.bf16.msra.mxu0 %v1061_v34 }
  0x99   :  { %430 = vmatpush1.bf16.msra.mxu1 %v1062_v35  ;;  %388 = vmatprep.subr.bf16.mxu0 %v1063_v36  ;;  %v198_v34 = vsub.s32 0, %v197_v33  ;;  %v206_v35 = vsub.s32 2, %v197_v33  ;;  %v194_v36 = vld [vmem:[#allocation10] sm:$0xf]  ;;  %v210_v38 = vsub.s32 3, %v197_v33 }
  0x9a   :  { %431 = vmatprep.subr.bf16.mxu1 %v1065_v37  ;;  %v202_v37 = vsub.s32 1, %v197_v33 }
  0x9c   :  { %389 = vmatpush1.bf16.msra.mxu0 %v1067_v39  ;;  %v199_v39 = vrot.slane %v194_v36, %v198_v34 }
  0x9d   :  { %432 = vmatpush1.bf16.msra.mxu1 %v1068_v40  ;;  %390 = vmatprep.subr.bf16.mxu0 %v1069_v41  ;;  %v207_v40 = vrot.slane %v194_v36, %v206_v35  ;;  %v203_v41 = vrot.slane %v194_v36, %v202_v37 }
  0x9e   :  { %433 = vmatprep.subr.bf16.mxu1 %v1071_v42  ;;  %v211_v42 = vrot.slane %v194_v36, %v210_v38 }
  0xa0   :  { %391 = vmatpush1.bf16.msra.mxu0 %v1073_v43 }
  0xa1   :  { %434 = vmatpush1.bf16.msra.mxu1 %v1074_v44  ;;  %968 = vmatprep.subr.bf16.mxu0 %v1075_v62 }
  0xa2   :  { %990 = vmatprep.subr.bf16.mxu1 %v1076_v63 }
 0x110   :  { %v122_v9 = vpop.xlane.xlu0 %121 }
 0x111   :  { %v125_v10 = vmul.f32 0.0078125, %v122_v9  ;;  %v1084_v9 = vld [vmem:[#allocation11 + $0xd0] sm:$0xff]  }
 0x113   :  { %v1486_v13 = vsub.f32 %v1478_v0, %v125_v10  ;;  %v1085_v10 = vld [vmem:[#allocation11 + $0x10] sm:$0xff]  }
 0x114   :  { %v118_v11 = vpop.xlane.xlu0 %117 }
 0x115   :  { %v124_v12 = vmul.f32 0.0078125, %v118_v11  ;;  %v129_v16 = vmul.f32 %v1486_v13, %v1486_v13  ;;  %v1086_v11 = vld [vmem:[#allocation11 + $0x90] sm:$0xff]  }
 0x117   :  { %v1489_v14 = vsub.f32 %v1482_v2, %v124_v12  ;;  %v132_v17 = vsel %vm119_vm0, %v129_v16, 0.0  ;;  %v1087_v12 = vld [vmem:[#allocation11 + $0x58] sm:$0xff]   ;;  %v1091_v16 = vld [vmem:[#allocation11 + $0x60] sm:$0xff]  }
 0x119   :  { %v128_v15 = vmul.f32 %v1489_v14, %v1489_v14 }
 0x11b   :  { %130 = vadd.xlane.f32.xlu1 %v128_v15  ;;  %v1090_v15 = vld [vmem:[#allocation11 + $0x98] sm:$0xff]  }
 0x11f   :  { %133 = vadd.xlane.f32.xlu1 %v132_v17  ;;  %v1092_v17 = vld [vmem:[#allocation11 + $0xe0] sm:$0xff]  }
 0x1a8   :  { %v131_v45 = vpop.xlane.xlu1 %130 }
 0x1a9   :  { %v135_v46 = vmul.f32 0.0078125, %v131_v45 }
 0x1ab   :  { %v137_v47 = vadd.f32 1e-05, %v135_v46 }
 0x1ac   :  { %v134_v48 = vpop.xlane.xlu1 %133 }
 0x1ad   :  { %1107 = vrsqrt.f32 %v137_v47  ;;  %v136_v49 = vmul.f32 0.0078125, %v134_v48 }
 0x1af   :  { %v138_v50 = vadd.f32 1e-05, %v136_v49 }
 0x1b1   :  { %1109 = vrsqrt.f32 %v138_v50 }
 0x1b7   :  { %v1108_v51 = vpop.eup %1107 }
 0x1b8   :  { %v141_v52 = vmul.f32 %v1108_v51, %v1489_v14  ;;  %v1089_v14 = vld [vmem:[#allocation11 + $0x18] sm:$0xff]  }
 0x1ba   :  { %v150_v56 = vmul.f32 %v893_v53, %v141_v52 }
 0x1bb   :  { %v1110_v54 = vpop.eup %1109 }
 0x1bc   :  { %v142_v55 = vmul.f32 %v1110_v54, %v1486_v13  ;;  %v159_v59 = vadd.f32 %v894_v57, %v150_v56  ;;  %v1088_v13 = vld [vmem:[#allocation11 + $0xd8] sm:$0xff]  }
 0x1be   :  { %v151_v58 = vmul.f32 %v893_v53, %v142_v55 }
 0x1c0   :  { %v160_v60 = vadd.f32 %v894_v57, %v151_v58 }
 0x1c2   :  { %v161_v61 = vpack.c.bf16 %v160_v60, %v159_v59 }
 0x1c4   :  { %409 = vmatmul.mubr.bf16.vlgmr.msra.gmra.mrb[0].mxu0 %v161_v61  ;;  %452 = vmatmul.mubr.bf16.vlgmr.msra.gmra.mrb[0].mxu1 %v161_v61 }
 0x1c5   :  { %969 = vmatpush3.bf16.msra.mxu0 %v1077_v1  ;;  %991 = vmatpush3.bf16.msra.mxu1 %v1078_v3 }
 0x1c6   :  { %970 = vmatprep.subr.bf16.mxu0 %v1079_v4  ;;  %992 = vmatprep.subr.bf16.mxu1 %v1080_v5 }
 0x1c9   :  { %971 = vmatpush3.bf16.msra.mxu0 %v1081_v6  ;;  %993 = vmatpush3.bf16.msra.mxu1 %v1082_v7 }
 0x1ca   :  { %972 = vmatprep.subr.bf16.mxu0 %v1083_v8  ;;  %994 = vmatprep.subr.bf16.mxu1 %v1084_v9 }
 0x1cd   :  { %973 = vmatpush3.bf16.msra.mxu0 %v1085_v10  ;;  %995 = vmatpush3.bf16.msra.mxu1 %v1086_v11 }
 0x1ce   :  { %974 = vmatprep.subr.bf16.mxu0 %v1087_v12  ;;  %996 = vmatprep.subr.bf16.mxu1 %v1088_v13 }
 0x1d1   :  { %975 = vmatpush3.bf16.msra.mxu0 %v1089_v14  ;;  %997 = vmatpush3.bf16.msra.mxu1 %v1090_v15 }
 0x1d2   :  { %976 = vmatprep.subr.bf16.mxu0 %v1091_v16  ;;  %998 = vmatprep.subr.bf16.mxu1 %v1092_v17 }
 0x1d5   :  { %977 = vmatpush3.bf16.msra.mxu0 %v1093_v18  ;;  %999 = vmatpush3.bf16.msra.mxu1 %v1094_v19 }
 0x1d6   :  { %978 = vmatprep.subr.bf16.mxu0 %v1095_v20  ;;  %1000 = vmatprep.subr.bf16.mxu1 %v1096_v21 }
 0x1d9   :  { %979 = vmatpush3.bf16.msra.mxu0 %v1097_v22  ;;  %1001 = vmatpush3.bf16.msra.mxu1 %v1098_v23 }
 0x1da   :  { %980 = vmatprep.subr.bf16.mxu0 %v1099_v24  ;;  %1002 = vmatprep.subr.bf16.mxu1 %v1100_v25 }
 0x1dd   :  { %981 = vmatpush3.bf16.msra.mxu0 %v1101_v26  ;;  %1003 = vmatpush3.bf16.msra.mxu1 %v1102_v27 }
 0x1de   :  { %982 = vmatprep.subr.bf16.mxu0 %v1103_v28  ;;  %1004 = vmatprep.subr.bf16.mxu1 %v1104_v29 }
 0x1e1   :  { %983 = vmatpush3.bf16.msra.mxu0 %v1105_v30  ;;  %1005 = vmatpush3.bf16.msra.mxu1 %v1106_v31 }
 0x297   :  { %v410_v43 = vpop.f32.mrb[0].mxu0  ;;  %v453_v44 = vpop.f32.mrb[0].mxu1 }
 0x298   :  { %v411_v45 = vadd.f32 %v410_v43, %v199_v39  ;;  %v454_v46 = vadd.f32 %v453_v44, %v207_v40  ;;  %v412_v47 = vpop.f32.mrb[1].mxu0  ;;  %v455_v48 = vpop.f32.mrb[1].mxu1  ;;  %v935_v43 = vld [vmem:[#allocation13] ss:$0 sm:$0xff] }
 0x299   :  { %v413_v49 = vadd.f32 %v412_v47, %v203_v41  ;;  %v1498_v50 = vadd.f32 %v455_v48, %v211_v42  ;;  %v414_v51 = vpop.f32.mrb[2].mxu0  ;;  %v457_v52 = vpop.f32.mrb[2].mxu1 }
 0x29a   :  { %v927_v53 = vmul.f32 -1.442695, %v411_v45  ;;  %v929_v54 = vmul.f32 -1.442695, %v454_v46  ;;  %v415_v55 = vadd.f32 %v414_v51, %v199_v39  ;;  %v458_v56 = vadd.f32 %v457_v52, %v207_v40  ;;  %v416_v57 = vpop.f32.mrb[3].mxu0  ;;  %v459_v58 = vpop.f32.mrb[3].mxu1 }
 0x29b   :  { %v928_v59 = vmul.f32 -1.442695, %v413_v49  ;;  %v930_v60 = vmul.f32 -1.442695, %v1498_v50  ;;  %v417_v61 = vadd.f32 %v416_v57, %v203_v41  ;;  %v460_v62 = vadd.f32 %v459_v58, %v211_v42 }
 0x29c   :  { %1111 = vpow2.f32 %v927_v53  ;;  %v931_v63 = vmul.f32 -1.442695, %v415_v55  ;;  %v933_v1 = vmul.f32 -1.442695, %v458_v56 }
 0x29d   :  { %1113 = vpow2.f32 %v929_v54  ;;  %v932_v3 = vmul.f32 -1.442695, %v417_v61  ;;  %v934_v4 = vmul.f32 -1.442695, %v460_v62 }
 0x29e   :  { %1115 = vpow2.f32 %v928_v59 }
 0x29f   :  { %1117 = vpow2.f32 %v930_v60 }
 0x2a0   :  { %1119 = vpow2.f32 %v931_v63 }
 0x2a1   :  { %1121 = vpow2.f32 %v933_v1 }
 0x2a2   :  { %1123 = vpow2.f32 %v932_v3 }
 0x2a3   :  { %1125 = vpow2.f32 %v934_v4 }
 0x2a6   :  { %v1112_v5 = vpop.eup %1111 }
 0x2a7   :  { %v1114_v6 = vpop.eup %1113  ;;  %v486_v7 = vadd.f32 1.0, %v1112_v5 }
 0x2a8   :  { %v1116_v8 = vpop.eup %1115  ;;  %v488_v9 = vadd.f32 1.0, %v1114_v6 }
 0x2a9   :  { %v1118_v10 = vpop.eup %1117  ;;  %1127 = vrcp.f32 %v486_v7  ;;  %v487_v11 = vadd.f32 1.0, %v1116_v8 }
 0x2aa   :  { %v1120_v12 = vpop.eup %1119  ;;  %1129 = vrcp.f32 %v488_v9  ;;  %v489_v13 = vadd.f32 1.0, %v1118_v10 }
 0x2ab   :  { %v1122_v14 = vpop.eup %1121  ;;  %1131 = vrcp.f32 %v487_v11  ;;  %v490_v15 = vadd.f32 1.0, %v1120_v12 }
 0x2ac   :  { %v1124_v16 = vpop.eup %1123  ;;  %1133 = vrcp.f32 %v489_v13  ;;  %v492_v17 = vadd.f32 1.0, %v1122_v14 }
 0x2ad   :  { %v1126_v18 = vpop.eup %1125  ;;  %1135 = vrcp.f32 %v490_v15  ;;  %v491_v19 = vadd.f32 1.0, %v1124_v16 }
 0x2ae   :  { %1137 = vrcp.f32 %v492_v17  ;;  %v493_v20 = vadd.f32 1.0, %v1126_v18 }
 0x2af   :  { %1139 = vrcp.f32 %v491_v19 }
 0x2b0   :  { %1141 = vrcp.f32 %v493_v20 }
 0x2b3   :  { %v1128_v21 = vpop.eup %1127 }
 0x2b4   :  { %v1130_v22 = vpop.eup %1129  ;;  %v510_v27 = vmul.f32 %v1128_v21, %v411_v45 }
 0x2b5   :  { %v1132_v23 = vpop.eup %1131  ;;  %v512_v30 = vmul.f32 %v1130_v22, %v454_v46 }
 0x2b6   :  { %v1134_v24 = vpop.eup %1133  ;;  %v511_v33 = vmul.f32 %v1132_v23, %v413_v49 }
 0x2b7   :  { %v1136_v25 = vpop.eup %1135  ;;  %v513_v36 = vmul.f32 %v1134_v24, %v1498_v50 }
 0x2b8   :  { %v1138_v26 = vpop.eup %1137  ;;  %v514_v28 = vmul.f32 %v1136_v25, %v415_v55 }
 0x2b9   :  { %v1140_v29 = vpop.eup %1139  ;;  %v516_v31 = vmul.f32 %v1138_v26, %v458_v56 }
 0x2ba   :  { %v1142_v32 = vpop.eup %1141  ;;  %v518_v34 = vpack.c.bf16 %v514_v28, %v510_v27  ;;  %v515_v35 = vmul.f32 %v1140_v29, %v417_v61 }
 0x2bb   :  { %v520_v37 = vpack.c.bf16 %v516_v31, %v512_v30  ;;  %v517_v38 = vmul.f32 %v1142_v32, %v460_v62 }
 0x2bc   :  { %v519_v39 = vpack.c.bf16 %v515_v35, %v511_v33 }
 0x2bd   :  { %v521_v40 = vpack.c.bf16 %v517_v38, %v513_v36 }
 0x2be   :  { %817 = vmatprep.mubr.bf16.mxu0 %v519_v39 }
 0x2bf   :  { %858 = vmatprep.mubr.bf16.mxu1 %v521_v40  ;;  %818 = vmatmul.mubr.bf16.vlgmr.msra.gmra.mrb[4].mxu0 %v518_v34 }
 0x2c0   :  { %859 = vmatmul.mubr.bf16.vlgmr.msra.gmra.mrb[4].mxu1 %v520_v37 }
 0x392   :  { %v984_v41 = vpop.f32.mrb[4].mxu0 }
 0x393   :  { %v1006_v42 = vpop.f32.mrb[4].mxu1  ;;  %v985_v44 = vpop.f32.mrb[5].mxu0 }
 0x394   :  { %v986_v45 = vadd.f32 %v985_v44, %v984_v41  ;;  %v1007_v46 = vpop.f32.mrb[5].mxu1  ;;  %v987_v47 = vpop.f32.mrb[6].mxu0 }
 0x395   :  { %v1008_v48 = vadd.f32 %v1007_v46, %v1006_v42  ;;  %v1009_v49 = vpop.f32.mrb[6].mxu1  ;;  %v988_v51 = vpop.f32.mrb[7].mxu0 }
 0x396   :  { %v820_v52 = vadd.f32 %v986_v45, %v935_v43  ;;  %v989_v50 = vadd.f32 %v988_v51, %v987_v47  ;;  %v1010_v53 = vpop.f32.mrb[7].mxu1 }
 0x397   :  { %v1011_v54 = vadd.f32 %v1010_v53, %v1009_v49 }
 0x398   :  { %v861_v55 = vadd.f32 %v1008_v48, %v820_v52  ;;  %v823_v56 = vadd.f32 %v989_v50, %v935_v43 }
 0x39a   :  { %v867_v57 = vmul.f32 0.5, %v861_v55  ;;  %v864_v58 = vadd.f32 %v1011_v54, %v823_v56 }
 0x39c   :  { %v869_v59 = vadd.f32 %v867_v57, %v1482_v2  ;;  %v868_v60 = vmul.f32 0.5, %v864_v58 }
 0x39e   :  { %871 = vst [vmem:[#allocation14] sm:$0xff] %v869_v59  ;;  %v870_v61 = vadd.f32 %v868_v60, %v1478_v0 }
 0x3a0   :  { %872 = vst [vmem:[#allocation14 + $0x8] sm:$0x1] %v870_v61 }
 0x3a1   :  { %1308 = shalt.err (!%p1305_p4)
}
 0x3a2   :  { %s1309_s19 = scalar_lea.hbm %s1526_s7, 256 }
 0x3a3   :  { %p1310_p5 = scmp.ne.s32.totalorder %s1526_s7, %s1309_s19  ;;  %p1313_p6 = scmp.lt.u32.totalorder %s1309_s19, %s1526_s7 }
 0x3a5   :  { %p1315_p7 = pnand %p1313_p6, %p1310_p5 }
 0x3a7   :  { %1318 = shalt.err (!%p1315_p7)
}
 0x3a8   :  { %884 = dma.vmem_to_hbm [thread:$0]  %s879_s0, 256, %s1526_s7, [#allocation4], %s1337_s5, %s1337_s5, %s1338_s26  }
 0x3a9   :  { %1327 = dma.done.wait [#allocation4], 256  }
 0x3aa   :  { %1328 = vsyncadd [#allocation4], 4294967040 }
 0x3ab   :  { %888 = vsyncpa [#allocation3], 1 }
 0x3ac   :  { %889 = vsyncpa [#allocation6], 1 }
 0x3ad   :  { %890 = vsyncpa [#allocation9], 1 }
 0x3ae   :  { %891 = vsyncpa [#allocation12], 1 }
 0x3af   :  { %892 = vsyncpa [#allocation4], 1 }

// kernel: model2_forward_single.16
= control target key start
LH: loop header
LB: loop body
LE: loop exit
PB: predicated region body
PF: predicated region fallthrough
CT: control target
= control target key end

     0   :  { %12 = vsyncpa [#allocation5], 0  ;;  %s1836_s0 = inlined_call_operand.hbm [shape: bf16[9,128], index: 0, kind: input, shape index: {}]   ;;  %s1837_s1 = inlined_call_operand.hbm [shape: bf16[9,128], index: 1, kind: input, shape index: {}]   ;;  %s1838_s2 = inlined_call_operand.hbm [shape: bf16[9,128], index: 2, kind: input, shape index: {}]   ;;  %s1839_s3 = inlined_call_operand.hbm [shape: bf16[4,9,9], index: 3, kind: input, shape index: {}]   ;;  %s1840_s4 = inlined_call_operand.hbm [shape: f32[9,128], index: 4, kind: input, shape index: {}]   ;;  %s1841_s5 = inlined_call_operand.hbm [shape: bf16[128,128], index: 5, kind: input, shape index: {}]   ;;  %s1842_s6 = inlined_call_operand.hbm [shape: f32[1,128], index: 6, kind: input, shape index: {}]   ;;  %s1843_s7 = inlined_call_operand.hbm [shape: f32[9,128], index: 7, kind: output, shape index: {}]  }
   0x1   :  { %13 = vsyncpa [#allocation8], 0 }
   0x2   :  { %14 = vsyncpa [#allocation11], 0 }
   0x3   :  { %15 = vsyncpa [#allocation14], 0 }
   0x4   :  { %16 = vsyncpa [#allocation6], 0  ;;  %s1429_s24 = smov [#allocation7]   ;;  %s1430_s26 = smov [#allocation10]  }
   0x5   :  { %s34_s25 = sshll.u32 %s1429_s24, 4  ;;  %s58_s27 = sshll.u32 %s1430_s26, 4  ;;  %s35_s25 = int_to_ptr.vmem [resolvable:$true] %s34_s25  ;;  %s1491_s27 = int_to_ptr.vmem [resolvable:$true] %s58_s27 }
   0x6   :  { %s1243_s30 = scalar_lea.hbm %s1837_s1, 128 }
   0x7   :  { %p1244_p0 = scmp.ne.s32.totalorder %s1837_s1, %s1243_s30  ;;  %p1247_p1 = scmp.lt.u32.totalorder %s1243_s30, %s1837_s1 }
   0x9   :  { %p1249_p2 = pnand %p1247_p1, %p1244_p0 }
   0xb   :  { %1252 = shalt.err (!%p1249_p2)
}
   0xc   :  { %s1253_s12 = scalar_lea.vmem %s35_s25, 128  ;;  %p1258_p4 = scmp.lt.s32.totalorder %s35_s25, %s35_s25 }
   0xd   :  { %p1254_p3 = scmp.ne.s32.totalorder %s35_s25, %s1253_s12  ;;  %p1259_p5 = scmp.lt.s32.totalorder %s1253_s12, %s1253_s12 }
   0xf   :  { %p1260_p6 = por %p1259_p5, %p1258_p4 }
  0x11   :  { %p1261_p7 = pnand %p1260_p6, %p1254_p3 }
  0x13   :  { %1264 = shalt.err (!%p1261_p7)
}
  0x14   :  { %s1431_s13 = smov 64   ;;  %s1432_s14 = smov 4  }
  0x15   :  { %40 = dma.hbm_to_vmem [thread:$0]  %s1837_s1, 128, %s35_s25, [#allocation8], %s1431_s13, %s1431_s13, %s1432_s14  }
  0x16   :  { %s1265_s19 = scalar_lea.hbm %s1839_s3, 512 }
  0x17   :  { %p1266_p8 = scmp.ne.s32.totalorder %s1839_s3, %s1265_s19  ;;  %p1269_p9 = scmp.lt.u32.totalorder %s1265_s19, %s1839_s3 }
  0x19   :  { %p1271_p10 = pnand %p1269_p9, %p1266_p8 }
  0x1b   :  { %1274 = shalt.err (!%p1271_p10)
}
  0x1c   :  { %s1275_s24 = scalar_lea.vmem %s1491_s27, 512  ;;  %p1280_p12 = scmp.lt.s32.totalorder %s1491_s27, %s1491_s27 }
  0x1d   :  { %p1276_p11 = scmp.ne.s32.totalorder %s1491_s27, %s1275_s24  ;;  %p1281_p13 = scmp.lt.s32.totalorder %s1275_s24, %s1275_s24 }
  0x1f   :  { %p1282_p0 = por %p1281_p13, %p1280_p12 }
  0x21   :  { %p1283_p1 = pnand %p1282_p0, %p1276_p11 }
  0x23   :  { %1286 = shalt.err (!%p1283_p1)
}
  0x24   :  { %64 = dma.hbm_to_vmem [thread:$0]  %s1839_s3, 512, %s1491_s27, [#allocation11], %s1431_s13, %s1431_s13, %s1432_s14  }
  0x25   :  { %s1433_s26 = smov [#allocation13]   ;;  %s1434_s29 = smov [#allocation4]  }
  0x26   :  { %s82_s28 = sshll.u32 %s1433_s26, 4  ;;  %s22_s30 = sshll.u32 %s1434_s29, 4  ;;  %s83_s28 = int_to_ptr.vmem [resolvable:$true] %s82_s28  ;;  %s1528_s30 = int_to_ptr.vmem [resolvable:$true] %s22_s30 }
  0x27   :  { %s1287_s10 = scalar_lea.hbm %s1841_s5, 1024 }
  0x28   :  { %p1288_p2 = scmp.ne.s32.totalorder %s1841_s5, %s1287_s10  ;;  %p1291_p3 = scmp.lt.u32.totalorder %s1287_s10, %s1841_s5 }
  0x2a   :  { %p1293_p4 = pnand %p1291_p3, %p1288_p2 }
  0x2c   :  { %1296 = shalt.err (!%p1293_p4)
}
  0x2d   :  { %s1297_s3 = scalar_lea.vmem %s83_s28, 1024  ;;  %p1302_p6 = scmp.lt.s32.totalorder %s83_s28, %s83_s28 }
  0x2e   :  { %p1298_p5 = scmp.ne.s32.totalorder %s83_s28, %s1297_s3  ;;  %p1303_p7 = scmp.lt.s32.totalorder %s1297_s3, %s1297_s3 }
  0x30   :  { %p1304_p8 = por %p1303_p7, %p1302_p6 }
  0x32   :  { %p1305_p9 = pnand %p1304_p8, %p1298_p5 }
  0x34   :  { %1308 = shalt.err (!%p1305_p9)
}
  0x35   :  { %88 = dma.hbm_to_vmem [thread:$0]  %s1841_s5, 1024, %s83_s28, [#allocation14], %s1431_s13, %s1431_s13, %s1432_s14  }
  0x36   :  { %s1309_s20 = scalar_lea.hbm %s1836_s0, 128 }
  0x37   :  { %p1310_p10 = scmp.ne.s32.totalorder %s1836_s0, %s1309_s20  ;;  %p1313_p11 = scmp.lt.u32.totalorder %s1309_s20, %s1836_s0 }
  0x39   :  { %p1315_p12 = pnand %p1313_p11, %p1310_p10 }
  0x3b   :  { %1318 = shalt.err (!%p1315_p12)
}
  0x3c   :  { %s1319_s1 = scalar_lea.vmem %s1528_s30, 128  ;;  %p1324_p0 = scmp.lt.s32.totalorder %s1528_s30, %s1528_s30 }
  0x3d   :  { %p1320_p13 = scmp.ne.s32.totalorder %s1528_s30, %s1319_s1  ;;  %p1325_p1 = scmp.lt.s32.totalorder %s1319_s1, %s1319_s1 }
  0x3f   :  { %p1326_p2 = por %p1325_p1, %p1324_p0 }
  0x41   :  { %p1327_p3 = pnand %p1326_p2, %p1320_p13 }
  0x43   :  { %1330 = shalt.err (!%p1327_p3)
}
  0x44   :  { %28 = dma.hbm_to_vmem [thread:$0]  %s1836_s0, 128, %s1528_s30, [#allocation5], %s1431_s13, %s1431_s13, %s1432_s14  }
  0x45   :  { %s1435_s26 = smov [#allocation9]   ;;  %s1436_s29 = smov [#allocation12]  }
  0x46   :  { %s46_s28 = sshll.u32 %s1435_s26, 4  ;;  %s70_s8 = sshll.u32 %s1436_s29, 4  ;;  %s47_s28 = int_to_ptr.vmem [resolvable:$true] %s46_s28  ;;  %s1565_s8 = int_to_ptr.vmem [resolvable:$true] %s70_s8 }
  0x47   :  { %s1331_s11 = scalar_lea.hbm %s1838_s2, 128 }
  0x48   :  { %p1332_p4 = scmp.ne.s32.totalorder %s1838_s2, %s1331_s11  ;;  %p1335_p5 = scmp.lt.u32.totalorder %s1331_s11, %s1838_s2 }
  0x4a   :  { %p1337_p6 = pnand %p1335_p5, %p1332_p4 }
  0x4c   :  { %1340 = shalt.err (!%p1337_p6)
}
  0x4d   :  { %s1341_s0 = scalar_lea.vmem %s47_s28, 128  ;;  %p1346_p8 = scmp.lt.s32.totalorder %s47_s28, %s47_s28 }
  0x4e   :  { %p1342_p7 = scmp.ne.s32.totalorder %s47_s28, %s1341_s0  ;;  %p1347_p9 = scmp.lt.s32.totalorder %s1341_s0, %s1341_s0 }
  0x50   :  { %p1348_p10 = por %p1347_p9, %p1346_p8 }
  0x52   :  { %p1349_p11 = pnand %p1348_p10, %p1342_p7 }
  0x54   :  { %1352 = shalt.err (!%p1349_p11)
}
  0x55   :  { %52 = dma.hbm_to_vmem [thread:$0]  %s1838_s2, 128, %s47_s28, [#allocation8], %s1431_s13, %s1431_s13, %s1432_s14  }
  0x56   :  { %s1353_s19 = scalar_lea.hbm %s1840_s4, 256 }
  0x57   :  { %p1354_p12 = scmp.ne.s32.totalorder %s1840_s4, %s1353_s19  ;;  %p1357_p13 = scmp.lt.u32.totalorder %s1353_s19, %s1840_s4 }
  0x59   :  { %p1359_p0 = pnand %p1357_p13, %p1354_p12 }
  0x5b   :  { %1362 = shalt.err (!%p1359_p0)
}
  0x5c   :  { %s1363_s24 = scalar_lea.vmem %s1565_s8, 256  ;;  %p1368_p2 = scmp.lt.s32.totalorder %s1565_s8, %s1565_s8 }
  0x5d   :  { %p1364_p1 = scmp.ne.s32.totalorder %s1565_s8, %s1363_s24  ;;  %p1369_p3 = scmp.lt.s32.totalorder %s1363_s24, %s1363_s24 }
  0x5f   :  { %p1370_p4 = por %p1369_p3, %p1368_p2 }
  0x61   :  { %p1371_p5 = pnand %p1370_p4, %p1364_p1 }
  0x63   :  { %1374 = shalt.err (!%p1371_p5)
}
  0x64   :  { %s1437_s2 = smov 128   ;;  %s1438_s14 = smov 8  }
  0x65   :  { %76 = dma.hbm_to_vmem [thread:$0]  %s1840_s4, 256, %s1565_s8, [#allocation11], %s1437_s2, %s1437_s2, %s1438_s14  }
  0x66   :  { %s1439_s25 = smov [#allocation15]   ;;  %s1375_s9 = scalar_lea.hbm %s1842_s6, 16 }
  0x67   :  { %s95_s26 = sshll.u32 %s1439_s25, 4  ;;  %p1376_p6 = scmp.ne.s32.totalorder %s1842_s6, %s1375_s9  ;;  %s96_s26 = int_to_ptr.vmem [resolvable:$true] %s95_s26 }
  0x68   :  { %p1379_p7 = scmp.lt.u32.totalorder %s1375_s9, %s1842_s6 }
  0x6a   :  { %p1381_p8 = pnand %p1379_p7, %p1376_p6 }
  0x6c   :  { %1384 = shalt.err (!%p1381_p8)
}
  0x6d   :  { %s1385_s16 = scalar_lea.vmem %s96_s26, 16  ;;  %s1389_s4 = scalar_lea.vmem %s96_s26, 32 }
  0x6e   :  { %p1386_p9 = scmp.ne.s32.totalorder %s96_s26, %s1385_s16  ;;  %p1390_p10 = scmp.lt.s32.totalorder %s96_s26, %s96_s26 }
  0x6f   :  { %p1391_p11 = scmp.lt.s32.totalorder %s1389_s4, %s1385_s16 }
  0x71   :  { %p1392_p12 = por %p1391_p11, %p1390_p10 }
  0x73   :  { %p1393_p13 = pnand %p1392_p12, %p1386_p9 }
  0x75   :  { %1396 = shalt.err (!%p1393_p13)
}
  0x76   :  { %98 = dma.hbm_to_vmem [thread:$0]  %s1842_s6, 16, %s96_s26, [#allocation14]  }
  0x77   :  { %1419 = dma.done.wait [#allocation5], 128  }
  0x78   :  { %1420 = vsyncadd [#allocation5], 4294967168 }
  0x79   :  { %1421 = dma.done.wait [#allocation8], 256  }
  0x7a   :  { %1422 = vsyncadd [#allocation8], 4294967040 }
  0x7b   :  { %1423 = dma.done.wait [#allocation11], 768  }
  0x7c   :  { %1424 = vsyncadd [#allocation11], 4294966528 }
  0x7d   :  { %1425 = dma.done.wait [#allocation14], 1040  }
  0x7e   :  { %1426 = vsyncadd [#allocation14], 4294966256  ;;  %v1440_v0 = vmov 0.0   ;;  %vm1441_vm0 = vmmov 0   ;;  %vm157_vm1 = vcmask 261120   ;;  %v1442_v4 = vmov -inf  }
  0x7f   :  { %1089 = vmatprep.subr.bf16.mxu0 %v1440_v0  ;;  %129 = vst [vmem:[#allocation2 + $0x18] sm:$0x1] %v1440_v0  ;;  %131 = vst [vmem:[#allocation3 + $0x8] sm:$0x1] %v1440_v0  ;;  %1091 = vmatprep.mubr.msk.bf16.mxu0 %vm1441_vm0, %v1440_v0  ;;  %v1196_v1 = vld [vmem:[#allocation7] sm:$0x1f]  }
  0x80   :  { %1113 = vmatprep.subr.bf16.mxu1 %v1440_v0  ;;  %1115 = vmatprep.mubr.msk.bf16.mxu1 %vm1441_vm0, %v1440_v0  ;;  %v162_v2 = vsel %vm157_vm1, %v1196_v1, 0  ;;  %v1197_v3 = vld [vmem:[#allocation4] sm:$0x1f]   ;;  %126 = vst [vmem:[#allocation2 + $0x8] sm:$0x1] %v1442_v4  ;;  %vm207_vm2 = vcmask 72704  }
  0x81   :  { %1090 = vmatpush3.bf16.xpose.msra.mxu0 %v162_v2  ;;  %v1627_v5 = vld [vmem:[#allocation10] ss:$8 sps:$4 sm:$0xff]   ;;  %v144_v6 = vld [vmem:[#allocation10 + $0x4] sm:$0x1]  ;;  %vm211_vm3 = vcmask 65536   ;;  %v1443_v19 = vmov 0  }
  0x82   :  { %1095 = vmatprep.subr.bf16.mxu0 %v1440_v0  ;;  %v145_v7 = vunpack.c.l.bf16 %v1627_v5  ;;  %v146_v8 = vunpack.c.l.bf16 %v144_v6  ;;  %1179 = vset.pattern.permute.xlu1 %v1443_v19  ;;  %s1444_s6 = smov 96   ;;  %v1644_v24 = vld [vmem:[#allocation9] sm:$0x1f]   ;;  %vm258_vm4 = vcmask 1043456   ;;  %vm259_vm5 = vcmask 1044480   ;;  %s1446_s0 = smov 32  }
  0x83   :  { %v1445_v25 = vmov 65535   ;;  %v496_v50 = vld [vmem:[#allocation10 + $0x14] sm:$0x1]  ;;  %v495_v56 = vld [vmem:[#allocation10 + $0x10] ss:$8 sps:$4 sm:$0xff]   ;;  %v329_v60 = vunpack.c.h.bf16 %v1627_v5  ;;  %vm832_vm6 = vcmask 523264  }
  0x84   :  { %v260_v26 = vsel %vm258_vm4, 4294967295, %v1445_v25  ;;  %v498_v57 = vunpack.c.l.bf16 %v496_v50  ;;  %v328_v58 = vld [vmem:[#allocation10 + $0xc] sm:$0x1]  ;;  %v664_v59 = vld [vmem:[#allocation10 + $0x1c] sm:$0x1]  ;;  %v497_v61 = vunpack.c.l.bf16 %v495_v56  ;;  %vm835_vm7 = vcmask 785408  }
  0x85   :  { %v1646_v27 = vsel %vm259_vm5, %v260_v26, 0  ;;  %v330_v62 = vunpack.c.l.bf16 %v328_v58  ;;  %v666_v2 = vunpack.c.l.bf16 %v664_v59 }
  0x86   :  { %v263_v28 = vand.u32 %v1644_v24, %v1646_v27 }
  0x87   :  { %v1636_v21 = vld [vmem:[#allocation2 + $0x8] sm:$0x1] }
  0x88   :  { %1092 = vmatmul.mubr.msk.bf16.vlgmr.msra.gmra.mrb[0].mxu0 %vm157_vm1, %v1197_v3 }
  0x89   :  { %1097 = vmatprep.mubr.msk.bf16.mxu0 %vm1441_vm0, %v1440_v0  ;;  %1096 = vmatpush3.bf16.msra.mxu0 %v263_v28 }
  0x8a   :  { %1101 = vmatprep.subr.bf16.mxu0 %v1440_v0 }
 0x15b   :  { %v198_v9 = vpop.f32.mrb[0].mxu0 }
 0x15c   :  { %v199_v10 = vadd.f32 %v198_v9, %v145_v7  ;;  %v1093_v11 = vpop.f32.mrb[1].mxu0 }
 0x15d   :  { %v201_v12 = vpop.f32.mrb[2].mxu0 }
 0x15e   :  { %v205_v13 = vmul.f32 0.17677669, %v199_v10  ;;  %v202_v14 = vadd.f32 %v201_v12, %v146_v8  ;;  %v1094_v15 = vpop.f32.mrb[3].mxu0  ;;  %v665_v8 = vunpack.c.h.bf16 %v495_v56 }
 0x160   :  { %v206_v16 = vmul.f32 0.17677669, %v202_v14  ;;  %v208_v17 = vsel %vm207_vm2, %v205_v13, -inf }
 0x161   :  { %209 = vmax.xlane.f32.xlu0 %v208_v17 }
 0x162   :  { %v212_v18 = vsel %vm211_vm3, %v206_v16, -inf }
 0x165   :  { %213 = vmax.xlane.f32.xlu0 %v212_v18 }
 0x17b   :  { %333 = vrot.lane.b32.xlu0 %v1196_v1, %s1444_s6 }
 0x1ee   :  { %v1634_v20 = vpop.xlane.xlu0 %209 }
 0x1ef   :  { %225 = vperm.xlu1 %1179, %v1634_v20  }
 0x1f2   :  { %v214_v22 = vpop.xlane.xlu0 %213 }
 0x1f3   :  { %v1640_v23 = vmax.f32 %v1636_v21, %v214_v22 }
 0x1f5   :  { %230 = vperm.xlu1 %1179, %v1640_v23  }
 0x1f6   :  { %v334_v39 = vpop.permute.xlu0 %333 }
 0x1f7   :  { %v339_v42 = vsel %vm157_vm1, %v334_v39, 0 }
 0x1f9   :  { %331 = vrot.lane.b32.xlu1 %v1197_v3, %s1444_s6 }
 0x1fd   :  { %501 = vrot.lane.b32.xlu1 %v1196_v1, %s1431_s13 }
 0x201   :  { %499 = vrot.lane.b32.xlu1 %v1197_v3, %s1431_s13 }
 0x205   :  { %669 = vrot.lane.b32.xlu1 %v1196_v1, %s1446_s0 }
 0x209   :  { %667 = vrot.lane.b32.xlu1 %v1197_v3, %s1446_s0 }
 0x26e   :  { %v226_v29 = vpop.permute.xlu1 %225 }
 0x26f   :  { %v233_v30 = vsub.f32 %v205_v13, %v226_v29 }
 0x271   :  { %v235_v31 = vmul.f32 1.442695, %v233_v30 }
 0x273   :  { %1207 = vpow2.f32 %v235_v31 }
 0x274   :  { %v1655_v32 = vpop.permute.xlu1 %230 }
 0x275   :  { %v234_v33 = vsub.f32 %v206_v16, %v1655_v32 }
 0x277   :  { %v237_v34 = vmul.f32 1.442695, %v234_v33 }
 0x278   :  { %v332_v35 = vpop.permute.xlu1 %331 }
 0x279   :  { %1209 = vpow2.f32 %v237_v34 }
 0x27c   :  { %v502_v36 = vpop.permute.xlu1 %501 }
 0x27d   :  { %v507_v37 = vsel %vm157_vm1, %v502_v36, 0  ;;  %v1660_v40 = vpop.eup %1207 }
 0x27e   :  { %1114 = vmatpush3.bf16.xpose.msra.mxu1 %v507_v37 }
 0x27f   :  { %1125 = vmatprep.subr.bf16.mxu1 %v1440_v0 }
 0x280   :  { %v500_v38 = vpop.permute.xlu1 %499 }
 0x283   :  { %v1662_v41 = vpop.eup %1209 }
 0x284   :  { %v249_v43 = vpack.c.bf16 %v1662_v41, %v1660_v40  ;;  %v670_v44 = vpop.permute.xlu1 %669  ;;  %v244_v50 = vsel %vm211_vm3, %v1662_v41, 0.0 }
 0x285   :  { %1116 = vmatmul.mubr.msk.bf16.vlgmr.msra.gmra.mrb[0].mxu1 %vm157_vm1, %v500_v38  ;;  %v675_v45 = vsel %vm157_vm1, %v670_v44, 0 }
 0x286   :  { %1098 = vmatmul.mubr.msk.bf16.vlgmr.msra.gmra.mrb[4].mxu0 %vm207_vm2, %v249_v43  ;;  %1126 = vmatpush3.bf16.xpose.msra.mxu1 %v675_v45  ;;  %v1448_v43 = vmov 64  }
 0x287   :  { %1102 = vmatpush3.bf16.xpose.msra.mxu0 %v339_v42  ;;  %1103 = vmatprep.mubr.msk.bf16.mxu0 %vm1441_vm0, %v1440_v0 }
 0x288   :  { %1127 = vmatprep.mubr.msk.bf16.mxu1 %vm1441_vm0, %v1440_v0  ;;  %1107 = vmatprep.subr.bf16.mxu0 %v1440_v0  ;;  %v668_v46 = vpop.permute.xlu1 %667 }
 0x289   :  { %1137 = vmatprep.subr.bf16.mxu1 %v1440_v0 }
 0x28d   :  { %1128 = vmatmul.mubr.msk.bf16.vlgmr.msra.gmra.mrb[4].mxu1 %vm157_vm1, %v668_v46 }
 0x28e   :  { %1104 = vmatmul.mubr.msk.bf16.vlgmr.msra.gmra.mrb[8].mxu0 %vm157_vm1, %v332_v35  ;;  %1153 = vmatprep.mubr.msk.bf16.mxu1 %vm1441_vm0, %v1440_v0  ;;  %v1447_v35 = vmov 32  }
 0x28f   :  { %1109 = vmatprep.mubr.msk.bf16.mxu0 %vm1441_vm0, %v1440_v0  ;;  %1180 = vset.pattern.permute.xlu0 %v1447_v35 }
 0x290   :  { %1181 = vset.pattern.permute.xlu1 %v1447_v35 }
 0x358   :  { %v543_v47 = vpop.f32.mrb[0].mxu1 }
 0x359   :  { %v1682_v48 = vpop.f32.mrb[4].mxu0  ;;  %v1117_v49 = vpop.f32.mrb[1].mxu1  ;;  %v544_v10 = vadd.f32 %v543_v47, %v497_v61  ;;  %v1449_v47 = vmov 96  }
 0x35a   :  { %v1099_v51 = vpop.f32.mrb[5].mxu0  ;;  %v546_v52 = vpop.f32.mrb[2].mxu1 }
 0x35b   :  { %v1684_v53 = vpop.f32.mrb[6].mxu0  ;;  %v1118_v54 = vpop.f32.mrb[3].mxu1  ;;  %v547_v63 = vadd.f32 %v546_v52, %v498_v57  ;;  %v550_v25 = vmul.f32 0.17677669, %v544_v10  ;;  %v241_v51 = vsel %vm207_vm2, %v1660_v40, 0.0 }
 0x35c   :  { %v1100_v55 = vpop.f32.mrb[7].mxu0 }
 0x35d   :  { %v1687_v16 = vmul.f32 0.17677669, %v547_v63  ;;  %v552_v31 = vsel %vm207_vm2, %v550_v25, -inf }
 0x35f   :  { %v555_v28 = vsel %vm211_vm3, %v1687_v16, -inf }
 0x360   :  { %v711_v1 = vpop.f32.mrb[4].mxu1 }
 0x361   :  { %v375_v3 = vpop.f32.mrb[8].mxu0  ;;  %v1129_v4 = vpop.f32.mrb[5].mxu1  ;;  %v712_v22 = vadd.f32 %v711_v1, %v665_v8 }
 0x362   :  { %v376_v6 = vadd.f32 %v375_v3, %v329_v60  ;;  %v1105_v7 = vpop.f32.mrb[9].mxu0  ;;  %v714_v9 = vpop.f32.mrb[6].mxu1 }
 0x363   :  { %v378_v11 = vpop.f32.mrb[10].mxu0  ;;  %v1130_v12 = vpop.f32.mrb[7].mxu1  ;;  %v715_v5 = vadd.f32 %v714_v9, %v666_v2  ;;  %v718_v30 = vmul.f32 0.17677669, %v712_v22 }
 0x364   :  { %v382_v13 = vmul.f32 0.17677669, %v376_v6  ;;  %v379_v14 = vadd.f32 %v378_v11, %v330_v62  ;;  %v1106_v15 = vpop.f32.mrb[11].mxu0 }
 0x365   :  { %v1693_v29 = vmul.f32 0.17677669, %v715_v5  ;;  %v720_v34 = vsel %vm207_vm2, %v718_v30, -inf }
 0x366   :  { %v383_v17 = vmul.f32 0.17677669, %v379_v14  ;;  %v384_v18 = vsel %vm207_vm2, %v382_v13, -inf }
 0x367   :  { %385 = vmax.xlane.f32.xlu1 %v384_v18  ;;  %v723_v33 = vsel %vm211_vm3, %v1693_v29, -inf }
 0x368   :  { %v387_v26 = vsel %vm211_vm3, %v383_v17, -inf }
 0x369   :  { %388 = vmax.xlane.f32.xlu0 %v387_v26 }
 0x36b   :  { %556 = vmax.xlane.f32.xlu1 %v555_v28  ;;  %v218_v28 = vsub.f32 %v1636_v21, %v1640_v23 }
 0x36d   :  { %553 = vmax.xlane.f32.xlu0 %v552_v31 }
 0x36f   :  { %724 = vmax.xlane.f32.xlu1 %v723_v33 }
 0x371   :  { %721 = vmax.xlane.f32.xlu0 %v720_v34  ;;  %v221_v34 = vmul.f32 1.442695, %v218_v28 }
 0x3f4   :  { %v1701_v36 = vpop.xlane.xlu1 %385 }
 0x3f5   :  { %400 = vperm.xlu0 %1180, %v1701_v36  }
 0x3f6   :  { %v389_v37 = vpop.xlane.xlu0 %388 }
 0x3f7   :  { %v1704_v38 = vmax.f32 %v1636_v21, %v389_v37 }
 0x3f8   :  { %v557_v42 = vpop.xlane.xlu1 %556 }
 0x3f9   :  { %405 = vperm.xlu1 %1181, %v1704_v38   ;;  %761 = vrot.lane.b32.xlu0 %v1644_v24, %s1446_s0  ;;  %v1716_v44 = vmax.f32 %v1636_v21, %v557_v42 }
 0x3fa   :  { %v1708_v39 = vpop.xlane.xlu0 %553  ;;  %1184 = vset.pattern.permute.xlu0 %v1443_v19 }
 0x3fc   :  { %v725_v46 = vpop.xlane.xlu1 %724 }
 0x3fd   :  { %1182 = vset.pattern.permute.xlu1 %v1448_v43  ;;  %v1724_v49 = vmax.f32 %v1636_v21, %v725_v46 }
 0x3fe   :  { %568 = vperm.xlu1 %1182, %v1708_v39   ;;  %v1718_v45 = vpop.xlane.xlu0 %721 }
 0x402   :  { %573 = vperm.xlu1 %1182, %v1716_v44  }
 0x406   :  { %1183 = vset.pattern.permute.xlu1 %v1449_v47 }
 0x407   :  { %736 = vperm.xlu1 %1183, %v1718_v45  }
 0x40b   :  { %741 = vperm.xlu1 %1183, %v1724_v49  }
 0x40f   :  { %425 = vrot.lane.b32.xlu1 %v1644_v24, %s1444_s6 }
 0x410   :  { %1185 = vset.pattern.permute.xlu1 %v1443_v19 }
 0x413   :  { %593 = vrot.lane.b32.xlu1 %v1644_v24, %s1431_s13 }
 0x418   :  { %245 = vadd.xlane.f32.xlu0 %v244_v50 }
 0x437   :  { %242 = vadd.xlane.f32.xlu1 %v241_v51  ;;  %v217_v51 = vsub.f32 -inf, %v1634_v20 }
 0x474   :  { %v401_v54 = vpop.permute.xlu0 %400 }
 0x475   :  { %v408_v55 = vsub.f32 %v382_v13, %v401_v54  ;;  %v219_v54 = vmul.f32 1.442695, %v217_v51 }
 0x477   :  { %v410_v59 = vmul.f32 1.442695, %v408_v55  ;;  %v393_v55 = vsub.f32 %v1636_v21, %v1704_v38  ;;  %v560_v38 = vsub.f32 -inf, %v1708_v39 }
 0x478   :  { %v406_v52 = vpop.permute.xlu1 %405  ;;  %v762_v26 = vpop.permute.xlu0 %761 }
 0x479   :  { %v409_v56 = vsub.f32 %v383_v17, %v406_v52  ;;  %v831_v1 = vsel %vm157_vm1, %v1655_v32, %v406_v52 }
 0x47b   :  { %v412_v61 = vmul.f32 1.442695, %v409_v56 }
 0x47d   :  { %v569_v57 = vpop.permute.xlu1 %568 }
 0x47e   :  { %v576_v58 = vsub.f32 %v550_v25, %v569_v57  ;;  %v396_v57 = vmul.f32 1.442695, %v393_v55 }
 0x480   :  { %v578_v60 = vmul.f32 1.442695, %v576_v58  ;;  %v728_v58 = vsub.f32 -inf, %v1718_v45  ;;  %v561_v45 = vsub.f32 %v1636_v21, %v1716_v44 }
 0x481   :  { %v574_v62 = vpop.permute.xlu1 %573 }
 0x482   :  { %1211 = vpow2.f32 %v578_v60  ;;  %v577_v24 = vsub.f32 %v1687_v16, %v574_v62  ;;  %v834_v3 = vsel %vm832_vm6, %v831_v1, %v574_v62  ;;  %v730_v62 = vmul.f32 1.442695, %v728_v58 }
 0x483   :  { %1213 = vpow2.f32 %v410_v59 }
 0x484   :  { %v580_v41 = vmul.f32 1.442695, %v577_v24  ;;  %1215 = vpow2.f32 %v412_v61 }
 0x486   :  { %1217 = vpow2.f32 %v580_v41  ;;  %v737_v40 = vpop.permute.xlu1 %736  ;;  %v562_v41 = vmul.f32 1.442695, %v560_v38 }
 0x487   :  { %v744_v63 = vsub.f32 %v718_v30, %v737_v40  ;;  %v767_v30 = vand.u32 %v762_v26, %v1646_v27  ;;  %v564_v40 = vmul.f32 1.442695, %v561_v45  ;;  %v1202_v26 = vld [vmem:[#allocation13 + $0x18] sm:$0xff]  }
 0x489   :  { %v746_v2 = vmul.f32 1.442695, %v744_v63  ;;  %v729_v63 = vsub.f32 %v1636_v21, %v1724_v49 }
 0x48a   :  { %v742_v4 = vpop.permute.xlu1 %741 }
 0x48b   :  { %1219 = vpow2.f32 %v746_v2  ;;  %v745_v6 = vsub.f32 %v1693_v29, %v742_v4  ;;  %v837_v7 = vsel %vm835_vm7, %v834_v3, %v742_v4  ;;  %v732_v1 = vmul.f32 1.442695, %v729_v63 }
 0x48c   :  { %v1212_v8 = vpop.eup %1211  ;;  %839 = vst [vmem:[#allocation2 + $0x8] sm:$0x1] %v837_v7 }
 0x48d   :  { %v748_v9 = vmul.f32 1.442695, %v745_v6  ;;  %v584_v10 = vsel %vm207_vm2, %v1212_v8, 0.0  ;;  %v1214_v11 = vpop.eup %1213 }
 0x48e   :  { %585 = vadd.xlane.f32.xlu0 %v584_v10  ;;  %v426_v12 = vpop.permute.xlu1 %425  ;;  %v1216_v13 = vpop.eup %1215  ;;  %v416_v15 = vsel %vm207_vm2, %v1214_v11, 0.0  ;;  %v392_v10 = vsub.f32 -inf, %v1701_v36 }
 0x48f   :  { %1221 = vpow2.f32 %v748_v9  ;;  %v431_v32 = vand.u32 %v426_v12, %v1646_v27  ;;  %v424_v5 = vpack.c.bf16 %v1216_v13, %v1214_v11  ;;  %v419_v37 = vsel %vm211_vm3, %v1216_v13, 0.0 }
 0x490   :  { %v1218_v14 = vpop.eup %1217  ;;  %1223 = vpow2.f32 %v221_v34  ;;  %v394_v49 = vmul.f32 1.442695, %v392_v10 }
 0x491   :  { %1108 = vmatpush3.bf16.msra.mxu0 %v431_v32  ;;  %v587_v16 = vsel %vm211_vm3, %v1218_v14, 0.0  ;;  %v592_v33 = vpack.c.bf16 %v1218_v14, %v1212_v8  ;;  %1225 = vpow2.f32 %v219_v54 }
 0x492   :  { %417 = vadd.xlane.f32.xlu0 %v416_v15  ;;  %588 = vadd.xlane.f32.xlu1 %v587_v16  ;;  %v594_v17 = vpop.permute.xlu1 %593  ;;  %1227 = vpow2.f32 %v396_v57 }
 0x493   :  { %v599_v18 = vand.u32 %v594_v17, %v1646_v27  ;;  %1119 = vmatprep.subr.bf16.mxu0 %v1440_v0  ;;  %v1762_v27 = vld [vmem:[#allocation2 + $0x18] sm:$0x1]  ;;  %1229 = vpow2.f32 %v730_v62 }
 0x494   :  { %1110 = vmatmul.mubr.msk.bf16.vlgmr.msra.gmra.mrb[12].mxu0 %vm207_vm2, %v424_v5  ;;  %1231 = vpow2.f32 %v562_v41 }
 0x495   :  { %v1220_v22 = vpop.eup %1219  ;;  %1120 = vmatpush3.bf16.msra.mxu0 %v599_v18  ;;  %1121 = vmatprep.mubr.msk.bf16.mxu0 %vm1441_vm0, %v1440_v0  ;;  %1233 = vpow2.f32 %v564_v40 }
 0x496   :  { %v752_v25 = vsel %vm207_vm2, %v1220_v22, 0.0  ;;  %1131 = vmatprep.subr.bf16.mxu0 %v1440_v0  ;;  %1235 = vpow2.f32 %v732_v1 }
 0x497   :  { %753 = vadd.xlane.f32.xlu0 %v752_v25  ;;  %1237 = vpow2.f32 %v394_v49  ;;  %v1200_v25 = vld [vmem:[#allocation13 + $0x8] sm:$0xff]  }
 0x499   :  { %v1222_v29 = vpop.eup %1221 }
 0x49a   :  { %v755_v31 = vsel %vm211_vm3, %v1222_v29, 0.0  ;;  %v760_v23 = vpack.c.bf16 %v1222_v29, %v1220_v22  ;;  %v1224_v42 = vpop.eup %1223 }
 0x49b   :  { %756 = vadd.xlane.f32.xlu1 %v755_v31  ;;  %v240_v50 = vmul.f32 %v1224_v42, %v1762_v27  ;;  %v1226_v56 = vpop.eup %1225 }
 0x49c   :  { %1122 = vmatmul.mubr.msk.bf16.vlgmr.msra.gmra.mrb[16].mxu0 %vm207_vm2, %v592_v33  ;;  %v239_v59 = vmul.f32 0.0, %v1226_v56  ;;  %v1228_v20 = vpop.eup %1227  ;;  %v1204_v33 = vld [vmem:[#allocation13 + $0x28] sm:$0xff]  }
 0x49d   :  { %1132 = vmatpush3.bf16.msra.mxu0 %v767_v30  ;;  %1133 = vmatprep.mubr.msk.bf16.mxu0 %vm1441_vm0, %v1440_v0  ;;  %v1230_v24 = vpop.eup %1229  ;;  %v415_v18 = vmul.f32 %v1228_v20, %v1762_v27  ;;  %v1203_v30 = vld [vmem:[#allocation13 + $0x20] sm:$0xff]  }
 0x49e   :  { %v1232_v2 = vpop.eup %1231  ;;  %v750_v11 = vmul.f32 0.0, %v1230_v24 }
 0x49f   :  { %420 = vadd.xlane.f32.xlu1 %v419_v37  ;;  %v582_v3 = vmul.f32 0.0, %v1232_v2  ;;  %v1234_v4 = vpop.eup %1233 }
 0x4a0   :  { %v583_v39 = vmul.f32 %v1234_v4, %v1762_v27  ;;  %v1236_v12 = vpop.eup %1235 }
 0x4a1   :  { %v751_v32 = vmul.f32 %v1236_v12, %v1762_v27  ;;  %v1238_v16 = vpop.eup %1237  ;;  %v1206_v27 = vld [vmem:[#allocation13 + $0x38] sm:$0xff]  }
 0x4a2   :  { %v414_v36 = vmul.f32 0.0, %v1238_v16 }
 0x4a4   :  { %1134 = vmatmul.mubr.msk.bf16.vlgmr.msra.gmra.mrb[20].mxu0 %vm207_vm2, %v760_v23  ;;  %v1205_v23 = vld [vmem:[#allocation13 + $0x30] sm:$0xff]  }
 0x4a5   :  { %v246_v46 = vpop.xlane.xlu0 %245 }
 0x4a6   :  { %v248_v52 = vadd.f32 %v246_v46, %v240_v50 }
 0x4b0   :  { %313 = vperm.xlu1 %1185, %v248_v52  }
 0x4b4   :  { %1186 = vset.pattern.permute.xlu1 %v1448_v43 }
 0x4c4   :  { %v243_v60 = vpop.xlane.xlu1 %242 }
 0x4c5   :  { %v247_v61 = vadd.f32 %v243_v60, %v239_v59 }
 0x4c7   :  { %308 = vperm.xlu0 %1184, %v247_v61  }
 0x4cb   :  { %323 = vperm.xlu0 %1184, %v1224_v42  }
 0x4cf   :  { %1190 = vset.pattern.permute.xlu0 %v1447_v35 }
 0x4d0   :  { %491 = vperm.xlu0 %1190, %v1228_v20  }
 0x4d4   :  { %1194 = vset.pattern.permute.xlu0 %v1449_v47 }
 0x4d5   :  { %822 = vperm.xlu0 %1194, %v1230_v24  }
 0x51b   :  { %v586_v6 = vpop.xlane.xlu0 %585 }
 0x51c   :  { %v590_v7 = vadd.f32 %v586_v6, %v582_v3 }
 0x51e   :  { %644 = vperm.xlu1 %1186, %v590_v7  }
 0x51f   :  { %v418_v8 = vpop.xlane.xlu0 %417  ;;  %v589_v9 = vpop.xlane.xlu1 %588 }
 0x520   :  { %v591_v44 = vadd.f32 %v589_v9, %v583_v39  ;;  %v422_v5 = vadd.f32 %v418_v8, %v414_v36 }
 0x522   :  { %649 = vperm.xlu1 %1186, %v591_v44  }
 0x524   :  { %v754_v13 = vpop.xlane.xlu0 %753 }
 0x525   :  { %v758_v21 = vadd.f32 %v754_v13, %v750_v11 }
 0x526   :  { %1187 = vset.pattern.permute.xlu1 %v1449_v47 }
 0x527   :  { %812 = vperm.xlu1 %1187, %v758_v21   ;;  %v855_v21 = vld [vmem:[#allocation3 + $0x8] sm:$0x1] }
 0x528   :  { %v757_v14 = vpop.xlane.xlu1 %756 }
 0x529   :  { %v759_v15 = vadd.f32 %v757_v14, %v751_v32 }
 0x52b   :  { %817 = vperm.xlu1 %1187, %v759_v15  }
 0x52c   :  { %v421_v17 = vpop.xlane.xlu1 %420 }
 0x52d   :  { %v423_v22 = vadd.f32 %v421_v17, %v415_v18 }
 0x52f   :  { %1188 = vset.pattern.permute.xlu1 %v1443_v19  ;;  %v1199_v19 = vld [vmem:[#allocation13] sm:$0xff]  }
 0x530   :  { %318 = vperm.xlu1 %1188, %v1226_v56   ;;  %1138 = vmatpush3.bf16.msra.mxu1 %v1199_v19  ;;  %v314_v54 = vpop.permute.xlu1 %313 }
 0x531   :  { %1139 = vmatprep.subr.bf16.mxu1 %v1440_v0 }
 0x534   :  { %1189 = vset.pattern.permute.xlu1 %v1447_v35  ;;  %1140 = vmatpush3.bf16.msra.mxu1 %v1200_v25 }
 0x535   :  { %486 = vperm.xlu1 %1189, %v1238_v16   ;;  %1141 = vmatprep.subr.bf16.mxu1 %v1440_v0 }
 0x539   :  { %1191 = vset.pattern.permute.xlu1 %v1448_v43 }
 0x53a   :  { %654 = vperm.xlu1 %1191, %v1232_v2  }
 0x53e   :  { %1192 = vset.pattern.permute.xlu1 %v1447_v35  ;;  %v1201_v35 = vld [vmem:[#allocation13 + $0x10] sm:$0xff]  }
 0x53f   :  { %476 = vperm.xlu1 %1192, %v422_v5   ;;  %1142 = vmatpush3.bf16.msra.mxu1 %v1201_v35 }
 0x540   :  { %1143 = vmatprep.subr.bf16.mxu1 %v1440_v0 }
 0x543   :  { %481 = vperm.xlu1 %1192, %v423_v22   ;;  %1144 = vmatpush3.bf16.msra.mxu1 %v1202_v26 }
 0x544   :  { %1145 = vmatprep.subr.bf16.mxu1 %v1440_v0 }
 0x546   :  { %v309_v62 = vpop.permute.xlu0 %308 }
 0x547   :  { %1193 = vset.pattern.permute.xlu1 %v1448_v43  ;;  %1146 = vmatpush3.bf16.msra.mxu1 %v1203_v30 }
 0x548   :  { %659 = vperm.xlu1 %1193, %v1234_v4   ;;  %1147 = vmatprep.subr.bf16.mxu1 %v1440_v0 }
 0x54a   :  { %v324_v1 = vpop.permute.xlu0 %323 }
 0x54b   :  { %1148 = vmatpush3.bf16.msra.mxu1 %v1204_v33  ;;  %v1063_v33 = vld [vmem:[#allocation15] ss:$0 sm:$0xff] }
 0x54c   :  { %1195 = vset.pattern.permute.xlu1 %v1449_v47  ;;  %1149 = vmatprep.subr.bf16.mxu1 %v1440_v0 }
 0x54d   :  { %827 = vperm.xlu1 %1195, %v1236_v12  }
 0x54f   :  { %1150 = vmatpush3.bf16.msra.mxu1 %v1205_v23  ;;  %v492_v3 = vpop.permute.xlu0 %491 }
 0x550   :  { %1151 = vmatprep.subr.bf16.mxu1 %v1440_v0  ;;  %v849_v10 = vsel %vm157_vm1, %v324_v1, %v492_v3 }
 0x553   :  { %1152 = vmatpush3.bf16.msra.mxu1 %v1206_v27 }
 0x554   :  { %v823_v6 = vpop.permute.xlu0 %822 }
 0x567   :  { %v467_v28 = vpop.f32.mrb[12].mxu0 }
 0x568   :  { %v1111_v29 = vpop.f32.mrb[13].mxu0  ;;  %860 = vrot.lane.b32.xlu1 %v467_v28, %s1446_s0 }
 0x569   :  { %v470_v43 = vpop.f32.mrb[14].mxu0 }
 0x56a   :  { %v1112_v47 = vpop.f32.mrb[15].mxu0  ;;  %862 = vrot.lane.b32.xlu0 %v470_v43, %s1446_s0 }
 0x56f   :  { %v635_v31 = vpop.f32.mrb[16].mxu0 }
 0x570   :  { %v1123_v34 = vpop.f32.mrb[17].mxu0  ;;  %868 = vrot.lane.b32.xlu1 %v635_v31, %s1431_s13 }
 0x571   :  { %v638_v37 = vpop.f32.mrb[18].mxu0  ;;  %v1010_v34 = vld [vmem:[#allocation12 + $0x8] sm:$0x1] }
 0x572   :  { %v1124_v42 = vpop.f32.mrb[19].mxu0  ;;  %870 = vrot.lane.b32.xlu0 %v638_v37, %s1431_s13  ;;  %s1450_s13 = smov [#allocation16]  }
 0x573   :  { %s1029_s30 = sshll.u32 %s1450_s13, 4  ;;  %s1030_s30 = int_to_ptr.vmem [resolvable:$true] %s1029_s30 }
 0x574   :  { %s1397_s27 = scalar_lea.vmem %s1030_s30, 256  ;;  %p1402_p1 = scmp.lt.s32.totalorder %s1030_s30, %s1030_s30 }
 0x575   :  { %p1398_p0 = scmp.ne.s32.totalorder %s1030_s30, %s1397_s27  ;;  %p1403_p2 = scmp.lt.s32.totalorder %s1397_s27, %s1397_s27 }
 0x577   :  { %v803_v46 = vpop.f32.mrb[20].mxu0  ;;  %p1404_p3 = por %p1403_p2, %p1402_p1 }
 0x578   :  { %v1135_v50 = vpop.f32.mrb[21].mxu0  ;;  %876 = vrot.lane.b32.xlu1 %v803_v46, %s1444_s6 }
 0x579   :  { %v806_v51 = vpop.f32.mrb[22].mxu0  ;;  %p1405_p4 = pnand %p1404_p3, %p1398_p0 }
 0x57a   :  { %v1136_v52 = vpop.f32.mrb[23].mxu0  ;;  %878 = vrot.lane.b32.xlu0 %v806_v51, %s1444_s6 }
 0x59d   :  { %v645_v55 = vpop.permute.xlu1 %644 }
 0x5a1   :  { %v650_v56 = vpop.permute.xlu1 %649 }
 0x5a6   :  { %v813_v57 = vpop.permute.xlu1 %812 }
 0x5aa   :  { %v818_v58 = vpop.permute.xlu1 %817 }
 0x5af   :  { %v319_v59 = vpop.permute.xlu1 %318 }
 0x5b4   :  { %v487_v60 = vpop.permute.xlu1 %486 }
 0x5b5   :  { %v848_v39 = vsel %vm157_vm1, %v319_v59, %v487_v60 }
 0x5b9   :  { %v655_v61 = vpop.permute.xlu1 %654 }
 0x5ba   :  { %v850_v8 = vsel %vm832_vm6, %v848_v39, %v655_v61 }
 0x5bb   :  { %v852_v11 = vsel %vm835_vm7, %v850_v8, %v823_v6 }
 0x5bc   :  { %v856_v16 = vmul.f32 0.0, %v852_v11 }
 0x5be   :  { %v477_v20 = vpop.permute.xlu1 %476 }
 0x5bf   :  { %v840_v0 = vsel %vm157_vm1, %v309_v62, %v477_v20 }
 0x5c0   :  { %v842_v24 = vsel %vm832_vm6, %v840_v0, %v645_v55 }
 0x5c1   :  { %v844_v38 = vsel %vm835_vm7, %v842_v24, %v813_v57 }
 0x5c2   :  { %v482_v45 = vpop.permute.xlu1 %481  ;;  %1239 = vrcp.f32 %v844_v38 }
 0x5c3   :  { %v841_v41 = vsel %vm157_vm1, %v314_v54, %v482_v45 }
 0x5c4   :  { %v843_v40 = vsel %vm832_vm6, %v841_v41, %v650_v56 }
 0x5c5   :  { %v845_v63 = vsel %vm835_vm7, %v843_v40, %v818_v58 }
 0x5c6   :  { %847 = vst [vmem:[#allocation2 + $0x18] sm:$0x1] %v845_v63 }
 0x5c7   :  { %v660_v2 = vpop.permute.xlu1 %659 }
 0x5c8   :  { %v851_v12 = vsel %vm832_vm6, %v849_v10, %v660_v2 }
 0x5cc   :  { %v828_v4 = vpop.permute.xlu1 %827  ;;  %v1240_v26 = vpop.eup %1239 }
 0x5cd   :  { %v853_v49 = vsel %vm835_vm7, %v851_v12, %v828_v4  ;;  %v898_v36 = vld [vmem:[#allocation2 + $0x18] sm:$0x1] }
 0x5ce   :  { %v857_v18 = vmul.f32 %v855_v21, %v853_v49  ;;  %1241 = vrcp.f32 %v898_v36 }
 0x5d8   :  { %v1242_v28 = vpop.eup %1241 }
 0x5da   :  { %v861_v7 = vpop.permute.xlu1 %860 }
 0x5db   :  { %v882_v32 = vsel %vm157_vm1, %v1682_v48, %v861_v7 }
 0x5dc   :  { %v863_v9 = vpop.permute.xlu0 %862 }
 0x5dd   :  { %v883_v5 = vsel %vm157_vm1, %v1684_v53, %v863_v9  ;;  %v1009_v53 = vld [vmem:[#allocation12] sm:$0xff] }
 0x5e2   :  { %v869_v44 = vpop.permute.xlu1 %868 }
 0x5e3   :  { %v884_v14 = vsel %vm832_vm6, %v882_v32, %v869_v44 }
 0x5e4   :  { %v871_v13 = vpop.permute.xlu0 %870 }
 0x5e5   :  { %v885_v22 = vsel %vm832_vm6, %v883_v5, %v871_v13 }
 0x5ea   :  { %v877_v15 = vpop.permute.xlu1 %876 }
 0x5eb   :  { %v886_v17 = vsel %vm835_vm7, %v884_v14, %v877_v15 }
 0x5ec   :  { %v888_v19 = vadd.f32 %v886_v17, %v856_v16  ;;  %v879_v25 = vpop.permute.xlu0 %878 }
 0x5ed   :  { %v887_v35 = vsel %vm835_vm7, %v885_v22, %v879_v25 }
 0x5ee   :  { %v889_v48 = vadd.f32 %v887_v35, %v857_v18  ;;  %v901_v43 = vmul.f32 %v1240_v26, %v888_v19 }
 0x5f0   :  { %891 = vst [vmem:[#allocation3 + $0x8] sm:$0x1] %v889_v48 }
 0x5f7   :  { %v896_v29 = vld [vmem:[#allocation3 + $0x8] sm:$0x1] }
 0x5f8   :  { %v902_v47 = vmul.f32 %v1242_v28, %v896_v29 }
 0x5fa   :  { %v903_v30 = vpack.c.bf16 %v902_v47, %v901_v43 }
 0x5fc   :  { %1154 = vmatmul.mubr.bf16.vlgmr.msra.gmra.mrb[8].mxu1 %v903_v30 }
 0x6cf   :  { %v1002_v31 = vpop.f32.mrb[8].mxu1 }
 0x6d0   :  { %v1011_v37 = vadd.f32 %v1009_v53, %v1002_v31  ;;  %v1155_v23 = vpop.f32.mrb[9].mxu1 }
 0x6d1   :  { %v1005_v42 = vpop.f32.mrb[10].mxu1 }
 0x6d2   :  { %v1020_v27 = vadd.f32 %v1063_v33, %v1011_v37  ;;  %v1012_v46 = vadd.f32 %v1010_v34, %v1005_v42  ;;  %v1156_v50 = vpop.f32.mrb[11].mxu1 }
 0x6d4   :  { %1022 = vst [vmem:[#allocation16] sm:$0xff] %v1020_v27  ;;  %v1021_v51 = vadd.f32 %v1063_v33, %v1012_v46 }
 0x6d6   :  { %1023 = vst [vmem:[#allocation16 + $0x8] sm:$0x1] %v1021_v51 }
 0x6d7   :  { %1408 = shalt.err (!%p1405_p4)
}
 0x6d8   :  { %s1409_s19 = scalar_lea.hbm %s1843_s7, 256 }
 0x6d9   :  { %p1410_p5 = scmp.ne.s32.totalorder %s1843_s7, %s1409_s19  ;;  %p1413_p6 = scmp.lt.u32.totalorder %s1409_s19, %s1843_s7 }
 0x6db   :  { %p1415_p7 = pnand %p1413_p6, %p1410_p5 }
 0x6dd   :  { %1418 = shalt.err (!%p1415_p7)
}
 0x6de   :  { %1035 = dma.vmem_to_hbm [thread:$0]  %s1030_s30, 256, %s1843_s7, [#allocation6], %s1437_s2, %s1437_s2, %s1438_s14  }
 0x6df   :  { %1427 = dma.done.wait [#allocation6], 256  }
 0x6e0   :  { %1428 = vsyncadd [#allocation6], 4294967040 }
 0x6e1   :  { %1039 = vsyncpa [#allocation5], 1 }
 0x6e2   :  { %1040 = vsyncpa [#allocation8], 1 }
 0x6e3   :  { %1041 = vsyncpa [#allocation11], 1 }
 0x6e4   :  { %1042 = vsyncpa [#allocation14], 1 }
 0x6e5   :  { %1043 = vsyncpa [#allocation6], 1 }

// kernel: model2_forward_single.18
= control target key start
LH: loop header
LB: loop body
LE: loop exit
PB: predicated region body
PF: predicated region fallthrough
CT: control target
= control target key end

     0   :  { %14 = vsyncpa [#allocation3], 0  ;;  %s1683_s0 = inlined_call_operand.hbm [shape: f32[9,128], index: 0, kind: input, shape index: {}]   ;;  %s1684_s1 = inlined_call_operand.hbm [shape: f32[1,128], index: 1, kind: input, shape index: {}]   ;;  %s1685_s2 = inlined_call_operand.hbm [shape: f32[1,128], index: 2, kind: input, shape index: {}]   ;;  %s1686_s3 = inlined_call_operand.hbm [shape: bf16[128,512], index: 3, kind: input, shape index: {}]   ;;  %s1687_s4 = inlined_call_operand.hbm [shape: f32[1,512], index: 4, kind: input, shape index: {}]   ;;  %s1688_s5 = inlined_call_operand.hbm [shape: bf16[512,128], index: 5, kind: input, shape index: {}]   ;;  %s1689_s6 = inlined_call_operand.hbm [shape: f32[1,128], index: 6, kind: input, shape index: {}]   ;;  %s1690_s7 = inlined_call_operand.hbm [shape: f32[1,128], index: 7, kind: input, shape index: {}]   ;;  %s1691_s8 = inlined_call_operand.hbm [shape: f32[1,128], index: 8, kind: input, shape index: {}]   ;;  %s1692_s9 = inlined_call_operand.hbm [shape: f32[9,128], index: 9, kind: output, shape index: {}]  }
   0x1   :  { %15 = vsyncpa [#allocation6], 0 }
   0x2   :  { %16 = vsyncpa [#allocation9], 0 }
   0x3   :  { %17 = vsyncpa [#allocation12], 0 }
   0x4   :  { %18 = vsyncpa [#allocation15], 0 }
   0x5   :  { %19 = vsyncpa [#allocation4], 0  ;;  %s1455_s30 = smov [#allocation5]   ;;  %s1456_s11 = smov [#allocation8]  }
   0x6   :  { %s38_s10 = sshll.u32 %s1455_s30, 4  ;;  %s57_s12 = sshll.u32 %s1456_s11, 4  ;;  %s39_s10 = int_to_ptr.vmem [resolvable:$true] %s38_s10  ;;  %s1522_s12 = int_to_ptr.vmem [resolvable:$true] %s57_s12 }
   0x7   :  { %s1223_s15 = scalar_lea.hbm %s1684_s1, 16 }
   0x8   :  { %p1224_p0 = scmp.ne.s32.totalorder %s1684_s1, %s1223_s15  ;;  %p1227_p1 = scmp.lt.u32.totalorder %s1223_s15, %s1684_s1 }
   0xa   :  { %p1229_p2 = pnand %p1227_p1, %p1224_p0 }
   0xc   :  { %1232 = shalt.err (!%p1229_p2)
}
   0xd   :  { %s1233_s20 = scalar_lea.vmem %s39_s10, 16  ;;  %s1237_s21 = scalar_lea.vmem %s39_s10, 32 }
   0xe   :  { %p1234_p3 = scmp.ne.s32.totalorder %s39_s10, %s1233_s20  ;;  %p1238_p4 = scmp.lt.s32.totalorder %s39_s10, %s39_s10 }
   0xf   :  { %p1239_p5 = scmp.lt.s32.totalorder %s1237_s21, %s1233_s20 }
  0x11   :  { %p1240_p6 = por %p1239_p5, %p1238_p4 }
  0x13   :  { %p1241_p7 = pnand %p1240_p6, %p1234_p3 }
  0x15   :  { %1244 = shalt.err (!%p1241_p7)
}
  0x16   :  { %41 = dma.hbm_to_vmem [thread:$0]  %s1684_s1, 16, %s39_s10, [#allocation6]  }
  0x17   :  { %s1245_s26 = scalar_lea.hbm %s1686_s3, 4096 }
  0x18   :  { %p1246_p8 = scmp.ne.s32.totalorder %s1686_s3, %s1245_s26  ;;  %p1249_p9 = scmp.lt.u32.totalorder %s1245_s26, %s1686_s3 }
  0x1a   :  { %p1251_p10 = pnand %p1249_p9, %p1246_p8 }
  0x1c   :  { %1254 = shalt.err (!%p1251_p10)
}
  0x1d   :  { %s1255_s11 = scalar_lea.vmem %s1522_s12, 4096  ;;  %p1260_p12 = scmp.lt.s32.totalorder %s1522_s12, %s1522_s12 }
  0x1e   :  { %p1256_p11 = scmp.ne.s32.totalorder %s1522_s12, %s1255_s11  ;;  %p1261_p13 = scmp.lt.s32.totalorder %s1255_s11, %s1255_s11 }
  0x20   :  { %p1262_p0 = por %p1261_p13, %p1260_p12 }
  0x22   :  { %p1263_p1 = pnand %p1262_p0, %p1256_p11 }
  0x24   :  { %1266 = shalt.err (!%p1263_p1)
}
  0x25   :  { %s1457_s1 = smov 256   ;;  %s1458_s10 = smov 16  }
  0x26   :  { %63 = dma.hbm_to_vmem [thread:$0]  %s1686_s3, 4096, %s1522_s12, [#allocation9], %s1457_s1, %s1457_s1, %s1458_s10  }
  0x27   :  { %s1459_s15 = smov [#allocation11]   ;;  %s1267_s19 = scalar_lea.hbm %s1688_s5, 4096 }
  0x28   :  { %s79_s16 = sshll.u32 %s1459_s15, 4  ;;  %p1268_p2 = scmp.ne.s32.totalorder %s1688_s5, %s1267_s19  ;;  %s80_s16 = int_to_ptr.vmem [resolvable:$true] %s79_s16 }
  0x29   :  { %p1271_p3 = scmp.lt.u32.totalorder %s1267_s19, %s1688_s5 }
  0x2b   :  { %p1273_p4 = pnand %p1271_p3, %p1268_p2 }
  0x2d   :  { %1276 = shalt.err (!%p1273_p4)
}
  0x2e   :  { %s1277_s24 = scalar_lea.vmem %s80_s16, 4096  ;;  %p1282_p6 = scmp.lt.s32.totalorder %s80_s16, %s80_s16 }
  0x2f   :  { %p1278_p5 = scmp.ne.s32.totalorder %s80_s16, %s1277_s24  ;;  %p1283_p7 = scmp.lt.s32.totalorder %s1277_s24, %s1277_s24 }
  0x31   :  { %p1284_p8 = por %p1283_p7, %p1282_p6 }
  0x33   :  { %p1285_p9 = pnand %p1284_p8, %p1278_p5 }
  0x35   :  { %1288 = shalt.err (!%p1285_p9)
}
  0x36   :  { %s1460_s3 = smov 64   ;;  %s1461_s12 = smov 4  }
  0x37   :  { %85 = dma.hbm_to_vmem [thread:$0]  %s1688_s5, 4096, %s80_s16, [#allocation12], %s1460_s3, %s1460_s3, %s1461_s12  }
  0x38   :  { %s1462_s27 = smov [#allocation14]   ;;  %s1463_s29 = smov [#allocation2]  }
  0x39   :  { %s102_s28 = sshll.u32 %s1462_s27, 4  ;;  %s25_s30 = sshll.u32 %s1463_s29, 4  ;;  %s103_s28 = int_to_ptr.vmem [resolvable:$true] %s102_s28  ;;  %s26_s30 = int_to_ptr.vmem [resolvable:$true] %s25_s30 }
  0x3a   :  { %s1289_s10 = scalar_lea.hbm %s1690_s7, 16 }
  0x3b   :  { %p1290_p10 = scmp.ne.s32.totalorder %s1690_s7, %s1289_s10  ;;  %p1293_p11 = scmp.lt.u32.totalorder %s1289_s10, %s1690_s7 }
  0x3d   :  { %p1295_p12 = pnand %p1293_p11, %p1290_p10 }
  0x3f   :  { %1298 = shalt.err (!%p1295_p12)
}
  0x40   :  { %s1299_s5 = scalar_lea.vmem %s103_s28, 16  ;;  %s1303_s16 = scalar_lea.vmem %s103_s28, 32 }
  0x41   :  { %p1300_p13 = scmp.ne.s32.totalorder %s103_s28, %s1299_s5  ;;  %p1304_p0 = scmp.lt.s32.totalorder %s103_s28, %s103_s28 }
  0x42   :  { %p1305_p1 = scmp.lt.s32.totalorder %s1303_s16, %s1299_s5 }
  0x44   :  { %p1306_p2 = por %p1305_p1, %p1304_p0 }
  0x46   :  { %p1307_p3 = pnand %p1306_p2, %p1300_p13 }
  0x48   :  { %1310 = shalt.err (!%p1307_p3)
}
  0x49   :  { %105 = dma.hbm_to_vmem [thread:$0]  %s1690_s7, 16, %s103_s28, [#allocation15]  }
  0x4a   :  { %s1311_s22 = scalar_lea.hbm %s1683_s0, 256 }
  0x4b   :  { %p1312_p4 = scmp.ne.s32.totalorder %s1683_s0, %s1311_s22  ;;  %p1315_p5 = scmp.lt.u32.totalorder %s1311_s22, %s1683_s0 }
  0x4d   :  { %p1317_p6 = pnand %p1315_p5, %p1312_p4 }
  0x4f   :  { %1320 = shalt.err (!%p1317_p6)
}
  0x50   :  { %s1321_s25 = scalar_lea.vmem %s26_s30, 256  ;;  %p1326_p8 = scmp.lt.s32.totalorder %s26_s30, %s26_s30 }
  0x51   :  { %p1322_p7 = scmp.ne.s32.totalorder %s26_s30, %s1321_s25  ;;  %p1327_p9 = scmp.lt.s32.totalorder %s1321_s25, %s1321_s25 }
  0x53   :  { %p1328_p10 = por %p1327_p9, %p1326_p8 }
  0x55   :  { %p1329_p11 = pnand %p1328_p10, %p1322_p7 }
  0x57   :  { %1332 = shalt.err (!%p1329_p11)
}
  0x58   :  { %s1464_s7 = smov 128   ;;  %s1465_s26 = smov 8  }
  0x59   :  { %31 = dma.hbm_to_vmem [thread:$0]  %s1683_s0, 256, %s26_s30, [#allocation3], %s1464_s7, %s1464_s7, %s1465_s26  }
  0x5a   :  { %s1466_s29 = smov [#allocation7]   ;;  %s1467_s1 = smov [#allocation10]  }
  0x5b   :  { %s48_s11 = sshll.u32 %s1466_s29, 4  ;;  %s70_s10 = sshll.u32 %s1467_s1, 4  ;;  %s49_s11 = int_to_ptr.vmem [resolvable:$true] %s48_s11  ;;  %s71_s10 = int_to_ptr.vmem [resolvable:$true] %s70_s10 }
  0x5c   :  { %s1333_s15 = scalar_lea.hbm %s1685_s2, 16 }
  0x5d   :  { %p1334_p12 = scmp.ne.s32.totalorder %s1685_s2, %s1333_s15  ;;  %p1337_p13 = scmp.lt.u32.totalorder %s1333_s15, %s1685_s2 }
  0x5f   :  { %p1339_p0 = pnand %p1337_p13, %p1334_p12 }
  0x61   :  { %1342 = shalt.err (!%p1339_p0)
}
  0x62   :  { %s1343_s0 = scalar_lea.vmem %s49_s11, 16  ;;  %s1347_s30 = scalar_lea.vmem %s49_s11, 32 }
  0x63   :  { %p1344_p1 = scmp.ne.s32.totalorder %s49_s11, %s1343_s0  ;;  %p1348_p2 = scmp.lt.s32.totalorder %s49_s11, %s49_s11 }
  0x64   :  { %p1349_p3 = scmp.lt.s32.totalorder %s1347_s30, %s1343_s0 }
  0x66   :  { %p1350_p4 = por %p1349_p3, %p1348_p2 }
  0x68   :  { %p1351_p5 = pnand %p1350_p4, %p1344_p1 }
  0x6a   :  { %1354 = shalt.err (!%p1351_p5)
}
  0x6b   :  { %51 = dma.hbm_to_vmem [thread:$0]  %s1685_s2, 16, %s49_s11, [#allocation6]  }
  0x6c   :  { %s1355_s23 = scalar_lea.hbm %s1687_s4, 64 }
  0x6d   :  { %p1356_p6 = scmp.ne.s32.totalorder %s1687_s4, %s1355_s23  ;;  %p1359_p7 = scmp.lt.u32.totalorder %s1355_s23, %s1687_s4 }
  0x6f   :  { %p1361_p8 = pnand %p1359_p7, %p1356_p6 }
  0x71   :  { %1364 = shalt.err (!%p1361_p8)
}
  0x72   :  { %s1365_s27 = scalar_lea.vmem %s71_s10, 64  ;;  %p1370_p10 = scmp.lt.s32.totalorder %s71_s10, %s71_s10 }
  0x73   :  { %p1366_p9 = scmp.ne.s32.totalorder %s71_s10, %s1365_s27  ;;  %p1371_p11 = scmp.lt.s32.totalorder %s1365_s27, %s1365_s27 }
  0x75   :  { %p1372_p12 = por %p1371_p11, %p1370_p10 }
  0x77   :  { %p1373_p13 = pnand %p1372_p12, %p1366_p9 }
  0x79   :  { %1376 = shalt.err (!%p1373_p13)
}
  0x7a   :  { %73 = dma.hbm_to_vmem [thread:$0]  %s1687_s4, 64, %s71_s10, [#allocation9]  }
  0x7b   :  { %s1468_s29 = smov [#allocation13]   ;;  %s1469_s1 = smov [#allocation16]  }
  0x7c   :  { %s92_s11 = sshll.u32 %s1468_s29, 4  ;;  %s112_s13 = sshll.u32 %s1469_s1, 4  ;;  %s93_s11 = int_to_ptr.vmem [resolvable:$true] %s92_s11  ;;  %s113_s13 = int_to_ptr.vmem [resolvable:$true] %s112_s13 }
  0x7d   :  { %s1377_s17 = scalar_lea.hbm %s1689_s6, 16 }
  0x7e   :  { %p1378_p0 = scmp.ne.s32.totalorder %s1689_s6, %s1377_s17  ;;  %p1381_p1 = scmp.lt.u32.totalorder %s1377_s17, %s1689_s6 }
  0x80   :  { %p1383_p2 = pnand %p1381_p1, %p1378_p0 }
  0x82   :  { %1386 = shalt.err (!%p1383_p2)
}
  0x83   :  { %s1387_s4 = scalar_lea.vmem %s93_s11, 16  ;;  %s1391_s10 = scalar_lea.vmem %s93_s11, 32 }
  0x84   :  { %p1388_p3 = scmp.ne.s32.totalorder %s93_s11, %s1387_s4  ;;  %p1392_p4 = scmp.lt.s32.totalorder %s93_s11, %s93_s11 }
  0x85   :  { %p1393_p5 = scmp.lt.s32.totalorder %s1391_s10, %s1387_s4 }
  0x87   :  { %p1394_p6 = por %p1393_p5, %p1392_p4 }
  0x89   :  { %p1395_p7 = pnand %p1394_p6, %p1388_p3 }
  0x8b   :  { %1398 = shalt.err (!%p1395_p7)
}
  0x8c   :  { %95 = dma.hbm_to_vmem [thread:$0]  %s1689_s6, 16, %s93_s11, [#allocation12]  }
  0x8d   :  { %s1399_s22 = scalar_lea.hbm %s1691_s8, 16 }
  0x8e   :  { %p1400_p8 = scmp.ne.s32.totalorder %s1691_s8, %s1399_s22  ;;  %p1403_p9 = scmp.lt.u32.totalorder %s1399_s22, %s1691_s8 }
  0x90   :  { %p1405_p10 = pnand %p1403_p9, %p1400_p8 }
  0x92   :  { %1408 = shalt.err (!%p1405_p10)
}
  0x93   :  { %s1409_s25 = scalar_lea.vmem %s113_s13, 16  ;;  %s1413_s27 = scalar_lea.vmem %s113_s13, 32 }
  0x94   :  { %p1410_p11 = scmp.ne.s32.totalorder %s113_s13, %s1409_s25  ;;  %p1414_p12 = scmp.lt.s32.totalorder %s113_s13, %s113_s13 }
  0x95   :  { %p1415_p13 = scmp.lt.s32.totalorder %s1413_s27, %s1409_s25 }
  0x97   :  { %p1416_p0 = por %p1415_p13, %p1414_p12 }
  0x99   :  { %p1417_p1 = pnand %p1416_p0, %p1410_p11 }
  0x9b   :  { %1420 = shalt.err (!%p1417_p1)
}
  0x9c   :  { %115 = dma.hbm_to_vmem [thread:$0]  %s1691_s8, 16, %s113_s13, [#allocation15]  }
  0x9d   :  { %1443 = dma.done.wait [#allocation3], 256  }
  0x9e   :  { %1444 = vsyncadd [#allocation3], 4294967040 }
  0x9f   :  { %1445 = dma.done.wait [#allocation6], 32  }
  0xa0   :  { %1446 = vsyncadd [#allocation6], 4294967264 }
  0xa1   :  { %1447 = dma.done.wait [#allocation9], 4160  }
  0xa2   :  { %1448 = vsyncadd [#allocation9], 4294963136 }
  0xa3   :  { %1449 = dma.done.wait [#allocation12], 4112  }
  0xa4   :  { %1450 = vsyncadd [#allocation12], 4294963184 }
  0xa5   :  { %1451 = dma.done.wait [#allocation15], 32  }
  0xa6   :  { %1452 = vsyncadd [#allocation15], 4294967264  ;;  %vm148_vm0 = vcmask 1040384   ;;  %v1640_v0 = vld [vmem:[#allocation2 + $0x8] sm:$0x1]  ;;  %v1644_v2 = vld [vmem:[#allocation2] sm:$0xff] }
  0xa7   :  { %v149_v1 = vsel %vm148_vm0, %v1640_v0, 0.0  ;;  %v1103_v3 = vld [vmem:[#allocation8 + $0x4] ss:$16 sps:$4 sm:$0xff]   ;;  %v1105_v4 = vld [vmem:[#allocation8 + $0xc] ss:$16 sps:$4 sm:$0xff]   ;;  %v1470_v38 = vmov 0  }
  0xa8   :  { %150 = vadd.xlane.f32.xlu0 %v149_v1  ;;  %v1107_v5 = vld [vmem:[#allocation8] ss:$16 sps:$4 sm:$0xff]   ;;  %v1108_v6 = vld [vmem:[#allocation8 + $0x8] ss:$16 sps:$4 sm:$0xff]   ;;  %v1109_v7 = vld [vmem:[#allocation8 + $0x24] ss:$16 sps:$4 sm:$0xff]   ;;  %405 = vmatprep.subr.bf16.mxu0 %v1103_v3 }
  0xa9   :  { %v1111_v8 = vld [vmem:[#allocation8 + $0x2c] ss:$16 sps:$4 sm:$0xff]   ;;  %448 = vmatprep.subr.bf16.mxu1 %v1105_v4  ;;  %406 = vmatpush1.bf16.msra.mxu0 %v1107_v5  ;;  %v1113_v18 = vld [vmem:[#allocation8 + $0x20] ss:$16 sps:$4 sm:$0xff]   ;;  %v1114_v19 = vld [vmem:[#allocation8 + $0x28] ss:$16 sps:$4 sm:$0xff]  }
  0xaa   :  { %449 = vmatpush1.bf16.msra.mxu1 %v1108_v6  ;;  %407 = vmatprep.subr.bf16.mxu0 %v1109_v7  ;;  %v1115_v20 = vld [vmem:[#allocation8 + $0x44] ss:$16 sps:$4 sm:$0xff]   ;;  %v1117_v21 = vld [vmem:[#allocation8 + $0x4c] ss:$16 sps:$4 sm:$0xff]   ;;  %v1119_v22 = vld [vmem:[#allocation8 + $0x40] ss:$16 sps:$4 sm:$0xff]  }
  0xab   :  { %450 = vmatprep.subr.bf16.mxu1 %v1111_v8  ;;  %v1120_v23 = vld [vmem:[#allocation8 + $0x48] ss:$16 sps:$4 sm:$0xff]   ;;  %v1121_v24 = vld [vmem:[#allocation8 + $0x64] ss:$16 sps:$4 sm:$0xff]   ;;  %v1123_v25 = vld [vmem:[#allocation8 + $0x6c] ss:$16 sps:$4 sm:$0xff]   ;;  %437 = vmatprep.mubr.bf16.mxu0 %v1470_v38 }
  0xac   :  { %146 = vadd.xlane.f32.xlu0 %v1644_v2  ;;  %v1125_v26 = vld [vmem:[#allocation8 + $0x60] ss:$16 sps:$4 sm:$0xff]   ;;  %v1126_v27 = vld [vmem:[#allocation8 + $0x68] ss:$16 sps:$4 sm:$0xff]   ;;  %v1127_v28 = vld [vmem:[#allocation8 + $0x84] ss:$16 sps:$4 sm:$0xff]   ;;  %480 = vmatprep.mubr.bf16.mxu1 %v1470_v38 }
  0xad   :  { %408 = vmatpush1.bf16.msra.mxu0 %v1113_v18  ;;  %v1129_v29 = vld [vmem:[#allocation8 + $0x8c] ss:$16 sps:$4 sm:$0xff]   ;;  %v1131_v30 = vld [vmem:[#allocation8 + $0x80] ss:$16 sps:$4 sm:$0xff]   ;;  %v1132_v31 = vld [vmem:[#allocation8 + $0x88] ss:$16 sps:$4 sm:$0xff]  }
  0xae   :  { %451 = vmatpush1.bf16.msra.mxu1 %v1114_v19  ;;  %409 = vmatprep.subr.bf16.mxu0 %v1115_v20  ;;  %v1133_v32 = vld [vmem:[#allocation8 + $0xa4] ss:$16 sps:$4 sm:$0xff]   ;;  %v1135_v33 = vld [vmem:[#allocation8 + $0xac] ss:$16 sps:$4 sm:$0xff]   ;;  %v1137_v34 = vld [vmem:[#allocation8 + $0xa0] ss:$16 sps:$4 sm:$0xff]  }
  0xaf   :  { %452 = vmatprep.subr.bf16.mxu1 %v1117_v21  ;;  %v1138_v35 = vld [vmem:[#allocation8 + $0xa8] ss:$16 sps:$4 sm:$0xff]   ;;  %v1139_v36 = vld [vmem:[#allocation8 + $0xc4] ss:$16 sps:$4 sm:$0xff]   ;;  %v1141_v37 = vld [vmem:[#allocation8 + $0xcc] ss:$16 sps:$4 sm:$0xff]  }
  0xb0   :  { %v1143_v39 = vld [vmem:[#allocation8 + $0xc0] ss:$16 sps:$4 sm:$0xff]   ;;  %v1144_v40 = vld [vmem:[#allocation8 + $0xc8] ss:$16 sps:$4 sm:$0xff]   ;;  %v1145_v41 = vld [vmem:[#allocation8 + $0xe4] ss:$16 sps:$4 sm:$0xff]  }
  0xb1   :  { %410 = vmatpush1.bf16.msra.mxu0 %v1119_v22  ;;  %v1147_v42 = vld [vmem:[#allocation8 + $0xec] ss:$16 sps:$4 sm:$0xff]   ;;  %v1149_v43 = vld [vmem:[#allocation8 + $0xe0] ss:$16 sps:$4 sm:$0xff]   ;;  %v1150_v44 = vld [vmem:[#allocation8 + $0xe8] ss:$16 sps:$4 sm:$0xff]  }
  0xb2   :  { %453 = vmatpush1.bf16.msra.mxu1 %v1120_v23  ;;  %411 = vmatprep.subr.bf16.mxu0 %v1121_v24  ;;  %v965_v53 = vld [vmem:[#allocation5] ss:$0 sm:$0xff]  ;;  %v966_v57 = vld [vmem:[#allocation7] ss:$0 sm:$0xff]  ;;  %v1151_v62 = vld [vmem:[#allocation11 + $0x40] sm:$0xff]   ;;  %s1471_s8 = smov [#allocation17]  }
  0xb3   :  { %454 = vmatprep.subr.bf16.mxu1 %v1123_v25  ;;  %v1152_v63 = vld [vmem:[#allocation11 + $0xc0] sm:$0xff]   ;;  %v1155_v4 = vld [vmem:[#allocation11 + $0x48] sm:$0xff]   ;;  %v1159_v8 = vld [vmem:[#allocation11 + $0x50] sm:$0xff]   ;;  %s949_s28 = sshll.u32 %s1471_s8, 4  ;;  %s950_s28 = int_to_ptr.vmem [resolvable:$true] %s949_s28 }
  0xb4   :  { %v1153_v1 = vld [vmem:[#allocation11] sm:$0xff]   ;;  %v1156_v5 = vld [vmem:[#allocation11 + $0xc8] sm:$0xff]   ;;  %v1175_v24 = vld [vmem:[#allocation11 + $0x70] sm:$0xff]   ;;  %s1421_s29 = scalar_lea.vmem %s950_s28, 256  ;;  %p1426_p3 = scmp.lt.s32.totalorder %s950_s28, %s950_s28 }
  0xb5   :  { %412 = vmatpush1.bf16.msra.mxu0 %v1125_v26  ;;  %v1154_v3 = vld [vmem:[#allocation11 + $0x80] sm:$0xff]   ;;  %v1157_v6 = vld [vmem:[#allocation11 + $0x8] sm:$0xff]   ;;  %v1176_v25 = vld [vmem:[#allocation11 + $0xf0] sm:$0xff]   ;;  %p1422_p2 = scmp.ne.s32.totalorder %s950_s28, %s1421_s29  ;;  %p1427_p4 = scmp.lt.s32.totalorder %s1421_s29, %s1421_s29 }
  0xb6   :  { %455 = vmatpush1.bf16.msra.mxu1 %v1126_v27  ;;  %413 = vmatprep.subr.bf16.mxu0 %v1127_v28  ;;  %v1158_v7 = vld [vmem:[#allocation11 + $0x88] sm:$0xff]   ;;  %v1169_v18 = vld [vmem:[#allocation11 + $0x20] sm:$0xff]   ;;  %v1177_v26 = vld [vmem:[#allocation11 + $0x30] sm:$0xff]  }
  0xb7   :  { %456 = vmatprep.subr.bf16.mxu1 %v1129_v29  ;;  %v1170_v19 = vld [vmem:[#allocation11 + $0xa0] sm:$0xff]   ;;  %v1171_v20 = vld [vmem:[#allocation11 + $0x68] sm:$0xff]   ;;  %v1178_v27 = vld [vmem:[#allocation11 + $0xb0] sm:$0xff]   ;;  %p1428_p5 = por %p1427_p4, %p1426_p3 }
  0xb8   :  { %v1172_v21 = vld [vmem:[#allocation11 + $0xe8] sm:$0xff]   ;;  %v1179_v28 = vld [vmem:[#allocation11 + $0x78] sm:$0xff]  }
  0xb9   :  { %414 = vmatpush1.bf16.msra.mxu0 %v1131_v30  ;;  %v1173_v22 = vld [vmem:[#allocation11 + $0x28] sm:$0xff]   ;;  %v1180_v29 = vld [vmem:[#allocation11 + $0xf8] sm:$0xff]   ;;  %p1429_p6 = pnand %p1428_p5, %p1422_p2 }
  0xba   :  { %457 = vmatpush1.bf16.msra.mxu1 %v1132_v31  ;;  %415 = vmatprep.subr.bf16.mxu0 %v1133_v32  ;;  %v1174_v23 = vld [vmem:[#allocation11 + $0xa8] sm:$0xff]   ;;  %v1181_v30 = vld [vmem:[#allocation11 + $0x38] sm:$0xff]   ;;  %v225_v32 = vlaneseq }
  0xbb   :  { %458 = vmatprep.subr.bf16.mxu1 %v1135_v33  ;;  %v1182_v31 = vld [vmem:[#allocation11 + $0xb8] sm:$0xff]  }
  0xbc   :  { %v226_v33 = vshrl.u32 %v225_v32, 7 }
  0xbd   :  { %416 = vmatpush1.bf16.msra.mxu0 %v1137_v34 }
  0xbe   :  { %459 = vmatpush1.bf16.msra.mxu1 %v1138_v35  ;;  %417 = vmatprep.subr.bf16.mxu0 %v1139_v36  ;;  %v227_v34 = vsub.s32 0, %v226_v33  ;;  %v235_v35 = vsub.s32 2, %v226_v33  ;;  %v223_v36 = vld [vmem:[#allocation10] sm:$0xf]  ;;  %v239_v38 = vsub.s32 3, %v226_v33 }
  0xbf   :  { %460 = vmatprep.subr.bf16.mxu1 %v1141_v37  ;;  %v231_v37 = vsub.s32 1, %v226_v33 }
  0xc1   :  { %418 = vmatpush1.bf16.msra.mxu0 %v1143_v39  ;;  %v228_v39 = vrot.slane %v223_v36, %v227_v34 }
  0xc2   :  { %461 = vmatpush1.bf16.msra.mxu1 %v1144_v40  ;;  %419 = vmatprep.subr.bf16.mxu0 %v1145_v41  ;;  %v236_v40 = vrot.slane %v223_v36, %v235_v35  ;;  %v232_v41 = vrot.slane %v223_v36, %v231_v37 }
  0xc3   :  { %462 = vmatprep.subr.bf16.mxu1 %v1147_v42  ;;  %v240_v42 = vrot.slane %v223_v36, %v239_v38 }
  0xc5   :  { %420 = vmatpush1.bf16.msra.mxu0 %v1149_v43 }
  0xc6   :  { %463 = vmatpush1.bf16.msra.mxu1 %v1150_v44  ;;  %1042 = vmatprep.subr.bf16.mxu0 %v1151_v62 }
  0xc7   :  { %1064 = vmatprep.subr.bf16.mxu1 %v1152_v63 }
 0x135   :  { %v151_v9 = vpop.xlane.xlu0 %150 }
 0x136   :  { %v154_v10 = vmul.f32 0.0078125, %v151_v9  ;;  %v1160_v9 = vld [vmem:[#allocation11 + $0xd0] sm:$0xff]  }
 0x138   :  { %v1648_v13 = vsub.f32 %v1640_v0, %v154_v10  ;;  %v1161_v10 = vld [vmem:[#allocation11 + $0x10] sm:$0xff]  }
 0x139   :  { %v147_v11 = vpop.xlane.xlu0 %146 }
 0x13a   :  { %v153_v12 = vmul.f32 0.0078125, %v147_v11  ;;  %v158_v16 = vmul.f32 %v1648_v13, %v1648_v13  ;;  %v1162_v11 = vld [vmem:[#allocation11 + $0x90] sm:$0xff]  }
 0x13c   :  { %v1651_v14 = vsub.f32 %v1644_v2, %v153_v12  ;;  %v161_v17 = vsel %vm148_vm0, %v158_v16, 0.0  ;;  %v1163_v12 = vld [vmem:[#allocation11 + $0x58] sm:$0xff]   ;;  %v1167_v16 = vld [vmem:[#allocation11 + $0x60] sm:$0xff]  }
 0x13e   :  { %v157_v15 = vmul.f32 %v1651_v14, %v1651_v14 }
 0x140   :  { %159 = vadd.xlane.f32.xlu1 %v157_v15  ;;  %v1166_v15 = vld [vmem:[#allocation11 + $0x98] sm:$0xff]  }
 0x144   :  { %162 = vadd.xlane.f32.xlu1 %v161_v17  ;;  %v1168_v17 = vld [vmem:[#allocation11 + $0xe0] sm:$0xff]  }
 0x1cd   :  { %v160_v45 = vpop.xlane.xlu1 %159 }
 0x1ce   :  { %v164_v46 = vmul.f32 0.0078125, %v160_v45 }
 0x1d0   :  { %v166_v47 = vadd.f32 1e-05, %v164_v46 }
 0x1d1   :  { %v163_v48 = vpop.xlane.xlu1 %162 }
 0x1d2   :  { %1183 = vrsqrt.f32 %v166_v47  ;;  %v165_v49 = vmul.f32 0.0078125, %v163_v48 }
 0x1d4   :  { %v167_v50 = vadd.f32 1e-05, %v165_v49 }
 0x1d6   :  { %1185 = vrsqrt.f32 %v167_v50 }
 0x1dc   :  { %v1184_v51 = vpop.eup %1183 }
 0x1dd   :  { %v170_v52 = vmul.f32 %v1184_v51, %v1651_v14  ;;  %v1165_v14 = vld [vmem:[#allocation11 + $0x18] sm:$0xff]  }
 0x1df   :  { %v179_v56 = vmul.f32 %v965_v53, %v170_v52 }
 0x1e0   :  { %v1186_v54 = vpop.eup %1185 }
 0x1e1   :  { %v171_v55 = vmul.f32 %v1186_v54, %v1648_v13  ;;  %v188_v59 = vadd.f32 %v966_v57, %v179_v56  ;;  %v1164_v13 = vld [vmem:[#allocation11 + $0xd8] sm:$0xff]  }
 0x1e3   :  { %v180_v58 = vmul.f32 %v965_v53, %v171_v55 }
 0x1e5   :  { %v189_v60 = vadd.f32 %v966_v57, %v180_v58 }
 0x1e7   :  { %v190_v61 = vpack.c.bf16 %v189_v60, %v188_v59 }
 0x1e9   :  { %438 = vmatmul.mubr.bf16.vlgmr.msra.gmra.mrb[0].mxu0 %v190_v61  ;;  %481 = vmatmul.mubr.bf16.vlgmr.msra.gmra.mrb[0].mxu1 %v190_v61 }
 0x1ea   :  { %1043 = vmatpush3.bf16.msra.mxu0 %v1153_v1  ;;  %1065 = vmatpush3.bf16.msra.mxu1 %v1154_v3 }
 0x1eb   :  { %1044 = vmatprep.subr.bf16.mxu0 %v1155_v4  ;;  %1066 = vmatprep.subr.bf16.mxu1 %v1156_v5 }
 0x1ee   :  { %1045 = vmatpush3.bf16.msra.mxu0 %v1157_v6  ;;  %1067 = vmatpush3.bf16.msra.mxu1 %v1158_v7 }
 0x1ef   :  { %1046 = vmatprep.subr.bf16.mxu0 %v1159_v8  ;;  %1068 = vmatprep.subr.bf16.mxu1 %v1160_v9 }
 0x1f2   :  { %1047 = vmatpush3.bf16.msra.mxu0 %v1161_v10  ;;  %1069 = vmatpush3.bf16.msra.mxu1 %v1162_v11 }
 0x1f3   :  { %1048 = vmatprep.subr.bf16.mxu0 %v1163_v12  ;;  %1070 = vmatprep.subr.bf16.mxu1 %v1164_v13 }
 0x1f6   :  { %1049 = vmatpush3.bf16.msra.mxu0 %v1165_v14  ;;  %1071 = vmatpush3.bf16.msra.mxu1 %v1166_v15 }
 0x1f7   :  { %1050 = vmatprep.subr.bf16.mxu0 %v1167_v16  ;;  %1072 = vmatprep.subr.bf16.mxu1 %v1168_v17 }
 0x1fa   :  { %1051 = vmatpush3.bf16.msra.mxu0 %v1169_v18  ;;  %1073 = vmatpush3.bf16.msra.mxu1 %v1170_v19 }
 0x1fb   :  { %1052 = vmatprep.subr.bf16.mxu0 %v1171_v20  ;;  %1074 = vmatprep.subr.bf16.mxu1 %v1172_v21 }
 0x1fe   :  { %1053 = vmatpush3.bf16.msra.mxu0 %v1173_v22  ;;  %1075 = vmatpush3.bf16.msra.mxu1 %v1174_v23 }
 0x1ff   :  { %1054 = vmatprep.subr.bf16.mxu0 %v1175_v24  ;;  %1076 = vmatprep.subr.bf16.mxu1 %v1176_v25 }
 0x202   :  { %1055 = vmatpush3.bf16.msra.mxu0 %v1177_v26  ;;  %1077 = vmatpush3.bf16.msra.mxu1 %v1178_v27 }
 0x203   :  { %1056 = vmatprep.subr.bf16.mxu0 %v1179_v28  ;;  %1078 = vmatprep.subr.bf16.mxu1 %v1180_v29 }
 0x206   :  { %1057 = vmatpush3.bf16.msra.mxu0 %v1181_v30  ;;  %1079 = vmatpush3.bf16.msra.mxu1 %v1182_v31 }
 0x2bc   :  { %v439_v43 = vpop.f32.mrb[0].mxu0  ;;  %v482_v44 = vpop.f32.mrb[0].mxu1 }
 0x2bd   :  { %v440_v45 = vadd.f32 %v439_v43, %v228_v39  ;;  %v483_v46 = vadd.f32 %v482_v44, %v236_v40  ;;  %v441_v47 = vpop.f32.mrb[1].mxu0  ;;  %v484_v48 = vpop.f32.mrb[1].mxu1  ;;  %v1007_v43 = vld [vmem:[#allocation13] ss:$0 sm:$0xff] }
 0x2be   :  { %v442_v49 = vadd.f32 %v441_v47, %v232_v41  ;;  %v1660_v50 = vadd.f32 %v484_v48, %v240_v42  ;;  %v443_v51 = vpop.f32.mrb[2].mxu0  ;;  %v486_v52 = vpop.f32.mrb[2].mxu1 }
 0x2bf   :  { %v999_v53 = vmul.f32 -1.442695, %v440_v45  ;;  %v1001_v54 = vmul.f32 -1.442695, %v483_v46  ;;  %v444_v55 = vadd.f32 %v443_v51, %v228_v39  ;;  %v487_v56 = vadd.f32 %v486_v52, %v236_v40  ;;  %v445_v57 = vpop.f32.mrb[3].mxu0  ;;  %v488_v58 = vpop.f32.mrb[3].mxu1 }
 0x2c0   :  { %v1000_v59 = vmul.f32 -1.442695, %v442_v49  ;;  %v1002_v60 = vmul.f32 -1.442695, %v1660_v50  ;;  %v446_v61 = vadd.f32 %v445_v57, %v232_v41  ;;  %v489_v62 = vadd.f32 %v488_v58, %v240_v42 }
 0x2c1   :  { %1187 = vpow2.f32 %v999_v53  ;;  %v1003_v63 = vmul.f32 -1.442695, %v444_v55  ;;  %v1005_v1 = vmul.f32 -1.442695, %v487_v56 }
 0x2c2   :  { %1189 = vpow2.f32 %v1001_v54  ;;  %v1004_v3 = vmul.f32 -1.442695, %v446_v61  ;;  %v1006_v4 = vmul.f32 -1.442695, %v489_v62 }
 0x2c3   :  { %1191 = vpow2.f32 %v1000_v59 }
 0x2c4   :  { %1193 = vpow2.f32 %v1002_v60 }
 0x2c5   :  { %1195 = vpow2.f32 %v1003_v63 }
 0x2c6   :  { %1197 = vpow2.f32 %v1005_v1 }
 0x2c7   :  { %1199 = vpow2.f32 %v1004_v3 }
 0x2c8   :  { %1201 = vpow2.f32 %v1006_v4 }
 0x2cb   :  { %v1188_v5 = vpop.eup %1187 }
 0x2cc   :  { %v1190_v6 = vpop.eup %1189  ;;  %v515_v7 = vadd.f32 1.0, %v1188_v5 }
 0x2cd   :  { %v1192_v8 = vpop.eup %1191  ;;  %v517_v9 = vadd.f32 1.0, %v1190_v6 }
 0x2ce   :  { %v1194_v10 = vpop.eup %1193  ;;  %1203 = vrcp.f32 %v515_v7  ;;  %v516_v11 = vadd.f32 1.0, %v1192_v8 }
 0x2cf   :  { %v1196_v12 = vpop.eup %1195  ;;  %1205 = vrcp.f32 %v517_v9  ;;  %v518_v13 = vadd.f32 1.0, %v1194_v10 }
 0x2d0   :  { %v1198_v14 = vpop.eup %1197  ;;  %1207 = vrcp.f32 %v516_v11  ;;  %v519_v15 = vadd.f32 1.0, %v1196_v12 }
 0x2d1   :  { %v1200_v16 = vpop.eup %1199  ;;  %1209 = vrcp.f32 %v518_v13  ;;  %v521_v17 = vadd.f32 1.0, %v1198_v14 }
 0x2d2   :  { %v1202_v18 = vpop.eup %1201  ;;  %1211 = vrcp.f32 %v519_v15  ;;  %v520_v19 = vadd.f32 1.0, %v1200_v16  ;;  %v1040_v15 = vld [vmem:[#allocation14] ss:$0 sm:$0xff] }
 0x2d3   :  { %1213 = vrcp.f32 %v521_v17  ;;  %v522_v20 = vadd.f32 1.0, %v1202_v18  ;;  %v1041_v17 = vld [vmem:[#allocation16] ss:$0 sm:$0xff] }
 0x2d4   :  { %1215 = vrcp.f32 %v520_v19 }
 0x2d5   :  { %1217 = vrcp.f32 %v522_v20 }
 0x2d8   :  { %v1204_v21 = vpop.eup %1203 }
 0x2d9   :  { %v1206_v22 = vpop.eup %1205  ;;  %v539_v27 = vmul.f32 %v1204_v21, %v440_v45 }
 0x2da   :  { %v1208_v23 = vpop.eup %1207  ;;  %v541_v30 = vmul.f32 %v1206_v22, %v483_v46 }
 0x2db   :  { %v1210_v24 = vpop.eup %1209  ;;  %v540_v33 = vmul.f32 %v1208_v23, %v442_v49 }
 0x2dc   :  { %v1212_v25 = vpop.eup %1211  ;;  %v542_v36 = vmul.f32 %v1210_v24, %v1660_v50 }
 0x2dd   :  { %v1214_v26 = vpop.eup %1213  ;;  %v543_v28 = vmul.f32 %v1212_v25, %v444_v55 }
 0x2de   :  { %v1216_v29 = vpop.eup %1215  ;;  %v545_v31 = vmul.f32 %v1214_v26, %v487_v56 }
 0x2df   :  { %v1218_v32 = vpop.eup %1217  ;;  %v547_v34 = vpack.c.bf16 %v543_v28, %v539_v27  ;;  %v544_v35 = vmul.f32 %v1216_v29, %v446_v61 }
 0x2e0   :  { %v549_v37 = vpack.c.bf16 %v545_v31, %v541_v30  ;;  %v546_v38 = vmul.f32 %v1218_v32, %v489_v62 }
 0x2e1   :  { %v548_v39 = vpack.c.bf16 %v544_v35, %v540_v33 }
 0x2e2   :  { %v550_v40 = vpack.c.bf16 %v546_v38, %v542_v36 }
 0x2e3   :  { %846 = vmatprep.mubr.bf16.mxu0 %v548_v39 }
 0x2e4   :  { %887 = vmatprep.mubr.bf16.mxu1 %v550_v40  ;;  %847 = vmatmul.mubr.bf16.vlgmr.msra.gmra.mrb[4].mxu0 %v547_v34 }
 0x2e5   :  { %888 = vmatmul.mubr.bf16.vlgmr.msra.gmra.mrb[4].mxu1 %v549_v37 }
 0x3b7   :  { %v1058_v41 = vpop.f32.mrb[4].mxu0 }
 0x3b8   :  { %v1080_v42 = vpop.f32.mrb[4].mxu1  ;;  %v1059_v44 = vpop.f32.mrb[5].mxu0 }
 0x3b9   :  { %v1060_v45 = vadd.f32 %v1059_v44, %v1058_v41  ;;  %v1081_v46 = vpop.f32.mrb[5].mxu1  ;;  %v1061_v47 = vpop.f32.mrb[6].mxu0 }
 0x3ba   :  { %v1082_v48 = vadd.f32 %v1081_v46, %v1080_v42  ;;  %v1083_v49 = vpop.f32.mrb[6].mxu1  ;;  %v1062_v51 = vpop.f32.mrb[7].mxu0 }
 0x3bb   :  { %v849_v52 = vadd.f32 %v1060_v45, %v1007_v43  ;;  %v1063_v50 = vadd.f32 %v1062_v51, %v1061_v47  ;;  %v1084_v53 = vpop.f32.mrb[7].mxu1 }
 0x3bc   :  { %v1085_v54 = vadd.f32 %v1084_v53, %v1083_v49 }
 0x3bd   :  { %v890_v55 = vadd.f32 %v1082_v48, %v849_v52  ;;  %v852_v56 = vadd.f32 %v1063_v50, %v1007_v43 }
 0x3bf   :  { %v896_v57 = vmul.f32 0.5, %v890_v55  ;;  %v893_v58 = vadd.f32 %v1085_v54, %v852_v56 }
 0x3c1   :  { %v897_v59 = vmul.f32 0.5, %v893_v58  ;;  %v898_v60 = vadd.f32 %v896_v57, %v1644_v2 }
 0x3c3   :  { %900 = vadd.xlane.f32.xlu1 %v898_v60  ;;  %v899_v61 = vadd.f32 %v897_v59, %v1640_v0 }
 0x3c5   :  { %v902_v62 = vsel %vm148_vm0, %v899_v61, 0.0 }
 0x3c6   :  { %903 = vadd.xlane.f32.xlu0 %v902_v62 }
 0x450   :  { %v901_v63 = vpop.xlane.xlu1 %900 }
 0x451   :  { %v905_v1 = vmul.f32 0.0078125, %v901_v63 }
 0x453   :  { %v907_v3 = vsub.f32 %v898_v60, %v905_v1  ;;  %v904_v4 = vpop.xlane.xlu0 %903 }
 0x454   :  { %v906_v5 = vmul.f32 0.0078125, %v904_v4 }
 0x455   :  { %v909_v6 = vmul.f32 %v907_v3, %v907_v3 }
 0x456   :  { %v908_v7 = vsub.f32 %v899_v61, %v906_v5 }
 0x457   :  { %911 = vadd.xlane.f32.xlu0 %v909_v6 }
 0x458   :  { %v910_v8 = vmul.f32 %v908_v7, %v908_v7 }
 0x45a   :  { %v913_v9 = vsel %vm148_vm0, %v910_v8, 0.0 }
 0x45b   :  { %914 = vadd.xlane.f32.xlu1 %v913_v9 }
 0x4e4   :  { %v912_v10 = vpop.xlane.xlu0 %911 }
 0x4e5   :  { %v916_v2 = vmul.f32 0.0078125, %v912_v10 }
 0x4e7   :  { %v918_v11 = vadd.f32 1e-05, %v916_v2 }
 0x4e8   :  { %v915_v12 = vpop.xlane.xlu1 %914 }
 0x4e9   :  { %1219 = vrsqrt.f32 %v918_v11  ;;  %v917_v0 = vmul.f32 0.0078125, %v915_v12 }
 0x4eb   :  { %v919_v13 = vadd.f32 1e-05, %v917_v0 }
 0x4ed   :  { %1221 = vrsqrt.f32 %v919_v13 }
 0x4f3   :  { %v1220_v14 = vpop.eup %1219 }
 0x4f4   :  { %v922_v16 = vmul.f32 %v1220_v14, %v907_v3 }
 0x4f6   :  { %v931_v18 = vmul.f32 %v1040_v15, %v922_v16 }
 0x4f7   :  { %v1222_v19 = vpop.eup %1221 }
 0x4f8   :  { %v923_v20 = vmul.f32 %v1222_v19, %v908_v7  ;;  %v940_v21 = vadd.f32 %v1041_v17, %v931_v18 }
 0x4fa   :  { %v932_v22 = vmul.f32 %v1040_v15, %v923_v20  ;;  %942 = vst [vmem:[#allocation17] sm:$0xff] %v940_v21 }
 0x4fc   :  { %v941_v23 = vadd.f32 %v1041_v17, %v932_v22 }
 0x4fe   :  { %943 = vst [vmem:[#allocation17 + $0x8] sm:$0x1] %v941_v23 }
 0x4ff   :  { %1432 = shalt.err (!%p1429_p6)
}
 0x500   :  { %s1433_s13 = scalar_lea.hbm %s1692_s9, 256 }
 0x501   :  { %p1434_p7 = scmp.ne.s32.totalorder %s1692_s9, %s1433_s13  ;;  %p1437_p8 = scmp.lt.u32.totalorder %s1433_s13, %s1692_s9 }
 0x503   :  { %p1439_p9 = pnand %p1437_p8, %p1434_p7 }
 0x505   :  { %1442 = shalt.err (!%p1439_p9)
}
 0x506   :  { %955 = dma.vmem_to_hbm [thread:$0]  %s950_s28, 256, %s1692_s9, [#allocation4], %s1464_s7, %s1464_s7, %s1465_s26  }
 0x507   :  { %1453 = dma.done.wait [#allocation4], 256  }
 0x508   :  { %1454 = vsyncadd [#allocation4], 4294967040 }
 0x509   :  { %959 = vsyncpa [#allocation3], 1 }
 0x50a   :  { %960 = vsyncpa [#allocation6], 1 }
 0x50b   :  { %961 = vsyncpa [#allocation9], 1 }
 0x50c   :  { %962 = vsyncpa [#allocation12], 1 }
 0x50d   :  { %963 = vsyncpa [#allocation15], 1 }
 0x50e   :  { %964 = vsyncpa [#allocation4], 1 }

// kernel: model2_forward_single.17
= control target key start
LH: loop header
LB: loop body
LE: loop exit
PB: predicated region body
PF: predicated region fallthrough
CT: control target
= control target key end

     0   :  { %16 = vsyncpa [#allocation4], 0  ;;  %s2634_s0 = inlined_call_operand.hbm [shape: f32[9,128], index: 0, kind: input, shape index: {}]   ;;  %s2635_s1 = inlined_call_operand.hbm [shape: f32[1,128], index: 1, kind: input, shape index: {}]   ;;  %s2636_s2 = inlined_call_operand.hbm [shape: f32[1,128], index: 2, kind: input, shape index: {}]   ;;  %s2637_s3 = inlined_call_operand.hbm [shape: bf16[128,512], index: 3, kind: input, shape index: {}]   ;;  %s2638_s4 = inlined_call_operand.hbm [shape: f32[1,512], index: 4, kind: input, shape index: {}]   ;;  %s2639_s5 = inlined_call_operand.hbm [shape: f32[16,256], index: 5, kind: input, shape index: {}]   ;;  %s2640_s6 = inlined_call_operand.hbm [shape: f32[1,256], index: 6, kind: input, shape index: {}]   ;;  %s2641_s7 = inlined_call_operand.hbm [shape: f32[1,256], index: 7, kind: input, shape index: {}]   ;;  %s2642_s8 = inlined_call_operand.hbm [shape: f32[1,256], index: 8, kind: input, shape index: {}]   ;;  %s2643_s9 = inlined_call_operand.hbm [shape: bf16[256,128], index: 9, kind: input, shape index: {}]   ;;  %s2644_s10 = inlined_call_operand.hbm [shape: f32[1,128], index: 10, kind: input, shape index: {}]   ;;  %s2645_s11 = inlined_call_operand.hbm [shape: f32[9,128], index: 11, kind: output, shape index: {}]  }
   0x1   :  { %17 = vsyncpa [#allocation7], 0 }
   0x2   :  { %18 = vsyncpa [#allocation10], 0 }
   0x3   :  { %19 = vsyncpa [#allocation13], 0 }
   0x4   :  { %20 = vsyncpa [#allocation16], 0 }
   0x5   :  { %21 = vsyncpa [#allocation19], 0 }
   0x6   :  { %22 = vsyncpa [#allocation5], 0  ;;  %s1980_s17 = smov [#allocation6]   ;;  %s1981_s19 = smov [#allocation9]  }
   0x7   :  { %s41_s18 = sshll.u32 %s1980_s17, 4  ;;  %s60_s20 = sshll.u32 %s1981_s19, 4  ;;  %s42_s18 = int_to_ptr.vmem [resolvable:$true] %s41_s18  ;;  %s2059_s20 = int_to_ptr.vmem [resolvable:$true] %s60_s20 }
   0x8   :  { %s1702_s23 = scalar_lea.hbm %s2635_s1, 16 }
   0x9   :  { %p1703_p0 = scmp.ne.s32.totalorder %s2635_s1, %s1702_s23  ;;  %p1706_p1 = scmp.lt.u32.totalorder %s1702_s23, %s2635_s1 }
   0xb   :  { %p1708_p2 = pnand %p1706_p1, %p1703_p0 }
   0xd   :  { %1711 = shalt.err (!%p1708_p2)
}
   0xe   :  { %s1712_s28 = scalar_lea.vmem %s42_s18, 16  ;;  %s1716_s29 = scalar_lea.vmem %s42_s18, 32 }
   0xf   :  { %p1713_p3 = scmp.ne.s32.totalorder %s42_s18, %s1712_s28  ;;  %p1717_p4 = scmp.lt.s32.totalorder %s42_s18, %s42_s18 }
  0x10   :  { %p1718_p5 = scmp.lt.s32.totalorder %s1716_s29, %s1712_s28 }
  0x12   :  { %p1719_p6 = por %p1718_p5, %p1717_p4 }
  0x14   :  { %p1720_p7 = pnand %p1719_p6, %p1713_p3 }
  0x16   :  { %1723 = shalt.err (!%p1720_p7)
}
  0x17   :  { %44 = dma.hbm_to_vmem [thread:$0]  %s2635_s1, 16, %s42_s18, [#allocation7]  }
  0x18   :  { %s1724_s15 = scalar_lea.hbm %s2637_s3, 4096 }
  0x19   :  { %p1725_p8 = scmp.ne.s32.totalorder %s2637_s3, %s1724_s15  ;;  %p1728_p9 = scmp.lt.u32.totalorder %s1724_s15, %s2637_s3 }
  0x1b   :  { %p1730_p10 = pnand %p1728_p9, %p1725_p8 }
  0x1d   :  { %1733 = shalt.err (!%p1730_p10)
}
  0x1e   :  { %s1734_s22 = scalar_lea.vmem %s2059_s20, 4096  ;;  %p1739_p12 = scmp.lt.s32.totalorder %s2059_s20, %s2059_s20 }
  0x1f   :  { %p1735_p11 = scmp.ne.s32.totalorder %s2059_s20, %s1734_s22  ;;  %p1740_p13 = scmp.lt.s32.totalorder %s1734_s22, %s1734_s22 }
  0x21   :  { %p1741_p0 = por %p1740_p13, %p1739_p12 }
  0x23   :  { %p1742_p1 = pnand %p1741_p0, %p1735_p11 }
  0x25   :  { %1745 = shalt.err (!%p1742_p1)
}
  0x26   :  { %s1982_s1 = smov 256   ;;  %s1983_s18 = smov 16  }
  0x27   :  { %66 = dma.hbm_to_vmem [thread:$0]  %s2637_s3, 4096, %s2059_s20, [#allocation10], %s1982_s1, %s1982_s1, %s1983_s18  }
  0x28   :  { %s1984_s25 = smov [#allocation12]   ;;  %s1985_s27 = smov [#allocation15]  }
  0x29   :  { %s82_s26 = sshll.u32 %s1984_s25, 4  ;;  %s105_s28 = sshll.u32 %s1985_s27, 4  ;;  %s83_s26 = int_to_ptr.vmem [resolvable:$true] %s82_s26  ;;  %s106_s28 = int_to_ptr.vmem [resolvable:$true] %s105_s28 }
  0x2a   :  { %s1746_s12 = scalar_lea.hbm %s2639_s5, 512 }
  0x2b   :  { %p1747_p2 = scmp.ne.s32.totalorder %s2639_s5, %s1746_s12  ;;  %p1750_p3 = scmp.lt.u32.totalorder %s1746_s12, %s2639_s5 }
  0x2d   :  { %p1752_p4 = pnand %p1750_p3, %p1747_p2 }
  0x2f   :  { %1755 = shalt.err (!%p1752_p4)
}
  0x30   :  { %s1756_s3 = scalar_lea.vmem %s83_s26, 512  ;;  %p1761_p6 = scmp.lt.s32.totalorder %s83_s26, %s83_s26 }
  0x31   :  { %p1757_p5 = scmp.ne.s32.totalorder %s83_s26, %s1756_s3  ;;  %p1762_p7 = scmp.lt.s32.totalorder %s1756_s3, %s1756_s3 }
  0x33   :  { %p1763_p8 = por %p1762_p7, %p1761_p6 }
  0x35   :  { %p1764_p9 = pnand %p1763_p8, %p1757_p5 }
  0x37   :  { %1767 = shalt.err (!%p1764_p9)
}
  0x38   :  { %88 = dma.hbm_to_vmem [thread:$0]  %s2639_s5, 512, %s83_s26, [#allocation13], %s1982_s1, %s1982_s1, %s1983_s18  }
  0x39   :  { %s1768_s22 = scalar_lea.hbm %s2641_s7, 32 }
  0x3a   :  { %p1769_p10 = scmp.ne.s32.totalorder %s2641_s7, %s1768_s22  ;;  %p1772_p11 = scmp.lt.u32.totalorder %s1768_s22, %s2641_s7 }
  0x3c   :  { %p1774_p12 = pnand %p1772_p11, %p1769_p10 }
  0x3e   :  { %1777 = shalt.err (!%p1774_p12)
}
  0x3f   :  { %s1778_s29 = scalar_lea.vmem %s106_s28, 32  ;;  %p1783_p0 = scmp.lt.s32.totalorder %s106_s28, %s106_s28 }
  0x40   :  { %p1779_p13 = scmp.ne.s32.totalorder %s106_s28, %s1778_s29  ;;  %p1784_p1 = scmp.lt.s32.totalorder %s1778_s29, %s1778_s29 }
  0x42   :  { %p1785_p2 = por %p1784_p1, %p1783_p0 }
  0x44   :  { %p1786_p3 = pnand %p1785_p2, %p1779_p13 }
  0x46   :  { %1789 = shalt.err (!%p1786_p3)
}
  0x47   :  { %108 = dma.hbm_to_vmem [thread:$0]  %s2641_s7, 32, %s106_s28, [#allocation16]  }
  0x48   :  { %s1986_s18 = smov [#allocation18]   ;;  %s1790_s13 = scalar_lea.hbm %s2643_s9, 2048 }
  0x49   :  { %s124_s26 = sshll.u32 %s1986_s18, 4  ;;  %p1791_p4 = scmp.ne.s32.totalorder %s2643_s9, %s1790_s13  ;;  %s125_s26 = int_to_ptr.vmem [resolvable:$true] %s124_s26 }
  0x4a   :  { %p1794_p5 = scmp.lt.u32.totalorder %s1790_s13, %s2643_s9 }
  0x4c   :  { %p1796_p6 = pnand %p1794_p5, %p1791_p4 }
  0x4e   :  { %1799 = shalt.err (!%p1796_p6)
}
  0x4f   :  { %s1800_s20 = scalar_lea.vmem %s125_s26, 2048  ;;  %p1805_p8 = scmp.lt.s32.totalorder %s125_s26, %s125_s26 }
  0x50   :  { %p1801_p7 = scmp.ne.s32.totalorder %s125_s26, %s1800_s20  ;;  %p1806_p9 = scmp.lt.s32.totalorder %s1800_s20, %s1800_s20 }
  0x52   :  { %p1807_p10 = por %p1806_p9, %p1805_p8 }
  0x54   :  { %p1808_p11 = pnand %p1807_p10, %p1801_p7 }
  0x56   :  { %1811 = shalt.err (!%p1808_p11)
}
  0x57   :  { %s1987_s7 = smov 64   ;;  %s1988_s28 = smov 4  }
  0x58   :  { %130 = dma.hbm_to_vmem [thread:$0]  %s2643_s9, 2048, %s125_s26, [#allocation19], %s1987_s7, %s1987_s7, %s1988_s28  }
  0x59   :  { %s1989_s21 = smov [#allocation3]   ;;  %s1812_s25 = scalar_lea.hbm %s2634_s0, 256 }
  0x5a   :  { %s28_s22 = sshll.u32 %s1989_s21, 4  ;;  %p1813_p12 = scmp.ne.s32.totalorder %s2634_s0, %s1812_s25  ;;  %s29_s22 = int_to_ptr.vmem [resolvable:$true] %s28_s22 }
  0x5b   :  { %p1816_p13 = scmp.lt.u32.totalorder %s1812_s25, %s2634_s0 }
  0x5d   :  { %p1818_p0 = pnand %p1816_p13, %p1813_p12 }
  0x5f   :  { %1821 = shalt.err (!%p1818_p0)
}
  0x60   :  { %s1822_s18 = scalar_lea.vmem %s29_s22, 256  ;;  %p1827_p2 = scmp.lt.s32.totalorder %s29_s22, %s29_s22 }
  0x61   :  { %p1823_p1 = scmp.ne.s32.totalorder %s29_s22, %s1822_s18  ;;  %p1828_p3 = scmp.lt.s32.totalorder %s1822_s18, %s1822_s18 }
  0x63   :  { %p1829_p4 = por %p1828_p3, %p1827_p2 }
  0x65   :  { %p1830_p5 = pnand %p1829_p4, %p1823_p1 }
  0x67   :  { %1833 = shalt.err (!%p1830_p5)
}
  0x68   :  { %s1990_s9 = smov 128   ;;  %s1991_s26 = smov 8  }
  0x69   :  { %34 = dma.hbm_to_vmem [thread:$0]  %s2634_s0, 256, %s29_s22, [#allocation4], %s1990_s9, %s1990_s9, %s1991_s26  }
  0x6a   :  { %s1992_s13 = smov [#allocation8]   ;;  %s1993_s15 = smov [#allocation11]  }
  0x6b   :  { %s51_s14 = sshll.u32 %s1992_s13, 4  ;;  %s73_s16 = sshll.u32 %s1993_s15, 4  ;;  %s52_s14 = int_to_ptr.vmem [resolvable:$true] %s51_s14  ;;  %s74_s16 = int_to_ptr.vmem [resolvable:$true] %s73_s16 }
  0x6c   :  { %s1834_s7 = scalar_lea.hbm %s2636_s2, 16 }
  0x6d   :  { %p1835_p6 = scmp.ne.s32.totalorder %s2636_s2, %s1834_s7  ;;  %p1838_p7 = scmp.lt.u32.totalorder %s1834_s7, %s2636_s2 }
  0x6f   :  { %p1840_p8 = pnand %p1838_p7, %p1835_p6 }
  0x71   :  { %1843 = shalt.err (!%p1840_p8)
}
  0x72   :  { %s1844_s0 = scalar_lea.vmem %s52_s14, 16  ;;  %s1848_s22 = scalar_lea.vmem %s52_s14, 32 }
  0x73   :  { %p1845_p9 = scmp.ne.s32.totalorder %s52_s14, %s1844_s0  ;;  %p1849_p10 = scmp.lt.s32.totalorder %s52_s14, %s52_s14 }
  0x74   :  { %p1850_p11 = scmp.lt.s32.totalorder %s1848_s22, %s1844_s0 }
  0x76   :  { %p1851_p12 = por %p1850_p11, %p1849_p10 }
  0x78   :  { %p1852_p13 = pnand %p1851_p12, %p1845_p9 }
  0x7a   :  { %1855 = shalt.err (!%p1852_p13)
}
  0x7b   :  { %54 = dma.hbm_to_vmem [thread:$0]  %s2636_s2, 16, %s52_s14, [#allocation7]  }
  0x7c   :  { %s1856_s29 = scalar_lea.hbm %s2638_s4, 64 }
  0x7d   :  { %p1857_p0 = scmp.ne.s32.totalorder %s2638_s4, %s1856_s29  ;;  %p1860_p1 = scmp.lt.u32.totalorder %s1856_s29, %s2638_s4 }
  0x7f   :  { %p1862_p2 = pnand %p1860_p1, %p1857_p0 }
  0x81   :  { %1865 = shalt.err (!%p1862_p2)
}
  0x82   :  { %s1866_s12 = scalar_lea.vmem %s74_s16, 64  ;;  %p1871_p4 = scmp.lt.s32.totalorder %s74_s16, %s74_s16 }
  0x83   :  { %p1867_p3 = scmp.ne.s32.totalorder %s74_s16, %s1866_s12  ;;  %p1872_p5 = scmp.lt.s32.totalorder %s1866_s12, %s1866_s12 }
  0x85   :  { %p1873_p6 = por %p1872_p5, %p1871_p4 }
  0x87   :  { %p1874_p7 = pnand %p1873_p6, %p1867_p3 }
  0x89   :  { %1877 = shalt.err (!%p1874_p7)
}
  0x8a   :  { %76 = dma.hbm_to_vmem [thread:$0]  %s2638_s4, 64, %s74_s16, [#allocation10]  }
  0x8b   :  { %s1994_s14 = smov [#allocation14]   ;;  %s1995_s3 = smov [#allocation17]  }
  0x8c   :  { %s95_s15 = sshll.u32 %s1994_s14, 4  ;;  %s115_s20 = sshll.u32 %s1995_s3, 4  ;;  %s96_s15 = int_to_ptr.vmem [resolvable:$true] %s95_s15  ;;  %s116_s20 = int_to_ptr.vmem [resolvable:$true] %s115_s20 }
  0x8d   :  { %s1878_s17 = scalar_lea.hbm %s2640_s6, 32 }
  0x8e   :  { %p1879_p8 = scmp.ne.s32.totalorder %s2640_s6, %s1878_s17  ;;  %p1882_p9 = scmp.lt.u32.totalorder %s1878_s17, %s2640_s6 }
  0x90   :  { %p1884_p10 = pnand %p1882_p9, %p1879_p8 }
  0x92   :  { %1887 = shalt.err (!%p1884_p10)
}
  0x93   :  { %s1888_s4 = scalar_lea.vmem %s96_s15, 32  ;;  %p1893_p12 = scmp.lt.s32.totalorder %s96_s15, %s96_s15 }
  0x94   :  { %p1889_p11 = scmp.ne.s32.totalorder %s96_s15, %s1888_s4  ;;  %p1894_p13 = scmp.lt.s32.totalorder %s1888_s4, %s1888_s4 }
  0x96   :  { %p1895_p0 = por %p1894_p13, %p1893_p12 }
  0x98   :  { %p1896_p1 = pnand %p1895_p0, %p1889_p11 }
  0x9a   :  { %1899 = shalt.err (!%p1896_p1)
}
  0x9b   :  { %98 = dma.hbm_to_vmem [thread:$0]  %s2640_s6, 32, %s96_s15, [#allocation13]  }
  0x9c   :  { %s1900_s27 = scalar_lea.hbm %s2642_s8, 32 }
  0x9d   :  { %p1901_p2 = scmp.ne.s32.totalorder %s2642_s8, %s1900_s27  ;;  %p1904_p3 = scmp.lt.u32.totalorder %s1900_s27, %s2642_s8 }
  0x9f   :  { %p1906_p4 = pnand %p1904_p3, %p1901_p2 }
  0xa1   :  { %1909 = shalt.err (!%p1906_p4)
}
  0xa2   :  { %s1910_s30 = scalar_lea.vmem %s116_s20, 32  ;;  %p1915_p6 = scmp.lt.s32.totalorder %s116_s20, %s116_s20 }
  0xa3   :  { %p1911_p5 = scmp.ne.s32.totalorder %s116_s20, %s1910_s30  ;;  %p1916_p7 = scmp.lt.s32.totalorder %s1910_s30, %s1910_s30 }
  0xa5   :  { %p1917_p8 = por %p1916_p7, %p1915_p6 }
  0xa7   :  { %p1918_p9 = pnand %p1917_p8, %p1911_p5 }
  0xa9   :  { %1921 = shalt.err (!%p1918_p9)
}
  0xaa   :  { %118 = dma.hbm_to_vmem [thread:$0]  %s2642_s8, 32, %s116_s20, [#allocation16]  }
  0xab   :  { %s1996_s2 = smov [#allocation20]   ;;  %s1922_s3 = scalar_lea.hbm %s2644_s10, 16 }
  0xac   :  { %s137_s13 = sshll.u32 %s1996_s2, 4  ;;  %p1923_p10 = scmp.ne.s32.totalorder %s2644_s10, %s1922_s3  ;;  %s138_s13 = int_to_ptr.vmem [resolvable:$true] %s137_s13 }
  0xad   :  { %p1926_p11 = scmp.lt.u32.totalorder %s1922_s3, %s2644_s10 }
  0xaf   :  { %p1928_p12 = pnand %p1926_p11, %p1923_p10 }
  0xb1   :  { %1931 = shalt.err (!%p1928_p12)
}
  0xb2   :  { %s1932_s21 = scalar_lea.vmem %s138_s13, 16  ;;  %s1936_s8 = scalar_lea.vmem %s138_s13, 32 }
  0xb3   :  { %p1933_p13 = scmp.ne.s32.totalorder %s138_s13, %s1932_s21  ;;  %p1937_p0 = scmp.lt.s32.totalorder %s138_s13, %s138_s13 }
  0xb4   :  { %p1938_p1 = scmp.lt.s32.totalorder %s1936_s8, %s1932_s21 }
  0xb6   :  { %p1939_p2 = por %p1938_p1, %p1937_p0 }
  0xb8   :  { %p1940_p3 = pnand %p1939_p2, %p1933_p13 }
  0xba   :  { %1943 = shalt.err (!%p1940_p3)
}
  0xbb   :  { %140 = dma.hbm_to_vmem [thread:$0]  %s2644_s10, 16, %s138_s13, [#allocation19]  }
  0xbc   :  { %1966 = dma.done.wait [#allocation4], 256  }
  0xbd   :  { %1967 = vsyncadd [#allocation4], 4294967040 }
  0xbe   :  { %1968 = dma.done.wait [#allocation7], 32  }
  0xbf   :  { %1969 = vsyncadd [#allocation7], 4294967264 }
  0xc0   :  { %1970 = dma.done.wait [#allocation10], 4160  }
  0xc1   :  { %1971 = vsyncadd [#allocation10], 4294963136 }
  0xc2   :  { %1972 = dma.done.wait [#allocation13], 544  }
  0xc3   :  { %1973 = vsyncadd [#allocation13], 4294966752 }
  0xc4   :  { %1974 = dma.done.wait [#allocation16], 64  }
  0xc5   :  { %1975 = vsyncadd [#allocation16], 4294967232 }
  0xc6   :  { %1976 = dma.done.wait [#allocation19], 2064  }
  0xc7   :  { %1977 = vsyncadd [#allocation19], 4294965232  ;;  %vm179_vm0 = vcmask 1040384   ;;  %v176_v0 = vld [vmem:[#allocation3 + $0x8] sm:$0x1]  ;;  %v175_v2 = vld [vmem:[#allocation3] sm:$0xff] }
  0xc8   :  { %v180_v1 = vsel %vm179_vm0, %v176_v0, 0.0  ;;  %v1596_v3 = vld [vmem:[#allocation9 + $0x4] ss:$16 sps:$4 sm:$0xff]   ;;  %v1598_v4 = vld [vmem:[#allocation9 + $0xc] ss:$16 sps:$4 sm:$0xff]   ;;  %v1997_v38 = vmov 0  }
  0xc9   :  { %181 = vadd.xlane.f32.xlu0 %v180_v1  ;;  %v1600_v5 = vld [vmem:[#allocation9] ss:$16 sps:$4 sm:$0xff]   ;;  %v1601_v6 = vld [vmem:[#allocation9 + $0x8] ss:$16 sps:$4 sm:$0xff]   ;;  %v1602_v7 = vld [vmem:[#allocation9 + $0x24] ss:$16 sps:$4 sm:$0xff]   ;;  %436 = vmatprep.subr.bf16.mxu0 %v1596_v3 }
  0xca   :  { %v1604_v8 = vld [vmem:[#allocation9 + $0x2c] ss:$16 sps:$4 sm:$0xff]   ;;  %479 = vmatprep.subr.bf16.mxu1 %v1598_v4  ;;  %437 = vmatpush1.bf16.msra.mxu0 %v1600_v5  ;;  %v1606_v18 = vld [vmem:[#allocation9 + $0x20] ss:$16 sps:$4 sm:$0xff]   ;;  %v1607_v19 = vld [vmem:[#allocation9 + $0x28] ss:$16 sps:$4 sm:$0xff]  }
  0xcb   :  { %480 = vmatpush1.bf16.msra.mxu1 %v1601_v6  ;;  %438 = vmatprep.subr.bf16.mxu0 %v1602_v7  ;;  %v1608_v20 = vld [vmem:[#allocation9 + $0x44] ss:$16 sps:$4 sm:$0xff]   ;;  %v1610_v21 = vld [vmem:[#allocation9 + $0x4c] ss:$16 sps:$4 sm:$0xff]   ;;  %v1612_v22 = vld [vmem:[#allocation9 + $0x40] ss:$16 sps:$4 sm:$0xff]  }
  0xcc   :  { %481 = vmatprep.subr.bf16.mxu1 %v1604_v8  ;;  %v1613_v23 = vld [vmem:[#allocation9 + $0x48] ss:$16 sps:$4 sm:$0xff]   ;;  %v1614_v24 = vld [vmem:[#allocation9 + $0x64] ss:$16 sps:$4 sm:$0xff]   ;;  %v1616_v25 = vld [vmem:[#allocation9 + $0x6c] ss:$16 sps:$4 sm:$0xff]   ;;  %468 = vmatprep.mubr.bf16.mxu0 %v1997_v38 }
  0xcd   :  { %177 = vadd.xlane.f32.xlu0 %v175_v2  ;;  %v1618_v26 = vld [vmem:[#allocation9 + $0x60] ss:$16 sps:$4 sm:$0xff]   ;;  %v1619_v27 = vld [vmem:[#allocation9 + $0x68] ss:$16 sps:$4 sm:$0xff]   ;;  %v1620_v28 = vld [vmem:[#allocation9 + $0x84] ss:$16 sps:$4 sm:$0xff]   ;;  %511 = vmatprep.mubr.bf16.mxu1 %v1997_v38 }
  0xce   :  { %439 = vmatpush1.bf16.msra.mxu0 %v1606_v18  ;;  %v1622_v29 = vld [vmem:[#allocation9 + $0x8c] ss:$16 sps:$4 sm:$0xff]   ;;  %v1624_v30 = vld [vmem:[#allocation9 + $0x80] ss:$16 sps:$4 sm:$0xff]   ;;  %v1625_v31 = vld [vmem:[#allocation9 + $0x88] ss:$16 sps:$4 sm:$0xff]  }
  0xcf   :  { %482 = vmatpush1.bf16.msra.mxu1 %v1607_v19  ;;  %440 = vmatprep.subr.bf16.mxu0 %v1608_v20  ;;  %v1626_v32 = vld [vmem:[#allocation9 + $0xa4] ss:$16 sps:$4 sm:$0xff]   ;;  %v1628_v33 = vld [vmem:[#allocation9 + $0xac] ss:$16 sps:$4 sm:$0xff]   ;;  %v1630_v34 = vld [vmem:[#allocation9 + $0xa0] ss:$16 sps:$4 sm:$0xff]  }
  0xd0   :  { %483 = vmatprep.subr.bf16.mxu1 %v1610_v21  ;;  %v1631_v35 = vld [vmem:[#allocation9 + $0xa8] ss:$16 sps:$4 sm:$0xff]   ;;  %v1632_v36 = vld [vmem:[#allocation9 + $0xc4] ss:$16 sps:$4 sm:$0xff]   ;;  %v1634_v37 = vld [vmem:[#allocation9 + $0xcc] ss:$16 sps:$4 sm:$0xff]  }
  0xd1   :  { %550 = vst [vmem:[#allocation2] sm:$0xff] %v1997_v38  ;;  %552 = vst [vmem:[#allocation2 + $0x10] sm:$0xff] %v1997_v38  ;;  %v1636_v39 = vld [vmem:[#allocation9 + $0xc0] ss:$16 sps:$4 sm:$0xff]   ;;  %v1637_v40 = vld [vmem:[#allocation9 + $0xc8] ss:$16 sps:$4 sm:$0xff]  }
  0xd2   :  { %441 = vmatpush1.bf16.msra.mxu0 %v1612_v22  ;;  %v1638_v41 = vld [vmem:[#allocation9 + $0xe4] ss:$16 sps:$4 sm:$0xff]   ;;  %v1640_v42 = vld [vmem:[#allocation9 + $0xec] ss:$16 sps:$4 sm:$0xff]   ;;  %v1642_v43 = vld [vmem:[#allocation9 + $0xe0] ss:$16 sps:$4 sm:$0xff]  }
  0xd3   :  { %484 = vmatpush1.bf16.msra.mxu1 %v1613_v23  ;;  %442 = vmatprep.subr.bf16.mxu0 %v1614_v24  ;;  %v1643_v44 = vld [vmem:[#allocation9 + $0xe8] ss:$16 sps:$4 sm:$0xff]   ;;  %v1492_v53 = vld [vmem:[#allocation6] ss:$0 sm:$0xff]  ;;  %v1493_v57 = vld [vmem:[#allocation8] ss:$0 sm:$0xff] }
  0xd4   :  { %485 = vmatprep.subr.bf16.mxu1 %v1616_v25  ;;  %v1644_v62 = vld [vmem:[#allocation18 + $0x40] sm:$0xff]   ;;  %v1647_v1 = vld [vmem:[#allocation18 + $0x8] sm:$0xff]   ;;  %v1649_v3 = vld [vmem:[#allocation18 + $0x10] sm:$0xff]   ;;  %vm567_vm1 = vsmask.f32 256  ;;  %vm569_vm2 = vcmask 1044484  }
  0xd5   :  { %v1645_v63 = vld [vmem:[#allocation18] sm:$0xff]   ;;  %v1650_v4 = vld [vmem:[#allocation18 + $0x58] sm:$0xff]   ;;  %v1654_v8 = vld [vmem:[#allocation18 + $0x68] sm:$0xff]   ;;  %vm570_vm3 = vsmask.f32 4352  ;;  %vm835_vm6 = vcmask 1041408  }
  0xd6   :  { %443 = vmatpush1.bf16.msra.mxu0 %v1618_v26  ;;  %v1651_v5 = vld [vmem:[#allocation18 + $0x18] sm:$0xff]   ;;  %v1652_v6 = vld [vmem:[#allocation18 + $0x60] sm:$0xff]   ;;  %vm2337_vm4 = vmand %vm179_vm0, %vm567_vm1  ;;  %vm637_vm8 = vcmask 1046528   ;;  %vm679_vm9 = vcmask 1045504   ;;  %vm715_vm10 = vcmask 1044480   ;;  %vm757_vm11 = vcmask 1043456  }
  0xd7   :  { %486 = vmatpush1.bf16.msra.mxu1 %v1619_v27  ;;  %444 = vmatprep.subr.bf16.mxu0 %v1620_v28  ;;  %v1653_v7 = vld [vmem:[#allocation18 + $0x20] sm:$0xff]   ;;  %vm2349_vm5 = vmand %vm569_vm2, %vm570_vm3  ;;  %vm793_vm12 = vcmask 1042432   ;;  %s1998_s10 = smov [#allocation21]  }
  0xd8   :  { %487 = vmatprep.subr.bf16.mxu1 %v1622_v29  ;;  %vm572_vm7 = vmor %vm2349_vm5, %vm2337_vm4  ;;  %s1475_s22 = sshll.u32 %s1998_s10, 4  ;;  %s1476_s22 = int_to_ptr.vmem [resolvable:$true] %s1475_s22 }
  0xd9   :  { %s1944_s4 = scalar_lea.vmem %s1476_s22, 256  ;;  %p1949_p5 = scmp.lt.s32.totalorder %s1476_s22, %s1476_s22 }
  0xda   :  { %445 = vmatpush1.bf16.msra.mxu0 %v1624_v30  ;;  %p1945_p4 = scmp.ne.s32.totalorder %s1476_s22, %s1944_s4  ;;  %p1950_p6 = scmp.lt.s32.totalorder %s1944_s4, %s1944_s4 }
  0xdb   :  { %488 = vmatpush1.bf16.msra.mxu1 %v1625_v31  ;;  %446 = vmatprep.subr.bf16.mxu0 %v1626_v32 }
  0xdc   :  { %489 = vmatprep.subr.bf16.mxu1 %v1628_v33  ;;  %p1951_p7 = por %p1950_p6, %p1949_p5 }
  0xde   :  { %447 = vmatpush1.bf16.msra.mxu0 %v1630_v34  ;;  %p1952_p8 = pnand %p1951_p7, %p1945_p4 }
  0xdf   :  { %490 = vmatpush1.bf16.msra.mxu1 %v1631_v35  ;;  %448 = vmatprep.subr.bf16.mxu0 %v1632_v36 }
  0xe0   :  { %491 = vmatprep.subr.bf16.mxu1 %v1634_v37  ;;  %v592_v37 = vld [vmem:[#allocation12] ss:$8 sm:$0x3] }
  0xe2   :  { %449 = vmatpush1.bf16.msra.mxu0 %v1636_v39 }
  0xe3   :  { %492 = vmatpush1.bf16.msra.mxu1 %v1637_v40  ;;  %450 = vmatprep.subr.bf16.mxu0 %v1638_v41  ;;  %v617_v41 = vld [vmem:[#allocation12 + $0x1] ss:$8 sm:$0x3] }
  0xe4   :  { %493 = vmatprep.subr.bf16.mxu1 %v1640_v42  ;;  %v576_v42 = vld [vmem:[#allocation14] sm:$0x3] }
  0xe6   :  { %451 = vmatpush1.bf16.msra.mxu0 %v1642_v43  ;;  %v593_v43 = vunpack.c.l.bf16 %v1997_v38 }
  0xe7   :  { %494 = vmatpush1.bf16.msra.mxu1 %v1643_v44  ;;  %1555 = vmatprep.subr.bf16.mxu0 %v1644_v62  ;;  %v594_v44 = vunpack.c.h.bf16 %v1997_v38  ;;  %v730_v62 = vld [vmem:[#allocation2] sm:$0xcc] }
 0x156   :  { %v182_v9 = vpop.xlane.xlu0 %181 }
 0x157   :  { %v185_v10 = vmul.f32 0.0078125, %v182_v9  ;;  %v1655_v9 = vld [vmem:[#allocation18 + $0x28] sm:$0xff]  }
 0x159   :  { %v2202_v13 = vsub.f32 %v176_v0, %v185_v10  ;;  %v1646_v0 = vld [vmem:[#allocation18 + $0x48] sm:$0xff]   ;;  %v1656_v10 = vld [vmem:[#allocation18 + $0x70] sm:$0xff]  }
 0x15a   :  { %v178_v11 = vpop.xlane.xlu0 %177 }
 0x15b   :  { %v184_v12 = vmul.f32 0.0078125, %v178_v11  ;;  %v189_v16 = vmul.f32 %v2202_v13, %v2202_v13  ;;  %v1657_v11 = vld [vmem:[#allocation18 + $0x30] sm:$0xff]  }
 0x15d   :  { %v2204_v14 = vsub.f32 %v175_v2, %v184_v12  ;;  %v192_v17 = vsel %vm179_vm0, %v189_v16, 0.0  ;;  %v1648_v2 = vld [vmem:[#allocation18 + $0x50] sm:$0xff]   ;;  %v1658_v12 = vld [vmem:[#allocation18 + $0x78] sm:$0xff]  }
 0x15f   :  { %v188_v15 = vmul.f32 %v2204_v14, %v2204_v14 }
 0x161   :  { %190 = vadd.xlane.f32.xlu1 %v188_v15 }
 0x165   :  { %193 = vadd.xlane.f32.xlu1 %v192_v17  ;;  %v254_v17 = vld [vmem:[#allocation11] sm:$0xf] }
 0x1ee   :  { %v191_v45 = vpop.xlane.xlu1 %190 }
 0x1ef   :  { %v195_v46 = vmul.f32 0.0078125, %v191_v45 }
 0x1f1   :  { %v197_v47 = vadd.f32 1e-05, %v195_v46 }
 0x1f2   :  { %v194_v48 = vpop.xlane.xlu1 %193 }
 0x1f3   :  { %1660 = vrsqrt.f32 %v197_v47  ;;  %v196_v49 = vmul.f32 0.0078125, %v194_v48  ;;  %v652_v47 = vld [vmem:[#allocation2] sm:$0xee] }
 0x1f5   :  { %v198_v50 = vadd.f32 1e-05, %v196_v49 }
 0x1f7   :  { %1662 = vrsqrt.f32 %v198_v50 }
 0x1fd   :  { %v1661_v51 = vpop.eup %1660 }
 0x1fe   :  { %v201_v52 = vmul.f32 %v1661_v51, %v2204_v14  ;;  %v256_v14 = vlaneseq  ;;  %v655_v51 = vld [vmem:[#allocation12 + $0x2] ss:$8 sm:$0x3] }
 0x200   :  { %v210_v56 = vmul.f32 %v1492_v53, %v201_v52  ;;  %v257_v15 = vshrl.u32 %v256_v14, 7 }
 0x201   :  { %v1663_v54 = vpop.eup %1662 }
 0x202   :  { %v202_v55 = vmul.f32 %v1663_v54, %v2202_v13  ;;  %v219_v59 = vadd.f32 %v1493_v57, %v210_v56  ;;  %v1659_v13 = vld [vmem:[#allocation18 + $0x38] sm:$0xff]   ;;  %v266_v16 = vsub.s32 2, %v257_v15  ;;  %v270_v18 = vsub.s32 3, %v257_v15 }
 0x203   :  { %v2225_v39 = vsub.s32 0, %v257_v15  ;;  %v2227_v40 = vsub.s32 1, %v257_v15  ;;  %v695_v56 = vld [vmem:[#allocation12 + $0x3] ss:$8 sm:$0x3] }
 0x204   :  { %v211_v58 = vmul.f32 %v1492_v53, %v202_v55  ;;  %v267_v19 = vrot.slane %v254_v17, %v266_v16  ;;  %v271_v20 = vrot.slane %v254_v17, %v270_v18  ;;  %v656_v55 = vunpack.c.l.bf16 %v652_v47 }
 0x205   :  { %2658 = vst [vmem:[#allocation29_spill] sm:$0xff] %v2225_v39  ;;  %2659 = vst [vmem:[#allocation30_spill] sm:$0xff] %v2227_v40  ;;  %v2232_v45 = vrot.slane %v592_v37, %v2225_v39  ;;  %v2235_v46 = vrot.slane %v592_v37, %v2227_v40  ;;  %v2238_v48 = vrot.slane %v617_v41, %v2225_v39 }
 0x206   :  { %v220_v60 = vadd.f32 %v1493_v57, %v211_v58  ;;  %v2241_v49 = vrot.slane %v254_v17, %v2225_v39  ;;  %v2244_v50 = vrot.slane %v617_v41, %v2227_v40  ;;  %v2247_v38 = vrot.slane %v254_v17, %v2227_v40 }
 0x207   :  { %v2250_v53 = vrot.slane %v576_v42, %v2225_v39  ;;  %v2253_v54 = vrot.slane %v576_v42, %v2227_v40 }
 0x208   :  { %v221_v61 = vpack.c.bf16 %v220_v60, %v219_v59  ;;  %v608_v59 = vmul.f32 %v2232_v45, %v593_v43  ;;  %v609_v60 = vmul.f32 %v2235_v46, %v594_v44 }
 0x20a   :  { %469 = vmatmul.mubr.bf16.vlgmr.msra.gmra.mrb[0].mxu0 %v221_v61  ;;  %512 = vmatmul.mubr.bf16.vlgmr.msra.gmra.mrb[0].mxu1 %v221_v61  ;;  %v657_v61 = vunpack.c.h.bf16 %v652_v47 }
 0x20b   :  { %1556 = vmatpush3.bf16.msra.mxu0 %v1645_v63 }
 0x20c   :  { %1557 = vmatprep.subr.bf16.mxu0 %v1646_v0 }
 0x20f   :  { %1558 = vmatpush3.bf16.msra.mxu0 %v1647_v1  ;;  %v2258_v1 = vmul.f32 %v2238_v48, %v593_v43 }
 0x210   :  { %1559 = vmatprep.subr.bf16.mxu0 %v1648_v2  ;;  %v2261_v2 = vrot.slane %v655_v51, %v2225_v39 }
 0x212   :  { %v2282_v16 = vmul.f32 %v2261_v2, %v656_v55 }
 0x213   :  { %1560 = vmatpush3.bf16.msra.mxu0 %v1649_v3  ;;  %v2264_v3 = vrot.slane %v655_v51, %v2227_v40 }
 0x214   :  { %1561 = vmatprep.subr.bf16.mxu0 %v1650_v4  ;;  %v733_v4 = vld [vmem:[#allocation12 + $0x4] ss:$8 sm:$0x3] }
 0x215   :  { %v2276_v14 = vrot.slane %v733_v4, %v2225_v39  ;;  %v2279_v15 = vrot.slane %v733_v4, %v2227_v40  ;;  %v2285_v17 = vmul.f32 %v2264_v3, %v657_v61 }
 0x217   :  { %1562 = vmatpush3.bf16.msra.mxu0 %v1651_v5 }
 0x218   :  { %1563 = vmatprep.subr.bf16.mxu0 %v1652_v6 }
 0x21b   :  { %1564 = vmatpush3.bf16.msra.mxu0 %v1653_v7  ;;  %v2267_v7 = vmul.f32 %v2244_v50, %v594_v44 }
 0x21c   :  { %1565 = vmatprep.subr.bf16.mxu0 %v1654_v8  ;;  %v2270_v8 = vrot.slane %v695_v56, %v2225_v39 }
 0x21f   :  { %1566 = vmatpush3.bf16.msra.mxu0 %v1655_v9 }
 0x220   :  { %1567 = vmatprep.subr.bf16.mxu0 %v1656_v10  ;;  %v2273_v10 = vrot.slane %v695_v56, %v2227_v40 }
 0x223   :  { %1568 = vmatpush3.bf16.msra.mxu0 %v1657_v11  ;;  %v734_v11 = vunpack.c.l.bf16 %v730_v62 }
 0x224   :  { %1569 = vmatprep.subr.bf16.mxu0 %v1658_v12  ;;  %v773_v12 = vld [vmem:[#allocation12 + $0x5] ss:$8 sm:$0x3] }
 0x225   :  { %v2288_v18 = vrot.slane %v773_v12, %v2225_v39 }
 0x227   :  { %1570 = vmatpush3.bf16.msra.mxu0 %v1659_v13  ;;  %v735_v13 = vunpack.c.h.bf16 %v730_v62  ;;  %v2318_v44 = vmul.f32 %v2288_v18, %v734_v11  ;;  %v888_v62 = vld [vmem:[#allocation12 + $0x10] ss:$8 sm:$0x3] }
 0x2dd   :  { %v2217_v21 = vpop.f32.mrb[0].mxu0  ;;  %v513_v22 = vpop.f32.mrb[0].mxu1 }
 0x2de   :  { %v514_v23 = vadd.f32 %v513_v22, %v267_v19  ;;  %v2219_v24 = vpop.f32.mrb[1].mxu0  ;;  %v515_v25 = vpop.f32.mrb[1].mxu1  ;;  %v811_v22 = vld [vmem:[#allocation12 + $0x6] ss:$8 sm:$0x3]  ;;  %v471_v51 = vadd.f32 %v2217_v21, %v2241_v49 }
 0x2df   :  { %v516_v26 = vadd.f32 %v515_v25, %v271_v20  ;;  %v2221_v27 = vpop.f32.mrb[2].mxu0  ;;  %v517_v28 = vpop.f32.mrb[2].mxu1  ;;  %v2297_v25 = vadd.f32 %v609_v60, %v2253_v54  ;;  %v820_v37 = vrot.slane %v811_v22, %v2225_v39  ;;  %v824_v41 = vrot.slane %v811_v22, %v2227_v40 }
 0x2e0   :  { %v1526_v29 = vmul.f32 -1.442695, %v514_v23  ;;  %v518_v30 = vadd.f32 %v517_v28, %v267_v19  ;;  %v2223_v31 = vpop.f32.mrb[3].mxu0  ;;  %v519_v32 = vpop.f32.mrb[3].mxu1  ;;  %v2291_v19 = vrot.slane %v773_v12, %v2227_v40  ;;  %v2294_v23 = vadd.f32 %v608_v59, %v2250_v53 }
 0x2e1   :  { %v1527_v33 = vmul.f32 -1.442695, %v516_v26  ;;  %v520_v34 = vadd.f32 %v519_v32, %v271_v20  ;;  %v808_v20 = vld [vmem:[#allocation2] sm:$0x88]  ;;  %v2301_v28 = vmul.f32 %v2270_v8, %v656_v55  ;;  %v2308_v32 = vmul.f32 %v2276_v14, %v734_v11 }
 0x2e2   :  { %1664 = vpow2.f32 %v1526_v29  ;;  %v1528_v35 = vmul.f32 -1.442695, %v518_v30  ;;  %v2305_v30 = vmul.f32 %v2273_v10, %v657_v61  ;;  %v2321_v47 = vmul.f32 %v2291_v19, %v735_v13  ;;  %v1026_v61 = vld [vmem:[#allocation12 + $0x14] ss:$8 sm:$0x3] }
 0x2e3   :  { %1666 = vpow2.f32 %v1527_v33  ;;  %v1529_v36 = vmul.f32 -1.442695, %v520_v34  ;;  %v2311_v33 = vmul.f32 %v2279_v15, %v735_v13  ;;  %v851_v34 = vld [vmem:[#allocation12 + $0x7] ss:$8 sm:$0x3]  ;;  %v475_v21 = vadd.f32 %v2221_v27, %v2241_v49 }
 0x2e4   :  { %1668 = vpow2.f32 %v1528_v35  ;;  %v812_v35 = vunpack.c.l.bf16 %v808_v20  ;;  %v856_v55 = vrot.slane %v851_v34, %v2225_v39  ;;  %v860_v56 = vrot.slane %v851_v34, %v2227_v40  ;;  %v989_v13 = vld [vmem:[#allocation12 + $0x13] ss:$8 sm:$0x3]  ;;  %v1065_v59 = vld [vmem:[#allocation12 + $0x15] ss:$8 sm:$0x3] }
 0x2e5   :  { %1670 = vpow2.f32 %v1529_v36  ;;  %v813_v36 = vunpack.c.h.bf16 %v808_v20  ;;  %v477_v12 = vadd.f32 %v2223_v31, %v2247_v38  ;;  %v950_v20 = vld [vmem:[#allocation12 + $0x12] ss:$8 sm:$0x3]  ;;  %v2360_v31 = vrot.slane %v888_v62, %v2225_v39 }
 0x2e6   :  { %v2408_v27 = vrot.slane %v1026_v61, %v2225_v39  ;;  %v2411_v4 = vrot.slane %v1026_v61, %v2227_v40 }
 0x2e7   :  { %2664 = vst [vmem:[#allocation31_spill] sm:$0xff] %v2360_v31 }
 0x2ec   :  { %v1665_v52 = vpop.eup %1664 }
 0x2ed   :  { %v1667_v57 = vpop.eup %1666  ;;  %v534_v58 = vadd.f32 1.0, %v1665_v52 }
 0x2ee   :  { %v1669_v63 = vpop.eup %1668  ;;  %v535_v0 = vadd.f32 1.0, %v1667_v57 }
 0x2ef   :  { %v1671_v5 = vpop.eup %1670  ;;  %1672 = vrcp.f32 %v534_v58  ;;  %v536_v6 = vadd.f32 1.0, %v1669_v63  ;;  %v473_v58 = vadd.f32 %v2219_v24, %v2247_v38  ;;  %v2343_v24 = vmul.f32 %v824_v41, %v813_v36 }
 0x2f0   :  { %1674 = vrcp.f32 %v535_v0  ;;  %v537_v9 = vadd.f32 1.0, %v1671_v5  ;;  %v2341_v5 = vmul.f32 %v820_v37, %v812_v35 }
 0x2f1   :  { %1676 = vrcp.f32 %v536_v6  ;;  %v913_v6 = vld [vmem:[#allocation12 + $0x11] ss:$8 sm:$0x3] }
 0x2f2   :  { %1678 = vrcp.f32 %v537_v9  ;;  %v2366_v49 = vrot.slane %v913_v6, %v2225_v39 }
 0x2f4   :  { %2665 = vst [vmem:[#allocation32_spill] sm:$0xff] %v2366_v49 }
 0x2f9   :  { %v1673_v57 = vpop.eup %1672 }
 0x2fa   :  { %v1675_v63 = vpop.eup %1674  ;;  %v546_v0 = vmul.f32 %v1673_v57, %v471_v51  ;;  %v2355_v51 = vmul.f32 %v856_v55, %v812_v35  ;;  %v2357_v57 = vmul.f32 %v860_v56, %v813_v36  ;;  %v573_v35 = vld [vmem:[#allocation2 + $0x10] sm:$0x11]  ;;  %v836_v36 = vrot.slane %v2341_v5, 6 }
 0x2fb   :  { %v1677_v9 = vpop.eup %1676  ;;  %v547_v11 = vmul.f32 %v1675_v63, %v473_v58  ;;  %v2363_v63 = vrot.slane %v888_v62, %v2227_v40  ;;  %v2378_v62 = vrot.slane %v950_v20, %v2225_v39 }
 0x2fc   :  { %v1679_v22 = vpop.eup %1678  ;;  %v548_v34 = vmul.f32 %v1677_v9, %v475_v21  ;;  %v839_v21 = vrot.slane %v2343_v24, 6  ;;  %v871_v60 = vrot.slane %v2355_v51, 7  ;;  %v2386_v24 = vrot.slane %v989_v13, %v2225_v39 }
 0x2fd   :  { %v1553_v38 = vpack.c.bf16 %v547_v11, %v546_v0  ;;  %v549_v58 = vmul.f32 %v1679_v22, %v477_v12  ;;  %v2375_v0 = vrot.slane %v913_v6, %v2227_v40  ;;  %v2381_v22 = vrot.slane %v950_v20, %v2227_v40 }
 0x2fe   :  { %v2389_v6 = vrot.slane %v989_v13, %v2227_v40 }
 0x2ff   :  { %565 = vst [vmem:[#allocation2 + $0x8] sm:$0xff] %v1553_v38  ;;  %v1554_v9 = vpack.c.bf16 %v549_v58, %v548_v34  ;;  %v814_v11 = vunpack.c.l.bf16 %v1553_v38  ;;  %v815_v12 = vunpack.c.h.bf16 %v1553_v38  ;;  %v1102_v58 = vld [vmem:[#allocation12 + $0x16] ss:$8 sm:$0x3] }
 0x300   :  { %v2426_v61 = vrot.slane %v1102_v58, %v2225_v39  ;;  %v2429_v52 = vrot.slane %v1102_v58, %v2227_v40 }
 0x301   :  { %v574_v34 = vsel %vm572_vm7, %v1554_v9, %v573_v35  ;;  %v2396_v20 = vmul.f32 %v820_v37, %v814_v11  ;;  %v2398_v38 = vmul.f32 %v824_v41, %v815_v12  ;;  %v2400_v51 = vmul.f32 %v856_v55, %v814_v11  ;;  %v1141_v37 = vld [vmem:[#allocation12 + $0x17] ss:$8 sm:$0x3] }
 0x302   :  { %575 = vst [vmem:[#allocation2 + $0x10] sm:$0x11] %v574_v34  ;;  %v2402_v5 = vmul.f32 %v860_v56, %v815_v12  ;;  %v2405_v13 = vmul.f32 %v2366_v49, %v814_v11  ;;  %v2416_v35 = vrot.slane %v1065_v59, %v2225_v39  ;;  %v2419_v56 = vrot.slane %v1065_v59, %v2227_v40 }
 0x303   :  { %2666 = vst [vmem:[#allocation33_spill] sm:$0xff] %v2400_v51  ;;  %v2655_v41 = vrot.slane %v2396_v20, 6  ;;  %v2423_v34 = vmul.f32 %v2375_v0, %v815_v12  ;;  %2668 = vst [vmem:[#allocation35_spill] sm:$0xff] %v2426_v61  ;;  %v2433_v42 = vrot.slane %v1141_v37, %v2225_v39  ;;  %v2436_v59 = vrot.slane %v1141_v37, %v2227_v40 }
 0x304   :  { %2667 = vst [vmem:[#allocation34_spill] sm:$0xff] %v2405_v13  ;;  %v2671_v58 = vrot.slane %v2398_v38, 6  ;;  %v2450_v39 = vmul.f32 %v2360_v31, %v814_v11  ;;  %v2453_v37 = vmul.f32 %v2363_v63, %v815_v12 }
 0x305   :  { %2669 = vst [vmem:[#allocation36_spill] sm:$0xff] %v2433_v42  ;;  %2670 = vst [vmem:[#allocation37_spill] sm:$0xff] %v2436_v59  ;;  %v2442_v61 = vsel %vm835_vm6, %v836_v36, %v2655_v41  ;;  %v2672_v36 = vrot.slane %v2400_v51, 7 }
 0x306   :  { %v591_v26 = vld [vmem:[#allocation2 + $0x8] sm:$0x11]  ;;  %v2447_v43 = vsel %vm835_vm6, %v839_v21, %v2671_v58 }
 0x307   :  { %v653_v9 = vld [vmem:[#allocation2 + $0x8] sm:$0x33]  ;;  %v595_v29 = vunpack.c.l.bf16 %v591_v26  ;;  %v596_v40 = vunpack.c.h.bf16 %v591_v26  ;;  %v2458_v41 = vsel %vm179_vm0, %v871_v60, %v2672_v36 }
 0x308   :  { %v731_v55 = vld [vmem:[#allocation2 + $0x8] sm:$0x77]  ;;  %v658_v42 = vunpack.c.l.bf16 %v653_v9  ;;  %v659_v13 = vunpack.c.h.bf16 %v653_v9 }
 0x309   :  { %v736_v49 = vunpack.c.l.bf16 %v731_v55  ;;  %v737_v59 = vunpack.c.h.bf16 %v731_v55  ;;  %v610_v58 = vmul.f32 %v2232_v45, %v595_v29  ;;  %v611_v11 = vmul.f32 %v2235_v46, %v596_v40 }
 0x30a   :  { %v631_v12 = vmul.f32 %v2238_v48, %v595_v29  ;;  %v632_v31 = vmul.f32 %v2244_v50, %v596_v40  ;;  %v673_v26 = vmul.f32 %v2261_v2, %v658_v42  ;;  %v674_v55 = vmul.f32 %v2264_v3, %v659_v13 }
 0x30b   :  { %v709_v9 = vmul.f32 %v2270_v8, %v658_v42  ;;  %v710_v60 = vmul.f32 %v2273_v10, %v659_v13  ;;  %v614_v36 = vadd.f32 %v610_v58, %v2250_v53  ;;  %v615_v45 = vadd.f32 %v611_v11, %v2253_v54 }
 0x30c   :  { %v639_v21 = vrot.slane %v631_v12, 1  ;;  %v642_v46 = vrot.slane %v632_v31, 1  ;;  %v681_v51 = vrot.slane %v673_v26, 2  ;;  %v684_v48 = vrot.slane %v674_v55, 2 }
 0x30d   :  { %v717_v29 = vrot.slane %v709_v9, 3  ;;  %v720_v40 = vrot.slane %v710_v60, 3  ;;  %v2673_v50 = vrot.slane %v2258_v1, 1  ;;  %v2674_v3 = vrot.slane %v2267_v7, 1  ;;  %v2493_v60 = vld [vmem:[#allocation2 + $0x10] sm:$0x11] }
 0x30e   :  { %v650_v10 = vadd.f32 %v639_v21, %v614_v36  ;;  %v651_v42 = vadd.f32 %v642_v46, %v615_v45  ;;  %v2675_v31 = vrot.slane %v2282_v16, 2  ;;  %v2676_v58 = vrot.slane %v2285_v17, 2 }
 0x30f   :  { %v640_v2 = vsel %vm637_vm8, %v2673_v50, %v639_v21  ;;  %v643_v8 = vsel %vm637_vm8, %v2674_v3, %v642_v46  ;;  %v2677_v7 = vrot.slane %v2301_v28, 3  ;;  %v2678_v21 = vrot.slane %v2305_v30, 3  ;;  %v947_v50 = vld [vmem:[#allocation2 + $0x8] sm:$0xee] }
 0x310   :  { %v648_v53 = vadd.f32 %v640_v2, %v2294_v23  ;;  %v649_v54 = vadd.f32 %v643_v8, %v2297_v25  ;;  %v682_v13 = vsel %vm679_vm9, %v2675_v31, %v681_v51  ;;  %v685_v1 = vsel %vm679_vm9, %v2676_v58, %v684_v48 }
 0x311   :  { %v692_v11 = vadd.f32 %v681_v51, %v650_v10  ;;  %v693_v12 = vadd.f32 %v684_v48, %v651_v42  ;;  %v718_v26 = vsel %vm715_vm10, %v2677_v7, %v717_v29  ;;  %v721_v23 = vsel %vm715_vm10, %v2678_v21, %v720_v40  ;;  %v2509_v42 = vld [vmem:[#allocation2 + $0x10] sm:$0x33] }
 0x312   :  { %v690_v55 = vadd.f32 %v682_v13, %v648_v53  ;;  %v691_v25 = vadd.f32 %v685_v1, %v649_v54  ;;  %v751_v16 = vmul.f32 %v2276_v14, %v736_v49  ;;  %v752_v9 = vmul.f32 %v2279_v15, %v737_v59 }
 0x313   :  { %v728_v17 = vadd.f32 %v717_v29, %v692_v11  ;;  %v729_v36 = vadd.f32 %v720_v40, %v693_v12  ;;  %v787_v51 = vmul.f32 %v2288_v18, %v736_v49  ;;  %v788_v28 = vmul.f32 %v2291_v19, %v737_v59 }
 0x314   :  { %v726_v45 = vadd.f32 %v718_v26, %v690_v55  ;;  %v727_v46 = vadd.f32 %v721_v23, %v691_v25  ;;  %v759_v48 = vrot.slane %v751_v16, 4  ;;  %v762_v30 = vrot.slane %v752_v9, 4 }
 0x315   :  { %v795_v2 = vrot.slane %v787_v51, 5  ;;  %v798_v3 = vrot.slane %v788_v28, 5  ;;  %v2679_v8 = vrot.slane %v2402_v5, 7  ;;  %v2680_v14 = vrot.slane %v2357_v57, 7 }
 0x316   :  { %v892_v29 = vunpack.c.h.bf16 %v2493_v60  ;;  %v2681_v40 = vrot.slane %v2308_v32, 4  ;;  %v2682_v19 = vrot.slane %v2311_v33, 4  ;;  %v770_v59 = vadd.f32 %v759_v48, %v728_v17 }
 0x317   :  { %v876_v15 = vsel %vm179_vm0, %v2680_v14, %v2679_v8  ;;  %v771_v10 = vadd.f32 %v762_v30, %v729_v36  ;;  %v2683_v57 = vrot.slane %v2318_v44, 5  ;;  %v952_v13 = vunpack.c.h.bf16 %v947_v50 }
 0x318   :  { %v760_v18 = vsel %vm757_vm11, %v2681_v40, %v759_v48  ;;  %v763_v49 = vsel %vm757_vm11, %v2682_v19, %v762_v30  ;;  %v2684_v58 = vrot.slane %v2321_v47, 5  ;;  %v806_v1 = vadd.f32 %v795_v2, %v770_v59 }
 0x319   :  { %v768_v53 = vadd.f32 %v760_v18, %v726_v45  ;;  %v769_v54 = vadd.f32 %v763_v49, %v727_v46  ;;  %v796_v31 = vsel %vm793_vm12, %v2683_v57, %v795_v2  ;;  %v807_v11 = vadd.f32 %v798_v3, %v771_v10 }
 0x31a   :  { %v799_v32 = vsel %vm793_vm12, %v2684_v58, %v798_v3  ;;  %v928_v33 = vmul.f32 %v2375_v0, %v892_v29  ;;  %v951_v26 = vunpack.c.l.bf16 %v947_v50  ;;  %v954_v21 = vunpack.c.h.bf16 %v2509_v42  ;;  %v2537_v50 = vld [vmem:[#allocation2 + $0x10] sm:$0x77] }
 0x31b   :  { %v804_v12 = vadd.f32 %v796_v31, %v768_v53  ;;  %v805_v7 = vadd.f32 %v799_v32, %v769_v54  ;;  %v2685_v23 = vrot.slane %v2398_v38, 6  ;;  %v891_v44 = vunpack.c.l.bf16 %v2493_v60  ;;  %v2551_v53 = vld [vmem:[#allocation2 + $0x8] sm:$0x88]  ;;  %v2556_v31 = vld [vmem:[#allocation2 + $0x10] sm:$0xff] }
 0x31c   :  { %v907_v25 = vmul.f32 %v2363_v63, %v892_v29  ;;  %v937_v16 = vrot.slane %v928_v33, 1  ;;  %v967_v17 = vmul.f32 %v2381_v22, %v952_v13  ;;  %v969_v0 = vmul.f32 %v2381_v22, %v954_v21  ;;  %v1023_v63 = vld [vmem:[#allocation2 + $0x8] sm:$0xcc] }
 0x31d   :  { %v849_v55 = vadd.f32 %v2685_v23, %v807_v11  ;;  %v846_v47 = vadd.f32 %v2442_v61, %v804_v12  ;;  %v847_v9 = vadd.f32 %v2447_v43, %v805_v7  ;;  %v2686_v36 = vrot.slane %v2396_v20, 6 }
 0x31e   :  { %v2687_v28 = vmov %v2679_v8  ;;  %v953_v45 = vunpack.c.l.bf16 %v2509_v42  ;;  %v1002_v46 = vmul.f32 %v2389_v6, %v952_v13  ;;  %v2535_v43 = vmul.f32 %v2378_v62, %v951_v26 }
 0x31f   :  { %v848_v51 = vadd.f32 %v2686_v36, %v806_v1  ;;  %v884_v38 = vadd.f32 %v2687_v28, %v849_v55  ;;  %v881_v48 = vadd.f32 %v2458_v41, %v846_v47  ;;  %v882_v61 = vadd.f32 %v876_v15, %v847_v9  ;;  %v2689_v28 = vld [vmem:[#allocation37_spill] sm:$0xff] }
 0x320   :  { %v978_v30 = vrot.slane %v969_v0, 2  ;;  %v2688_v20 = vrot.slane %v2423_v34, 1  ;;  %v2543_v2 = vmul.f32 %v2386_v24, %v951_v26  ;;  %v1004_v3 = vmul.f32 %v2389_v6, %v954_v21 }
 0x321   :  { %v911_v22 = vadd.f32 %v907_v25, %v884_v38  ;;  %v909_v8 = vadd.f32 %v2453_v37, %v882_v61  ;;  %v977_v41 = vrot.slane %v967_v17, 2  ;;  %v1027_v14 = vunpack.c.l.bf16 %v1023_v63  ;;  %v2690_v61 = vld [vmem:[#allocation33_spill] sm:$0xff] }
 0x322   :  { %v938_v5 = vsel %vm637_vm8, %v2688_v20, %v937_v16  ;;  %v1028_v15 = vunpack.c.h.bf16 %v1023_v63  ;;  %v1012_v40 = vrot.slane %v1002_v46, 3  ;;  %v1013_v18 = vrot.slane %v1004_v3, 3 }
 0x323   :  { %v946_v29 = vadd.f32 %v937_v16, %v911_v22  ;;  %v1030_v19 = vunpack.c.h.bf16 %v2537_v50  ;;  %v908_v49 = vadd.f32 %v2450_v39, %v881_v48  ;;  %v944_v34 = vadd.f32 %v938_v5, %v909_v8  ;;  %v2692_v22 = vld [vmem:[#allocation31_spill] sm:$0xff] }
 0x324   :  { %v979_v59 = vsel %vm679_vm9, %v977_v41, %v978_v30  ;;  %v1043_v10 = vmul.f32 %v2411_v4, %v1028_v15  ;;  %v1029_v37 = vunpack.c.l.bf16 %v2537_v50  ;;  %v1078_v57 = vmul.f32 %v2419_v56, %v1028_v15 }
 0x325   :  { %v987_v6 = vadd.f32 %v978_v30, %v946_v29  ;;  %v1045_v54 = vmul.f32 %v2411_v4, %v1030_v19  ;;  %v985_v13 = vadd.f32 %v979_v59, %v944_v34  ;;  %v1014_v58 = vsel %vm715_vm10, %v1012_v40, %v1013_v18 }
 0x326   :  { %v2560_v39 = vmul.f32 %v2408_v27, %v1027_v14  ;;  %v1080_v32 = vmul.f32 %v2419_v56, %v1030_v19  ;;  %v1053_v11 = vrot.slane %v1043_v10, 4  ;;  %v1104_v12 = vunpack.c.h.bf16 %v2551_v53 }
 0x327   :  { %v1022_v1 = vadd.f32 %v1013_v18, %v987_v6  ;;  %v1054_v33 = vrot.slane %v1045_v54, 4  ;;  %v1020_v7 = vadd.f32 %v1014_v58, %v985_v13  ;;  %v1088_v26 = vrot.slane %v1078_v57, 5 }
 0x328   :  { %v1089_v4 = vrot.slane %v1080_v32, 5  ;;  %v1106_v21 = vunpack.c.h.bf16 %v2556_v31  ;;  %v2567_v25 = vmul.f32 %v2416_v35, %v1027_v14  ;;  %v1119_v16 = vmul.f32 %v2429_v52, %v1104_v12 }
 0x329   :  { %v1055_v23 = vsel %vm757_vm11, %v1053_v11, %v1054_v33  ;;  %v1063_v55 = vadd.f32 %v1054_v33, %v1022_v1  ;;  %v1103_v9 = vunpack.c.l.bf16 %v2551_v53  ;;  %v1154_v38 = vmul.f32 %v2689_v28, %v1104_v12  ;;  %v2694_v53 = vld [vmem:[#allocation34_spill] sm:$0xff] }
 0x32a   :  { %v1061_v47 = vadd.f32 %v1055_v23, %v1020_v7  ;;  %v1090_v56 = vsel %vm793_vm12, %v1088_v26, %v1089_v4  ;;  %v1121_v17 = vmul.f32 %v2429_v52, %v1106_v21  ;;  %v1129_v36 = vrot.slane %v1119_v16, 6  ;;  %v2693_v52 = vld [vmem:[#allocation32_spill] sm:$0xff] }
 0x32b   :  { %v1098_v0 = vadd.f32 %v1089_v4, %v1063_v55  ;;  %v1156_v46 = vmul.f32 %v2689_v28, %v1106_v21  ;;  %v2691_v30 = vrot.slane %v2690_v61, 7  ;;  %v906_v20 = vmul.f32 %v2692_v22, %v891_v44  ;;  %v2697_v21 = vld [vmem:[#allocation36_spill] sm:$0xff] }
 0x32c   :  { %v1096_v63 = vadd.f32 %v1090_v56, %v1061_v47  ;;  %v1130_v48 = vrot.slane %v1121_v17, 6  ;;  %v1105_v5 = vunpack.c.l.bf16 %v2556_v31  ;;  %v927_v8 = vmul.f32 %v2693_v52, %v891_v44 }
 0x32d   :  { %v883_v50 = vadd.f32 %v2691_v30, %v848_v51  ;;  %v1165_v3 = vrot.slane %v1156_v46, 7  ;;  %v968_v41 = vmul.f32 %v2378_v62, %v953_v45  ;;  %v1164_v29 = vrot.slane %v1154_v38, 7 }
 0x32e   :  { %v1131_v14 = vsel %vm835_vm6, %v1129_v36, %v1130_v48  ;;  %v1139_v15 = vadd.f32 %v1130_v48, %v1098_v0  ;;  %v934_v18 = vrot.slane %v927_v8, 1  ;;  %v974_v19 = vrot.slane %v2535_v43, 2 }
 0x32f   :  { %v910_v51 = vadd.f32 %v906_v20, %v883_v50  ;;  %v1137_v40 = vadd.f32 %v1131_v14, %v1096_v63  ;;  %v975_v34 = vrot.slane %v968_v41, 2  ;;  %v1166_v59 = vsel %vm179_vm0, %v1164_v29, %v1165_v3 }
 0x330   :  { %v1174_v10 = vadd.f32 %v1165_v3, %v1139_v15  ;;  %v1003_v60 = vmul.f32 %v2386_v24, %v953_v45  ;;  %v1044_v44 = vmul.f32 %v2408_v27, %v1029_v37  ;;  %v2695_v6 = vrot.slane %v2694_v53, 1  ;;  %v2696_v27 = vld [vmem:[#allocation35_spill] sm:$0xff] }
 0x331   :  { %v1172_v62 = vadd.f32 %v1166_v59, %v1137_v40  ;;  %v945_v57 = vadd.f32 %v934_v18, %v910_v51  ;;  %v1009_v31 = vrot.slane %v2543_v2, 3  ;;  %v976_v58 = vsel %vm679_vm9, %v974_v19, %v975_v34 }
 0x332   :  { %v935_v54 = vsel %vm637_vm8, %v2695_v6, %v934_v18  ;;  %v1183_v43 = vsel %vm179_vm0, %v1174_v10, 0.0  ;;  %v1010_v32 = vrot.slane %v1003_v60, 3  ;;  %v1051_v11 = vrot.slane %v1044_v44, 4 }
 0x333   :  { %v943_v13 = vadd.f32 %v935_v54, %v908_v49  ;;  %v1184_v1 = vadd.f32 %v1183_v43, %v1172_v62  ;;  %v986_v42 = vadd.f32 %v975_v34, %v945_v57  ;;  %v1079_v24 = vmul.f32 %v2416_v35, %v1029_v37 }
 0x334   :  { %v1118_v45 = vmul.f32 %v2696_v27, %v1103_v9  ;;  %v1050_v12 = vrot.slane %v2560_v39, 4  ;;  %v1120_v7 = vmul.f32 %v2696_v27, %v1105_v5  ;;  %v1011_v2 = vsel %vm715_vm10, %v1009_v31, %v1010_v32 }
 0x335   :  { %v984_v33 = vadd.f32 %v976_v58, %v943_v13  ;;  %v1185_v26 = vrot.slane %v1184_v1, 4  ;;  %v1021_v4 = vadd.f32 %v1010_v32, %v986_v42  ;;  %v1086_v49 = vrot.slane %v1079_v24, 5 }
 0x336   :  { %v1153_v23 = vmul.f32 %v2697_v21, %v1103_v9  ;;  %v1085_v16 = vrot.slane %v2567_v25, 5  ;;  %v1155_v47 = vmul.f32 %v2697_v21, %v1105_v5  ;;  %v1052_v37 = vsel %vm757_vm11, %v1050_v12, %v1051_v11  ;;  %v2698_v21 = vld [vmem:[#allocation30_spill] sm:$0xff] }
 0x337   :  { %v1019_v55 = vadd.f32 %v1011_v2, %v984_v33  ;;  %v1186_v35 = vadd.f32 %v1185_v26, %v1184_v1  ;;  %v1062_v56 = vadd.f32 %v1051_v11, %v1021_v4  ;;  %v1127_v17 = vrot.slane %v1120_v7, 6  ;;  %v1228_v2 = vld [vmem:[#allocation15] sm:$0x3] }
 0x338   :  { %v1126_v0 = vrot.slane %v1118_v45, 6  ;;  %v1087_v28 = vsel %vm793_vm12, %v1085_v16, %v1086_v49  ;;  %v1162_v46 = vrot.slane %v1155_v47, 7  ;;  %v1161_v25 = vrot.slane %v1153_v23, 7 }
 0x339   :  { %v1060_v39 = vadd.f32 %v1052_v37, %v1019_v55  ;;  %v1187_v36 = vrot.slane %v1186_v35, 2  ;;  %v1097_v38 = vadd.f32 %v1086_v49, %v1062_v56  ;;  %v1244_v49 = vld [vmem:[#allocation17] sm:$0x3]  ;;  %v1237_v23 = vrot.slane %v1228_v2, %v2698_v21 }
 0x33a   :  { %v1128_v9 = vsel %vm835_vm6, %v1126_v0, %v1127_v17  ;;  %v1163_v22 = vsel %vm179_vm0, %v1161_v25, %v1162_v46  ;;  %v1253_v37 = vrot.slane %v1244_v49, %v2698_v21 }
 0x33b   :  { %v1095_v63 = vadd.f32 %v1087_v28, %v1060_v39  ;;  %v1188_v48 = vadd.f32 %v1187_v36, %v1186_v35  ;;  %v1138_v61 = vadd.f32 %v1127_v17, %v1097_v38 }
 0x33d   :  { %v1136_v30 = vadd.f32 %v1128_v9, %v1095_v63  ;;  %v1189_v50 = vrot.slane %v1188_v48, 1  ;;  %v1173_v20 = vadd.f32 %v1162_v46, %v1138_v61  ;;  %v2699_v46 = vld [vmem:[#allocation29_spill] sm:$0xff] }
 0x33e   :  { %v1233_v63 = vrot.slane %v1228_v2, %v2699_v46  ;;  %v1249_v9 = vrot.slane %v1244_v49, %v2699_v46 }
 0x33f   :  { %v1171_v5 = vadd.f32 %v1163_v22, %v1136_v30  ;;  %v1190_v3 = vadd.f32 %v1189_v50, %v1188_v48  ;;  %v1175_v52 = vsel %vm179_vm0, %v1173_v20, 0.0 }
 0x341   :  { %v1176_v8 = vadd.f32 %v1175_v52, %v1171_v5  ;;  %v1193_v41 = vmul.f32 0.11111111, %v1190_v3 }
 0x343   :  { %v1177_v14 = vrot.slane %v1176_v8, 4  ;;  %v1195_v15 = vsub.f32 %v1172_v62, %v1193_v41  ;;  %v1197_v29 = vsub.f32 %v1174_v10, %v1193_v41 }
 0x345   :  { %v1178_v51 = vadd.f32 %v1177_v14, %v1176_v8  ;;  %v1199_v40 = vmul.f32 %v1195_v15, %v1195_v15  ;;  %v1201_v18 = vmul.f32 %v1197_v29, %v1197_v29 }
 0x347   :  { %v1179_v19 = vrot.slane %v1178_v51, 2  ;;  %v1210_v34 = vsel %vm179_vm0, %v1201_v18, 0.0 }
 0x348   :  { %v1211_v59 = vadd.f32 %v1210_v34, %v1199_v40 }
 0x349   :  { %v1180_v60 = vadd.f32 %v1179_v19, %v1178_v51 }
 0x34a   :  { %v1212_v44 = vrot.slane %v1211_v59, 4 }
 0x34b   :  { %v1181_v53 = vrot.slane %v1180_v60, 1 }
 0x34c   :  { %v1213_v6 = vadd.f32 %v1212_v44, %v1211_v59 }
 0x34d   :  { %v1182_v54 = vadd.f32 %v1181_v53, %v1180_v60 }
 0x34e   :  { %v1214_v57 = vrot.slane %v1213_v6, 2 }
 0x34f   :  { %v1192_v31 = vmul.f32 0.11111111, %v1182_v54 }
 0x350   :  { %v1215_v43 = vadd.f32 %v1214_v57, %v1213_v6 }
 0x351   :  { %v1194_v13 = vsub.f32 %v1171_v5, %v1192_v31  ;;  %v1196_v58 = vsub.f32 %v1173_v20, %v1192_v31 }
 0x352   :  { %v1216_v32 = vrot.slane %v1215_v43, 1 }
 0x353   :  { %v1198_v62 = vmul.f32 %v1194_v13, %v1194_v13  ;;  %v1200_v10 = vmul.f32 %v1196_v58, %v1196_v58 }
 0x354   :  { %v1217_v1 = vadd.f32 %v1216_v32, %v1215_v43  ;;  %v1536_v43 = vld [vmem:[#allocation20] ss:$0 sm:$0xff] }
 0x355   :  { %v1202_v42 = vsel %vm179_vm0, %v1200_v10, 0.0 }
 0x356   :  { %v1203_v11 = vadd.f32 %v1202_v42, %v1198_v62  ;;  %v1219_v24 = vmul.f32 0.11111111, %v1217_v1  ;;  %v1700_v42 = vld [vmem:[#allocation3] sm:$0xff] }
 0x358   :  { %v1204_v27 = vrot.slane %v1203_v11, 4  ;;  %v1221_v45 = vadd.f32 1e-05, %v1219_v24 }
 0x35a   :  { %v1205_v33 = vadd.f32 %v1204_v27, %v1203_v11  ;;  %1680 = vrsqrt.f32 %v1221_v45  ;;  %v1701_v27 = vld [vmem:[#allocation3 + $0x8] sm:$0x1] }
 0x35c   :  { %v1206_v12 = vrot.slane %v1205_v33, 2 }
 0x35e   :  { %v1207_v7 = vadd.f32 %v1206_v12, %v1205_v33 }
 0x360   :  { %v1208_v26 = vrot.slane %v1207_v7, 1 }
 0x362   :  { %v1209_v4 = vadd.f32 %v1208_v26, %v1207_v7 }
 0x364   :  { %v1218_v55 = vmul.f32 0.11111111, %v1209_v4  ;;  %v1681_v16 = vpop.eup %1680 }
 0x365   :  { %v1225_v47 = vmul.f32 %v1681_v16, %v1195_v15  ;;  %v1227_v35 = vmul.f32 %v1681_v16, %v1197_v29 }
 0x366   :  { %v1220_v56 = vadd.f32 1e-05, %v1218_v55 }
 0x367   :  { %v1241_v17 = vmul.f32 %v1237_v23, %v1225_v47  ;;  %v1243_v39 = vmul.f32 %v1237_v23, %v1227_v35 }
 0x368   :  { %1682 = vrsqrt.f32 %v1220_v56 }
 0x369   :  { %v1257_v0 = vadd.f32 %v1253_v37, %v1241_v17  ;;  %v1259_v36 = vadd.f32 %v1253_v37, %v1243_v39 }
 0x36b   :  { %v1533_v28 = vmul.f32 -1.442695, %v1257_v0  ;;  %v1535_v38 = vmul.f32 -1.442695, %v1259_v36 }
 0x36d   :  { %1684 = vpow2.f32 %v1533_v28 }
 0x36e   :  { %1686 = vpow2.f32 %v1535_v38 }
 0x372   :  { %v1683_v48 = vpop.eup %1682 }
 0x373   :  { %v1224_v61 = vmul.f32 %v1683_v48, %v1194_v13  ;;  %v1226_v25 = vmul.f32 %v1683_v48, %v1196_v58 }
 0x375   :  { %v1240_v30 = vmul.f32 %v1233_v63, %v1224_v61  ;;  %v1242_v50 = vmul.f32 %v1233_v63, %v1226_v25 }
 0x377   :  { %v1256_v22 = vadd.f32 %v1249_v9, %v1240_v30  ;;  %v1258_v20 = vadd.f32 %v1249_v9, %v1242_v50  ;;  %v1685_v5 = vpop.eup %1684 }
 0x378   :  { %v1687_v3 = vpop.eup %1686  ;;  %v1273_v52 = vadd.f32 1.0, %v1685_v5 }
 0x379   :  { %v1532_v8 = vmul.f32 -1.442695, %v1256_v22  ;;  %v1275_v41 = vadd.f32 1.0, %v1687_v3  ;;  %v1534_v14 = vmul.f32 -1.442695, %v1258_v20 }
 0x37a   :  { %1688 = vrcp.f32 %v1273_v52 }
 0x37b   :  { %1690 = vrcp.f32 %v1275_v41 }
 0x37c   :  { %1692 = vpow2.f32 %v1532_v8 }
 0x37d   :  { %1694 = vpow2.f32 %v1534_v14 }
 0x384   :  { %v1689_v15 = vpop.eup %1688 }
 0x385   :  { %v1691_v29 = vpop.eup %1690  ;;  %v1285_v51 = vmul.f32 %v1689_v15, %v1257_v0 }
 0x386   :  { %v1693_v40 = vpop.eup %1692  ;;  %v1287_v18 = vmul.f32 %v1691_v29, %v1259_v36 }
 0x387   :  { %v1695_v19 = vpop.eup %1694  ;;  %v1272_v34 = vadd.f32 1.0, %v1693_v40 }
 0x388   :  { %v1289_v59 = vpack.c.bf16 %v1287_v18, %v1285_v51  ;;  %v1274_v60 = vadd.f32 1.0, %v1695_v19 }
 0x389   :  { %1696 = vrcp.f32 %v1272_v34 }
 0x38a   :  { %1457 = vmatprep.mubr.bf16.mxu0 %v1289_v59  ;;  %1698 = vrcp.f32 %v1274_v60 }
 0x393   :  { %v1697_v44 = vpop.eup %1696 }
 0x394   :  { %v1699_v53 = vpop.eup %1698  ;;  %v1284_v6 = vmul.f32 %v1697_v44, %v1256_v22 }
 0x395   :  { %v1286_v54 = vmul.f32 %v1699_v53, %v1258_v20 }
 0x397   :  { %v1288_v57 = vpack.c.bf16 %v1286_v54, %v1284_v6 }
 0x399   :  { %1458 = vmatmul.mubr.bf16.vlgmr.msra.gmra.mrb[4].mxu0 %v1288_v57 }
 0x46c   :  { %v1571_v31 = vpop.f32.mrb[4].mxu0 }
 0x46d   :  { %v1572_v13 = vpop.f32.mrb[5].mxu0 }
 0x46e   :  { %v1573_v58 = vadd.f32 %v1572_v13, %v1571_v31  ;;  %v1574_v32 = vpop.f32.mrb[6].mxu0 }
 0x46f   :  { %v1575_v62 = vpop.f32.mrb[7].mxu0 }
 0x470   :  { %v1460_v10 = vadd.f32 %v1573_v58, %v1536_v43  ;;  %v1576_v1 = vadd.f32 %v1575_v62, %v1574_v32 }
 0x472   :  { %v1466_v11 = vadd.f32 %v1700_v42, %v1460_v10  ;;  %v1463_v24 = vadd.f32 %v1576_v1, %v1536_v43 }
 0x474   :  { %1468 = vst [vmem:[#allocation21] sm:$0xff] %v1466_v11  ;;  %v1467_v45 = vadd.f32 %v1701_v27, %v1463_v24 }
 0x476   :  { %1469 = vst [vmem:[#allocation21 + $0x8] sm:$0x1] %v1467_v45 }
 0x477   :  { %1955 = shalt.err (!%p1952_p8)
}
 0x478   :  { %s1956_s24 = scalar_lea.hbm %s2645_s11, 256 }
 0x479   :  { %p1957_p9 = scmp.ne.s32.totalorder %s2645_s11, %s1956_s24  ;;  %p1960_p10 = scmp.lt.u32.totalorder %s1956_s24, %s2645_s11 }
 0x47b   :  { %p1962_p11 = pnand %p1960_p10, %p1957_p9 }
 0x47d   :  { %1965 = shalt.err (!%p1962_p11)
}
 0x47e   :  { %1481 = dma.vmem_to_hbm [thread:$0]  %s1476_s22, 256, %s2645_s11, [#allocation5], %s1990_s9, %s1990_s9, %s1991_s26  }
 0x47f   :  { %1978 = dma.done.wait [#allocation5], 256  }
 0x480   :  { %1979 = vsyncadd [#allocation5], 4294967040 }
 0x481   :  { %1485 = vsyncpa [#allocation4], 1 }
 0x482   :  { %1486 = vsyncpa [#allocation7], 1 }
 0x483   :  { %1487 = vsyncpa [#allocation10], 1 }
 0x484   :  { %1488 = vsyncpa [#allocation13], 1 }
 0x485   :  { %1489 = vsyncpa [#allocation16], 1 }
 0x486   :  { %1490 = vsyncpa [#allocation19], 1 }
 0x487   :  { %1491 = vsyncpa [#allocation5], 1 }

</bundles_post_ra>
